<compile_context>
chip_gen: v7x
topology: tpu7x:2x2x1
jax: 0.10.0
libtpu: 0.0.40
codegen_flags: <defaults>
</compile_context>

<pallas_src>
import math
import numpy as np
import jax
import jax.numpy as jnp
from jax.experimental import pallas as pl
from jax.experimental.pallas import tpu as pltpu

# ----------------------------- model dimensions (small) -----------------------------
LAT_C = 4            # unet.in_channels
LAT_H = 16           # 512//8 in the real model -> 16 here (small)
LAT_W = 16
T_TOK = LAT_H * LAT_W  # 256 latent "tokens"
SEQ = 8              # text sequence length
HID = 32             # text-embedding hidden size / unet model dim
FF = 64              # MLP inner dim
VOCAB = 16           # synthetic tokenizer vocab
GUIDANCE = 7.5
NUM_STEPS = 5
NUM_TRAIN_T = 1000
LMS_ORDER = 4

# --------------------------- packed weight-slab layout -------------------------------
# One (368, 64) f32 slab holds every weight/bias (row offsets 8-aligned for matrices);
# the kernel slices it with static offsets -> one input ref / one DMA instead of 16+.
R_W_TE, R_W_T1, R_W_T2 = 0, 32, 64
R_WQ, R_WK, R_WV, R_WO = 96, 128, 160, 192
R_W1, R_W2, R_W_OUT, R_W_IN = 224, 256, 320, 352
(R_B_TE, R_B_T1, R_B_T2, R_B_IN,
 R_BO, R_B1, R_B2, R_B_OUT) = 360, 361, 362, 363, 364, 365, 366, 367
SLAB_ROWS, SLAB_COLS = 368, FF


# ================================ fused Pallas kernel =================================

def _denoise_step_kernel(sched_ref,                      # SMEM (NUM_STEPS, 8) scalar prefetch
                         temb_sin_ref, ctx_ref, w_ref, init_ref,   # VMEM inputs
                         lat_ref,                        # output: latents accumulator
                         deriv_ref):                     # scratch: (4, T, C) LMS history
    i = pl.program_id(0)

    @pl.when(i == 0)
    def _init():
        lat_ref[...] = init_ref[...]                     # init_noise * init_noise_sigma
        deriv_ref[...] = jnp.zeros_like(deriv_ref)       # empty LMS history

    # ---- static views into the packed weight slab ----
    def W(off, rows, cols=HID):
        return w_ref[off:off + rows, 0:cols]

    def B(row, cols=HID):
        return w_ref[row:row + 1, 0:cols]

    w_te, b_te = W(R_W_TE, HID), B(R_B_TE)
    w_t1, b_t1 = W(R_W_T1, HID), B(R_B_T1)
    w_t2, b_t2 = W(R_W_T2, HID), B(R_B_T2)
    w_in, b_in = W(R_W_IN, LAT_C), B(R_B_IN)
    wq, wk, wv = W(R_WQ, HID), W(R_WK, HID), W(R_WV, HID)
    wo, bo = W(R_WO, HID), B(R_BO)
    w1, b1 = W(R_W1, HID, FF), B(R_B1, FF)
    w2, b2 = W(R_W2, FF), B(R_B2)
    w_out, b_out = W(R_W_OUT, HID, LAT_C), B(R_B_OUT, LAT_C)

    # ---- timestep-conditioning MLP (fused; was two separate pallas_linear launches) ----
    temb0 = temb_sin_ref[0]                                              # (1, HID)
    t1 = jnp.dot(temb0, w_t1, preferred_element_type=jnp.float32) + b_t1
    t1 = t1 * jax.nn.sigmoid(t1)                                         # SiLU
    temb = jnp.dot(t1, w_t2, preferred_element_type=jnp.float32) + b_t2  # (1, HID)

    # ---- text context: uncond rows go through the text-encoder projection; the
    #      conditional embedding is used as-is (matches the PyTorch reference, where the
    #      forward input is already an embedding and only '' is re-encoded) ----
    ctx_raw = ctx_ref[...]                                               # (2*SEQ, HID)
    ctx_u = jnp.dot(ctx_raw[0:SEQ], w_te,
                    preferred_element_type=jnp.float32) + b_te
    ctx_t = ctx_raw[SEQ:2 * SEQ]
    kv_src = jnp.concatenate([ctx_u, ctx_t], axis=0)                     # (2*SEQ, HID)

    # ---- scheduler.scale_model_input (per-step scalar from SMEM) ----
    x = lat_ref[...] * sched_ref[i, 0]                                   # (T, C)

    # ---- "conv_in" (1x1 conv == channel matmul) + timestep conditioning (shared by
    #      both CFG branches, since the latent input is identical for uncond / text) ----
    h = jnp.dot(x, w_in, preferred_element_type=jnp.float32) + b_in + temb   # (T, HID)

    # ---- cross-attention: latent tokens attend to text embeddings ----
    q = jnp.dot(h, wq, preferred_element_type=jnp.float32)              # (T, HID)
    k_all = jnp.dot(kv_src, wk, preferred_element_type=jnp.float32)     # (2S, HID)
    v_all = jnp.dot(kv_src, wv, preferred_element_type=jnp.float32)
    inv_sqrt_d = 1.0 / math.sqrt(HID)

    def attend(kk, vv):
        s = jax.lax.dot_general(q, kk, (((1,), (1,)), ((), ())),
                                preferred_element_type=jnp.float32) * inv_sqrt_d
        s = s - jnp.max(s, axis=-1, keepdims=True)
        p = jnp.exp(s)
        # EUP reciprocal instead of a VALU divide
        return jnp.dot(p * pl.reciprocal(jnp.sum(p, axis=-1, keepdims=True), approx=True),
                       vv, preferred_element_type=jnp.float32)

    attn_u = attend(k_all[0:SEQ], v_all[0:SEQ])                          # (T, HID)
    attn_t = attend(k_all[SEQ:2 * SEQ], v_all[SEQ:2 * SEQ])

    # ---- stack both CFG branches along rows (512x32) for the proj / MLP / conv_out
    #      matmuls -> 2x MXU row occupancy, and CFG is combined in-kernel ----
    attn2 = jnp.concatenate([attn_u, attn_t], axis=0)                    # (2T, HID)
    h2 = jnp.concatenate([h, h], axis=0)
    h2 = h2 + jnp.dot(attn2, wo, preferred_element_type=jnp.float32) + bo

    ff = jnp.dot(h2, w1, preferred_element_type=jnp.float32) + b1
    ff = ff * jax.nn.sigmoid(ff)                                         # SiLU MLP
    h2 = h2 + jnp.dot(ff, w2, preferred_element_type=jnp.float32) + b2

    eps2 = jnp.dot(h2, w_out, preferred_element_type=jnp.float32) + b_out  # (2T, C)
    eps_u = eps2[0:T_TOK]
    eps_t = eps2[T_TOK:2 * T_TOK]

    # ---- classifier-free guidance ----
    guided = eps_u + GUIDANCE * (eps_t - eps_u)                          # (T, C)

    # ---- LMS multistep update (epsilon prediction -> derivative == model_output).
    #      Shift the history ring, then apply host-precomputed coefficients. ----
    deriv_ref[3] = deriv_ref[2]
    deriv_ref[2] = deriv_ref[1]
    deriv_ref[1] = deriv_ref[0]
    deriv_ref[0] = guided
    update = (sched_ref[i, 1] * guided
              + sched_ref[i, 2] * deriv_ref[1]
              + sched_ref[i, 3] * deriv_ref[2]
              + sched_ref[i, 4] * deriv_ref[3])
    lat_ref[...] = lat_ref[...] + update


def run_denoise_loop(sched, temb_sin, ctx_in, w_slab, latents0):
    """One pallas_call for the entire NUM_STEPS denoising loop."""
    return pl.pallas_call(
        _denoise_step_kernel,
        out_shape=jax.ShapeDtypeStruct((T_TOK, LAT_C), jnp.float32),
        grid_spec=pltpu.PrefetchScalarGridSpec(
            num_scalar_prefetch=1,                       # sched table -> SMEM
            grid=(NUM_STEPS,),
            in_specs=[
                pl.BlockSpec((1, 1, HID), lambda i, s: (i, 0, 0)),          # temb_sin row i
                pl.BlockSpec((2 * SEQ, HID), lambda i, s: (0, 0)),          # ctx (uncond|text)
                pl.BlockSpec((SLAB_ROWS, SLAB_COLS), lambda i, s: (0, 0)),  # weight slab
                pl.BlockSpec((T_TOK, LAT_C), lambda i, s: (0, 0)),          # init latents
            ],
            out_specs=pl.BlockSpec((T_TOK, LAT_C), lambda i, s: (0, 0)),    # latents (carried)
            scratch_shapes=[pltpu.VMEM((LMS_ORDER, T_TOK, LAT_C), jnp.float32)],
        ),
        compiler_params=pltpu.CompilerParams(dimension_semantics=("arbitrary",)),
    )(sched, temb_sin, ctx_in, w_slab, latents0)


# ============================ host-side scheduler tables ==============================

def lms_coefficient(sigmas, order, t, current_order, n=4097):
    """Integral of the Lagrange basis polynomial over [sigma_t, sigma_{t+1}] (trapezoid)."""
    tau = np.linspace(sigmas[t], sigmas[t + 1], n)
    prod = np.ones_like(tau)
    for k in range(order):
        if k == current_order:
            continue
        prod *= (tau - sigmas[t - k]) / (sigmas[t - current_order] - sigmas[t - k])
    return float(np.sum((prod[1:] + prod[:-1]) * np.diff(tau)) * 0.5)


def make_scheduler_tables(num_inference_steps=NUM_STEPS,
                          num_train_timesteps=NUM_TRAIN_T,
                          beta_start=0.00085, beta_end=0.012):
    """LMSDiscreteScheduler ('scaled_linear') tables, fully precomputed on the host."""
    betas = np.linspace(beta_start ** 0.5, beta_end ** 0.5,
                        num_train_timesteps, dtype=np.float64) ** 2
    alphas_cumprod = np.cumprod(1.0 - betas)
    sigmas_full = np.sqrt((1.0 - alphas_cumprod) / alphas_cumprod)
    timesteps = np.linspace(num_train_timesteps - 1, 0,
                            num_inference_steps, dtype=np.float64)
    sigmas = np.interp(timesteps, np.arange(len(sigmas_full)), sigmas_full)
    sigmas = np.concatenate([sigmas, [0.0]])
    init_noise_sigma = float(sigmas.max())

    # per-step table: col 0 = scale_model_input factor, cols 1..4 = LMS coefficients
    sched = np.zeros((num_inference_steps, 8), dtype=np.float32)
    for i in range(num_inference_steps):
        sched[i, 0] = 1.0 / math.sqrt(sigmas[i] ** 2 + 1.0)
        order = min(i + 1, LMS_ORDER)
        for k in range(order):
            sched[i, 1 + k] = lms_coefficient(sigmas, order, i, k)
    return timesteps, sched, init_noise_sigma


def timestep_embedding_table(timesteps, dim=HID):
    """Sinusoidal timestep embeddings for all steps, shape (NUM_STEPS, 1, dim)."""
    half = dim // 2
    freqs = np.exp(-np.log(10000.0) * np.arange(half, dtype=np.float64) / half)
    args = np.asarray(timesteps, dtype=np.float64)[:, None] * freqs[None, :]
    emb = np.concatenate([np.sin(args), np.cos(args)], axis=1).astype(np.float32)
    return emb.reshape(len(timesteps), 1, dim)


# ================================ parameters ==========================================

def init_params(key):
    ks = jax.random.split(key, 20)
    s = 0.05
    return {
        # synthetic text encoder
        "embed": jax.random.normal(ks[0], (VOCAB, HID), jnp.float32) * s,
        "w_te": jax.random.normal(ks[1], (HID, HID), jnp.float32) * s,
        "b_te": jnp.zeros((1, HID), jnp.float32),
        # timestep MLP
        "w_t1": jax.random.normal(ks[2], (HID, HID), jnp.float32) * s,
        "b_t1": jnp.zeros((1, HID), jnp.float32),
        "w_t2": jax.random.normal(ks[3], (HID, HID), jnp.float32) * s,
        "b_t2": jnp.zeros((1, HID), jnp.float32),
        # simplified UNet block
        "w_in": jax.random.normal(ks[4], (LAT_C, HID), jnp.float32) * s,
        "b_in": jnp.zeros((1, HID), jnp.float32),
        "wq": jax.random.normal(ks[5], (HID, HID), jnp.float32) * s,
        "wk": jax.random.normal(ks[6], (HID, HID), jnp.float32) * s,
        "wv": jax.random.normal(ks[7], (HID, HID), jnp.float32) * s,
        "wo": jax.random.normal(ks[8], (HID, HID), jnp.float32) * s,
        "bo": jnp.zeros((1, HID), jnp.float32),
        "w1": jax.random.normal(ks[9], (HID, FF), jnp.float32) * s,
        "b1": jnp.zeros((1, FF), jnp.float32),
        "w2": jax.random.normal(ks[10], (FF, HID), jnp.float32) * s,
        "b2": jnp.zeros((1, HID), jnp.float32),
        "w_out": jax.random.normal(ks[11], (HID, LAT_C), jnp.float32) * s,
        "b_out": jnp.zeros((1, LAT_C), jnp.float32),
    }


def pack_weight_slab(p):
    """Pack all weights/biases into one (SLAB_ROWS, SLAB_COLS) f32 slab."""
    slab = jnp.zeros((SLAB_ROWS, SLAB_COLS), jnp.float32)
    mats = [("w_te", R_W_TE), ("w_t1", R_W_T1), ("w_t2", R_W_T2),
            ("wq", R_WQ), ("wk", R_WK), ("wv", R_WV), ("wo", R_WO),
            ("w1", R_W1), ("w2", R_W2), ("w_out", R_W_OUT), ("w_in", R_W_IN)]
    for name, off in mats:
        w = p[name]
        slab = slab.at[off:off + w.shape[0], 0:w.shape[1]].set(w)
    biases = [("b_te", R_B_TE), ("b_t1", R_B_T1), ("b_t2", R_B_T2), ("b_in", R_B_IN),
              ("bo", R_BO), ("b1", R_B1), ("b2", R_B2), ("b_out", R_B_OUT)]
    for name, row in biases:
        b = p[name].reshape(-1)
        slab = slab.at[row, 0:b.shape[0]].set(b)
    return slab


# ================================ forward pass ========================================

def stable_diffusion_forward(text_embedding, embed_table, w_slab, noise_key):
    """Mirrors StableDiffusionModel.forward with synthetic sub-models.

    text_embedding: (1, SEQ, HID).  Returns latents in NCHW: (1, LAT_C, LAT_H, LAT_W).
    """
    # Scheduler tables + timestep embeddings are pure host numpy -> baked in at trace time.
    timesteps, sched_np, init_noise_sigma = make_scheduler_tables()
    sched = jnp.asarray(sched_np)                                     # (NUM_STEPS, 8)
    temb_sin = jnp.asarray(timestep_embedding_table(timesteps))       # (NUM_STEPS, 1, HID)

    # init_noise (NCHW) — TODO(synk): torch.manual_seed(0) randn is not bit-reproducible in JAX.
    init_noise = jax.random.normal(noise_key, (1, LAT_C, LAT_H, LAT_W), jnp.float32)
    # layout: NCHW -> (H*W, C) tokens for all kernel compute
    latents0 = (init_noise.transpose(0, 2, 3, 1).reshape(T_TOK, LAT_C)
                * init_noise_sigma)

    # tokenizer([''], padding='max_length', max_length=SEQ) -> synthetic uncond ids.
    # Rows 0..SEQ of ctx_in are raw token embeddings (projected by w_te inside the kernel);
    # rows SEQ..2*SEQ are the conditional embedding used as-is (as in the PyTorch reference).
    uncond_ids = jnp.array([1, 2] + [0] * (SEQ - 2), dtype=jnp.int32)
    uncond_tok = embed_table[uncond_ids]                              # (SEQ, HID)
    ctx_in = jnp.concatenate(
        [uncond_tok, text_embedding[0].astype(jnp.float32)], axis=0)  # (2*SEQ, HID)

    latents = run_denoise_loop(sched, temb_sin, ctx_in, w_slab, latents0)   # (T, C)

    # back to NCHW
    return latents.reshape(1, LAT_H, LAT_W, LAT_C).transpose(0, 3, 1, 2)


# ======================================================================================

if __name__ == "__main__":
    key = jax.random.PRNGKey(0)
    k_params, k_text, k_noise = jax.random.split(key, 3)

    params = init_params(k_params)
    w_slab = pack_weight_slab(params)
    text_embedding = jax.random.normal(k_text, (1, SEQ, HID), jnp.float32)

    forward = jax.jit(stable_diffusion_forward)
    out = forward(text_embedding, params["embed"], w_slab, k_noise)
    out = jax.block_until_ready(out)

    assert out.shape == (1, LAT_C, LAT_H, LAT_W)
    assert bool(jnp.all(jnp.isfinite(out)))
    print("KERNEL_OK")
</pallas_src>

<mosaic_0001>
module attributes {stable_mosaic.version = 11 : i64} {
  func.func @_denoise_step_kernel(%arg0: i32, %arg1: memref<5x8xf32, #tpu.memory_space<smem>>, %arg2: memref<1x1x32xf32, #tpu.memory_space<vmem>>, %arg3: memref<16x32xf32, #tpu.memory_space<vmem>>, %arg4: memref<368x64xf32, #tpu.memory_space<vmem>>, %arg5: memref<256x4xf32, #tpu.memory_space<vmem>>, %arg6: memref<256x4xf32, #tpu.memory_space<vmem>>, %arg7: memref<4x256x4xf32, #tpu.memory_space<vmem>>) attributes {dimension_semantics = [#tpu.dimension_semantics<arbitrary>], iteration_bounds = array<i64: 5>, scalar_prefetch = 1 : i64, scratch_operands = 1 : i64, tpu.core_type = #tpu.core_type<tc>, window_params = [{transform_indices = @transform_0, window_bounds = array<i64: 1, 1, 32>}, {pipeline_mode = #tpu.pipeline_mode<synchronous>, transform_indices = @transform_1, window_bounds = array<i64: 16, 32>}, {pipeline_mode = #tpu.pipeline_mode<synchronous>, transform_indices = @transform_2, window_bounds = array<i64: 368, 64>}, {pipeline_mode = #tpu.pipeline_mode<synchronous>, transform_indices = @transform_3, window_bounds = array<i64: 256, 4>}, {pipeline_mode = #tpu.pipeline_mode<synchronous>, transform_indices = @transform_4, window_bounds = array<i64: 256, 4>}]} {
    %c0_i32 = arith.constant 0 : i32
    %0 = arith.cmpi eq, %arg0, %c0_i32 : i32
    %1 = arith.extui %0 : i1 to i32
    %c0_i32_0 = arith.constant 0 : i32
    %2 = arith.cmpi ne, %1, %c0_i32_0 : i32
    scf.if %2 {
      %c0_85 = arith.constant 0 : index
      %c0_86 = arith.constant 0 : index
      %160 = vector.load %arg5[%c0_85, %c0_86] : memref<256x4xf32, #tpu.memory_space<vmem>>, vector<256x4xf32>
      %c0_87 = arith.constant 0 : index
      %c0_88 = arith.constant 0 : index
      %161 = vector.load %arg6[%c0_87, %c0_88] : memref<256x4xf32, #tpu.memory_space<vmem>>, vector<256x4xf32>
      tpu.vector_store %arg6[%c0_87, %c0_88], %160 {strides = array<i32>} : memref<256x4xf32, #tpu.memory_space<vmem>>, vector<256x4xf32>,
      %cst_89 = arith.constant 0.000000e+00 : f32
      %162 = vector.broadcast %cst_89 : f32 to vector<4x256x4xf32>
      %c0_90 = arith.constant 0 : index
      %c0_91 = arith.constant 0 : index
      %c0_92 = arith.constant 0 : index
      %163 = vector.load %arg7[%c0_90, %c0_91, %c0_92] : memref<4x256x4xf32, #tpu.memory_space<vmem>>, vector<4x256x4xf32>
      tpu.vector_store %arg7[%c0_90, %c0_91, %c0_92], %162 {strides = array<i32>} : memref<4x256x4xf32, #tpu.memory_space<vmem>>, vector<4x256x4xf32>,
    } else {
    }
    %c0 = arith.constant 0 : index
    %c0_1 = arith.constant 0 : index
    %3 = vector.load %arg4[%c0, %c0_1] : memref<368x64xf32, #tpu.memory_space<vmem>>, vector<32x32xf32>
    %c360 = arith.constant 360 : index
    %c0_2 = arith.constant 0 : index
    %4 = vector.load %arg4[%c360, %c0_2] : memref<368x64xf32, #tpu.memory_space<vmem>>, vector<1x32xf32>
    %c32 = arith.constant 32 : index
    %c0_3 = arith.constant 0 : index
    %5 = vector.load %arg4[%c32, %c0_3] : memref<368x64xf32, #tpu.memory_space<vmem>>, vector<32x32xf32>
    %c361 = arith.constant 361 : index
    %c0_4 = arith.constant 0 : index
    %6 = vector.load %arg4[%c361, %c0_4] : memref<368x64xf32, #tpu.memory_space<vmem>>, vector<1x32xf32>
    %c64 = arith.constant 64 : index
    %c0_5 = arith.constant 0 : index
    %7 = vector.load %arg4[%c64, %c0_5] : memref<368x64xf32, #tpu.memory_space<vmem>>, vector<32x32xf32>
    %c362 = arith.constant 362 : index
    %c0_6 = arith.constant 0 : index
    %8 = vector.load %arg4[%c362, %c0_6] : memref<368x64xf32, #tpu.memory_space<vmem>>, vector<1x32xf32>
    %c352 = arith.constant 352 : index
    %c0_7 = arith.constant 0 : index
    %9 = vector.load %arg4[%c352, %c0_7] : memref<368x64xf32, #tpu.memory_space<vmem>>, vector<4x32xf32>
    %c363 = arith.constant 363 : index
    %c0_8 = arith.constant 0 : index
    %10 = vector.load %arg4[%c363, %c0_8] : memref<368x64xf32, #tpu.memory_space<vmem>>, vector<1x32xf32>
    %c96 = arith.constant 96 : index
    %c0_9 = arith.constant 0 : index
    %11 = vector.load %arg4[%c96, %c0_9] : memref<368x64xf32, #tpu.memory_space<vmem>>, vector<32x32xf32>
    %c128 = arith.constant 128 : index
    %c0_10 = arith.constant 0 : index
    %12 = vector.load %arg4[%c128, %c0_10] : memref<368x64xf32, #tpu.memory_space<vmem>>, vector<32x32xf32>
    %c160 = arith.constant 160 : index
    %c0_11 = arith.constant 0 : index
    %13 = vector.load %arg4[%c160, %c0_11] : memref<368x64xf32, #tpu.memory_space<vmem>>, vector<32x32xf32>
    %c192 = arith.constant 192 : index
    %c0_12 = arith.constant 0 : index
    %14 = vector.load %arg4[%c192, %c0_12] : memref<368x64xf32, #tpu.memory_space<vmem>>, vector<32x32xf32>
    %c364 = arith.constant 364 : index
    %c0_13 = arith.constant 0 : index
    %15 = vector.load %arg4[%c364, %c0_13] : memref<368x64xf32, #tpu.memory_space<vmem>>, vector<1x32xf32>
    %c224 = arith.constant 224 : index
    %c0_14 = arith.constant 0 : index
    %16 = vector.load %arg4[%c224, %c0_14] : memref<368x64xf32, #tpu.memory_space<vmem>>, vector<32x64xf32>
    %c365 = arith.constant 365 : index
    %c0_15 = arith.constant 0 : index
    %17 = vector.load %arg4[%c365, %c0_15] : memref<368x64xf32, #tpu.memory_space<vmem>>, vector<1x64xf32>
    %c256 = arith.constant 256 : index
    %c0_16 = arith.constant 0 : index
    %18 = vector.load %arg4[%c256, %c0_16] : memref<368x64xf32, #tpu.memory_space<vmem>>, vector<64x32xf32>
    %c366 = arith.constant 366 : index
    %c0_17 = arith.constant 0 : index
    %19 = vector.load %arg4[%c366, %c0_17] : memref<368x64xf32, #tpu.memory_space<vmem>>, vector<1x32xf32>
    %c320 = arith.constant 320 : index
    %c0_18 = arith.constant 0 : index
    %20 = vector.load %arg4[%c320, %c0_18] : memref<368x64xf32, #tpu.memory_space<vmem>>, vector<32x4xf32>
    %c367 = arith.constant 367 : index
    %c0_19 = arith.constant 0 : index
    %21 = vector.load %arg4[%c367, %c0_19] : memref<368x64xf32, #tpu.memory_space<vmem>>, vector<1x4xf32>
    %c0_20 = arith.constant 0 : index
    %c0_21 = arith.constant 0 : index
    %c0_22 = arith.constant 0 : index
    %22 = vector.load %arg2[%c0_20, %c0_21, %c0_22] : memref<1x1x32xf32, #tpu.memory_space<vmem>>, vector<1x1x32xf32>
    %23 = vector.shape_cast %22 : vector<1x1x32xf32> to vector<1x32xf32>
    %cst = arith.constant dense<0.000000e+00> : vector<1x32xf32>
    %24 = tpu.matmul %23, %5, %cst {dimension_numbers = #tpu.dot_dimension_numbers<[1], [0], [0], [1], [0, 0, 1, 1], [], []>} : vector<1x32xf32>, vector<32x32xf32>, vector<1x32xf32> -> vector<1x32xf32>
    %25 = arith.addf %24, %6 : vector<1x32xf32>
    %26 = arith.negf %25 : vector<1x32xf32>
    %27 = math.exp %26 : vector<1x32xf32>
    %cst_23 = arith.constant 1.000000e+00 : f32
    %28 = vector.broadcast %cst_23 : f32 to vector<1x32xf32>
    %29 = arith.addf %28, %27 : vector<1x32xf32>
    %30 = arith.divf %28, %29 : vector<1x32xf32>
    %31 = arith.mulf %25, %30 : vector<1x32xf32>
    %cst_24 = arith.constant dense<0.000000e+00> : vector<1x32xf32>
    %32 = tpu.matmul %31, %7, %cst_24 {dimension_numbers = #tpu.dot_dimension_numbers<[1], [0], [0], [1], [0, 0, 1, 1], [], []>} : vector<1x32xf32>, vector<32x32xf32>, vector<1x32xf32> -> vector<1x32xf32>
    %33 = arith.addf %32, %8 : vector<1x32xf32>
    %c0_25 = arith.constant 0 : index
    %c0_26 = arith.constant 0 : index
    %34 = vector.load %arg3[%c0_25, %c0_26] : memref<16x32xf32, #tpu.memory_space<vmem>>, vector<16x32xf32>
    %35 = vector.extract_strided_slice %34 {offsets = [0, 0], sizes = [8, 32], strides = [1, 1]} : vector<16x32xf32> to vector<8x32xf32>
    %cst_27 = arith.constant dense<0.000000e+00> : vector<8x32xf32>
    %36 = tpu.matmul %35, %3, %cst_27 {dimension_numbers = #tpu.dot_dimension_numbers<[1], [0], [0], [1], [0, 0, 1, 1], [], []>} : vector<8x32xf32>, vector<32x32xf32>, vector<8x32xf32> -> vector<8x32xf32>
    %37 = vector.broadcast %4 : vector<1x32xf32> to vector<8x32xf32>
    %38 = arith.addf %36, %37 : vector<8x32xf32>
    %39 = vector.extract_strided_slice %34 {offsets = [8, 0], sizes = [8, 32], strides = [1, 1]} : vector<16x32xf32> to vector<8x32xf32>
    %40 = tpu.concatenate %38, %39 in 0 : vector<8x32xf32>, vector<8x32xf32> -> vector<16x32xf32>
    %c0_28 = arith.constant 0 : index
    %c0_29 = arith.constant 0 : index
    %41 = vector.load %arg6[%c0_28, %c0_29] : memref<256x4xf32, #tpu.memory_space<vmem>>, vector<256x4xf32>
    %42 = arith.index_cast %arg0 : i32 to index
    %c0_30 = arith.constant 0 : index
    %43 = memref.load %arg1[%42, %c0_30] : memref<5x8xf32, #tpu.memory_space<smem>>
    %44 = vector.broadcast %43 : f32 to vector<256x4xf32>
    %45 = arith.mulf %41, %44 : vector<256x4xf32>
    %cst_31 = arith.constant dense<0.000000e+00> : vector<256x32xf32>
    %46 = tpu.matmul %45, %9, %cst_31 {dimension_numbers = #tpu.dot_dimension_numbers<[1], [0], [0], [1], [0, 0, 1, 1], [], []>} : vector<256x4xf32>, vector<4x32xf32>, vector<256x32xf32> -> vector<256x32xf32>
    %47 = vector.broadcast %10 : vector<1x32xf32> to vector<256x32xf32>
    %48 = arith.addf %46, %47 : vector<256x32xf32>
    %49 = vector.broadcast %33 : vector<1x32xf32> to vector<256x32xf32>
    %50 = arith.addf %48, %49 : vector<256x32xf32>
    %cst_32 = arith.constant dense<0.000000e+00> : vector<256x32xf32>
    %51 = tpu.matmul %50, %11, %cst_32 {dimension_numbers = #tpu.dot_dimension_numbers<[1], [0], [0], [1], [0, 0, 1, 1], [], []>} : vector<256x32xf32>, vector<32x32xf32>, vector<256x32xf32> -> vector<256x32xf32>
    %cst_33 = arith.constant dense<0.000000e+00> : vector<16x32xf32>
    %52 = tpu.matmul %40, %12, %cst_33 {dimension_numbers = #tpu.dot_dimension_numbers<[1], [0], [0], [1], [0, 0, 1, 1], [], []>} : vector<16x32xf32>, vector<32x32xf32>, vector<16x32xf32> -> vector<16x32xf32>
    %cst_34 = arith.constant dense<0.000000e+00> : vector<16x32xf32>
    %53 = tpu.matmul %40, %13, %cst_34 {dimension_numbers = #tpu.dot_dimension_numbers<[1], [0], [0], [1], [0, 0, 1, 1], [], []>} : vector<16x32xf32>, vector<32x32xf32>, vector<16x32xf32> -> vector<16x32xf32>
    %54 = vector.extract_strided_slice %52 {offsets = [0, 0], sizes = [8, 32], strides = [1, 1]} : vector<16x32xf32> to vector<8x32xf32>
    %55 = vector.extract_strided_slice %53 {offsets = [0, 0], sizes = [8, 32], strides = [1, 1]} : vector<16x32xf32> to vector<8x32xf32>
    %cst_35 = arith.constant dense<0.000000e+00> : vector<256x8xf32>
    %56 = tpu.matmul %51, %54, %cst_35 {dimension_numbers = #tpu.dot_dimension_numbers<[1], [1], [0], [0], [0, 0, 1, 0], [], []>} : vector<256x32xf32>, vector<8x32xf32>, vector<256x8xf32> -> vector<256x8xf32>
    %cst_36 = arith.constant 0.176776692 : f32
    %57 = vector.broadcast %cst_36 : f32 to vector<256x8xf32>
    %58 = arith.mulf %56, %57 : vector<256x8xf32>
    %cst_37 = arith.constant dense<0xFF800000> : vector<256xf32>
    %59 = vector.multi_reduction <maximumf>, %58, %cst_37 [1] : vector<256x8xf32> to vector<256xf32>
    %60 = vector.shape_cast %59 : vector<256xf32> to vector<256x1xf32>
    %61 = vector.broadcast %60 : vector<256x1xf32> to vector<256x8xf32>
    %62 = arith.subf %58, %61 : vector<256x8xf32>
    %63 = math.exp %62 : vector<256x8xf32>
    %cst_38 = arith.constant dense<0.000000e+00> : vector<256xf32>
    %64 = vector.multi_reduction <add>, %63, %cst_38 [1] : vector<256x8xf32> to vector<256xf32>
    %65 = vector.shape_cast %64 : vector<256xf32> to vector<256x1xf32>
    %66 = tpu.reciprocal %65 {approx = true} : vector<256x1xf32> -> vector<256x1xf32>
    %67 = vector.broadcast %66 : vector<256x1xf32> to vector<256x8xf32>
    %68 = arith.mulf %63, %67 : vector<256x8xf32>
    %cst_39 = arith.constant dense<0.000000e+00> : vector<256x32xf32>
    %69 = tpu.matmul %68, %55, %cst_39 {dimension_numbers = #tpu.dot_dimension_numbers<[1], [0], [0], [1], [0, 0, 1, 1], [], []>} : vector<256x8xf32>, vector<8x32xf32>, vector<256x32xf32> -> vector<256x32xf32>
    %70 = vector.extract_strided_slice %52 {offsets = [8, 0], sizes = [8, 32], strides = [1, 1]} : vector<16x32xf32> to vector<8x32xf32>
    %71 = vector.extract_strided_slice %53 {offsets = [8, 0], sizes = [8, 32], strides = [1, 1]} : vector<16x32xf32> to vector<8x32xf32>
    %cst_40 = arith.constant dense<0.000000e+00> : vector<256x8xf32>
    %72 = tpu.matmul %51, %70, %cst_40 {dimension_numbers = #tpu.dot_dimension_numbers<[1], [1], [0], [0], [0, 0, 1, 0], [], []>} : vector<256x32xf32>, vector<8x32xf32>, vector<256x8xf32> -> vector<256x8xf32>
    %cst_41 = arith.constant 0.176776692 : f32
    %73 = vector.broadcast %cst_41 : f32 to vector<256x8xf32>
    %74 = arith.mulf %72, %73 : vector<256x8xf32>
    %cst_42 = arith.constant dense<0xFF800000> : vector<256xf32>
    %75 = vector.multi_reduction <maximumf>, %74, %cst_42 [1] : vector<256x8xf32> to vector<256xf32>
    %76 = vector.shape_cast %75 : vector<256xf32> to vector<256x1xf32>
    %77 = vector.broadcast %76 : vector<256x1xf32> to vector<256x8xf32>
    %78 = arith.subf %74, %77 : vector<256x8xf32>
    %79 = math.exp %78 : vector<256x8xf32>
    %cst_43 = arith.constant dense<0.000000e+00> : vector<256xf32>
    %80 = vector.multi_reduction <add>, %79, %cst_43 [1] : vector<256x8xf32> to vector<256xf32>
    %81 = vector.shape_cast %80 : vector<256xf32> to vector<256x1xf32>
    %82 = tpu.reciprocal %81 {approx = true} : vector<256x1xf32> -> vector<256x1xf32>
    %83 = vector.broadcast %82 : vector<256x1xf32> to vector<256x8xf32>
    %84 = arith.mulf %79, %83 : vector<256x8xf32>
    %cst_44 = arith.constant dense<0.000000e+00> : vector<256x32xf32>
    %85 = tpu.matmul %84, %71, %cst_44 {dimension_numbers = #tpu.dot_dimension_numbers<[1], [0], [0], [1], [0, 0, 1, 1], [], []>} : vector<256x8xf32>, vector<8x32xf32>, vector<256x32xf32> -> vector<256x32xf32>
    %86 = tpu.concatenate %69, %85 in 0 : vector<256x32xf32>, vector<256x32xf32> -> vector<512x32xf32>
    %87 = tpu.concatenate %50, %50 in 0 : vector<256x32xf32>, vector<256x32xf32> -> vector<512x32xf32>
    %cst_45 = arith.constant dense<0.000000e+00> : vector<512x32xf32>
    %88 = tpu.matmul %86, %14, %cst_45 {dimension_numbers = #tpu.dot_dimension_numbers<[1], [0], [0], [1], [0, 0, 1, 1], [], []>} : vector<512x32xf32>, vector<32x32xf32>, vector<512x32xf32> -> vector<512x32xf32>
    %89 = arith.addf %87, %88 : vector<512x32xf32>
    %90 = vector.broadcast %15 : vector<1x32xf32> to vector<512x32xf32>
    %91 = arith.addf %89, %90 : vector<512x32xf32>
    %cst_46 = arith.constant dense<0.000000e+00> : vector<512x64xf32>
    %92 = tpu.matmul %91, %16, %cst_46 {dimension_numbers = #tpu.dot_dimension_numbers<[1], [0], [0], [1], [0, 0, 1, 1], [], []>} : vector<512x32xf32>, vector<32x64xf32>, vector<512x64xf32> -> vector<512x64xf32>
    %93 = vector.broadcast %17 : vector<1x64xf32> to vector<512x64xf32>
    %94 = arith.addf %92, %93 : vector<512x64xf32>
    %95 = arith.negf %94 : vector<512x64xf32>
    %96 = math.exp %95 : vector<512x64xf32>
    %cst_47 = arith.constant 1.000000e+00 : f32
    %97 = vector.broadcast %cst_47 : f32 to vector<512x64xf32>
    %98 = arith.addf %97, %96 : vector<512x64xf32>
    %99 = arith.divf %97, %98 : vector<512x64xf32>
    %100 = arith.mulf %94, %99 : vector<512x64xf32>
    %cst_48 = arith.constant dense<0.000000e+00> : vector<512x32xf32>
    %101 = tpu.matmul %100, %18, %cst_48 {dimension_numbers = #tpu.dot_dimension_numbers<[1], [0], [0], [1], [0, 0, 1, 1], [], []>} : vector<512x64xf32>, vector<64x32xf32>, vector<512x32xf32> -> vector<512x32xf32>
    %102 = arith.addf %91, %101 : vector<512x32xf32>
    %103 = vector.broadcast %19 : vector<1x32xf32> to vector<512x32xf32>
    %104 = arith.addf %102, %103 : vector<512x32xf32>
    %cst_49 = arith.constant dense<0.000000e+00> : vector<512x4xf32>
    %105 = tpu.matmul %104, %20, %cst_49 {dimension_numbers = #tpu.dot_dimension_numbers<[1], [0], [0], [1], [0, 0, 1, 1], [], []>} : vector<512x32xf32>, vector<32x4xf32>, vector<512x4xf32> -> vector<512x4xf32>
    %106 = vector.broadcast %21 : vector<1x4xf32> to vector<512x4xf32>
    %107 = arith.addf %105, %106 : vector<512x4xf32>
    %108 = vector.extract_strided_slice %107 {offsets = [0, 0], sizes = [256, 4], strides = [1, 1]} : vector<512x4xf32> to vector<256x4xf32>
    %109 = vector.extract_strided_slice %107 {offsets = [256, 0], sizes = [256, 4], strides = [1, 1]} : vector<512x4xf32> to vector<256x4xf32>
    %110 = arith.subf %109, %108 : vector<256x4xf32>
    %cst_50 = arith.constant 7.500000e+00 : f32
    %111 = vector.broadcast %cst_50 : f32 to vector<256x4xf32>
    %112 = arith.mulf %111, %110 : vector<256x4xf32>
    %113 = arith.addf %108, %112 : vector<256x4xf32>
    %c2 = arith.constant 2 : index
    %c0_51 = arith.constant 0 : index
    %c0_52 = arith.constant 0 : index
    %114 = vector.load %arg7[%c2, %c0_51, %c0_52] : memref<4x256x4xf32, #tpu.memory_space<vmem>>, vector<1x256x4xf32>
    %115 = vector.shape_cast %114 : vector<1x256x4xf32> to vector<256x4xf32>
    %c3 = arith.constant 3 : index
    %c0_53 = arith.constant 0 : index
    %c0_54 = arith.constant 0 : index
    %116 = vector.load %arg7[%c3, %c0_53, %c0_54] : memref<4x256x4xf32, #tpu.memory_space<vmem>>, vector<1x256x4xf32>
    %117 = vector.shape_cast %116 : vector<1x256x4xf32> to vector<256x4xf32>
    %118 = vector.shape_cast %115 : vector<256x4xf32> to vector<1x256x4xf32>
    tpu.vector_store %arg7[%c3, %c0_53, %c0_54], %118 {strides = array<i32>} : memref<4x256x4xf32, #tpu.memory_space<vmem>>, vector<1x256x4xf32>,
    %c1 = arith.constant 1 : index
    %c0_55 = arith.constant 0 : index
    %c0_56 = arith.constant 0 : index
    %119 = vector.load %arg7[%c1, %c0_55, %c0_56] : memref<4x256x4xf32, #tpu.memory_space<vmem>>, vector<1x256x4xf32>
    %120 = vector.shape_cast %119 : vector<1x256x4xf32> to vector<256x4xf32>
    %c2_57 = arith.constant 2 : index
    %c0_58 = arith.constant 0 : index
    %c0_59 = arith.constant 0 : index
    %121 = vector.load %arg7[%c2_57, %c0_58, %c0_59] : memref<4x256x4xf32, #tpu.memory_space<vmem>>, vector<1x256x4xf32>
    %122 = vector.shape_cast %121 : vector<1x256x4xf32> to vector<256x4xf32>
    %123 = vector.shape_cast %120 : vector<256x4xf32> to vector<1x256x4xf32>
    tpu.vector_store %arg7[%c2_57, %c0_58, %c0_59], %123 {strides = array<i32>} : memref<4x256x4xf32, #tpu.memory_space<vmem>>, vector<1x256x4xf32>,
    %c0_60 = arith.constant 0 : index
    %c0_61 = arith.constant 0 : index
    %c0_62 = arith.constant 0 : index
    %124 = vector.load %arg7[%c0_60, %c0_61, %c0_62] : memref<4x256x4xf32, #tpu.memory_space<vmem>>, vector<1x256x4xf32>
    %125 = vector.shape_cast %124 : vector<1x256x4xf32> to vector<256x4xf32>
    %c1_63 = arith.constant 1 : index
    %c0_64 = arith.constant 0 : index
    %c0_65 = arith.constant 0 : index
    %126 = vector.load %arg7[%c1_63, %c0_64, %c0_65] : memref<4x256x4xf32, #tpu.memory_space<vmem>>, vector<1x256x4xf32>
    %127 = vector.shape_cast %126 : vector<1x256x4xf32> to vector<256x4xf32>
    %128 = vector.shape_cast %125 : vector<256x4xf32> to vector<1x256x4xf32>
    tpu.vector_store %arg7[%c1_63, %c0_64, %c0_65], %128 {strides = array<i32>} : memref<4x256x4xf32, #tpu.memory_space<vmem>>, vector<1x256x4xf32>,
    %c0_66 = arith.constant 0 : index
    %c0_67 = arith.constant 0 : index
    %c0_68 = arith.constant 0 : index
    %129 = vector.load %arg7[%c0_66, %c0_67, %c0_68] : memref<4x256x4xf32, #tpu.memory_space<vmem>>, vector<1x256x4xf32>
    %130 = vector.shape_cast %129 : vector<1x256x4xf32> to vector<256x4xf32>
    %131 = vector.shape_cast %113 : vector<256x4xf32> to vector<1x256x4xf32>
    tpu.vector_store %arg7[%c0_66, %c0_67, %c0_68], %131 {strides = array<i32>} : memref<4x256x4xf32, #tpu.memory_space<vmem>>, vector<1x256x4xf32>,
    %132 = arith.index_cast %arg0 : i32 to index
    %c1_69 = arith.constant 1 : index
    %133 = memref.load %arg1[%132, %c1_69] : memref<5x8xf32, #tpu.memory_space<smem>>
    %134 = vector.broadcast %133 : f32 to vector<256x4xf32>
    %135 = arith.mulf %134, %113 : vector<256x4xf32>
    %136 = arith.index_cast %arg0 : i32 to index
    %c2_70 = arith.constant 2 : index
    %137 = memref.load %arg1[%136, %c2_70] : memref<5x8xf32, #tpu.memory_space<smem>>
    %c1_71 = arith.constant 1 : index
    %c0_72 = arith.constant 0 : index
    %c0_73 = arith.constant 0 : index
    %138 = vector.load %arg7[%c1_71, %c0_72, %c0_73] : memref<4x256x4xf32, #tpu.memory_space<vmem>>, vector<1x256x4xf32>
    %139 = vector.shape_cast %138 : vector<1x256x4xf32> to vector<256x4xf32>
    %140 = vector.broadcast %137 : f32 to vector<256x4xf32>
    %141 = arith.mulf %140, %139 : vector<256x4xf32>
    %142 = arith.addf %135, %141 : vector<256x4xf32>
    %143 = arith.index_cast %arg0 : i32 to index
    %c3_74 = arith.constant 3 : index
    %144 = memref.load %arg1[%143, %c3_74] : memref<5x8xf32, #tpu.memory_space<smem>>
    %c2_75 = arith.constant 2 : index
    %c0_76 = arith.constant 0 : index
    %c0_77 = arith.constant 0 : index
    %145 = vector.load %arg7[%c2_75, %c0_76, %c0_77] : memref<4x256x4xf32, #tpu.memory_space<vmem>>, vector<1x256x4xf32>
    %146 = vector.shape_cast %145 : vector<1x256x4xf32> to vector<256x4xf32>
    %147 = vector.broadcast %144 : f32 to vector<256x4xf32>
    %148 = arith.mulf %147, %146 : vector<256x4xf32>
    %149 = arith.addf %142, %148 : vector<256x4xf32>
    %150 = arith.index_cast %arg0 : i32 to index
    %c4 = arith.constant 4 : index
    %151 = memref.load %arg1[%150, %c4] : memref<5x8xf32, #tpu.memory_space<smem>>
    %c3_78 = arith.constant 3 : index
    %c0_79 = arith.constant 0 : index
    %c0_80 = arith.constant 0 : index
    %152 = vector.load %arg7[%c3_78, %c0_79, %c0_80] : memref<4x256x4xf32, #tpu.memory_space<vmem>>, vector<1x256x4xf32>
    %153 = vector.shape_cast %152 : vector<1x256x4xf32> to vector<256x4xf32>
    %154 = vector.broadcast %151 : f32 to vector<256x4xf32>
    %155 = arith.mulf %154, %153 : vector<256x4xf32>
    %156 = arith.addf %149, %155 : vector<256x4xf32>
    %c0_81 = arith.constant 0 : index
    %c0_82 = arith.constant 0 : index
    %157 = vector.load %arg6[%c0_81, %c0_82] : memref<256x4xf32, #tpu.memory_space<vmem>>, vector<256x4xf32>
    %158 = arith.addf %157, %156 : vector<256x4xf32>
    %c0_83 = arith.constant 0 : index
    %c0_84 = arith.constant 0 : index
    %159 = vector.load %arg6[%c0_83, %c0_84] : memref<256x4xf32, #tpu.memory_space<vmem>>, vector<256x4xf32>
    tpu.vector_store %arg6[%c0_83, %c0_84], %158 {strides = array<i32>} : memref<256x4xf32, #tpu.memory_space<vmem>>, vector<256x4xf32>,
    return
  }
  func.func @transform_0(%arg0: i32, %arg1: memref<5x8xf32, #tpu.memory_space<smem>>) -> (i32, i32, i32) {
    %c0_i32 = arith.constant 0 : i32
    %c0_i32_0 = arith.constant 0 : i32
    %c0_i32_1 = arith.constant 0 : i32
    return %arg0, %c0_i32, %c0_i32_0 : i32, i32, i32
  }
  func.func @transform_1(%arg0: i32, %arg1: memref<5x8xf32, #tpu.memory_space<smem>>) -> (i32, i32) {
    %c0_i32 = arith.constant 0 : i32
    %c0_i32_0 = arith.constant 0 : i32
    %c0_i32_1 = arith.constant 0 : i32
    return %c0_i32, %c0_i32_0 : i32, i32
  }
  func.func @transform_2(%arg0: i32, %arg1: memref<5x8xf32, #tpu.memory_space<smem>>) -> (i32, i32) {
    %c0_i32 = arith.constant 0 : i32
    %c0_i32_0 = arith.constant 0 : i32
    %c0_i32_1 = arith.constant 0 : i32
    return %c0_i32, %c0_i32_0 : i32, i32
  }
  func.func @transform_3(%arg0: i32, %arg1: memref<5x8xf32, #tpu.memory_space<smem>>) -> (i32, i32) {
    %c0_i32 = arith.constant 0 : i32
    %c0_i32_0 = arith.constant 0 : i32
    %c0_i32_1 = arith.constant 0 : i32
    return %c0_i32, %c0_i32_0 : i32, i32
  }
  func.func @transform_4(%arg0: i32, %arg1: memref<5x8xf32, #tpu.memory_space<smem>>) -> (i32, i32) {
    %c0_i32 = arith.constant 0 : i32
    %c0_i32_0 = arith.constant 0 : i32
    %c0_i32_1 = arith.constant 0 : i32
    return %c0_i32, %c0_i32_0 : i32, i32
  }
}

</mosaic_0001>

<bundles_post_ra>
// kernel: stable_diffusion_forward.1
= control target key start
LH: loop header
LB: loop body
LE: loop exit
PB: predicated region body
PF: predicated region fallthrough
CT: control target
= control target key end

     0   :  { %s13791_s0 = inlined_call_operand.vmem [shape: f32[5,8], index: 0, kind: input, shape index: {}]   ;;  %s13792_s1 = inlined_call_operand.vmem [shape: f32[5,1,32], index: 1, kind: input, shape index: {}]   ;;  %s13793_s2 = inlined_call_operand.vmem [shape: f32[16,32], index: 2, kind: input, shape index: {}]   ;;  %s13794_s3 = inlined_call_operand.vmem [shape: f32[368,64], index: 3, kind: input, shape index: {}]   ;;  %s13795_s4 = inlined_call_operand.vmem [shape: f32[256,4], index: 4, kind: input, shape index: {}]   ;;  %s13796_s5 = inlined_call_operand.vmem [shape: f32[256,4], index: 5, kind: output, shape index: {}]  }
   0x1   :  { %s10_s20 = sshll.u32 %s13791_s0, 4  ;;  %s11_s20 = int_to_ptr.vmem [resolvable:$true] %s10_s20 }
   0x2   :  { %s9785_s21 = scalar_lea.vmem %s11_s20, 128  ;;  %p9790_p1 = scmp.lt.s32.totalorder %s11_s20, %s11_s20 }
   0x3   :  { %p9786_p0 = scmp.ne.s32.totalorder %s11_s20, %s9785_s21  ;;  %p9791_p2 = scmp.lt.s32.totalorder %s9785_s21, %s9785_s21 }
   0x5   :  { %p9792_p3 = por %p9791_p2, %p9790_p1 }
   0x7   :  { %p9793_p4 = pnand %p9792_p3, %p9786_p0 }
   0x9   :  { %9796 = shalt.err (!%p9793_p4)  }
   0xa   :  { %s9807_s22 = smov [#allocation4]  }
   0xb   :  { %13 = dma.vmem_to_smem %s11_s20, 128, %s9807_s22, [#allocation3] }
   0xc   :  { %9801 = dma.done.wait [#allocation3], 128 }
   0xd   :  { %9802 = vsyncadd [#allocation3], 4294967168 }
   0xe   :  { %15 = sfence }
   0xf   :  { %s9845_s23 = smov 0  }
  0x10 LB: > { %s9851_s0 = sadd.s32 4294967295, %s9805_s23   ;;  %p7349_p5 = scmp.ge.s32.totalorder %s9805_s23, 1  ;;  %s9805_s23 = sphi %s9845_s23, %s21_s23  }
  0x11   : > { %p162_p6 = scmp.lt.s32.totalorder %s9805_s23, 6 }
  0x13   : > { %p163_p7 = pnand %p7349_p5, %p162_p6 }
  0x15   : > { %166 = sbr.rel (%p163_p7) target bundleno = 2628 (0xa44), region = 36 }
  0x1c   : > { %p181_p8 = scmp.lt.s32.totalorder %s9851_s0, 4  ;;  %p7350_p9 = scmp.ne.s32.totalorder %s9851_s0, 0 }
  0x1d   : > { %v188_v0 = vld [vmem:[%s13795_s4] sm:$0xff] (!%p7350_p9)  ;;  %vm220_vm0 = vcmask (!%p7350_p9), 31744   ;;  %v189_v1 = vld [vmem:[%s13795_s4 + $0x8] sm:$0xff] (!%p7350_p9)  ;;  %v190_v2 = vld [vmem:[%s13795_s4 + $0x10] sm:$0xff] (!%p7350_p9)  ;;  %v9808_v6 = vmov (!%p7350_p9), 0.0  }
  0x1e   : > { %s9857_s24 = scalar_select %p181_p8, %s9851_s0, 4 }
  0x1f   : > { %187 = sbr.rel (%p7350_p9) target bundleno = 111 (0x6f), region = 40  ;;  %221 = vst.msk [vmem:[%s13796_s5] sm:$0xff] (!%p7350_p9), %vm220_vm0, %v188_v0  ;;  %222 = vst.msk [vmem:[%s13796_s5 + $0x8] sm:$0xff] (!%p7350_p9), %vm220_vm0, %v189_v1  ;;  %v9888_v3 = vld [vmem:[%s13795_s4 + $0x18] sm:$0xff] (!%p7350_p9)  ;;  %v9893_v4 = vld [vmem:[%s13795_s4 + $0x20] sm:$0xff] (!%p7350_p9) }
  0x20   : > { %s183_s27 = scalar_lea.vmem %s13792_s1, %s9857_s24  ;;  %223 = vst.msk [vmem:[%s13796_s5 + $0x10] sm:$0xff] (!%p7350_p9), %vm220_vm0, %v190_v2  ;;  %v9898_v5 = vld [vmem:[%s13795_s4 + $0x28] sm:$0xff] (!%p7350_p9)  ;;  %253 = vst.msk [vmem:[#allocation2] sm:$0xff] (!%p7350_p9), %vm220_vm0, %v9808_v6  ;;  %v194_v7 = vld [vmem:[%s13795_s4 + $0x30] sm:$0xff] (!%p7350_p9) }
  0x21   : > { %254 = vst.msk [vmem:[#allocation2 + $0x8] sm:$0xff] (!%p7350_p9), %vm220_vm0, %v9808_v6  ;;  %255 = vst.msk [vmem:[#allocation2 + $0x10] sm:$0xff] (!%p7350_p9), %vm220_vm0, %v9808_v6  ;;  %v195_v8 = vld [vmem:[%s13795_s4 + $0x38] sm:$0xff] (!%p7350_p9)  ;;  %v196_v9 = vld [vmem:[%s13795_s4 + $0x40] sm:$0xff] (!%p7350_p9) }
  0x22   : > { %256 = vst.msk [vmem:[#allocation2 + $0x18] sm:$0xff] (!%p7350_p9), %vm220_vm0, %v9808_v6  ;;  %257 = vst.msk [vmem:[#allocation2 + $0x20] sm:$0xff] (!%p7350_p9), %vm220_vm0, %v9808_v6  ;;  %v197_v10 = vld [vmem:[%s13795_s4 + $0x48] sm:$0xff] (!%p7350_p9)  ;;  %v198_v11 = vld [vmem:[%s13795_s4 + $0x50] sm:$0xff] (!%p7350_p9) }
  0x23   : > { %258 = vst.msk [vmem:[#allocation2 + $0x28] sm:$0xff] (!%p7350_p9), %vm220_vm0, %v9808_v6  ;;  %259 = vst.msk [vmem:[#allocation2 + $0x30] sm:$0xff] (!%p7350_p9), %vm220_vm0, %v9808_v6  ;;  %v199_v12 = vld [vmem:[%s13795_s4 + $0x58] sm:$0xff] (!%p7350_p9)  ;;  %v200_v13 = vld [vmem:[%s13795_s4 + $0x60] sm:$0xff] (!%p7350_p9) }
  0x24   : > { %260 = vst.msk [vmem:[#allocation2 + $0x38] sm:$0xff] (!%p7350_p9), %vm220_vm0, %v9808_v6  ;;  %261 = vst.msk [vmem:[#allocation2 + $0x40] sm:$0xff] (!%p7350_p9), %vm220_vm0, %v9808_v6  ;;  %v201_v14 = vld [vmem:[%s13795_s4 + $0x68] sm:$0xff] (!%p7350_p9)  ;;  %v202_v15 = vld [vmem:[%s13795_s4 + $0x70] sm:$0xff] (!%p7350_p9) }
  0x25   : > { %262 = vst.msk [vmem:[#allocation2 + $0x48] sm:$0xff] (!%p7350_p9), %vm220_vm0, %v9808_v6  ;;  %263 = vst.msk [vmem:[#allocation2 + $0x50] sm:$0xff] (!%p7350_p9), %vm220_vm0, %v9808_v6  ;;  %v203_v16 = vld [vmem:[%s13795_s4 + $0x78] sm:$0xff] (!%p7350_p9)  ;;  %v204_v17 = vld [vmem:[%s13795_s4 + $0x80] sm:$0xff] (!%p7350_p9) }
  0x26   : > { %264 = vst.msk [vmem:[#allocation2 + $0x58] sm:$0xff] %vm220_vm0, %v9808_v6  ;;  %265 = vst.msk [vmem:[#allocation2 + $0x60] sm:$0xff] %vm220_vm0, %v9808_v6  ;;  %v205_v18 = vld [vmem:[%s13795_s4 + $0x88] sm:$0xff]  ;;  %v206_v19 = vld [vmem:[%s13795_s4 + $0x90] sm:$0xff] }
  0x27   : > { %266 = vst.msk [vmem:[#allocation2 + $0x68] sm:$0xff] %vm220_vm0, %v9808_v6  ;;  %267 = vst.msk [vmem:[#allocation2 + $0x70] sm:$0xff] %vm220_vm0, %v9808_v6  ;;  %v207_v20 = vld [vmem:[%s13795_s4 + $0x98] sm:$0xff]  ;;  %v208_v21 = vld [vmem:[%s13795_s4 + $0xa0] sm:$0xff] }
  0x28   : > { %268 = vst.msk [vmem:[#allocation2 + $0x78] sm:$0xff] %vm220_vm0, %v9808_v6  ;;  %269 = vst.msk [vmem:[#allocation2 + $0x80] sm:$0xff] %vm220_vm0, %v9808_v6  ;;  %v209_v22 = vld [vmem:[%s13795_s4 + $0xa8] sm:$0xff]  ;;  %v210_v23 = vld [vmem:[%s13795_s4 + $0xb0] sm:$0xff] }
  0x29   : > { %270 = vst.msk [vmem:[#allocation2 + $0x88] sm:$0xff] %vm220_vm0, %v9808_v6  ;;  %271 = vst.msk [vmem:[#allocation2 + $0x90] sm:$0xff] %vm220_vm0, %v9808_v6  ;;  %v211_v24 = vld [vmem:[%s13795_s4 + $0xb8] sm:$0xff]  ;;  %v212_v25 = vld [vmem:[%s13795_s4 + $0xc0] sm:$0xff] }
  0x2a   : > { %272 = vst.msk [vmem:[#allocation2 + $0x98] sm:$0xff] %vm220_vm0, %v9808_v6  ;;  %273 = vst.msk [vmem:[#allocation2 + $0xa0] sm:$0xff] %vm220_vm0, %v9808_v6  ;;  %v213_v26 = vld [vmem:[%s13795_s4 + $0xc8] sm:$0xff]  ;;  %v214_v27 = vld [vmem:[%s13795_s4 + $0xd0] sm:$0xff] }
  0x2b   : > { %274 = vst.msk [vmem:[#allocation2 + $0xa8] sm:$0xff] %vm220_vm0, %v9808_v6  ;;  %275 = vst.msk [vmem:[#allocation2 + $0xb0] sm:$0xff] %vm220_vm0, %v9808_v6  ;;  %v215_v28 = vld [vmem:[%s13795_s4 + $0xd8] sm:$0xff]  ;;  %v216_v29 = vld [vmem:[%s13795_s4 + $0xe0] sm:$0xff] }
  0x2c   : > { %276 = vst.msk [vmem:[#allocation2 + $0xb8] sm:$0xff] %vm220_vm0, %v9808_v6  ;;  %277 = vst.msk [vmem:[#allocation2 + $0xc0] sm:$0xff] %vm220_vm0, %v9808_v6  ;;  %v217_v30 = vld [vmem:[%s13795_s4 + $0xe8] sm:$0xff]  ;;  %v218_v31 = vld [vmem:[%s13795_s4 + $0xf0] sm:$0xff] }
  0x2d   : > { %278 = vst.msk [vmem:[#allocation2 + $0xc8] sm:$0xff] %vm220_vm0, %v9808_v6  ;;  %279 = vst.msk [vmem:[#allocation2 + $0xd0] sm:$0xff] %vm220_vm0, %v9808_v6  ;;  %v219_v32 = vld [vmem:[%s13795_s4 + $0xf8] sm:$0xff] }
  0x2e   : > { %280 = vst.msk [vmem:[#allocation2 + $0xd8] sm:$0xff] %vm220_vm0, %v9808_v6  ;;  %281 = vst.msk [vmem:[#allocation2 + $0xe0] sm:$0xff] %vm220_vm0, %v9808_v6 }
  0x2f   : > { %282 = vst.msk [vmem:[#allocation2 + $0xe8] sm:$0xff] %vm220_vm0, %v9808_v6  ;;  %283 = vst.msk [vmem:[#allocation2 + $0xf0] sm:$0xff] %vm220_vm0, %v9808_v6 }
  0x30   : > { %284 = vst.msk [vmem:[#allocation2 + $0xf8] sm:$0xff] %vm220_vm0, %v9808_v6  ;;  %285 = vst.msk [vmem:[#allocation2 + $0x100] sm:$0xff] %vm220_vm0, %v9808_v6 }
  0x31   : > { %286 = vst.msk [vmem:[#allocation2 + $0x108] sm:$0xff] %vm220_vm0, %v9808_v6  ;;  %287 = vst.msk [vmem:[#allocation2 + $0x110] sm:$0xff] %vm220_vm0, %v9808_v6 }
  0x32   : > { %288 = vst.msk [vmem:[#allocation2 + $0x118] sm:$0xff] %vm220_vm0, %v9808_v6  ;;  %289 = vst.msk [vmem:[#allocation2 + $0x120] sm:$0xff] %vm220_vm0, %v9808_v6 }
  0x33   : > { %290 = vst.msk [vmem:[#allocation2 + $0x128] sm:$0xff] %vm220_vm0, %v9808_v6  ;;  %291 = vst.msk [vmem:[#allocation2 + $0x130] sm:$0xff] %vm220_vm0, %v9808_v6 }
  0x34   : > { %292 = vst.msk [vmem:[#allocation2 + $0x138] sm:$0xff] %vm220_vm0, %v9808_v6  ;;  %293 = vst.msk [vmem:[#allocation2 + $0x140] sm:$0xff] %vm220_vm0, %v9808_v6 }
  0x35   : > { %294 = vst.msk [vmem:[#allocation2 + $0x148] sm:$0xff] %vm220_vm0, %v9808_v6  ;;  %295 = vst.msk [vmem:[#allocation2 + $0x150] sm:$0xff] %vm220_vm0, %v9808_v6 }
  0x36   : > { %296 = vst.msk [vmem:[#allocation2 + $0x158] sm:$0xff] %vm220_vm0, %v9808_v6  ;;  %297 = vst.msk [vmem:[#allocation2 + $0x160] sm:$0xff] %vm220_vm0, %v9808_v6 }
  0x37   : > { %298 = vst.msk [vmem:[#allocation2 + $0x168] sm:$0xff] %vm220_vm0, %v9808_v6  ;;  %299 = vst.msk [vmem:[#allocation2 + $0x170] sm:$0xff] %vm220_vm0, %v9808_v6 }
  0x38   : > { %300 = vst.msk [vmem:[#allocation2 + $0x178] sm:$0xff] %vm220_vm0, %v9808_v6  ;;  %301 = vst.msk [vmem:[#allocation2 + $0x180] sm:$0xff] %vm220_vm0, %v9808_v6 }
  0x39   : > { %302 = vst.msk [vmem:[#allocation2 + $0x188] sm:$0xff] %vm220_vm0, %v9808_v6  ;;  %303 = vst.msk [vmem:[#allocation2 + $0x190] sm:$0xff] %vm220_vm0, %v9808_v6 }
  0x3a   : > { %304 = vst.msk [vmem:[#allocation2 + $0x198] sm:$0xff] %vm220_vm0, %v9808_v6  ;;  %305 = vst.msk [vmem:[#allocation2 + $0x1a0] sm:$0xff] %vm220_vm0, %v9808_v6 }
  0x3b   : > { %306 = vst.msk [vmem:[#allocation2 + $0x1a8] sm:$0xff] %vm220_vm0, %v9808_v6  ;;  %307 = vst.msk [vmem:[#allocation2 + $0x1b0] sm:$0xff] %vm220_vm0, %v9808_v6 }
  0x3c   : > { %308 = vst.msk [vmem:[#allocation2 + $0x1b8] sm:$0xff] %vm220_vm0, %v9808_v6  ;;  %309 = vst.msk [vmem:[#allocation2 + $0x1c0] sm:$0xff] %vm220_vm0, %v9808_v6 }
  0x3d   : > { %310 = vst.msk [vmem:[#allocation2 + $0x1c8] sm:$0xff] %vm220_vm0, %v9808_v6  ;;  %311 = vst.msk [vmem:[#allocation2 + $0x1d0] sm:$0xff] %vm220_vm0, %v9808_v6 }
  0x3e   : > { %312 = vst.msk [vmem:[#allocation2 + $0x1d8] sm:$0xff] %vm220_vm0, %v9808_v6  ;;  %313 = vst.msk [vmem:[#allocation2 + $0x1e0] sm:$0xff] %vm220_vm0, %v9808_v6 }
  0x3f   : > { %314 = vst.msk [vmem:[#allocation2 + $0x1e8] sm:$0xff] %vm220_vm0, %v9808_v6  ;;  %315 = vst.msk [vmem:[#allocation2 + $0x1f0] sm:$0xff] %vm220_vm0, %v9808_v6 }
  0x40   : > { %316 = vst.msk [vmem:[#allocation2 + $0x1f8] sm:$0xff] %vm220_vm0, %v9808_v6  ;;  %317 = vst.msk [vmem:[#allocation2 + $0x200] sm:$0xff] %vm220_vm0, %v9808_v6 }
  0x41   : > { %318 = vst.msk [vmem:[#allocation2 + $0x208] sm:$0xff] %vm220_vm0, %v9808_v6  ;;  %319 = vst.msk [vmem:[#allocation2 + $0x210] sm:$0xff] %vm220_vm0, %v9808_v6 }
  0x42   : > { %320 = vst.msk [vmem:[#allocation2 + $0x218] sm:$0xff] %vm220_vm0, %v9808_v6  ;;  %321 = vst.msk [vmem:[#allocation2 + $0x220] sm:$0xff] %vm220_vm0, %v9808_v6 }
  0x43   : > { %322 = vst.msk [vmem:[#allocation2 + $0x228] sm:$0xff] %vm220_vm0, %v9808_v6  ;;  %323 = vst.msk [vmem:[#allocation2 + $0x230] sm:$0xff] %vm220_vm0, %v9808_v6 }
  0x44   : > { %324 = vst.msk [vmem:[#allocation2 + $0x238] sm:$0xff] %vm220_vm0, %v9808_v6  ;;  %325 = vst.msk [vmem:[#allocation2 + $0x240] sm:$0xff] %vm220_vm0, %v9808_v6 }
  0x45   : > { %326 = vst.msk [vmem:[#allocation2 + $0x248] sm:$0xff] %vm220_vm0, %v9808_v6  ;;  %327 = vst.msk [vmem:[#allocation2 + $0x250] sm:$0xff] %vm220_vm0, %v9808_v6 }
  0x46   : > { %328 = vst.msk [vmem:[#allocation2 + $0x258] sm:$0xff] %vm220_vm0, %v9808_v6  ;;  %329 = vst.msk [vmem:[#allocation2 + $0x260] sm:$0xff] %vm220_vm0, %v9808_v6 }
  0x47   : > { %330 = vst.msk [vmem:[#allocation2 + $0x268] sm:$0xff] %vm220_vm0, %v9808_v6  ;;  %331 = vst.msk [vmem:[#allocation2 + $0x270] sm:$0xff] %vm220_vm0, %v9808_v6 }
  0x48   : > { %332 = vst.msk [vmem:[#allocation2 + $0x278] sm:$0xff] %vm220_vm0, %v9808_v6  ;;  %333 = vst.msk [vmem:[#allocation2 + $0x280] sm:$0xff] %vm220_vm0, %v9808_v6 }
  0x49   : > { %334 = vst.msk [vmem:[#allocation2 + $0x288] sm:$0xff] %vm220_vm0, %v9808_v6  ;;  %335 = vst.msk [vmem:[#allocation2 + $0x290] sm:$0xff] %vm220_vm0, %v9808_v6 }
  0x4a   : > { %336 = vst.msk [vmem:[#allocation2 + $0x298] sm:$0xff] %vm220_vm0, %v9808_v6  ;;  %337 = vst.msk [vmem:[#allocation2 + $0x2a0] sm:$0xff] %vm220_vm0, %v9808_v6 }
  0x4b   : > { %338 = vst.msk [vmem:[#allocation2 + $0x2a8] sm:$0xff] %vm220_vm0, %v9808_v6  ;;  %339 = vst.msk [vmem:[#allocation2 + $0x2b0] sm:$0xff] %vm220_vm0, %v9808_v6 }
  0x4c   : > { %340 = vst.msk [vmem:[#allocation2 + $0x2b8] sm:$0xff] %vm220_vm0, %v9808_v6  ;;  %341 = vst.msk [vmem:[#allocation2 + $0x2c0] sm:$0xff] %vm220_vm0, %v9808_v6 }
  0x4d   : > { %342 = vst.msk [vmem:[#allocation2 + $0x2c8] sm:$0xff] %vm220_vm0, %v9808_v6  ;;  %343 = vst.msk [vmem:[#allocation2 + $0x2d0] sm:$0xff] %vm220_vm0, %v9808_v6 }
  0x4e   : > { %344 = vst.msk [vmem:[#allocation2 + $0x2d8] sm:$0xff] %vm220_vm0, %v9808_v6  ;;  %345 = vst.msk [vmem:[#allocation2 + $0x2e0] sm:$0xff] %vm220_vm0, %v9808_v6 }
  0x4f   : > { %346 = vst.msk [vmem:[#allocation2 + $0x2e8] sm:$0xff] %vm220_vm0, %v9808_v6  ;;  %347 = vst.msk [vmem:[#allocation2 + $0x2f0] sm:$0xff] %vm220_vm0, %v9808_v6 }
  0x50   : > { %348 = vst.msk [vmem:[#allocation2 + $0x2f8] sm:$0xff] %vm220_vm0, %v9808_v6  ;;  %349 = vst.msk [vmem:[#allocation2 + $0x300] sm:$0xff] %vm220_vm0, %v9808_v6 }
  0x51   : > { %350 = vst.msk [vmem:[#allocation2 + $0x308] sm:$0xff] %vm220_vm0, %v9808_v6  ;;  %351 = vst.msk [vmem:[#allocation2 + $0x310] sm:$0xff] %vm220_vm0, %v9808_v6 }
  0x52   : > { %352 = vst.msk [vmem:[#allocation2 + $0x318] sm:$0xff] %vm220_vm0, %v9808_v6  ;;  %353 = vst.msk [vmem:[#allocation2 + $0x320] sm:$0xff] %vm220_vm0, %v9808_v6 }
  0x53   : > { %354 = vst.msk [vmem:[#allocation2 + $0x328] sm:$0xff] %vm220_vm0, %v9808_v6  ;;  %355 = vst.msk [vmem:[#allocation2 + $0x330] sm:$0xff] %vm220_vm0, %v9808_v6 }
  0x54   : > { %356 = vst.msk [vmem:[#allocation2 + $0x338] sm:$0xff] %vm220_vm0, %v9808_v6  ;;  %357 = vst.msk [vmem:[#allocation2 + $0x340] sm:$0xff] %vm220_vm0, %v9808_v6 }
  0x55   : > { %358 = vst.msk [vmem:[#allocation2 + $0x348] sm:$0xff] %vm220_vm0, %v9808_v6  ;;  %359 = vst.msk [vmem:[#allocation2 + $0x350] sm:$0xff] %vm220_vm0, %v9808_v6 }
  0x56   : > { %360 = vst.msk [vmem:[#allocation2 + $0x358] sm:$0xff] %vm220_vm0, %v9808_v6  ;;  %361 = vst.msk [vmem:[#allocation2 + $0x360] sm:$0xff] %vm220_vm0, %v9808_v6 }
  0x57   : > { %362 = vst.msk [vmem:[#allocation2 + $0x368] sm:$0xff] %vm220_vm0, %v9808_v6  ;;  %363 = vst.msk [vmem:[#allocation2 + $0x370] sm:$0xff] %vm220_vm0, %v9808_v6 }
  0x58   : > { %364 = vst.msk [vmem:[#allocation2 + $0x378] sm:$0xff] %vm220_vm0, %v9808_v6  ;;  %365 = vst.msk [vmem:[#allocation2 + $0x380] sm:$0xff] %vm220_vm0, %v9808_v6 }
  0x59   : > { %366 = vst.msk [vmem:[#allocation2 + $0x388] sm:$0xff] %vm220_vm0, %v9808_v6  ;;  %367 = vst.msk [vmem:[#allocation2 + $0x390] sm:$0xff] %vm220_vm0, %v9808_v6 }
  0x5a   : > { %368 = vst.msk [vmem:[#allocation2 + $0x398] sm:$0xff] %vm220_vm0, %v9808_v6  ;;  %369 = vst.msk [vmem:[#allocation2 + $0x3a0] sm:$0xff] %vm220_vm0, %v9808_v6 }
  0x5b   : > { %370 = vst.msk [vmem:[#allocation2 + $0x3a8] sm:$0xff] %vm220_vm0, %v9808_v6  ;;  %371 = vst.msk [vmem:[#allocation2 + $0x3b0] sm:$0xff] %vm220_vm0, %v9808_v6 }
  0x5c   : > { %372 = vst.msk [vmem:[#allocation2 + $0x3b8] sm:$0xff] %vm220_vm0, %v9808_v6  ;;  %373 = vst.msk [vmem:[#allocation2 + $0x3c0] sm:$0xff] %vm220_vm0, %v9808_v6 }
  0x5d   : > { %374 = vst.msk [vmem:[#allocation2 + $0x3c8] sm:$0xff] %vm220_vm0, %v9808_v6  ;;  %375 = vst.msk [vmem:[#allocation2 + $0x3d0] sm:$0xff] %vm220_vm0, %v9808_v6 }
  0x5e   : > { %376 = vst.msk [vmem:[#allocation2 + $0x3d8] sm:$0xff] %vm220_vm0, %v9808_v6  ;;  %377 = vst.msk [vmem:[#allocation2 + $0x3e0] sm:$0xff] %vm220_vm0, %v9808_v6 }
  0x5f   : > { %378 = vst.msk [vmem:[#allocation2 + $0x3e8] sm:$0xff] %vm220_vm0, %v9808_v6  ;;  %379 = vst.msk [vmem:[#allocation2 + $0x3f0] sm:$0xff] %vm220_vm0, %v9808_v6 }
  0x60   : > { %380 = vst.msk [vmem:[#allocation2 + $0x3f8] sm:$0xff] %vm220_vm0, %v9808_v6  ;;  %224 = vst.msk [vmem:[%s13796_s5 + $0x18] sm:$0xff] %vm220_vm0, %v9888_v3 }
  0x61   : > { %225 = vst.msk [vmem:[%s13796_s5 + $0x20] sm:$0xff] %vm220_vm0, %v9893_v4  ;;  %226 = vst.msk [vmem:[%s13796_s5 + $0x28] sm:$0xff] %vm220_vm0, %v9898_v5 }
  0x62   : > { %227 = vst.msk [vmem:[%s13796_s5 + $0x30] sm:$0xff] %vm220_vm0, %v194_v7  ;;  %228 = vst.msk [vmem:[%s13796_s5 + $0x38] sm:$0xff] %vm220_vm0, %v195_v8 }
  0x63   : > { %229 = vst.msk [vmem:[%s13796_s5 + $0x40] sm:$0xff] %vm220_vm0, %v196_v9  ;;  %230 = vst.msk [vmem:[%s13796_s5 + $0x48] sm:$0xff] %vm220_vm0, %v197_v10 }
  0x64   : > { %231 = vst.msk [vmem:[%s13796_s5 + $0x50] sm:$0xff] %vm220_vm0, %v198_v11  ;;  %232 = vst.msk [vmem:[%s13796_s5 + $0x58] sm:$0xff] %vm220_vm0, %v199_v12 }
  0x65   : > { %233 = vst.msk [vmem:[%s13796_s5 + $0x60] sm:$0xff] %vm220_vm0, %v200_v13  ;;  %234 = vst.msk [vmem:[%s13796_s5 + $0x68] sm:$0xff] %vm220_vm0, %v201_v14 }
  0x66   : > { %235 = vst.msk [vmem:[%s13796_s5 + $0x70] sm:$0xff] %vm220_vm0, %v202_v15  ;;  %236 = vst.msk [vmem:[%s13796_s5 + $0x78] sm:$0xff] %vm220_vm0, %v203_v16 }
  0x67   : > { %237 = vst.msk [vmem:[%s13796_s5 + $0x80] sm:$0xff] %vm220_vm0, %v204_v17  ;;  %238 = vst.msk [vmem:[%s13796_s5 + $0x88] sm:$0xff] %vm220_vm0, %v205_v18 }
  0x68   : > { %239 = vst.msk [vmem:[%s13796_s5 + $0x90] sm:$0xff] %vm220_vm0, %v206_v19  ;;  %240 = vst.msk [vmem:[%s13796_s5 + $0x98] sm:$0xff] %vm220_vm0, %v207_v20 }
  0x69   : > { %241 = vst.msk [vmem:[%s13796_s5 + $0xa0] sm:$0xff] %vm220_vm0, %v208_v21  ;;  %242 = vst.msk [vmem:[%s13796_s5 + $0xa8] sm:$0xff] %vm220_vm0, %v209_v22 }
  0x6a   : > { %243 = vst.msk [vmem:[%s13796_s5 + $0xb0] sm:$0xff] %vm220_vm0, %v210_v23  ;;  %244 = vst.msk [vmem:[%s13796_s5 + $0xb8] sm:$0xff] %vm220_vm0, %v211_v24 }
  0x6b   : > { %245 = vst.msk [vmem:[%s13796_s5 + $0xc0] sm:$0xff] %vm220_vm0, %v212_v25  ;;  %246 = vst.msk [vmem:[%s13796_s5 + $0xc8] sm:$0xff] %vm220_vm0, %v213_v26 }
  0x6c   : > { %247 = vst.msk [vmem:[%s13796_s5 + $0xd0] sm:$0xff] %vm220_vm0, %v214_v27  ;;  %248 = vst.msk [vmem:[%s13796_s5 + $0xd8] sm:$0xff] %vm220_vm0, %v215_v28 }
  0x6d   : > { %249 = vst.msk [vmem:[%s13796_s5 + $0xe0] sm:$0xff] %vm220_vm0, %v216_v29  ;;  %250 = vst.msk [vmem:[%s13796_s5 + $0xe8] sm:$0xff] %vm220_vm0, %v217_v30 }
  0x6e   : > { %251 = vst.msk [vmem:[%s13796_s5 + $0xf0] sm:$0xff] %vm220_vm0, %v218_v31  ;;  %252 = vst.msk [vmem:[%s13796_s5 + $0xf8] sm:$0xff] %vm220_vm0, %v219_v32 }
  0x6f PF: > { %v386_v33 = vld [vmem:[%s13794_s3 + $0x20] sm:$0xff]  ;;  %v387_v34 = vld [vmem:[%s13794_s3 + $0x28] sm:$0xff]  ;;  %v388_v35 = vld [vmem:[%s13794_s3 + $0x30] sm:$0xff]  ;;  %v9809_v36 = vmov 0.0|0.0   ;;  %vm9810_vm1 = vmmov 0   ;;  %v9811_v39 = vmov 0.0  }
  0x70   : > { %9172 = vmatprep.subr.bf16.mxu0 %v9809_v36  ;;  %v9173_v37 = vpack.c.bf16 %v387_v34, %v386_v33  ;;  %v389_v38 = vld [vmem:[%s13794_s3 + $0x38] sm:$0xff]  ;;  %8395 = vmatprep.mubr.msk.f32.mxu0 %vm9810_vm1, %v9811_v39  ;;  %v381_v41 = vld [vmem:[%s13794_s3] sm:$0xff]  ;;  %v382_v42 = vld [vmem:[%s13794_s3 + $0x8] sm:$0xff]  ;;  %vm435_vm2 = vcmask 261120   ;;  %vm836_vm3 = vcmask 1043456   ;;  %s10412_s7 = sshll.u32 %s9851_s0, 7 }
  0x71   : > { %9178 = vmatprep.subr.bf16.mxu1 %v9809_v36  ;;  %8406 = vmatprep.mubr.msk.f32.mxu1 %vm9810_vm1, %v9811_v39  ;;  %v9176_v40 = vpack.c.bf16 %v389_v38, %v388_v35  ;;  %v434_v43 = vld [vmem:[%s183_s27] sm:$0x1]  ;;  %v9185_v44 = vpack.c.bf16 %v382_v42, %v381_v41  ;;  %v383_v45 = vld [vmem:[%s13794_s3 + $0x10] sm:$0xff]  ;;  %v384_v46 = vld [vmem:[%s13794_s3 + $0x18] sm:$0xff]  ;;  %s701_s8 = sld [smem:[#allocation4 + %s10412_s7]]  ;;  %vm739_vm4 = vcmask 31744  }
  0x72   : > { %9174 = vmatpush3.bf16.msra.mxu0 %v9173_v37  ;;  %v9188_v47 = vpack.c.bf16 %v384_v46, %v383_v45  ;;  %v589_v48 = vld [vmem:[%s13793_s2] sm:$0xff]  ;;  %v392_v50 = vld [vmem:[%s13794_s3 + $0x48] sm:$0xff]  ;;  %v393_v52 = vld [vmem:[%s13794_s3 + $0x50] sm:$0xff]  ;;  %vm1934_vm5 = vcmask 64512   ;;  %vm5279_vm6 = vcmask 523264   ;;  %s6928_s9 = sadd.s32 2, %s10412_s7 }
  0x73   : > { %9175 = vmatprep.subr.bf16.mxu0 %v9809_v36  ;;  %v391_v49 = vld [vmem:[%s13794_s3 + $0x40] sm:$0xff]  ;;  %v394_v53 = vld [vmem:[%s13794_s3 + $0x58] sm:$0xff]  ;;  %v390_v56 = vld [vmem:[%s13794_s3 + $0x169] sm:$0x1]  ;;  %s7027_s10 = sadd.s32 3, %s10412_s7  ;;  %s7126_s11 = sadd.s32 4, %s10412_s7 }
  0x74   : > { %v9179_v51 = vpack.c.bf16 %v392_v50, %v391_v49  ;;  %v9182_v54 = vpack.c.bf16 %v394_v53, %v393_v52  ;;  %v396_v55 = vld [vmem:[%s13794_s3 + $0x160] sm:$0xf]  ;;  %v403_v4 = vld [vmem:[%s13794_s3 + $0x88] sm:$0xff]  ;;  %v670_v9 = vld [vmem:[%s13796_s5 + $0x10] sm:$0xff]  ;;  %s6893_s12 = sadd.s32 1, %s10412_s7  ;;  %s6929_s13 = sld [smem:[#allocation4 + %s6928_s9]] }
  0x75   : > { %v668_v1 = vld [vmem:[%s13796_s5] sm:$0xff]  ;;  %v669_v7 = vld [vmem:[%s13796_s5 + $0x8] sm:$0xff]  ;;  %v404_v11 = vld [vmem:[%s13794_s3 + $0x90] sm:$0xff]  ;;  %s7028_s14 = sld [smem:[#allocation4 + %s7027_s10]] }
  0x76   : > { %9177 = vmatpush3.bf16.msra.mxu0 %v9176_v40  ;;  %9180 = vmatpush3.bf16.msra.mxu1 %v9179_v51  ;;  %v402_v3 = vld [vmem:[%s13794_s3 + $0x80] sm:$0xff]  ;;  %v405_v12 = vld [vmem:[%s13794_s3 + $0x98] sm:$0xff]  ;;  %v673_v20 = vld [vmem:[%s13796_s5 + $0x28] sm:$0xff]  ;;  %s7127_s0 = sld [smem:[#allocation4 + %s7126_s11]] }
  0x77   : > { %9184 = vmatprep.subr.bf16.mxu0 %v9809_v36  ;;  %9181 = vmatprep.subr.bf16.mxu1 %v9809_v36  ;;  %v10418_v2 = vstv %s701_s8  ;;  %v9198_v10 = vpack.c.bf16 %v403_v4, %v402_v3  ;;  %v671_v15 = vld [vmem:[%s13796_s5 + $0x18] sm:$0xff]  ;;  %v672_v16 = vld [vmem:[%s13796_s5 + $0x20] sm:$0xff]  ;;  %v9202_v17 = vpack.c.bf16 %v405_v12, %v404_v11  ;;  %v674_v21 = vld [vmem:[%s13796_s5 + $0x30] sm:$0xff]  ;;  %s6894_s15 = sld [smem:[#allocation4 + %s6893_s12]] }
  0x78   : > { %v703_v6 = vmul.f32 %v10418_v2, %v668_v1  ;;  %v704_v13 = vmul.f32 %v10418_v2, %v669_v7  ;;  %v705_v14 = vmul.f32 %v10418_v2, %v670_v9  ;;  %v706_v18 = vmul.f32 %v10418_v2, %v671_v15  ;;  %v675_v24 = vld [vmem:[%s13796_s5 + $0x38] sm:$0xff]  ;;  %v676_v25 = vld [vmem:[%s13796_s5 + $0x40] sm:$0xff]  ;;  %v677_v28 = vld [vmem:[%s13796_s5 + $0x48] sm:$0xff] }
  0x79   : > { %8396 = vmatmul.mubr.msk.f32.vlgmr.msra.gmra.mrb[0].mxu0 %vm435_vm2, %v434_v43  ;;  %v707_v19 = vmul.f32 %v10418_v2, %v672_v16  ;;  %v708_v22 = vmul.f32 %v10418_v2, %v673_v20  ;;  %v709_v23 = vmul.f32 %v10418_v2, %v674_v21  ;;  %v710_v26 = vmul.f32 %v10418_v2, %v675_v24  ;;  %v678_v29 = vld [vmem:[%s13796_s5 + $0x50] sm:$0xff]  ;;  %v679_v32 = vld [vmem:[%s13796_s5 + $0x58] sm:$0xff]  ;;  %v680_v33 = vld [vmem:[%s13796_s5 + $0x60] sm:$0xff] }
  0x7a   : > { %9186 = vmatpush3.bf16.msra.mxu0 %v9185_v44  ;;  %8417 = vmatprep.mubr.msk.f32.mxu0 %vm9810_vm1, %v9811_v39  ;;  %v711_v27 = vmul.f32 %v10418_v2, %v676_v25  ;;  %v712_v30 = vmul.f32 %v10418_v2, %v677_v28  ;;  %v713_v31 = vmul.f32 %v10418_v2, %v678_v29  ;;  %v682_v37 = vld [vmem:[%s13796_s5 + $0x70] sm:$0xff]  ;;  %v683_v40 = vld [vmem:[%s13796_s5 + $0x78] sm:$0xff]  ;;  %v684_v41 = vld [vmem:[%s13796_s5 + $0x80] sm:$0xff] }
  0x7b   : > { %9187 = vmatprep.subr.bf16.mxu0 %v9809_v36  ;;  %9183 = vmatpush3.bf16.msra.mxu1 %v9182_v54  ;;  %v714_v34 = vmul.f32 %v10418_v2, %v679_v32  ;;  %v715_v35 = vmul.f32 %v10418_v2, %v680_v33  ;;  %v681_v36 = vld [vmem:[%s13796_s5 + $0x68] sm:$0xff]  ;;  %v717_v39 = vmul.f32 %v10418_v2, %v682_v37  ;;  %v686_v45 = vld [vmem:[%s13796_s5 + $0x90] sm:$0xff]  ;;  %v688_v49 = vld [vmem:[%s13796_s5 + $0xa0] sm:$0xff] }
  0x7c   : > { %8420 = vmatprep.subr.msk.mxu1 %vm836_vm3, %v396_v55  ;;  %v716_v38 = vmul.f32 %v10418_v2, %v681_v36  ;;  %v718_v42 = vmul.f32 %v10418_v2, %v683_v40  ;;  %v719_v43 = vmul.f32 %v10418_v2, %v684_v41  ;;  %v685_v44 = vld [vmem:[%s13796_s5 + $0x88] sm:$0xff]  ;;  %v723_v51 = vmul.f32 %v10418_v2, %v688_v49  ;;  %v690_v53 = vld [vmem:[%s13796_s5 + $0xb0] sm:$0xff]  ;;  %v695_v1 = vld [vmem:[%s13796_s5 + $0xd8] sm:$0xff] }
  0x7d   : > { %v720_v46 = vmul.f32 %v10418_v2, %v685_v44  ;;  %v689_v52 = vld [vmem:[%s13796_s5 + $0xa8] sm:$0xff]  ;;  %v696_v3 = vld [vmem:[%s13796_s5 + $0xe0] sm:$0xff]  ;;  %v730_v4 = vmul.f32 %v10418_v2, %v695_v1  ;;  %v698_v7 = vld [vmem:[%s13796_s5 + $0xf0] sm:$0xff] }
  0x7e   : > { %9189 = vmatpush3.bf16.msra.mxu0 %v9188_v47  ;;  %v721_v47 = vmul.f32 %v10418_v2, %v686_v45  ;;  %v724_v54 = vmul.f32 %v10418_v2, %v689_v52  ;;  %v733_v9 = vmul.f32 %v10418_v2, %v698_v7  ;;  %v7354_v11 = vld [vmem:[%s13794_s3 + $0x168] ss:$0 sm:$0xff]  ;;  %v400_v16 = vld [vmem:[%s13794_s3 + $0x70] sm:$0xff]  ;;  %v395_v21 = vld [vmem:[%s13794_s3 + $0x16a] sm:$0x1] }
  0x81   : > { %8418 = vmatmul.mubr.msk.f32.vlgmr.msra.gmra.mrb[2].mxu0 %vm435_vm2, %v589_v48  ;;  %v687_v48 = vld [vmem:[%s13796_s5 + $0x98] sm:$0xff] }
  0x82   : > { %v722_v50 = vmul.f32 %v10418_v2, %v687_v48 }
 0x14c   : > { %v505_v57 = vpop.f32.mrb[0].mxu0 }
 0x14d   : > { %v506_v58 = vadd.f32 %v505_v57, %v390_v56  ;;  %v8397_v59 = vpop.f32.mrb[1].mxu0  ;;  %v691_v56 = vld [vmem:[%s13796_s5 + $0xb8] sm:$0xff]  ;;  %v692_v57 = vld [vmem:[%s13796_s5 + $0xc0] sm:$0xff] }
 0x14e   : > { %v727_v59 = vmul.f32 %v10418_v2, %v692_v57 }
 0x14f   : > { %v7352_v60 = vmul.f32 -1.442695, %v506_v58 }
 0x151   : > { %9267 = vpow2.f32 %v7352_v60  ;;  %v693_v60 = vld [vmem:[%s13796_s5 + $0xc8] sm:$0xff] }
 0x154   : > { %v10409_v61 = vpop.f32.mrb[2].mxu0 }
 0x155   : > { %v8419_v62 = vpop.f32.mrb[3].mxu0 }
 0x156   : > { %v694_v62 = vld [vmem:[%s13796_s5 + $0xd0] sm:$0xff] }
 0x15b   : > { %v9268_v63 = vpop.eup %9267 }
 0x15c   : > { %v512_v0 = vadd.f32 1.0, %v9268_v63  ;;  %v728_v63 = vmul.f32 %v10418_v2, %v693_v60 }
 0x15e   : > { %9269 = vrcp.f32 %v512_v0  ;;  %v729_v0 = vmul.f32 %v10418_v2, %v694_v62 }
 0x168   : > { %v9270_v5 = vpop.eup %9269 }
 0x169   : > { %v515_v8 = vmul.f32 %v9270_v5, %v506_v58  ;;  %v726_v58 = vmul.f32 %v10418_v2, %v691_v56  ;;  %v731_v5 = vmul.f32 %v10418_v2, %v696_v3 }
 0x16b   : > { %8407 = vmatmul.mubr.msk.f32.vlgmr.msra.gmra.mrb[0].mxu1 %vm435_vm2, %v515_v8 }
 0x16c   : > { %8421 = vmatpush3.msk.msra.mxu1 %vm836_vm3, %v396_v55  ;;  %8422 = vmatprep.mubr.msk.f32.mxu1 %vm739_vm4, %v703_v6  ;;  %v725_v55 = vmul.f32 %v10418_v2, %v690_v53  ;;  %v697_v6 = vld [vmem:[%s13796_s5 + $0xe8] sm:$0xff] }
 0x16d   : > { %9199 = vmatprep.subr.bf16.mxu1 %v9198_v10  ;;  %v732_v8 = vmul.f32 %v10418_v2, %v697_v6 }
 0x16f   : > { %8423 = vmatmul.mubr.msk.f32.vlgmr.msra.gmra.mrb[2].mxu1 %vm739_vm4, %v704_v13  ;;  %v665_v13 = vadd.f32 %v7354_v11, %v10409_v61  ;;  %v399_v61 = vld [vmem:[%s13794_s3 + $0x68] sm:$0xff] }
 0x170   : > { %8425 = vmatprep.mubr.msk.f32.mxu1 %vm739_vm4, %v705_v14  ;;  %9201 = vmatpush3.bf16.msra.mxu1 %v9198_v10  ;;  %v699_v10 = vld [vmem:[%s13796_s5 + $0xf8] sm:$0xff]  ;;  %v10599_v14 = vld [vmem:[%s13793_s2 + $0x8] sm:$0xff] }
 0x171   : > { %9203 = vmatprep.subr.bf16.mxu1 %v9202_v17  ;;  %v734_v12 = vmul.f32 %v10418_v2, %v699_v10  ;;  %v398_v2 = vld [vmem:[%s13794_s3 + $0x60] sm:$0xff] }
 0x172   : > { %v9190_v15 = vpack.c.bf16 %v399_v61, %v398_v2 }
 0x173   : > { %8426 = vmatmul.mubr.msk.f32.gmra.mrb[4].mxu1 %vm739_vm4, %v706_v18 }
 0x174   : > { %8428 = vmatprep.mubr.msk.f32.mxu1 %vm739_vm4, %v707_v19  ;;  %9205 = vmatpush3.bf16.msra.mxu1 %v9202_v17  ;;  %v401_v17 = vld [vmem:[%s13794_s3 + $0x78] sm:$0xff]  ;;  %v1065_v19 = vlaneseq }
 0x175   : > { %9191 = vmatprep.subr.bf16.mxu0 %v9190_v15  ;;  %v9194_v18 = vpack.c.bf16 %v401_v17, %v400_v16 }
 0x176   : > { %9193 = vmatpush3.bf16.msra.mxu0 %v9190_v15  ;;  %v1066_v20 = vshrl.u32 %v1065_v19, 7 }
 0x177   : > { %8429 = vmatmul.mubr.msk.f32.gmra.mrb[6].mxu1 %vm739_vm4, %v708_v22  ;;  %9195 = vmatprep.subr.bf16.mxu0 %v9194_v18 }
 0x178   : > { %8431 = vmatprep.mubr.msk.f32.mxu1 %vm739_vm4, %v709_v23  ;;  %v1067_v24 = vsub.s32 0, %v1066_v20 }
 0x17a   : > { %9197 = vmatpush3.bf16.msra.mxu0 %v9194_v18 }
 0x17b   : > { %8432 = vmatmul.mubr.msk.f32.gmra.mrb[8].mxu1 %vm739_vm4, %v710_v26  ;;  %v10622_v26 = vld [vmem:[%s13794_s3 + $0x16b] ss:$0 sm:$0xff] }
 0x17c   : > { %8434 = vmatprep.mubr.msk.f32.mxu1 %vm739_vm4, %v711_v27 }
 0x17f   : > { %8435 = vmatmul.mubr.msk.f32.gmra.mrb[10].mxu1 %vm739_vm4, %v712_v30 }
 0x180   : > { %8437 = vmatprep.mubr.msk.f32.mxu1 %vm739_vm4, %v713_v31 }
 0x183   : > { %8438 = vmatmul.mubr.msk.f32.gmra.mrb[12].mxu1 %vm739_vm4, %v714_v34 }
 0x184   : > { %8440 = vmatprep.mubr.msk.f32.mxu1 %vm739_vm4, %v715_v35 }
 0x187   : > { %8441 = vmatmul.mubr.msk.f32.gmra.mrb[14].mxu1 %vm739_vm4, %v716_v38 }
 0x188   : > { %8443 = vmatprep.mubr.msk.f32.mxu1 %vm739_vm4, %v717_v39 }
 0x18b   : > { %8444 = vmatmul.mubr.msk.f32.gmra.mrb[16].mxu1 %vm739_vm4, %v718_v42 }
 0x18c   : > { %8446 = vmatprep.mubr.msk.f32.mxu1 %vm739_vm4, %v719_v43 }
 0x18f   : > { %8447 = vmatmul.mubr.msk.f32.gmra.mrb[18].mxu1 %vm739_vm4, %v720_v46 }
 0x190   : > { %8449 = vmatprep.mubr.msk.f32.mxu1 %vm739_vm4, %v721_v47 }
 0x193   : > { %8450 = vmatmul.mubr.msk.f32.gmra.mrb[20].mxu1 %vm739_vm4, %v722_v50 }
 0x194   : > { %8452 = vmatprep.mubr.msk.f32.mxu1 %vm739_vm4, %v723_v51 }
 0x197   : > { %8453 = vmatmul.mubr.msk.f32.gmra.mrb[22].mxu1 %vm739_vm4, %v724_v54 }
 0x198   : > { %8455 = vmatprep.mubr.msk.f32.mxu1 %vm739_vm4, %v725_v55 }
 0x19b   : > { %8456 = vmatmul.mubr.msk.f32.gmra.mrb[24].mxu1 %vm739_vm4, %v726_v58 }
 0x19c   : > { %8458 = vmatprep.mubr.msk.f32.mxu1 %vm739_vm4, %v727_v59 }
 0x19f   : > { %8459 = vmatmul.mubr.msk.f32.gmra.mrb[26].mxu1 %vm739_vm4, %v728_v63 }
 0x1a0   : > { %8461 = vmatprep.mubr.msk.f32.mxu1 %vm739_vm4, %v729_v0 }
 0x1a3   : > { %8462 = vmatmul.mubr.msk.f32.gmra.mrb[28].mxu1 %vm739_vm4, %v730_v4 }
 0x1a4   : > { %8464 = vmatprep.mubr.msk.f32.mxu1 %vm739_vm4, %v731_v5 }
 0x1a7   : > { %8465 = vmatmul.mubr.msk.f32.gmra.mrb[30].mxu1 %vm739_vm4, %v732_v8 }
 0x1a8   : > { %8467 = vmatprep.mubr.msk.f32.mxu1 %vm739_vm4, %v733_v9 }
 0x1ab   : > { %8468 = vmatmul.mubr.msk.f32.gmra.mrb[32].mxu1 %vm739_vm4, %v734_v12 }
 0x1ac   : > { %8534 = vmatprep.mubr.msk.f32.mxu1 %vm435_vm2, %v665_v13 }
 0x1af   : > { %8535 = vmatmul.mubr.msk.f32.vlgmr.msra.gmra.mrb[34].mxu1 %vm435_vm2, %v10599_v14 }
 0x1b0   : > { %8545 = vmatprep.mubr.msk.f32.mxu1 %vm435_vm2, %v665_v13 }
 0x23e   : > { %v585_v22 = vpop.f32.mrb[0].mxu1 }
 0x23f   : > { %v586_v23 = vadd.f32 %v585_v22, %v395_v21  ;;  %v8408_v25 = vpop.f32.mrb[1].mxu1 }
 0x241   : > { %v10624_v28 = vrot.slane %v586_v23, %v1067_v24 }
 0x242   : > { %v8424_v27 = vpop.f32.mrb[2].mxu1 }
 0x243   : > { %v912_v29 = vadd.f32 %v8424_v27, %v10622_v26  ;;  %v906_v30 = vpop.f32.mrb[3].mxu1 }
 0x244   : > { %v907_v31 = vadd.f32 %v10622_v26, %v906_v30 }
 0x245   : > { %v10629_v32 = vadd.f32 %v10624_v28, %v912_v29 }
 0x246   : > { %v10632_v33 = vadd.f32 %v10624_v28, %v907_v31  ;;  %v8427_v34 = vpop.f32.mrb[4].mxu1 }
 0x247   : > { %13924 = vst [vmem:[#allocation6_spill] sm:$0xff] %v10629_v32  ;;  %v922_v35 = vadd.f32 %v8427_v34, %v10622_v26  ;;  %v916_v36 = vpop.f32.mrb[5].mxu1 }
 0x248   : > { %13925 = vst [vmem:[#allocation7_spill] sm:$0xff] %v10632_v33  ;;  %v917_v37 = vadd.f32 %v10622_v26, %v916_v36  ;;  %8478 = vmatprep.mubr.msk.f32.mxu0 %vm435_vm2, %v10632_v33 }
 0x249   : > { %v10639_v38 = vadd.f32 %v10624_v28, %v922_v35  ;;  %8479 = vmatmul.mubr.msk.f32.vlgmr.msra.gmra.mrb[4].mxu0 %vm435_vm2, %v10629_v32 }
 0x24a   : > { %v10644_v39 = vadd.f32 %v10624_v28, %v917_v37  ;;  %v8430_v40 = vpop.f32.mrb[6].mxu1 }
 0x24b   : > { %13926 = vst [vmem:[#allocation8_spill] sm:$0xff] %v10639_v38  ;;  %v932_v41 = vadd.f32 %v8430_v40, %v10622_v26  ;;  %v926_v42 = vpop.f32.mrb[7].mxu1 }
 0x24c   : > { %13927 = vst [vmem:[#allocation9_spill] sm:$0xff] %v10644_v39  ;;  %v927_v43 = vadd.f32 %v10622_v26, %v926_v42  ;;  %8481 = vmatprep.mubr.msk.f32.mxu0 %vm435_vm2, %v10644_v39 }
 0x24d   : > { %v10651_v44 = vadd.f32 %v10624_v28, %v932_v41  ;;  %8482 = vmatmul.mubr.msk.f32.gmra.mrb[6].mxu0 %vm435_vm2, %v10639_v38 }
 0x24e   : > { %v10656_v45 = vadd.f32 %v10624_v28, %v927_v43  ;;  %v8433_v46 = vpop.f32.mrb[8].mxu1 }
 0x24f   : > { %13928 = vst [vmem:[#allocation10_spill] sm:$0xff] %v10651_v44  ;;  %v942_v47 = vadd.f32 %v8433_v46, %v10622_v26  ;;  %v936_v48 = vpop.f32.mrb[9].mxu1 }
 0x250   : > { %13929 = vst [vmem:[#allocation11_spill] sm:$0xff] %v10656_v45  ;;  %v937_v49 = vadd.f32 %v10622_v26, %v936_v48  ;;  %8484 = vmatprep.mubr.msk.f32.mxu0 %vm435_vm2, %v10656_v45 }
 0x251   : > { %v10663_v50 = vadd.f32 %v10624_v28, %v942_v47  ;;  %8485 = vmatmul.mubr.msk.f32.gmra.mrb[8].mxu0 %vm435_vm2, %v10651_v44 }
 0x252   : > { %v10668_v51 = vadd.f32 %v10624_v28, %v937_v49  ;;  %v8436_v52 = vpop.f32.mrb[10].mxu1 }
 0x253   : > { %13930 = vst [vmem:[#allocation12_spill] sm:$0xff] %v10663_v50  ;;  %v952_v53 = vadd.f32 %v8436_v52, %v10622_v26  ;;  %v946_v54 = vpop.f32.mrb[11].mxu1 }
 0x254   : > { %13931 = vst [vmem:[#allocation13_spill] sm:$0xff] %v10668_v51  ;;  %v947_v55 = vadd.f32 %v10622_v26, %v946_v54  ;;  %8487 = vmatprep.mubr.msk.f32.mxu0 %vm435_vm2, %v10668_v51 }
 0x255   : > { %v10675_v56 = vadd.f32 %v10624_v28, %v952_v53  ;;  %8488 = vmatmul.mubr.msk.f32.gmra.mrb[10].mxu0 %vm435_vm2, %v10663_v50 }
 0x256   : > { %v10680_v57 = vadd.f32 %v10624_v28, %v947_v55  ;;  %v8439_v58 = vpop.f32.mrb[12].mxu1 }
 0x257   : > { %13932 = vst [vmem:[#allocation14_spill] sm:$0xff] %v10675_v56  ;;  %v962_v59 = vadd.f32 %v8439_v58, %v10622_v26  ;;  %v956_v60 = vpop.f32.mrb[13].mxu1 }
 0x258   : > { %13933 = vst [vmem:[#allocation15_spill] sm:$0xff] %v10680_v57  ;;  %v957_v62 = vadd.f32 %v10622_v26, %v956_v60  ;;  %8490 = vmatprep.mubr.msk.f32.mxu0 %vm435_vm2, %v10680_v57 }
 0x259   : > { %v10687_v63 = vadd.f32 %v10624_v28, %v962_v59  ;;  %8491 = vmatmul.mubr.msk.f32.gmra.mrb[12].mxu0 %vm435_vm2, %v10675_v56 }
 0x25a   : > { %v10692_v0 = vadd.f32 %v10624_v28, %v957_v62  ;;  %v8442_v1 = vpop.f32.mrb[14].mxu1 }
 0x25b   : > { %13934 = vst [vmem:[#allocation16_spill] sm:$0xff] %v10687_v63  ;;  %v972_v3 = vadd.f32 %v8442_v1, %v10622_v26  ;;  %v966_v4 = vpop.f32.mrb[15].mxu1 }
 0x25c   : > { %13935 = vst [vmem:[#allocation17_spill] sm:$0xff] %v10692_v0  ;;  %v967_v5 = vadd.f32 %v10622_v26, %v966_v4  ;;  %8493 = vmatprep.mubr.msk.f32.mxu0 %vm435_vm2, %v10692_v0 }
 0x25d   : > { %v10699_v6 = vadd.f32 %v10624_v28, %v972_v3  ;;  %8494 = vmatmul.mubr.msk.f32.gmra.mrb[14].mxu0 %vm435_vm2, %v10687_v63 }
 0x25e   : > { %v10704_v7 = vadd.f32 %v10624_v28, %v967_v5  ;;  %v8445_v8 = vpop.f32.mrb[16].mxu1 }
 0x25f   : > { %13936 = vst [vmem:[#allocation18_spill] sm:$0xff] %v10699_v6  ;;  %v982_v9 = vadd.f32 %v8445_v8, %v10622_v26  ;;  %v976_v10 = vpop.f32.mrb[17].mxu1 }
 0x260   : > { %13937 = vst [vmem:[#allocation19_spill] sm:$0xff] %v10704_v7  ;;  %v977_v11 = vadd.f32 %v10622_v26, %v976_v10  ;;  %8496 = vmatprep.mubr.msk.f32.mxu0 %vm435_vm2, %v10704_v7 }
 0x261   : > { %v10711_v12 = vadd.f32 %v10624_v28, %v982_v9  ;;  %8497 = vmatmul.mubr.msk.f32.gmra.mrb[16].mxu0 %vm435_vm2, %v10699_v6 }
 0x262   : > { %v10716_v13 = vadd.f32 %v10624_v28, %v977_v11  ;;  %v8448_v2 = vpop.f32.mrb[18].mxu1 }
 0x263   : > { %13938 = vst [vmem:[#allocation20_spill] sm:$0xff] %v10711_v12  ;;  %v992_v61 = vadd.f32 %v8448_v2, %v10622_v26  ;;  %v986_v15 = vpop.f32.mrb[19].mxu1 }
 0x264   : > { %13939 = vst [vmem:[#allocation21_spill] sm:$0xff] %v10716_v13  ;;  %v987_v16 = vadd.f32 %v10622_v26, %v986_v15  ;;  %8499 = vmatprep.mubr.msk.f32.mxu0 %vm435_vm2, %v10716_v13 }
 0x265   : > { %v10723_v17 = vadd.f32 %v10624_v28, %v992_v61  ;;  %8500 = vmatmul.mubr.msk.f32.gmra.mrb[18].mxu0 %vm435_vm2, %v10711_v12 }
 0x266   : > { %v10728_v18 = vadd.f32 %v10624_v28, %v987_v16  ;;  %v8451_v19 = vpop.f32.mrb[20].mxu1 }
 0x267   : > { %13940 = vst [vmem:[#allocation22_spill] sm:$0xff] %v10723_v17  ;;  %v1002_v20 = vadd.f32 %v8451_v19, %v10622_v26  ;;  %v996_v21 = vpop.f32.mrb[21].mxu1 }
 0x268   : > { %13941 = vst [vmem:[#allocation23_spill] sm:$0xff] %v10728_v18  ;;  %v997_v22 = vadd.f32 %v10622_v26, %v996_v21  ;;  %8502 = vmatprep.mubr.msk.f32.mxu0 %vm435_vm2, %v10728_v18 }
 0x269   : > { %v10735_v23 = vadd.f32 %v10624_v28, %v1002_v20  ;;  %8503 = vmatmul.mubr.msk.f32.gmra.mrb[20].mxu0 %vm435_vm2, %v10723_v17 }
 0x26a   : > { %v10740_v24 = vadd.f32 %v10624_v28, %v997_v22  ;;  %v8454_v25 = vpop.f32.mrb[22].mxu1 }
 0x26b   : > { %13942 = vst [vmem:[#allocation24_spill] sm:$0xff] %v10735_v23  ;;  %v1012_v27 = vadd.f32 %v8454_v25, %v10622_v26  ;;  %v1006_v29 = vpop.f32.mrb[23].mxu1 }
 0x26c   : > { %13943 = vst [vmem:[#allocation25_spill] sm:$0xff] %v10740_v24  ;;  %v1007_v30 = vadd.f32 %v10622_v26, %v1006_v29  ;;  %8505 = vmatprep.mubr.msk.f32.mxu0 %vm435_vm2, %v10740_v24 }
 0x26d   : > { %v10747_v31 = vadd.f32 %v10624_v28, %v1012_v27  ;;  %8506 = vmatmul.mubr.msk.f32.gmra.mrb[22].mxu0 %vm435_vm2, %v10735_v23 }
 0x26e   : > { %v10752_v34 = vadd.f32 %v10624_v28, %v1007_v30  ;;  %v8457_v35 = vpop.f32.mrb[24].mxu1 }
 0x26f   : > { %13944 = vst [vmem:[#allocation26_spill] sm:$0xff] %v10747_v31  ;;  %v1022_v36 = vadd.f32 %v8457_v35, %v10622_v26  ;;  %v1016_v37 = vpop.f32.mrb[25].mxu1 }
 0x270   : > { %13945 = vst [vmem:[#allocation27_spill] sm:$0xff] %v10752_v34  ;;  %v1017_v40 = vadd.f32 %v10622_v26, %v1016_v37  ;;  %8508 = vmatprep.mubr.msk.f32.mxu0 %vm435_vm2, %v10752_v34 }
 0x271   : > { %v10759_v41 = vadd.f32 %v10624_v28, %v1022_v36  ;;  %8509 = vmatmul.mubr.msk.f32.gmra.mrb[24].mxu0 %vm435_vm2, %v10747_v31 }
 0x272   : > { %v10764_v42 = vadd.f32 %v10624_v28, %v1017_v40  ;;  %v8460_v43 = vpop.f32.mrb[26].mxu1 }
 0x273   : > { %13946 = vst [vmem:[#allocation28_spill] sm:$0xff] %v10759_v41  ;;  %v1032_v46 = vadd.f32 %v8460_v43, %v10622_v26  ;;  %v1026_v47 = vpop.f32.mrb[27].mxu1 }
 0x274   : > { %13947 = vst [vmem:[#allocation29_spill] sm:$0xff] %v10764_v42  ;;  %v1027_v48 = vadd.f32 %v10622_v26, %v1026_v47  ;;  %8511 = vmatprep.mubr.msk.f32.mxu0 %vm435_vm2, %v10764_v42 }
 0x275   : > { %v10771_v49 = vadd.f32 %v10624_v28, %v1032_v46  ;;  %8512 = vmatmul.mubr.msk.f32.gmra.mrb[26].mxu0 %vm435_vm2, %v10759_v41 }
 0x276   : > { %v10776_v52 = vadd.f32 %v10624_v28, %v1027_v48  ;;  %v8463_v53 = vpop.f32.mrb[28].mxu1 }
 0x277   : > { %13948 = vst [vmem:[#allocation30_spill] sm:$0xff] %v10771_v49  ;;  %v1042_v54 = vadd.f32 %v8463_v53, %v10622_v26  ;;  %v1036_v55 = vpop.f32.mrb[29].mxu1 }
 0x278   : > { %13949 = vst [vmem:[#allocation31_spill] sm:$0xff] %v10776_v52  ;;  %v1037_v58 = vadd.f32 %v10622_v26, %v1036_v55  ;;  %8514 = vmatprep.mubr.msk.f32.mxu0 %vm435_vm2, %v10776_v52 }
 0x279   : > { %v10783_v59 = vadd.f32 %v10624_v28, %v1042_v54  ;;  %8515 = vmatmul.mubr.msk.f32.gmra.mrb[28].mxu0 %vm435_vm2, %v10771_v49 }
 0x27a   : > { %v10788_v60 = vadd.f32 %v10624_v28, %v1037_v58  ;;  %v8466_v62 = vpop.f32.mrb[30].mxu1 }
 0x27b   : > { %13950 = vst [vmem:[#allocation32_spill] sm:$0xff] %v10783_v59  ;;  %v1052_v1 = vadd.f32 %v8466_v62, %v10622_v26  ;;  %v1046_v3 = vpop.f32.mrb[31].mxu1 }
 0x27c   : > { %13951 = vst [vmem:[#allocation33_spill] sm:$0xff] %v10788_v60  ;;  %v1047_v4 = vadd.f32 %v10622_v26, %v1046_v3  ;;  %8517 = vmatprep.mubr.msk.f32.mxu0 %vm435_vm2, %v10788_v60 }
 0x27d   : > { %v10795_v5 = vadd.f32 %v10624_v28, %v1052_v1  ;;  %8518 = vmatmul.mubr.msk.f32.gmra.mrb[30].mxu0 %vm435_vm2, %v10783_v59 }
 0x27e   : > { %v10800_v8 = vadd.f32 %v10624_v28, %v1047_v4  ;;  %v8469_v9 = vpop.f32.mrb[32].mxu1 }
 0x27f   : > { %13952 = vst [vmem:[#allocation34_spill] sm:$0xff] %v10795_v5  ;;  %v1062_v10 = vadd.f32 %v8469_v9, %v10622_v26  ;;  %v1056_v11 = vpop.f32.mrb[33].mxu1 }
 0x280   : > { %13953 = vst [vmem:[#allocation35_spill] sm:$0xff] %v10800_v8  ;;  %v1057_v2 = vadd.f32 %v10622_v26, %v1056_v11  ;;  %8520 = vmatprep.mubr.msk.f32.mxu0 %vm435_vm2, %v10800_v8 }
 0x281   : > { %v10807_v61 = vadd.f32 %v10624_v28, %v1062_v10  ;;  %8521 = vmatmul.mubr.msk.f32.gmra.mrb[32].mxu0 %vm435_vm2, %v10795_v5 }
 0x282   : > { %v10812_v15 = vadd.f32 %v10624_v28, %v1057_v2  ;;  %v8536_v16 = vpop.f32.mrb[34].mxu1 }
 0x283   : > { %13954 = vst [vmem:[#allocation36_spill] sm:$0xff] %v10807_v61  ;;  %v1494_v19 = vpop.f32.mrb[35].mxu1 }
 0x284   : > { %13955 = vst [vmem:[#allocation37_spill] sm:$0xff] %v10812_v15  ;;  %8523 = vmatprep.mubr.msk.f32.mxu0 %vm435_vm2, %v10812_v15  ;;  %8548 = vmatprep.subr.msk.mxu0 %vm435_vm2, %v1494_v19 }
 0x285   : > { %8524 = vmatmul.mubr.msk.f32.gmra.mrb[34].mxu0 %vm435_vm2, %v10807_v61 }
 0x286   : > { %8549 = vmatpush3.xpose.msk.msra.mxu0 %vm435_vm2, %v1494_v19 }
 0x287   : > { %8648 = vmatprep.subr.msk.mxu0 %vm435_vm2, %v8536_v16 }
 0x31c   : > { %v10821_v26 = vpop.f32.mrb[4].mxu0 }
 0x31d   : > { %v10823_v20 = vpop.f32.mrb[5].mxu0 }
 0x31e   : > { %8550 = vmatprep.mubr.msk.f32.mxu0 %vm435_vm2, %v10823_v20 }
 0x31f   : > { %8551 = vmatmul.mubr.msk.f32.vlgmr.msra.gmra.mrb[36].mxu0 %vm435_vm2, %v10821_v26 }
 0x320   : > { %8649 = vmatpush3.xpose.msk.msra.mxu0 %vm435_vm2, %v8536_v16  ;;  %v10830_v28 = vpop.f32.mrb[6].mxu0 }
 0x321   : > { %v1273_v21 = vpop.f32.mrb[7].mxu0 }
 0x322   : > { %8553 = vmatprep.mubr.msk.f32.mxu0 %vm435_vm2, %v1273_v21 }
 0x323   : > { %8554 = vmatmul.mubr.msk.f32.gmra.mrb[38].mxu0 %vm435_vm2, %v10830_v28 }
 0x324   : > { %v8486_v22 = vpop.f32.mrb[8].mxu0 }
 0x325   : > { %v1283_v25 = vpop.f32.mrb[9].mxu0 }
 0x326   : > { %8556 = vmatprep.mubr.msk.f32.mxu0 %vm435_vm2, %v1283_v25 }
 0x327   : > { %8557 = vmatmul.mubr.msk.f32.gmra.mrb[40].mxu0 %vm435_vm2, %v8486_v22 }
 0x328   : > { %v8489_v27 = vpop.f32.mrb[10].mxu0 }
 0x329   : > { %v1293_v29 = vpop.f32.mrb[11].mxu0 }
 0x32a   : > { %8559 = vmatprep.mubr.msk.f32.mxu0 %vm435_vm2, %v1293_v29 }
 0x32b   : > { %8560 = vmatmul.mubr.msk.f32.gmra.mrb[42].mxu0 %vm435_vm2, %v8489_v27 }
 0x32c   : > { %v8492_v30 = vpop.f32.mrb[12].mxu0 }
 0x32d   : > { %v1303_v35 = vpop.f32.mrb[13].mxu0 }
 0x32e   : > { %8562 = vmatprep.mubr.msk.f32.mxu0 %vm435_vm2, %v1303_v35 }
 0x32f   : > { %8563 = vmatmul.mubr.msk.f32.gmra.mrb[44].mxu0 %vm435_vm2, %v8492_v30 }
 0x330   : > { %v8495_v36 = vpop.f32.mrb[14].mxu0 }
 0x331   : > { %v1313_v37 = vpop.f32.mrb[15].mxu0 }
 0x332   : > { %8565 = vmatprep.mubr.msk.f32.mxu0 %vm435_vm2, %v1313_v37 }
 0x333   : > { %8566 = vmatmul.mubr.msk.f32.gmra.mrb[46].mxu0 %vm435_vm2, %v8495_v36 }
 0x334   : > { %v8498_v40 = vpop.f32.mrb[16].mxu0 }
 0x335   : > { %v1323_v43 = vpop.f32.mrb[17].mxu0 }
 0x336   : > { %8568 = vmatprep.mubr.msk.f32.mxu0 %vm435_vm2, %v1323_v43 }
 0x337   : > { %8569 = vmatmul.mubr.msk.f32.gmra.mrb[48].mxu0 %vm435_vm2, %v8498_v40 }
 0x338   : > { %v8501_v46 = vpop.f32.mrb[18].mxu0 }
 0x339   : > { %v1333_v47 = vpop.f32.mrb[19].mxu0 }
 0x33a   : > { %8571 = vmatprep.mubr.msk.f32.mxu0 %vm435_vm2, %v1333_v47 }
 0x33b   : > { %8572 = vmatmul.mubr.msk.f32.gmra.mrb[50].mxu0 %vm435_vm2, %v8501_v46 }
 0x33c   : > { %v8504_v48 = vpop.f32.mrb[20].mxu0 }
 0x33d   : > { %v1343_v53 = vpop.f32.mrb[21].mxu0 }
 0x33e   : > { %8574 = vmatprep.mubr.msk.f32.mxu0 %vm435_vm2, %v1343_v53 }
 0x33f   : > { %8575 = vmatmul.mubr.msk.f32.gmra.mrb[52].mxu0 %vm435_vm2, %v8504_v48 }
 0x340   : > { %v8507_v54 = vpop.f32.mrb[22].mxu0 }
 0x341   : > { %v1353_v55 = vpop.f32.mrb[23].mxu0 }
 0x342   : > { %8577 = vmatprep.mubr.msk.f32.mxu0 %vm435_vm2, %v1353_v55 }
 0x343   : > { %8578 = vmatmul.mubr.msk.f32.gmra.mrb[54].mxu0 %vm435_vm2, %v8507_v54 }
 0x344   : > { %v8510_v58 = vpop.f32.mrb[24].mxu0 }
 0x345   : > { %v1363_v62 = vpop.f32.mrb[25].mxu0 }
 0x346   : > { %8580 = vmatprep.mubr.msk.f32.mxu0 %vm435_vm2, %v1363_v62 }
 0x347   : > { %8581 = vmatmul.mubr.msk.f32.gmra.mrb[56].mxu0 %vm435_vm2, %v8510_v58 }
 0x348   : > { %v8513_v1 = vpop.f32.mrb[26].mxu0 }
 0x349   : > { %v1373_v3 = vpop.f32.mrb[27].mxu0 }
 0x34a   : > { %8583 = vmatprep.mubr.msk.f32.mxu0 %vm435_vm2, %v1373_v3 }
 0x34b   : > { %8584 = vmatmul.mubr.msk.f32.gmra.mrb[58].mxu0 %vm435_vm2, %v8513_v1 }
 0x34c   : > { %v8516_v4 = vpop.f32.mrb[28].mxu0 }
 0x34d   : > { %v1383_v9 = vpop.f32.mrb[29].mxu0 }
 0x34e   : > { %8586 = vmatprep.mubr.msk.f32.mxu0 %vm435_vm2, %v1383_v9 }
 0x34f   : > { %8587 = vmatmul.mubr.msk.f32.gmra.mrb[60].mxu0 %vm435_vm2, %v8516_v4 }
 0x350   : > { %v8519_v10 = vpop.f32.mrb[30].mxu0 }
 0x351   : > { %v1393_v11 = vpop.f32.mrb[31].mxu0 }
 0x352   : > { %8589 = vmatprep.mubr.msk.f32.mxu0 %vm435_vm2, %v1393_v11 }
 0x353   : > { %8590 = vmatmul.mubr.msk.f32.gmra.mrb[62].mxu0 %vm435_vm2, %v8519_v10 }
 0x354   : > { %v8522_v2 = vpop.f32.mrb[32].mxu0 }
 0x355   : > { %v1403_v16 = vpop.f32.mrb[33].mxu0 }
 0x356   : > { %8592 = vmatprep.mubr.msk.f32.mxu0 %vm435_vm2, %v1403_v16 }
 0x357   : > { %8593 = vmatmul.mubr.msk.f32.gmra.mrb[64].mxu0 %vm435_vm2, %v8522_v2 }
 0x358   : > { %v8525_v19 = vpop.f32.mrb[34].mxu0 }
 0x359   : > { %v1413_v15 = vpop.f32.mrb[35].mxu0 }
 0x35a   : > { %8595 = vmatprep.mubr.msk.f32.mxu0 %vm435_vm2, %v1413_v15 }
 0x35b   : > { %8596 = vmatmul.mubr.msk.f32.gmra.mrb[66].mxu0 %vm435_vm2, %v8525_v19 }
 0x35c   : > { %8650 = vmatprep.mubr.msk.f32.mxu0 %vm435_vm2, %v10823_v20  ;;  %v407_v20 = vld [vmem:[%s13794_s3 + $0xa8] sm:$0xff] }
 0x35f   : > { %8651 = vmatmul.mubr.msk.f32.vlgmr.msra.gmra.mrb[68].mxu0 %vm435_vm2, %v10821_v26  ;;  %v406_v26 = vld [vmem:[%s13794_s3 + $0xa0] sm:$0xff] }
 0x360   : > { %8653 = vmatprep.mubr.msk.f32.mxu0 %vm435_vm2, %v1273_v21  ;;  %v408_v21 = vld [vmem:[%s13794_s3 + $0xb0] sm:$0xff] }
 0x363   : > { %8654 = vmatmul.mubr.msk.f32.gmra.mrb[70].mxu0 %vm435_vm2, %v10830_v28  ;;  %v9206_v28 = vpack.c.bf16 %v407_v20, %v406_v26 }
 0x364   : > { %8656 = vmatprep.mubr.msk.f32.mxu0 %vm435_vm2, %v1283_v25 }
 0x365   : > { %9207 = vmatprep.subr.bf16.mxu1 %v9206_v28 }
 0x366   : > { %9209 = vmatpush3.bf16.msra.mxu1 %v9206_v28 }
 0x367   : > { %8657 = vmatmul.mubr.msk.f32.gmra.mrb[72].mxu0 %vm435_vm2, %v8486_v22 }
 0x368   : > { %8659 = vmatprep.mubr.msk.f32.mxu0 %vm435_vm2, %v1293_v29 }
 0x36b   : > { %8660 = vmatmul.mubr.msk.f32.gmra.mrb[74].mxu0 %vm435_vm2, %v8489_v27 }
 0x36c   : > { %8662 = vmatprep.mubr.msk.f32.mxu0 %vm435_vm2, %v1303_v35 }
 0x36f   : > { %8663 = vmatmul.mubr.msk.f32.gmra.mrb[76].mxu0 %vm435_vm2, %v8492_v30 }
 0x370   : > { %8665 = vmatprep.mubr.msk.f32.mxu0 %vm435_vm2, %v1313_v37 }
 0x373   : > { %8666 = vmatmul.mubr.msk.f32.gmra.mrb[78].mxu0 %vm435_vm2, %v8495_v36 }
 0x374   : > { %8668 = vmatprep.mubr.msk.f32.mxu0 %vm435_vm2, %v1323_v43 }
 0x377   : > { %8669 = vmatmul.mubr.msk.f32.gmra.mrb[80].mxu0 %vm435_vm2, %v8498_v40 }
 0x378   : > { %8671 = vmatprep.mubr.msk.f32.mxu0 %vm435_vm2, %v1333_v47 }
 0x37b   : > { %8672 = vmatmul.mubr.msk.f32.gmra.mrb[82].mxu0 %vm435_vm2, %v8501_v46 }
 0x37c   : > { %8674 = vmatprep.mubr.msk.f32.mxu0 %vm435_vm2, %v1343_v53 }
 0x37f   : > { %8675 = vmatmul.mubr.msk.f32.gmra.mrb[84].mxu0 %vm435_vm2, %v8504_v48 }
 0x380   : > { %8677 = vmatprep.mubr.msk.f32.mxu0 %vm435_vm2, %v1353_v55 }
 0x383   : > { %8678 = vmatmul.mubr.msk.f32.gmra.mrb[86].mxu0 %vm435_vm2, %v8507_v54 }
 0x384   : > { %8680 = vmatprep.mubr.msk.f32.mxu0 %vm435_vm2, %v1363_v62 }
 0x387   : > { %8681 = vmatmul.mubr.msk.f32.gmra.mrb[88].mxu0 %vm435_vm2, %v8510_v58 }
 0x388   : > { %8683 = vmatprep.mubr.msk.f32.mxu0 %vm435_vm2, %v1373_v3 }
 0x38b   : > { %8684 = vmatmul.mubr.msk.f32.gmra.mrb[90].mxu0 %vm435_vm2, %v8513_v1 }
 0x38c   : > { %8686 = vmatprep.mubr.msk.f32.mxu0 %vm435_vm2, %v1383_v9 }
 0x38f   : > { %8687 = vmatmul.mubr.msk.f32.gmra.mrb[92].mxu0 %vm435_vm2, %v8516_v4 }
 0x390   : > { %8689 = vmatprep.mubr.msk.f32.mxu0 %vm435_vm2, %v1393_v11 }
 0x393   : > { %8690 = vmatmul.mubr.msk.f32.gmra.mrb[94].mxu0 %vm435_vm2, %v8519_v10 }
 0x394   : > { %8692 = vmatprep.mubr.msk.f32.mxu0 %vm435_vm2, %v1403_v16 }
 0x397   : > { %8693 = vmatmul.mubr.msk.f32.gmra.mrb[96].mxu0 %vm435_vm2, %v8522_v2 }
 0x398   : > { %8695 = vmatprep.mubr.msk.f32.mxu0 %vm435_vm2, %v1413_v15  ;;  %v409_v15 = vld [vmem:[%s13794_s3 + $0xb8] sm:$0xff] }
 0x399   : > { %v9210_v22 = vpack.c.bf16 %v409_v15, %v408_v21 }
 0x39b   : > { %8696 = vmatmul.mubr.msk.f32.gmra.mrb[98].mxu0 %vm435_vm2, %v8525_v19  ;;  %9211 = vmatprep.subr.bf16.mxu1 %v9210_v22 }
 0x39c   : > { %9213 = vmatpush3.bf16.msra.mxu1 %v9210_v22 }
 0x39f   : > { %8546 = vmatmul.mubr.msk.f32.vlgmr.msra.gmra.mrb[36].mxu1 %vm435_vm2, %v10599_v14 }
 0x3f2   : > { %v8552_v25 = vpop.f32.mrb[36].mxu0 }
 0x3f3   : > { %v10912_v27 = vmul.f32 0.17677669, %v8552_v25  ;;  %v1743_v29 = vpop.f32.mrb[37].mxu0 }
 0x3f4   : > { %v10914_v30 = vmul.f32 0.17677669, %v1743_v29 }
 0x3f5   : > { %v1938_v35 = vsel %vm1934_vm5, %v10912_v27, -inf }
 0x3f6   : > { %1939 = vmax.xlane.f32.xlu0 %v1938_v35  ;;  %v8555_v36 = vpop.f32.mrb[38].mxu0  ;;  %v1935_v14 = vsel %vm1934_vm5, %v10914_v30, -inf }
 0x3f7   : > { %v10918_v37 = vmul.f32 0.17677669, %v8555_v36  ;;  %v1753_v40 = vpop.f32.mrb[39].mxu0 }
 0x3f8   : > { %v10920_v43 = vmul.f32 0.17677669, %v1753_v40 }
 0x3f9   : > { %v1944_v46 = vsel %vm1934_vm5, %v10918_v37, -inf }
 0x3fa   : > { %1936 = vmax.xlane.f32.xlu0 %v1935_v14  ;;  %1945 = vmax.xlane.f32.xlu1 %v1944_v46  ;;  %v8558_v47 = vpop.f32.mrb[40].mxu0  ;;  %v1941_v55 = vsel %vm1934_vm5, %v10920_v43, -inf }
 0x3fb   : > { %v1763_v48 = vpop.f32.mrb[41].mxu0  ;;  %v10928_v54 = vmul.f32 0.17677669, %v8558_v47 }
 0x3fc   : > { %v10926_v53 = vmul.f32 0.17677669, %v1763_v48 }
 0x3fd   : > { %v1950_v9 = vsel %vm1934_vm5, %v10928_v54, -inf }
 0x3fe   : > { %1942 = vmax.xlane.f32.xlu1 %v1941_v55  ;;  %v8561_v58 = vpop.f32.mrb[42].mxu0  ;;  %v1947_v62 = vsel %vm1934_vm5, %v10926_v53, -inf }
 0x3ff   : > { %1948 = vmax.xlane.f32.xlu0 %v1947_v62  ;;  %v1773_v1 = vpop.f32.mrb[43].mxu0  ;;  %v10936_v4 = vmul.f32 0.17677669, %v8561_v58 }
 0x400   : > { %v10934_v3 = vmul.f32 0.17677669, %v1773_v1 }
 0x401   : > { %v1956_v26 = vsel %vm1934_vm5, %v10936_v4, -inf }
 0x402   : > { %1951 = vmax.xlane.f32.xlu1 %v1950_v9  ;;  %v8564_v10 = vpop.f32.mrb[44].mxu0  ;;  %v1953_v11 = vsel %vm1934_vm5, %v10934_v3, -inf }
 0x403   : > { %1954 = vmax.xlane.f32.xlu0 %v1953_v11  ;;  %v1783_v2 = vpop.f32.mrb[45].mxu0  ;;  %v10944_v19 = vmul.f32 0.17677669, %v8564_v10 }
 0x404   : > { %v10942_v16 = vmul.f32 0.17677669, %v1783_v2 }
 0x405   : > { %v1962_v25 = vsel %vm1934_vm5, %v10944_v19, -inf }
 0x406   : > { %1957 = vmax.xlane.f32.xlu1 %v1956_v26  ;;  %v8567_v20 = vpop.f32.mrb[46].mxu0  ;;  %v1959_v28 = vsel %vm1934_vm5, %v10942_v16, -inf }
 0x407   : > { %1960 = vmax.xlane.f32.xlu0 %v1959_v28  ;;  %v1793_v21 = vpop.f32.mrb[47].mxu0  ;;  %v10952_v22 = vmul.f32 0.17677669, %v8567_v20 }
 0x408   : > { %v10950_v15 = vmul.f32 0.17677669, %v1793_v21 }
 0x409   : > { %v1968_v46 = vsel %vm1934_vm5, %v10952_v22, -inf }
 0x40a   : > { %1963 = vmax.xlane.f32.xlu1 %v1962_v25  ;;  %v8570_v29 = vpop.f32.mrb[48].mxu0  ;;  %v1965_v35 = vsel %vm1934_vm5, %v10950_v15, -inf }
 0x40b   : > { %1966 = vmax.xlane.f32.xlu0 %v1965_v35  ;;  %v1803_v36 = vpop.f32.mrb[49].mxu0  ;;  %v10960_v14 = vmul.f32 0.17677669, %v8570_v29 }
 0x40c   : > { %v10958_v40 = vmul.f32 0.17677669, %v1803_v36 }
 0x40d   : > { %v1974_v1 = vsel %vm1934_vm5, %v10960_v14, -inf }
 0x40e   : > { %1969 = vmax.xlane.f32.xlu1 %v1968_v46  ;;  %v8573_v47 = vpop.f32.mrb[50].mxu0  ;;  %v1971_v48 = vsel %vm1934_vm5, %v10958_v40, -inf }
 0x40f   : > { %1972 = vmax.xlane.f32.xlu0 %v1971_v48  ;;  %v1813_v55 = vpop.f32.mrb[51].mxu0  ;;  %v10968_v62 = vmul.f32 0.17677669, %v8573_v47 }
 0x410   : > { %v10966_v58 = vmul.f32 0.17677669, %v1813_v55 }
 0x411   : > { %v1980_v20 = vsel %vm1934_vm5, %v10968_v62, -inf }
 0x412   : > { %1975 = vmax.xlane.f32.xlu1 %v1974_v1  ;;  %v8576_v9 = vpop.f32.mrb[52].mxu0  ;;  %v1977_v10 = vsel %vm1934_vm5, %v10966_v58, -inf }
 0x413   : > { %1978 = vmax.xlane.f32.xlu0 %v1977_v10  ;;  %v1823_v11 = vpop.f32.mrb[53].mxu0  ;;  %v10976_v26 = vmul.f32 0.17677669, %v8576_v9 }
 0x414   : > { %v10974_v2 = vmul.f32 0.17677669, %v1823_v11 }
 0x415   : > { %v1986_v36 = vsel %vm1934_vm5, %v10976_v26, -inf }
 0x416   : > { %1981 = vmax.xlane.f32.xlu1 %v1980_v20  ;;  %v8579_v28 = vpop.f32.mrb[54].mxu0  ;;  %v1983_v21 = vsel %vm1934_vm5, %v10974_v2, -inf }
 0x417   : > { %1984 = vmax.xlane.f32.xlu0 %v1983_v21  ;;  %v1833_v25 = vpop.f32.mrb[55].mxu0  ;;  %v10984_v35 = vmul.f32 0.17677669, %v8579_v28 }
 0x418   : > { %v10982_v29 = vmul.f32 0.17677669, %v1833_v25 }
 0x419   : > { %v1992_v9 = vsel %vm1934_vm5, %v10984_v35, -inf }
 0x41a   : > { %1987 = vmax.xlane.f32.xlu1 %v1986_v36  ;;  %v8582_v46 = vpop.f32.mrb[56].mxu0  ;;  %v1989_v47 = vsel %vm1934_vm5, %v10982_v29, -inf }
 0x41b   : > { %1990 = vmax.xlane.f32.xlu0 %v1989_v47  ;;  %v1843_v48 = vpop.f32.mrb[57].mxu0  ;;  %v10992_v1 = vmul.f32 0.17677669, %v8582_v46 }
 0x41c   : > { %v10990_v55 = vmul.f32 0.17677669, %v1843_v48 }
 0x41d   : > { %v1998_v25 = vsel %vm1934_vm5, %v10992_v1, -inf }
 0x41e   : > { %1993 = vmax.xlane.f32.xlu1 %v1992_v9  ;;  %v8585_v10 = vpop.f32.mrb[58].mxu0  ;;  %v1995_v11 = vsel %vm1934_vm5, %v10990_v55, -inf }
 0x41f   : > { %1996 = vmax.xlane.f32.xlu0 %v1995_v11  ;;  %v1853_v20 = vpop.f32.mrb[59].mxu0  ;;  %v11000_v21 = vmul.f32 0.17677669, %v8585_v10 }
 0x420   : > { %v10998_v28 = vmul.f32 0.17677669, %v1853_v20 }
 0x421   : > { %v2004_v11 = vsel %vm1934_vm5, %v11000_v21, -inf }
 0x422   : > { %1999 = vmax.xlane.f32.xlu1 %v1998_v25  ;;  %v8588_v36 = vpop.f32.mrb[60].mxu0  ;;  %v2001_v46 = vsel %vm1934_vm5, %v10998_v28, -inf }
 0x423   : > { %2002 = vmax.xlane.f32.xlu0 %v2001_v46  ;;  %v1863_v47 = vpop.f32.mrb[61].mxu0  ;;  %v11008_v9 = vmul.f32 0.17677669, %v8588_v36 }
 0x424   : > { %v11006_v48 = vmul.f32 0.17677669, %v1863_v47 }
 0x425   : > { %v2010_v46 = vsel %vm1934_vm5, %v11008_v9, -inf }
 0x426   : > { %2005 = vmax.xlane.f32.xlu1 %v2004_v11  ;;  %v8591_v10 = vpop.f32.mrb[62].mxu0  ;;  %v2007_v20 = vsel %vm1934_vm5, %v11006_v48, -inf }
 0x427   : > { %2008 = vmax.xlane.f32.xlu0 %v2007_v20  ;;  %v1873_v25 = vpop.f32.mrb[63].mxu0  ;;  %v11016_v8 = vmul.f32 0.17677669, %v8591_v10 }
 0x428   : > { %v11014_v61 = vmul.f32 0.17677669, %v1873_v25 }
 0x429   : > { %v2016_v20 = vsel %vm1934_vm5, %v11016_v8, -inf }
 0x42a   : > { %2011 = vmax.xlane.f32.xlu1 %v2010_v46  ;;  %v8594_v36 = vpop.f32.mrb[64].mxu0  ;;  %v2013_v47 = vsel %vm1934_vm5, %v11014_v61, -inf }
 0x42b   : > { %2014 = vmax.xlane.f32.xlu0 %v2013_v47  ;;  %v1883_v11 = vpop.f32.mrb[65].mxu0  ;;  %v11024_v60 = vmul.f32 0.17677669, %v8594_v36 }
 0x42c   : > { %v11022_v5 = vmul.f32 0.17677669, %v1883_v11 }
 0x42d   : > { %v2022_v47 = vsel %vm1934_vm5, %v11024_v60, -inf }
 0x42e   : > { %2017 = vmax.xlane.f32.xlu1 %v2016_v20  ;;  %v8597_v10 = vpop.f32.mrb[66].mxu0  ;;  %v2019_v25 = vsel %vm1934_vm5, %v11022_v5, -inf }
 0x42f   : > { %2020 = vmax.xlane.f32.xlu0 %v2019_v25  ;;  %v1893_v46 = vpop.f32.mrb[67].mxu0  ;;  %v11032_v52 = vmul.f32 0.17677669, %v8597_v10 }
 0x430   : > { %v11030_v59 = vmul.f32 0.17677669, %v1893_v46 }
 0x431   : > { %v2028_v25 = vsel %vm1934_vm5, %v11032_v52, -inf }
 0x432   : > { %2023 = vmax.xlane.f32.xlu1 %v2022_v47  ;;  %v8652_v36 = vpop.f32.mrb[68].mxu0  ;;  %v2025_v11 = vsel %vm1934_vm5, %v11030_v59, -inf }
 0x433   : > { %v2677_v49 = vpop.f32.mrb[69].mxu0  ;;  %2026 = vmax.xlane.f32.xlu0 %v2025_v11  ;;  %v11040_v42 = vmul.f32 0.17677669, %v8652_v36 }
 0x434   : > { %v11038_v20 = vmul.f32 0.17677669, %v2677_v49 }
 0x435   : > { %v2871_v49 = vsel %vm1934_vm5, %v11040_v42, -inf }
 0x436   : > { %2029 = vmax.xlane.f32.xlu1 %v2028_v25  ;;  %v8655_v10 = vpop.f32.mrb[70].mxu0  ;;  %v2868_v46 = vsel %vm1934_vm5, %v11038_v20, -inf }
 0x437   : > { %v2687_v41 = vpop.f32.mrb[71].mxu0  ;;  %2869 = vmax.xlane.f32.xlu0 %v2868_v46  ;;  %v11048_v34 = vmul.f32 0.17677669, %v8655_v10 }
 0x438   : > { %v11046_v47 = vmul.f32 0.17677669, %v2687_v41 }
 0x439   : > { %v2877_v41 = vsel %vm1934_vm5, %v11048_v34, -inf }
 0x43a   : > { %2872 = vmax.xlane.f32.xlu1 %v2871_v49  ;;  %v8658_v36 = vpop.f32.mrb[72].mxu0  ;;  %v2874_v11 = vsel %vm1934_vm5, %v11046_v47, -inf }
 0x43b   : > { %v2697_v31 = vpop.f32.mrb[73].mxu0  ;;  %2875 = vmax.xlane.f32.xlu0 %v2874_v11  ;;  %v11056_v24 = vmul.f32 0.17677669, %v8658_v36 }
 0x43c   : > { %v11054_v25 = vmul.f32 0.17677669, %v2697_v31 }
 0x43d   : > { %v2883_v31 = vsel %vm1934_vm5, %v11056_v24, -inf }
 0x43e   : > { %2878 = vmax.xlane.f32.xlu1 %v2877_v41  ;;  %v8661_v10 = vpop.f32.mrb[74].mxu0  ;;  %v2880_v46 = vsel %vm1934_vm5, %v11054_v25, -inf }
 0x43f   : > { %v2707_v23 = vpop.f32.mrb[75].mxu0  ;;  %2881 = vmax.xlane.f32.xlu0 %v2880_v46  ;;  %v11064_v18 = vmul.f32 0.17677669, %v8661_v10 }
 0x440   : > { %v11062_v49 = vmul.f32 0.17677669, %v2707_v23 }
 0x441   : > { %v2889_v23 = vsel %vm1934_vm5, %v11064_v18, -inf }
 0x442   : > { %13956 = vst [vmem:[#allocation38_spill] sm:$0xff] %v11062_v49  ;;  %2884 = vmax.xlane.f32.xlu1 %v2883_v31  ;;  %v8664_v36 = vpop.f32.mrb[76].mxu0  ;;  %v2886_v11 = vsel %vm1934_vm5, %v11062_v49, -inf }
 0x443   : > { %v2717_v17 = vpop.f32.mrb[77].mxu0  ;;  %2887 = vmax.xlane.f32.xlu0 %v2886_v11  ;;  %v11072_v13 = vmul.f32 0.17677669, %v8664_v36 }
 0x444   : > { %v11070_v41 = vmul.f32 0.17677669, %v2717_v17 }
 0x445   : > { %v2895_v17 = vsel %vm1934_vm5, %v11072_v13, -inf }
 0x446   : > { %13957 = vst [vmem:[#allocation39_spill] sm:$0xff] %v11070_v41  ;;  %2890 = vmax.xlane.f32.xlu1 %v2889_v23  ;;  %v8667_v10 = vpop.f32.mrb[78].mxu0  ;;  %v2892_v46 = vsel %vm1934_vm5, %v11070_v41, -inf }
 0x447   : > { %v2727_v12 = vpop.f32.mrb[79].mxu0  ;;  %2893 = vmax.xlane.f32.xlu0 %v2892_v46  ;;  %v11080_v7 = vmul.f32 0.17677669, %v8667_v10 }
 0x448   : > { %v11078_v31 = vmul.f32 0.17677669, %v2727_v12 }
 0x449   : > { %v2901_v0 = vsel %vm1934_vm5, %v11080_v7, -inf }
 0x44a   : > { %13958 = vst [vmem:[#allocation40_spill] sm:$0xff] %v11078_v31  ;;  %2896 = vmax.xlane.f32.xlu1 %v2895_v17  ;;  %v8670_v36 = vpop.f32.mrb[80].mxu0  ;;  %v2898_v11 = vsel %vm1934_vm5, %v11078_v31, -inf }
 0x44b   : > { %v2737_v6 = vpop.f32.mrb[81].mxu0  ;;  %2899 = vmax.xlane.f32.xlu0 %v2898_v11  ;;  %v11086_v23 = vmul.f32 0.17677669, %v8670_v36 }
 0x44c   : > { %v11090_v10 = vmul.f32 0.17677669, %v2737_v6 }
 0x44d   : > { %v2907_v63 = vsel %vm1934_vm5, %v11086_v23, -inf }
 0x44e   : > { %2902 = vmax.xlane.f32.xlu1 %v2901_v0  ;;  %v8673_v12 = vpop.f32.mrb[82].mxu0  ;;  %13959 = vst [vmem:[#allocation41_spill] sm:$0xff] %v11090_v10  ;;  %v2904_v36 = vsel %vm1934_vm5, %v11090_v10, -inf }
 0x44f   : > { %v2747_v46 = vpop.f32.mrb[83].mxu0  ;;  %v11094_v56 = vmul.f32 0.17677669, %v8673_v12 }
 0x450   : > { %v11098_v50 = vmul.f32 0.17677669, %v2747_v46 }
 0x451   : > { %v2913_v0 = vsel %vm1934_vm5, %v11094_v56, -inf }
 0x452   : > { %2908 = vmax.xlane.f32.xlu1 %v2907_v63  ;;  %v8676_v17 = vpop.f32.mrb[84].mxu0  ;;  %13960 = vst [vmem:[#allocation42_spill] sm:$0xff] %v11098_v50  ;;  %v2910_v63 = vsel %vm1934_vm5, %v11098_v50, -inf }
 0x453   : > { %v2757_v57 = vpop.f32.mrb[85].mxu0  ;;  %v11102_v44 = vmul.f32 0.17677669, %v8676_v17 }
 0x454   : > { %v11106_v38 = vmul.f32 0.17677669, %v2757_v57 }
 0x455   : > { %v2919_v46 = vsel %vm1934_vm5, %v11102_v44, -inf }
 0x456   : > { %2905 = vmax.xlane.f32.xlu1 %v2904_v36  ;;  %v8679_v11 = vpop.f32.mrb[86].mxu0  ;;  %13961 = vst [vmem:[#allocation43_spill] sm:$0xff] %v11106_v38  ;;  %v2916_v17 = vsel %vm1934_vm5, %v11106_v38, -inf }
 0x457   : > { %v2767_v51 = vpop.f32.mrb[87].mxu0  ;;  %v11110_v32 = vmul.f32 0.17677669, %v8679_v11 }
 0x458   : > { %v11114_v50 = vmul.f32 0.17677669, %v2767_v51 }
 0x459   : > { %v2925_v57 = vsel %vm1934_vm5, %v11110_v32, -inf }
 0x45a   : > { %2914 = vmax.xlane.f32.xlu1 %v2913_v0  ;;  %v8682_v6 = vpop.f32.mrb[88].mxu0  ;;  %13962 = vst [vmem:[#allocation44_spill] sm:$0xff] %v11114_v50  ;;  %v2922_v11 = vsel %vm1934_vm5, %v11114_v50, -inf }
 0x45b   : > { %v2777_v45 = vpop.f32.mrb[89].mxu0  ;;  %v11118_v41 = vmul.f32 0.17677669, %v8682_v6 }
 0x45d   : > { %13963 = vst [vmem:[#allocation45_spill] sm:$0xff] %v11118_v41  ;;  %v2931_v51 = vsel %vm1934_vm5, %v11118_v41, -inf }
 0x45e   : > { %2911 = vmax.xlane.f32.xlu1 %v2910_v63  ;;  %v8685_v12 = vpop.f32.mrb[90].mxu0 }
 0x45f   : > { %v2787_v39 = vpop.f32.mrb[91].mxu0  ;;  %v11128_v49 = vmul.f32 0.17677669, %v8685_v12 }
 0x460   : > { %v11132_v6 = vmul.f32 0.17677669, %v2787_v39 }
 0x461   : > { %13965 = vst [vmem:[#allocation47_spill] sm:$0xff] %v11128_v49 }
 0x462   : > { %2920 = vmax.xlane.f32.xlu1 %v2919_v46  ;;  %v8688_v36 = vpop.f32.mrb[92].mxu0  ;;  %13966 = vst [vmem:[#allocation48_spill] sm:$0xff] %v11132_v6 }
 0x463   : > { %v2797_v33 = vpop.f32.mrb[93].mxu0  ;;  %v11136_v50 = vmul.f32 0.17677669, %v8688_v36 }
 0x464   : > { %v11140_v41 = vmul.f32 0.17677669, %v2797_v33 }
 0x465   : > { %v2943_v12 = vsel %vm1934_vm5, %v11136_v50, -inf }
 0x466   : > { %2917 = vmax.xlane.f32.xlu1 %v2916_v17  ;;  %v8691_v0 = vpop.f32.mrb[94].mxu0  ;;  %v11124_v17 = vmul.f32 0.17677669, %v2777_v45  ;;  %v2934_v45 = vsel %vm1934_vm5, %v11132_v6, -inf  ;;  %13967 = vst [vmem:[#allocation49_spill] sm:$0xff] %v11140_v41 }
 0x467   : > { %v2807_v10 = vpop.f32.mrb[95].mxu0 }
 0x468   : > { %13964 = vst [vmem:[#allocation46_spill] sm:$0xff] %v11124_v17  ;;  %v11151_v6 = vmul.f32 0.17677669, %v2807_v10 }
 0x46a   : > { %2926 = vmax.xlane.f32.xlu1 %v2925_v57  ;;  %v8694_v63 = vpop.f32.mrb[96].mxu0  ;;  %v2928_v57 = vsel %vm1934_vm5, %v11124_v17, -inf }
 0x46b   : > { %v2817_v31 = vpop.f32.mrb[97].mxu0 }
 0x46e   : > { %2923 = vmax.xlane.f32.xlu1 %v2922_v11  ;;  %v11122_v46 = vpop.f32.mrb[98].mxu0  ;;  %v2937_v11 = vsel %vm1934_vm5, %v11128_v49, -inf }
 0x46f   : > { %v2827_v38 = vpop.f32.mrb[99].mxu0 }
 0x472   : > { %2932 = vmax.xlane.f32.xlu1 %v2931_v51 }
 0x476   : > { %2929 = vmax.xlane.f32.xlu1 %v2928_v57  ;;  %v11145_v57 = vmul.f32 0.17677669, %v8691_v0 }
 0x47a   : > { %2938 = vmax.xlane.f32.xlu1 %v2937_v11  ;;  %v2940_v11 = vsel %vm1934_vm5, %v11140_v41, -inf  ;;  %v11156_v41 = vmul.f32 0.17677669, %v8694_v63 }
 0x47e   : > { %2935 = vmax.xlane.f32.xlu1 %v2934_v45 }
 0x482   : > { %2944 = vmax.xlane.f32.xlu1 %v2943_v12  ;;  %v2949_v12 = vsel %vm1934_vm5, %v11145_v57, -inf }
 0x483   : > { %v1940_v51 = vpop.xlane.xlu0 %1939 }
 0x484   : > { %v2032_v39 = vsub.f32 %v10912_v27, %v1940_v51 }
 0x486   : > { %v2065_v36 = vmul.f32 1.442695, %v2032_v39  ;;  %2941 = vmax.xlane.f32.xlu1 %v2940_v11 }
 0x487   : > { %v1937_v17 = vpop.xlane.xlu0 %1936  ;;  %v1946_v49 = vpop.xlane.xlu1 %1945 }
 0x488   : > { %9271 = vpow2.f32 %v2065_v36  ;;  %v2031_v33 = vsub.f32 %v10914_v30, %v1937_v17  ;;  %v2034_v45 = vsub.f32 %v10918_v37, %v1946_v49  ;;  %v2946_v30 = vsel %vm1934_vm5, %v11151_v6, -inf }
 0x489   : > { %v11161_v36 = vmul.f32 0.17677669, %v2817_v31 }
 0x48a   : > { %v2063_v27 = vmul.f32 1.442695, %v2031_v33  ;;  %v2069_v0 = vmul.f32 1.442695, %v2034_v45  ;;  %2950 = vmax.xlane.f32.xlu1 %v2949_v12  ;;  %v2955_v33 = vsel %vm1934_vm5, %v11156_v41, -inf }
 0x48b   : > { %v1943_v51 = vpop.xlane.xlu1 %1942  ;;  %v2952_v31 = vsel %vm1934_vm5, %v11161_v36, -inf }
 0x48c   : > { %9273 = vpow2.f32 %v2063_v27  ;;  %v2033_v39 = vsub.f32 %v10920_v43, %v1943_v51  ;;  %v1949_v11 = vpop.xlane.xlu0 %1948 }
 0x48d   : > { %9275 = vpow2.f32 %v2069_v0  ;;  %v2035_v43 = vsub.f32 %v10926_v53, %v1949_v11 }
 0x48e   : > { %v2067_v37 = vmul.f32 1.442695, %v2033_v39  ;;  %2947 = vmax.xlane.f32.xlu1 %v2946_v30 }
 0x48f   : > { %v1952_v49 = vpop.xlane.xlu1 %1951  ;;  %v2071_v39 = vmul.f32 1.442695, %v2035_v43 }
 0x490   : > { %v2036_v10 = vsub.f32 %v10928_v54, %v1952_v49  ;;  %v1955_v17 = vpop.xlane.xlu0 %1954  ;;  %9277 = vpow2.f32 %v2067_v37  ;;  %v11170_v54 = vmul.f32 0.17677669, %v2827_v38  ;;  %v11182_v38 = vmul.f32 0.17677669, %v11122_v46 }
 0x492   : > { %v11165_v45 = vpop.eup %9271  ;;  %v2073_v63 = vmul.f32 1.442695, %v2036_v10  ;;  %2956 = vmax.xlane.f32.xlu1 %v2955_v33  ;;  %v2958_v10 = vsel %vm1934_vm5, %v11170_v54, -inf  ;;  %v2037_v33 = vsub.f32 %v10934_v3, %v1955_v17  ;;  %v2961_v46 = vsel %vm1934_vm5, %v11182_v38, -inf }
 0x493   : > { %v1958_v12 = vpop.xlane.xlu1 %1957  ;;  %v2130_v27 = vsel %vm1934_vm5, %v11165_v45, 0.0 }
 0x494   : > { %v1961_v0 = vpop.xlane.xlu0 %1960  ;;  %2131 = vadd.xlane.f32.xlu0 %v2130_v27  ;;  %9279 = vpow2.f32 %v2073_v63  ;;  %v2038_v30 = vsub.f32 %v10936_v4, %v1958_v12 }
 0x495   : > { %9281 = vpow2.f32 %v2071_v39 }
 0x496   : > { %v11174_v51 = vpop.eup %9273  ;;  %2953 = vmax.xlane.f32.xlu1 %v2952_v31  ;;  %v2077_v43 = vmul.f32 1.442695, %v2038_v30  ;;  %v2075_v31 = vmul.f32 1.442695, %v2037_v33  ;;  %v2039_v30 = vsub.f32 %v10942_v16, %v1961_v0 }
 0x497   : > { %v1964_v53 = vpop.xlane.xlu1 %1963  ;;  %v2127_v11 = vsel %vm1934_vm5, %v11174_v51, 0.0  ;;  %v11179_v37 = vpop.eup %9275 }
 0x498   : > { %13968 = vst [vmem:[#allocation50_spill] sm:$0xff] %v11179_v37  ;;  %v1967_v49 = vpop.xlane.xlu0 %1966  ;;  %2128 = vadd.xlane.f32.xlu0 %v2127_v11  ;;  %v2136_v63 = vsel %vm1934_vm5, %v11179_v37, 0.0  ;;  %9283 = vpow2.f32 %v2077_v43  ;;  %v2040_v11 = vsub.f32 %v10944_v19, %v1964_v53  ;;  %v2079_v19 = vmul.f32 1.442695, %v2039_v30 }
 0x499   : > { %9285 = vpow2.f32 %v2075_v31 }
 0x49a   : > { %2959 = vmax.xlane.f32.xlu1 %v2958_v10  ;;  %v11189_v12 = vpop.eup %9277  ;;  %v2081_v10 = vmul.f32 1.442695, %v2040_v11  ;;  %v2041_v11 = vsub.f32 %v10950_v15, %v1967_v49 }
 0x49b   : > { %v1970_v4 = vpop.xlane.xlu1 %1969  ;;  %v2133_v3 = vsel %vm1934_vm5, %v11189_v12, 0.0 }
 0x49c   : > { %2137 = vadd.xlane.f32.xlu0 %v2136_v63  ;;  %v1973_v27 = vpop.xlane.xlu0 %1972  ;;  %9287 = vpow2.f32 %v2081_v10  ;;  %v2042_v53 = vsub.f32 %v10952_v22, %v1970_v4  ;;  %v2083_v4 = vmul.f32 1.442695, %v2041_v11 }
 0x49d   : > { %9289 = vpow2.f32 %v2079_v19 }
 0x49e   : > { %2962 = vmax.xlane.f32.xlu1 %v2961_v46  ;;  %v11196_v17 = vpop.eup %9279 }
 0x49f   : > { %v1976_v39 = vpop.xlane.xlu1 %1975  ;;  %13969 = vst [vmem:[#allocation51_spill] sm:$0xff] %v11196_v17  ;;  %v2142_v33 = vsel %vm1934_vm5, %v11196_v17, 0.0  ;;  %v11203_v43 = vpop.eup %9281 }
 0x4a0   : > { %2134 = vadd.xlane.f32.xlu0 %v2133_v3  ;;  %v11199_v63 = vpop.xlane.xlu0 %1978  ;;  %13970 = vst [vmem:[#allocation52_spill] sm:$0xff] %v11203_v43  ;;  %v2139_v31 = vsel %vm1934_vm5, %v11203_v43, 0.0  ;;  %v2085_v3 = vmul.f32 1.442695, %v2042_v53  ;;  %v2044_v10 = vsub.f32 %v10960_v14, %v1976_v39  ;;  %v11229_v53 = vpop.f32.mrb[36].mxu1 }
 0x4a2   : > { %v11210_v16 = vpop.eup %9283  ;;  %9291 = vpow2.f32 %v2085_v3  ;;  %v2089_v11 = vmul.f32 1.442695, %v2044_v10 }
 0x4a3   : > { %v1982_v37 = vpop.xlane.xlu1 %1981  ;;  %13971 = vst [vmem:[#allocation53_spill] sm:$0xff] %v11210_v16  ;;  %v2148_v30 = vsel %vm1934_vm5, %v11210_v16, 0.0  ;;  %v11219_v22 = vpop.eup %9285  ;;  %9293 = vpow2.f32 %v2083_v4 }
 0x4a4   : > { %2143 = vadd.xlane.f32.xlu0 %v2142_v33  ;;  %v11212_v0 = vpop.xlane.xlu0 %1984  ;;  %13972 = vst [vmem:[#allocation54_spill] sm:$0xff] %v11219_v22  ;;  %v2145_v19 = vsel %vm1934_vm5, %v11219_v22, 0.0  ;;  %v1569_v16 = vpop.f32.mrb[37].mxu1 }
 0x4a5   : > { %8598 = vmatprep.subr.mxu1 %v1569_v16 }
 0x4a6   : > { %v11226_v15 = vpop.eup %9287  ;;  %8599 = vmatpush3.msra.mxu1 %v1569_v16  ;;  %v2045_v16 = vsub.f32 %v10966_v58, %v11199_v63 }
 0x4a7   : > { %v11206_v46 = vpop.xlane.xlu1 %1987  ;;  %v2154_v39 = vsel %vm1934_vm5, %v11226_v15, 0.0  ;;  %v11234_v43 = vpop.eup %9289  ;;  %8698 = vmatprep.subr.mxu1 %v11229_v53 }
 0x4a8   : > { %2140 = vadd.xlane.f32.xlu0 %v2139_v31  ;;  %v11222_v33 = vpop.xlane.xlu0 %1990  ;;  %v2048_v58 = vsub.f32 %v10976_v26, %v11206_v46  ;;  %v2047_v26 = vsub.f32 %v10974_v2, %v11212_v0 }
 0x4aa   : > { %v2097_v46 = vmul.f32 1.442695, %v2048_v58 }
 0x4ab   : > { %v11215_v17 = vpop.xlane.xlu1 %1993 }
 0x4ac   : > { %2149 = vadd.xlane.f32.xlu0 %v2148_v30  ;;  %v2043_v30 = vsub.f32 %v10958_v40, %v1973_v27  ;;  %v2046_v27 = vsub.f32 %v10968_v62, %v1982_v37  ;;  %v2050_v2 = vsub.f32 %v10984_v35, %v11215_v17  ;;  %v2049_v35 = vsub.f32 %v10982_v29, %v11222_v33 }
 0x4ae   : > { %v2087_v40 = vmul.f32 1.442695, %v2043_v30  ;;  %v2101_v17 = vmul.f32 1.442695, %v2050_v2  ;;  %v2099_v29 = vmul.f32 1.442695, %v2049_v35 }
 0x4af   : > { %v2000_v31 = vpop.xlane.xlu1 %1999 }
 0x4b0   : > { %v2052_v49 = vsub.f32 %v10992_v1, %v2000_v31  ;;  %2146 = vadd.xlane.f32.xlu0 %v2145_v19  ;;  %v11237_v1 = vpop.xlane.xlu0 %1996  ;;  %v2151_v31 = vsel %vm1934_vm5, %v11234_v43, 0.0  ;;  %v11243_v19 = vpop.eup %9291 }
 0x4b1   : > { %v2160_v37 = vsel %vm1934_vm5, %v11243_v19, 0.0  ;;  %v2051_v33 = vsub.f32 %v10990_v55, %v11237_v1 }
 0x4b2   : > { %v2105_v3 = vmul.f32 1.442695, %v2052_v49  ;;  %v2093_v49 = vmul.f32 1.442695, %v2046_v27 }
 0x4b3   : > { %v2006_v14 = vpop.xlane.xlu1 %2005 }
 0x4b4   : > { %9295 = vpow2.f32 %v2105_v3  ;;  %v2054_v22 = vsub.f32 %v11000_v21, %v2006_v14  ;;  %2155 = vadd.xlane.f32.xlu0 %v2154_v39  ;;  %v2091_v14 = vmul.f32 1.442695, %v2045_v16 }
 0x4b5   : > { %9297 = vpow2.f32 %v2089_v11  ;;  %v11248_v11 = vpop.xlane.xlu0 %2002 }
 0x4b6   : > { %v2109_v4 = vmul.f32 1.442695, %v2054_v22  ;;  %v11252_v22 = vpop.eup %9293  ;;  %v2053_v55 = vsub.f32 %v10998_v28, %v11248_v11 }
 0x4b7   : > { %v2012_v10 = vpop.xlane.xlu1 %2011  ;;  %v2157_v27 = vsel %vm1934_vm5, %v11252_v22, 0.0 }
 0x4b8   : > { %9299 = vpow2.f32 %v2109_v4  ;;  %v2056_v21 = vsub.f32 %v11008_v9, %v2012_v10  ;;  %2152 = vadd.xlane.f32.xlu0 %v2151_v31  ;;  %v2107_v28 = vmul.f32 1.442695, %v2053_v55 }
 0x4b9   : > { %9301 = vpow2.f32 %v2087_v40  ;;  %v11266_v10 = vpop.xlane.xlu0 %2008 }
 0x4ba   : > { %v2113_v30 = vmul.f32 1.442695, %v2056_v21  ;;  %v2055_v11 = vsub.f32 %v11006_v48, %v11266_v10 }
 0x4bb   : > { %v2018_v62 = vpop.xlane.xlu1 %2017 }
 0x4bc   : > { %9303 = vpow2.f32 %v2113_v30  ;;  %v2058_v3 = vsub.f32 %v11016_v8, %v2018_v62  ;;  %2161 = vadd.xlane.f32.xlu0 %v2160_v37  ;;  %v2111_v48 = vmul.f32 1.442695, %v2055_v11 }
 0x4bd   : > { %9305 = vpow2.f32 %v2093_v49 }
 0x4be   : > { %v11255_v9 = vpop.eup %9295  ;;  %v2117_v63 = vmul.f32 1.442695, %v2058_v3  ;;  %v2095_v3 = vmul.f32 1.442695, %v2047_v26 }
 0x4bf   : > { %v2024_v39 = vpop.xlane.xlu1 %2023  ;;  %v2190_v40 = vsel %vm1934_vm5, %v11255_v9, 0.0  ;;  %v11263_v4 = vpop.eup %9297 }
 0x4c0   : > { %9307 = vpow2.f32 %v2117_v63  ;;  %v2060_v8 = vsub.f32 %v11024_v60, %v2024_v39  ;;  %2191 = vadd.xlane.f32.xlu1 %v2190_v40  ;;  %2158 = vadd.xlane.f32.xlu0 %v2157_v27  ;;  %v2166_v30 = vsel %vm1934_vm5, %v11263_v4, 0.0 }
 0x4c1   : > { %9309 = vpow2.f32 %v2091_v14  ;;  %v11283_v14 = vpop.xlane.xlu0 %2014 }
 0x4c2   : > { %v11268_v31 = vpop.eup %9299  ;;  %v2121_v21 = vmul.f32 1.442695, %v2060_v8  ;;  %v2057_v10 = vsub.f32 %v11014_v61, %v11283_v14 }
 0x4c3   : > { %v2030_v16 = vpop.xlane.xlu1 %2029  ;;  %v2196_v49 = vsel %vm1934_vm5, %v11268_v31, 0.0  ;;  %v11276_v60 = vpop.eup %9301 }
 0x4c4   : > { %9311 = vpow2.f32 %v2121_v21  ;;  %v2062_v62 = vsub.f32 %v11032_v52, %v2030_v16  ;;  %2197 = vadd.xlane.f32.xlu1 %v2196_v49  ;;  %2167 = vadd.xlane.f32.xlu0 %v2166_v30  ;;  %v2163_v39 = vsel %vm1934_vm5, %v11276_v60, 0.0 }
 0x4c5   : > { %9313 = vpow2.f32 %v2097_v46  ;;  %v11303_v49 = vpop.xlane.xlu0 %2020 }
 0x4c6   : > { %v11279_v37 = vpop.eup %9303  ;;  %v2125_v0 = vmul.f32 1.442695, %v2062_v62  ;;  %v2059_v61 = vsub.f32 %v11022_v5, %v11303_v49 }
 0x4c7   : > { %v2873_v58 = vpop.xlane.xlu1 %2872  ;;  %v2202_v63 = vsel %vm1934_vm5, %v11279_v37, 0.0  ;;  %v11289_v52 = vpop.eup %9305 }
 0x4c8   : > { %9315 = vpow2.f32 %v2125_v0  ;;  %v2965_v40 = vsub.f32 %v11040_v42, %v2873_v58  ;;  %2203 = vadd.xlane.f32.xlu1 %v2202_v63  ;;  %2164 = vadd.xlane.f32.xlu0 %v2163_v39  ;;  %v2172_v21 = vsel %vm1934_vm5, %v11289_v52, 0.0  ;;  %v2103_v39 = vmul.f32 1.442695, %v2051_v33 }
 0x4c9   : > { %9317 = vpow2.f32 %v2095_v3  ;;  %v2119_v5 = vmul.f32 1.442695, %v2059_v61 }
 0x4ca   : > { %v11292_v27 = vpop.eup %9307  ;;  %v2998_v8 = vmul.f32 1.442695, %v2965_v40  ;;  %v11320_v40 = vpop.xlane.xlu0 %2026 }
 0x4cb   : > { %v2879_v26 = vpop.xlane.xlu1 %2878  ;;  %v2208_v46 = vsel %vm1934_vm5, %v11292_v27, 0.0  ;;  %v11300_v16 = vpop.eup %9309  ;;  %v2061_v49 = vsub.f32 %v11030_v59, %v11320_v40 }
 0x4cc   : > { %9319 = vpow2.f32 %v2998_v8  ;;  %v2967_v42 = vsub.f32 %v11048_v34, %v2879_v26  ;;  %2209 = vadd.xlane.f32.xlu1 %v2208_v46  ;;  %2173 = vadd.xlane.f32.xlu0 %v2172_v21  ;;  %v2169_v0 = vsel %vm1934_vm5, %v11300_v16, 0.0 }
 0x4cd   : > { %9321 = vpow2.f32 %v2101_v17 }
 0x4ce   : > { %v11305_v30 = vpop.eup %9311  ;;  %v3002_v62 = vmul.f32 1.442695, %v2967_v42 }
 0x4cf   : > { %v2885_v3 = vpop.xlane.xlu1 %2884  ;;  %v2214_v2 = vsel %vm1934_vm5, %v11305_v30, 0.0  ;;  %v11313_v34 = vpop.eup %9313 }
 0x4d0   : > { %9323 = vpow2.f32 %v3002_v62  ;;  %v2969_v58 = vsub.f32 %v11056_v24, %v2885_v3  ;;  %2215 = vadd.xlane.f32.xlu1 %v2214_v2  ;;  %2170 = vadd.xlane.f32.xlu0 %v2169_v0  ;;  %v2178_v8 = vsel %vm1934_vm5, %v11313_v34, 0.0  ;;  %v2870_v3 = vpop.xlane.xlu0 %2869 }
 0x4d1   : > { %9325 = vpow2.f32 %v2099_v29  ;;  %v2964_v59 = vsub.f32 %v11038_v20, %v2870_v3 }
 0x4d2   : > { %v11316_v63 = vpop.eup %9315  ;;  %v3006_v1 = vmul.f32 1.442695, %v2969_v58 }
 0x4d3   : > { %v2891_v35 = vpop.xlane.xlu1 %2890  ;;  %v2220_v17 = vsel %vm1934_vm5, %v11316_v63, 0.0  ;;  %v11326_v24 = vpop.eup %9317 }
 0x4d4   : > { %9327 = vpow2.f32 %v3006_v1  ;;  %v2971_v26 = vsub.f32 %v11064_v18, %v2891_v35  ;;  %2221 = vadd.xlane.f32.xlu1 %v2220_v17  ;;  %2179 = vadd.xlane.f32.xlu0 %v2178_v8  ;;  %v2175_v33 = vsel %vm1934_vm5, %v11326_v24, 0.0  ;;  %v2115_v17 = vmul.f32 1.442695, %v2057_v10  ;;  %v2876_v8 = vpop.xlane.xlu0 %2875 }
 0x4d5   : > { %9329 = vpow2.f32 %v2103_v39 }
 0x4d6   : > { %v11329_v46 = vpop.eup %9319  ;;  %v3010_v21 = vmul.f32 1.442695, %v2971_v26 }
 0x4d7   : > { %v2897_v42 = vpop.xlane.xlu1 %2896  ;;  %v3063_v29 = vsel %vm1934_vm5, %v11329_v46, 0.0  ;;  %v11337_v62 = vpop.eup %9321 }
 0x4d8   : > { %9331 = vpow2.f32 %v3010_v21  ;;  %v2973_v18 = vsub.f32 %v11072_v13, %v2897_v42  ;;  %3064 = vadd.xlane.f32.xlu1 %v3063_v29  ;;  %2176 = vadd.xlane.f32.xlu0 %v2175_v33  ;;  %v2184_v55 = vsel %vm1934_vm5, %v11337_v62, 0.0 }
 0x4d9   : > { %9333 = vpow2.f32 %v2107_v28 }
 0x4da   : > { %v11340_v2 = vpop.eup %9323  ;;  %v3014_v0 = vmul.f32 1.442695, %v2973_v18 }
 0x4db   : > { %v2903_v58 = vpop.xlane.xlu1 %2902  ;;  %v3069_v39 = vsel %vm1934_vm5, %v11340_v2, 0.0  ;;  %v11348_v1 = vpop.eup %9325 }
 0x4dc   : > { %9335 = vpow2.f32 %v3014_v0  ;;  %v2975_v13 = vsub.f32 %v11080_v7, %v2903_v58  ;;  %3070 = vadd.xlane.f32.xlu1 %v3069_v39  ;;  %2185 = vadd.xlane.f32.xlu0 %v2184_v55  ;;  %v2181_v11 = vsel %vm1934_vm5, %v11348_v1, 0.0  ;;  %v2123_v58 = vmul.f32 1.442695, %v2061_v49 }
 0x4dd   : > { %9337 = vpow2.f32 %v2111_v48 }
 0x4de   : > { %v11351_v35 = vpop.eup %9327  ;;  %v3018_v14 = vmul.f32 1.442695, %v2975_v13 }
 0x4df   : > { %v2909_v26 = vpop.xlane.xlu1 %2908  ;;  %v3075_v28 = vsel %vm1934_vm5, %v11351_v35, 0.0  ;;  %v11359_v21 = vpop.eup %9329 }
 0x4e0   : > { %9339 = vpow2.f32 %v3018_v14  ;;  %v2977_v7 = vsub.f32 %v11086_v23, %v2909_v26  ;;  %3076 = vadd.xlane.f32.xlu1 %v3075_v28  ;;  %2182 = vadd.xlane.f32.xlu0 %v2181_v11  ;;  %v2187_v48 = vsel %vm1934_vm5, %v11359_v21, 0.0  ;;  %v2882_v23 = vpop.xlane.xlu0 %2881  ;;  %v2996_v14 = vmul.f32 1.442695, %v2964_v59 }
 0x4e1   : > { %9341 = vpow2.f32 %v2115_v17  ;;  %v2966_v26 = vsub.f32 %v11046_v47, %v2876_v8  ;;  %v2968_v47 = vsub.f32 %v11054_v25, %v2882_v23 }
 0x4e2   : > { %v11362_v42 = vpop.eup %9331  ;;  %v3022_v29 = vmul.f32 1.442695, %v2977_v7 }
 0x4e3   : > { %v11366_v33 = vpop.xlane.xlu1 %2905  ;;  %v3081_v18 = vsel %vm1934_vm5, %v11362_v42, 0.0  ;;  %v11372_v10 = vpop.eup %9333  ;;  %v3000_v49 = vmul.f32 1.442695, %v2966_v26 }
 0x4e4   : > { %9343 = vpow2.f32 %v3022_v29  ;;  %3082 = vadd.xlane.f32.xlu1 %v3081_v18  ;;  %2188 = vadd.xlane.f32.xlu0 %v2187_v48  ;;  %v2193_v55 = vsel %vm1934_vm5, %v11372_v10, 0.0  ;;  %v2888_v3 = vpop.xlane.xlu0 %2887 }
 0x4e5   : > { %9345 = vpow2.f32 %v2119_v5 }
 0x4e6   : > { %v11374_v0 = vpop.eup %9335  ;;  %9347 = vpow2.f32 %v2123_v58 }
 0x4e7   : > { %v2915_v40 = vpop.xlane.xlu1 %2914  ;;  %v3087_v39 = vsel %vm1934_vm5, %v11374_v0, 0.0  ;;  %v11381_v13 = vpop.eup %9337 }
 0x4e8   : > { %v2979_v17 = vsub.f32 %v11094_v56, %v2915_v40  ;;  %3088 = vadd.xlane.f32.xlu1 %v3087_v39  ;;  %2194 = vadd.xlane.f32.xlu0 %v2193_v55  ;;  %v2199_v7 = vsel %vm1934_vm5, %v11381_v13, 0.0  ;;  %v2894_v59 = vpop.xlane.xlu0 %2893  ;;  %v3004_v40 = vmul.f32 1.442695, %v2968_v47  ;;  %v13974_v39 = vld [vmem:[#allocation38_spill] sm:$0xff] }
 0x4e9   : > { %v2970_v55 = vsub.f32 %v13974_v39, %v2888_v3 }
 0x4ea   : > { %v11384_v61 = vpop.eup %9339  ;;  %v3026_v20 = vmul.f32 1.442695, %v2979_v17 }
 0x4eb   : > { %v11387_v28 = vpop.xlane.xlu1 %2911  ;;  %v3093_v11 = vsel %vm1934_vm5, %v11384_v61, 0.0  ;;  %v11393_v5 = vpop.eup %9341 }
 0x4ec   : > { %9349 = vpow2.f32 %v3026_v20  ;;  %3094 = vadd.xlane.f32.xlu1 %v3093_v11  ;;  %2200 = vadd.xlane.f32.xlu0 %v2199_v7  ;;  %v2205_v18 = vsel %vm1934_vm5, %v11393_v5, 0.0  ;;  %v13976_v20 = vld [vmem:[#allocation39_spill] sm:$0xff]  ;;  %v2900_v7 = vpop.xlane.xlu0 %2899 }
 0x4ed   : > { %9351 = vpow2.f32 %v2996_v14  ;;  %v2972_v11 = vsub.f32 %v13976_v20, %v2894_v59 }
 0x4ee   : > { %v11395_v56 = vpop.eup %9343  ;;  %9353 = vpow2.f32 %v3000_v49 }
 0x4ef   : > { %13973 = vst [vmem:[#allocation55_spill] sm:$0xff] %v11395_v56  ;;  %v2921_v8 = vpop.xlane.xlu1 %2920  ;;  %v3099_v29 = vsel %vm1934_vm5, %v11395_v56, 0.0  ;;  %v11402_v48 = vpop.eup %9345 }
 0x4f0   : > { %v2981_v58 = vsub.f32 %v11102_v44, %v2921_v8  ;;  %3100 = vadd.xlane.f32.xlu1 %v3099_v29  ;;  %2206 = vadd.xlane.f32.xlu0 %v2205_v18  ;;  %v2211_v23 = vsel %vm1934_vm5, %v11402_v48, 0.0  ;;  %v11408_v14 = vpop.eup %9347  ;;  %v3008_v44 = vmul.f32 1.442695, %v2970_v55  ;;  %v3012_v18 = vmul.f32 1.442695, %v2972_v11 }
 0x4f1   : > { %v2217_v47 = vsel %vm1934_vm5, %v11408_v14, 0.0 }
 0x4f2   : > { %v3030_v17 = vmul.f32 1.442695, %v2981_v58  ;;  %v13977_v58 = vld [vmem:[#allocation40_spill] sm:$0xff] }
 0x4f3   : > { %v2918_v25 = vpop.xlane.xlu1 %2917 }
 0x4f4   : > { %9355 = vpow2.f32 %v3030_v17  ;;  %2212 = vadd.xlane.f32.xlu0 %v2211_v23 }
 0x4f5   : > { %9357 = vpow2.f32 %v3004_v40  ;;  %v2974_v40 = vsub.f32 %v13977_v58, %v2900_v7 }
 0x4f6   : > { %v11410_v26 = vpop.eup %9349  ;;  %9359 = vpow2.f32 %v3008_v44 }
 0x4f7   : > { %13975 = vst [vmem:[#allocation38_spill] sm:$0xff] %v11410_v26  ;;  %v2927_v49 = vpop.xlane.xlu1 %2926  ;;  %v3105_v3 = vsel %vm1934_vm5, %v11410_v26, 0.0  ;;  %v11417_v8 = vpop.eup %9351  ;;  %v3016_v20 = vmul.f32 1.442695, %v2974_v40 }
 0x4f8   : > { %v2983_v29 = vsub.f32 %v11110_v32, %v2927_v49  ;;  %3106 = vadd.xlane.f32.xlu1 %v3105_v3  ;;  %2218 = vadd.xlane.f32.xlu0 %v2217_v47  ;;  %v3060_v55 = vsel %vm1934_vm5, %v11417_v8, 0.0  ;;  %v11423_v17 = vpop.eup %9353  ;;  %v13979_v32 = vld [vmem:[#allocation41_spill] sm:$0xff] }
 0x4f9   : > { %v2976_v49 = vsub.f32 %v13979_v32, %v11366_v33  ;;  %v3066_v7 = vsel %vm1934_vm5, %v11423_v17, 0.0  ;;  %v13980_v47 = vld [vmem:[#allocation45_spill] sm:$0xff] }
 0x4fa   : > { %v3034_v39 = vmul.f32 1.442695, %v2983_v29 }
 0x4fb   : > { %v2924_v59 = vpop.xlane.xlu1 %2923  ;;  %v3020_v58 = vmul.f32 1.442695, %v2976_v49 }
 0x4fc   : > { %9361 = vpow2.f32 %v3034_v39  ;;  %3061 = vadd.xlane.f32.xlu0 %v3060_v55 }
 0x4fd   : > { %9363 = vpow2.f32 %v3012_v18  ;;  %v13981_v18 = vld [vmem:[#allocation42_spill] sm:$0xff] }
 0x4fe   : > { %v11425_v23 = vpop.eup %9355  ;;  %9365 = vpow2.f32 %v3016_v20  ;;  %v2978_v40 = vsub.f32 %v13981_v18, %v11387_v28 }
 0x4ff   : > { %13978 = vst [vmem:[#allocation39_spill] sm:$0xff] %v11425_v23  ;;  %v2933_v44 = vpop.xlane.xlu1 %2932  ;;  %v3111_v11 = vsel %vm1934_vm5, %v11425_v23, 0.0  ;;  %v11433_v3 = vpop.eup %9357 }
 0x500   : > { %v2985_v29 = vsub.f32 %v13980_v47, %v2933_v44  ;;  %3112 = vadd.xlane.f32.xlu1 %v3111_v11  ;;  %3067 = vadd.xlane.f32.xlu0 %v3066_v7  ;;  %v3072_v55 = vsel %vm1934_vm5, %v11433_v3, 0.0  ;;  %v11440_v32 = vpop.eup %9359  ;;  %v3024_v44 = vmul.f32 1.442695, %v2978_v40  ;;  %v13983_v11 = vld [vmem:[#allocation43_spill] sm:$0xff] }
 0x501   : > { %v2980_v7 = vsub.f32 %v13983_v11, %v2918_v25  ;;  %v3078_v28 = vsel %vm1934_vm5, %v11440_v32, 0.0 }
 0x502   : > { %v3038_v39 = vmul.f32 1.442695, %v2985_v29  ;;  %v13984_v29 = vld [vmem:[#allocation47_spill] sm:$0xff] }
 0x503   : > { %v2930_v33 = vpop.xlane.xlu1 %2929 }
 0x504   : > { %9367 = vpow2.f32 %v3038_v39  ;;  %3073 = vadd.xlane.f32.xlu0 %v3072_v55  ;;  %v3028_v39 = vmul.f32 1.442695, %v2980_v7  ;;  %v13985_v55 = vld [vmem:[#allocation44_spill] sm:$0xff] }
 0x505   : > { %9369 = vpow2.f32 %v3020_v58  ;;  %v2982_v58 = vsub.f32 %v13985_v55, %v2924_v59  ;;  %v13988_v55 = vld [vmem:[#allocation48_spill] sm:$0xff] }
 0x506   : > { %v11442_v23 = vpop.eup %9361  ;;  %9371 = vpow2.f32 %v3024_v44 }
 0x507   : > { %13982 = vst [vmem:[#allocation40_spill] sm:$0xff] %v11442_v23  ;;  %v2939_v20 = vpop.xlane.xlu1 %2938  ;;  %v3117_v49 = vsel %vm1934_vm5, %v11442_v23, 0.0  ;;  %v11449_v47 = vpop.eup %9363  ;;  %v3032_v56 = vmul.f32 1.442695, %v2982_v58 }
 0x508   : > { %v2987_v18 = vsub.f32 %v13984_v29, %v2939_v20  ;;  %3118 = vadd.xlane.f32.xlu1 %v3117_v49  ;;  %3079 = vadd.xlane.f32.xlu0 %v3078_v28  ;;  %v3084_v25 = vsel %vm1934_vm5, %v11449_v47, 0.0  ;;  %v11455_v11 = vpop.eup %9365  ;;  %v13987_v20 = vld [vmem:[#allocation46_spill] sm:$0xff] }
 0x509   : > { %v2984_v49 = vsub.f32 %v13987_v20, %v2930_v33  ;;  %v3090_v59 = vsel %vm1934_vm5, %v11455_v11, 0.0 }
 0x50a   : > { %v3042_v40 = vmul.f32 1.442695, %v2987_v18 }
 0x50b   : > { %v2936_v26 = vpop.xlane.xlu1 %2935  ;;  %v3036_v18 = vmul.f32 1.442695, %v2984_v49 }
 0x50c   : > { %9373 = vpow2.f32 %v3042_v40  ;;  %3085 = vadd.xlane.f32.xlu0 %v3084_v25 }
 0x50d   : > { %9375 = vpow2.f32 %v3028_v39  ;;  %v2986_v39 = vsub.f32 %v13988_v55, %v2936_v26 }
 0x50e   : > { %v11457_v23 = vpop.eup %9367  ;;  %9377 = vpow2.f32 %v3032_v56 }
 0x50f   : > { %13986 = vst [vmem:[#allocation41_spill] sm:$0xff] %v11457_v23  ;;  %v2945_v28 = vpop.xlane.xlu1 %2944  ;;  %v3123_v44 = vsel %vm1934_vm5, %v11457_v23, 0.0  ;;  %v11464_v7 = vpop.eup %9369  ;;  %v3040_v23 = vmul.f32 1.442695, %v2986_v39 }
 0x510   : > { %v2989_v29 = vsub.f32 %v11136_v50, %v2945_v28  ;;  %3124 = vadd.xlane.f32.xlu1 %v3123_v44  ;;  %3091 = vadd.xlane.f32.xlu0 %v3090_v59  ;;  %v3096_v33 = vsel %vm1934_vm5, %v11464_v7, 0.0  ;;  %v11470_v25 = vpop.eup %9371  ;;  %v13989_v50 = vld [vmem:[#allocation49_spill] sm:$0xff] }
 0x511   : > { %v3102_v26 = vsel %vm1934_vm5, %v11470_v25, 0.0 }
 0x512   : > { %v3046_v58 = vmul.f32 1.442695, %v2989_v29 }
 0x513   : > { %v2942_v40 = vpop.xlane.xlu1 %2941 }
 0x514   : > { %9379 = vpow2.f32 %v3046_v58  ;;  %3097 = vadd.xlane.f32.xlu0 %v3096_v33  ;;  %v2988_v28 = vsub.f32 %v13989_v50, %v2942_v40 }
 0x515   : > { %9381 = vpow2.f32 %v3036_v18 }
 0x516   : > { %v11472_v20 = vpop.eup %9373  ;;  %9383 = vpow2.f32 %v3040_v23  ;;  %v3044_v29 = vmul.f32 1.442695, %v2988_v28 }
 0x517   : > { %v2951_v44 = vpop.xlane.xlu1 %2950  ;;  %v3129_v56 = vsel %vm1934_vm5, %v11472_v20, 0.0  ;;  %v11479_v49 = vpop.eup %9375 }
 0x518   : > { %v2991_v59 = vsub.f32 %v11145_v57, %v2951_v44  ;;  %3130 = vadd.xlane.f32.xlu1 %v3129_v56  ;;  %3103 = vadd.xlane.f32.xlu0 %v3102_v26  ;;  %v3108_v39 = vsel %vm1934_vm5, %v11479_v49, 0.0  ;;  %v11484_v58 = vpop.eup %9377 }
 0x519   : > { %v3114_v28 = vsel %vm1934_vm5, %v11484_v58, 0.0 }
 0x51a   : > { %v3050_v55 = vmul.f32 1.442695, %v2991_v59 }
 0x51b   : > { %v2948_v18 = vpop.xlane.xlu1 %2947 }
 0x51c   : > { %9385 = vpow2.f32 %v3050_v55  ;;  %v2990_v40 = vsub.f32 %v11151_v6, %v2948_v18  ;;  %3109 = vadd.xlane.f32.xlu0 %v3108_v39 }
 0x51d   : > { %9387 = vpow2.f32 %v3044_v29 }
 0x51e   : > { %v11487_v33 = vpop.eup %9379  ;;  %v3048_v50 = vmul.f32 1.442695, %v2990_v40 }
 0x51f   : > { %v2957_v57 = vpop.xlane.xlu1 %2956  ;;  %v3135_v23 = vsel %vm1934_vm5, %v11487_v33, 0.0  ;;  %v11493_v44 = vpop.eup %9381 }
 0x520   : > { %v2993_v56 = vsub.f32 %v11156_v41, %v2957_v57  ;;  %3136 = vadd.xlane.f32.xlu1 %v3135_v23  ;;  %3115 = vadd.xlane.f32.xlu0 %v3114_v28  ;;  %9389 = vpow2.f32 %v3048_v50  ;;  %v3120_v29 = vsel %vm1934_vm5, %v11493_v44, 0.0  ;;  %v11498_v55 = vpop.eup %9383 }
 0x521   : > { %v2132_v26 = vpop.xlane.xlu0 %2131  ;;  %v3126_v23 = vsel %vm1934_vm5, %v11498_v55, 0.0 }
 0x522   : > { %v3054_v6 = vmul.f32 1.442695, %v2993_v56 }
 0x523   : > { %v2954_v59 = vpop.xlane.xlu1 %2953 }
 0x524   : > { %9391 = vpow2.f32 %v3054_v6  ;;  %v2992_v18 = vsub.f32 %v11161_v36, %v2954_v59  ;;  %3121 = vadd.xlane.f32.xlu0 %v3120_v29 }
 0x525   : > { %9393 = vrcp.f32 %v2132_v26  ;;  %v2129_v39 = vpop.xlane.xlu0 %2128 }
 0x526   : > { %v11501_v40 = vpop.eup %9385  ;;  %v3052_v41 = vmul.f32 1.442695, %v2992_v18  ;;  %9395 = vrcp.f32 %v2129_v39 }
 0x527   : > { %13990 = vst [vmem:[#allocation45_spill] sm:$0xff] %v11501_v40  ;;  %v2960_v57 = vpop.xlane.xlu1 %2959  ;;  %v3141_v50 = vsel %vm1934_vm5, %v11501_v40, 0.0  ;;  %v11507_v28 = vpop.eup %9387 }
 0x528   : > { %9397 = vpow2.f32 %v3052_v41  ;;  %v2994_v56 = vsub.f32 %v11170_v54, %v2960_v57  ;;  %3142 = vadd.xlane.f32.xlu1 %v3141_v50  ;;  %3127 = vadd.xlane.f32.xlu0 %v3126_v23  ;;  %v3132_v59 = vsel %vm1934_vm5, %v11507_v28, 0.0 }
 0x529   : > { %v2138_v36 = vpop.xlane.xlu0 %2137 }
 0x52a   : > { %v3056_v26 = vmul.f32 1.442695, %v2994_v56  ;;  %v11512_v29 = vpop.eup %9389 }
 0x52b   : > { %v2963_v6 = vpop.xlane.xlu1 %2962  ;;  %v3138_v50 = vsel %vm1934_vm5, %v11512_v29, 0.0 }
 0x52c   : > { %9399 = vpow2.f32 %v3056_v26  ;;  %v2995_v18 = vsub.f32 %v11182_v38, %v2963_v6  ;;  %3133 = vadd.xlane.f32.xlu0 %v3132_v59 }
 0x52d   : > { %9401 = vrcp.f32 %v2138_v36  ;;  %v2135_v39 = vpop.xlane.xlu0 %2134 }
 0x52e   : > { %v11515_v40 = vpop.eup %9391  ;;  %v3058_v41 = vmul.f32 1.442695, %v2995_v18  ;;  %9403 = vrcp.f32 %v2135_v39 }
 0x52f   : > { %v9394_v54 = vpop.eup %9393  ;;  %v3147_v57 = vsel %vm1934_vm5, %v11515_v40, 0.0 }
 0x530   : > { %v9396_v23 = vpop.eup %9395  ;;  %9405 = vpow2.f32 %v3058_v41  ;;  %3148 = vadd.xlane.f32.xlu1 %v3147_v57  ;;  %3139 = vadd.xlane.f32.xlu0 %v3138_v50  ;;  %v2256_v26 = vmul.f32 %v9394_v54, %v11165_v45  ;;  %v13992_v50 = vld [vmem:[#allocation50_spill] sm:$0xff] }
 0x531   : > { %v2144_v56 = vpop.xlane.xlu0 %2143  ;;  %v2255_v38 = vmul.f32 %v9396_v23, %v11174_v51 }
 0x532   : > { %v11522_v36 = vpop.eup %9397  ;;  %9407 = vrcp.f32 %v2144_v56 }
 0x533   : > { %8600 = vmatprep.mubr.msk.f32.mxu1 %vm1934_vm5, %v2255_v38  ;;  %v3144_v6 = vsel %vm1934_vm5, %v11522_v36, 0.0 }
 0x534   : > { %3145 = vadd.xlane.f32.xlu0 %v3144_v6  ;;  %8601 = vmatmul.mubr.msk.f32.vlgmr.msra.gmra.mrb[38].mxu1 %vm1934_vm5, %v2256_v26 }
 0x535   : > { %v2141_v59 = vpop.xlane.xlu0 %2140  ;;  %8699 = vmatpush3.msra.mxu1 %v11229_v53 }
 0x536   : > { %v11530_v18 = vpop.eup %9399  ;;  %9409 = vrcp.f32 %v2141_v59  ;;  %v13993_v59 = vld [vmem:[#allocation52_spill] sm:$0xff] }
 0x537   : > { %v9402_v51 = vpop.eup %9401  ;;  %v3150_v39 = vsel %vm1934_vm5, %v11530_v18, 0.0 }
 0x538   : > { %v9404_v45 = vpop.eup %9403  ;;  %3151 = vadd.xlane.f32.xlu0 %v3150_v39  ;;  %v2258_v23 = vmul.f32 %v9402_v51, %v13992_v50  ;;  %v13994_v39 = vld [vmem:[#allocation51_spill] sm:$0xff] }
 0x539   : > { %v2150_v41 = vpop.xlane.xlu0 %2149  ;;  %v2257_v54 = vmul.f32 %v9404_v45, %v11189_v12 }
 0x53a   : > { %v11535_v57 = vpop.eup %9405  ;;  %9411 = vrcp.f32 %v2150_v41  ;;  %v13995_v41 = vld [vmem:[#allocation54_spill] sm:$0xff] }
 0x53b   : > { %13991 = vst [vmem:[#allocation42_spill] sm:$0xff] %v11535_v57  ;;  %8603 = vmatprep.mubr.msk.f32.mxu1 %vm1934_vm5, %v2257_v54  ;;  %v3153_v53 = vsel %vm1934_vm5, %v11535_v57, 0.0 }
 0x53c   : > { %3154 = vadd.xlane.f32.xlu1 %v3153_v53  ;;  %8604 = vmatmul.mubr.msk.f32.gmra.mrb[40].mxu1 %vm1934_vm5, %v2258_v23  ;;  %v9408_v38 = vpop.eup %9407 }
 0x53d   : > { %v2147_v56 = vpop.xlane.xlu0 %2146  ;;  %v2260_v45 = vmul.f32 %v9408_v38, %v13994_v39 }
 0x53e   : > { %9413 = vrcp.f32 %v2147_v56  ;;  %v13996_v56 = vld [vmem:[#allocation53_spill] sm:$0xff] }
 0x540   : > { %v9410_v26 = vpop.eup %9409 }
 0x541   : > { %v2156_v6 = vpop.xlane.xlu0 %2155  ;;  %v2259_v12 = vmul.f32 %v9410_v26, %v13993_v59 }
 0x542   : > { %9415 = vrcp.f32 %v2156_v6 }
 0x543   : > { %8606 = vmatprep.mubr.msk.f32.mxu1 %vm1934_vm5, %v2259_v12 }
 0x544   : > { %8607 = vmatmul.mubr.msk.f32.gmra.mrb[42].mxu1 %vm1934_vm5, %v2260_v45  ;;  %v9412_v54 = vpop.eup %9411 }
 0x545   : > { %v2153_v51 = vpop.xlane.xlu0 %2152  ;;  %v2262_v57 = vmul.f32 %v9412_v54, %v13996_v56  ;;  %v411_v54 = vld [vmem:[%s13794_s3 + $0xc8] sm:$0xff] }
 0x546   : > { %9417 = vrcp.f32 %v2153_v51 }
 0x548   : > { %v9414_v50 = vpop.eup %9413 }
 0x549   : > { %v2162_v23 = vpop.xlane.xlu0 %2161  ;;  %v2261_v53 = vmul.f32 %v9414_v50, %v13995_v41 }
 0x54a   : > { %9419 = vrcp.f32 %v2162_v23  ;;  %v413_v23 = vld [vmem:[%s13794_s3 + $0xd8] sm:$0xff] }
 0x54b   : > { %8609 = vmatprep.mubr.msk.f32.mxu1 %vm1934_vm5, %v2261_v53 }
 0x54c   : > { %8610 = vmatmul.mubr.msk.f32.gmra.mrb[44].mxu1 %vm1934_vm5, %v2262_v57  ;;  %v9416_v38 = vpop.eup %9415  ;;  %v410_v57 = vld [vmem:[%s13794_s3 + $0xc0] sm:$0xff] }
 0x54d   : > { %v2159_v26 = vpop.xlane.xlu0 %2158  ;;  %v2264_v39 = vmul.f32 %v9416_v38, %v11226_v15  ;;  %v2192_v51 = vpop.xlane.xlu1 %2191  ;;  %v9214_v50 = vpack.c.bf16 %v411_v54, %v410_v57 }
 0x54e   : > { %9421 = vrcp.f32 %v2159_v26 }
 0x54f   : > { %9215 = vmatprep.subr.bf16.mxu0 %v9214_v50 }
 0x550   : > { %v9418_v59 = vpop.eup %9417  ;;  %9217 = vmatpush3.bf16.msra.mxu0 %v9214_v50 }
 0x551   : > { %v2168_v12 = vpop.xlane.xlu0 %2167  ;;  %v2263_v6 = vmul.f32 %v9418_v59, %v11234_v43  ;;  %v412_v43 = vld [vmem:[%s13794_s3 + $0xd0] sm:$0xff]  ;;  %v2198_v59 = vpop.xlane.xlu1 %2197 }
 0x552   : > { %9423 = vrcp.f32 %v2168_v12  ;;  %v9218_v56 = vpack.c.bf16 %v413_v23, %v412_v43 }
 0x553   : > { %8612 = vmatprep.mubr.msk.f32.mxu1 %vm1934_vm5, %v2263_v6 }
 0x554   : > { %8613 = vmatmul.mubr.msk.f32.gmra.mrb[46].mxu1 %vm1934_vm5, %v2264_v39  ;;  %v9420_v15 = vpop.eup %9419  ;;  %9219 = vmatprep.subr.bf16.mxu0 %v9218_v56 }
 0x555   : > { %v2165_v45 = vpop.xlane.xlu0 %2164  ;;  %v2266_v38 = vmul.f32 %v9420_v15, %v11243_v19  ;;  %9221 = vmatpush3.bf16.msra.mxu0 %v9218_v56  ;;  %v2204_v57 = vpop.xlane.xlu1 %2203 }
 0x556   : > { %9425 = vrcp.f32 %v2165_v45 }
 0x558   : > { %v9422_v41 = vpop.eup %9421 }
 0x559   : > { %v2174_v53 = vpop.xlane.xlu0 %2173  ;;  %v2265_v26 = vmul.f32 %v9422_v41, %v11252_v22  ;;  %v2210_v15 = vpop.xlane.xlu1 %2209 }
 0x55a   : > { %9427 = vrcp.f32 %v2174_v53 }
 0x55b   : > { %8615 = vmatprep.mubr.msk.f32.mxu1 %vm1934_vm5, %v2265_v26 }
 0x55c   : > { %8616 = vmatmul.mubr.msk.f32.gmra.mrb[48].mxu1 %vm1934_vm5, %v2266_v38  ;;  %v9424_v6 = vpop.eup %9423 }
 0x55d   : > { %v2171_v12 = vpop.xlane.xlu0 %2170  ;;  %v2268_v54 = vmul.f32 %v9424_v6, %v11263_v4 }
 0x55e   : > { %9429 = vrcp.f32 %v2171_v12 }
 0x560   : > { %v9426_v39 = vpop.eup %9425 }
 0x561   : > { %v2180_v45 = vpop.xlane.xlu0 %2179  ;;  %v2267_v22 = vmul.f32 %v9426_v39, %v11276_v60  ;;  %v2216_v60 = vpop.xlane.xlu1 %2215 }
 0x562   : > { %9431 = vrcp.f32 %v2180_v45 }
 0x563   : > { %8618 = vmatprep.mubr.msk.f32.mxu1 %vm1934_vm5, %v2267_v22 }
 0x564   : > { %8619 = vmatmul.mubr.msk.f32.gmra.mrb[50].mxu1 %vm1934_vm5, %v2268_v54  ;;  %v9428_v43 = vpop.eup %9427 }
 0x565   : > { %v2177_v19 = vpop.xlane.xlu0 %2176  ;;  %v2270_v53 = vmul.f32 %v9428_v43, %v11289_v52 }
 0x566   : > { %9433 = vrcp.f32 %v2177_v19 }
 0x568   : > { %v9430_v50 = vpop.eup %9429 }
 0x569   : > { %v2186_v23 = vpop.xlane.xlu0 %2185  ;;  %v2269_v41 = vmul.f32 %v9430_v50, %v11300_v16  ;;  %v2222_v16 = vpop.xlane.xlu1 %2221 }
 0x56a   : > { %9435 = vrcp.f32 %v2186_v23 }
 0x56b   : > { %8621 = vmatprep.mubr.msk.f32.mxu1 %vm1934_vm5, %v2269_v41 }
 0x56c   : > { %8622 = vmatmul.mubr.msk.f32.gmra.mrb[52].mxu1 %vm1934_vm5, %v2270_v53  ;;  %v9432_v56 = vpop.eup %9431 }
 0x56d   : > { %v2183_v4 = vpop.xlane.xlu0 %2182  ;;  %v2272_v6 = vmul.f32 %v9432_v56, %v11313_v34  ;;  %v3065_v54 = vpop.xlane.xlu1 %3064 }
 0x56e   : > { %9437 = vrcp.f32 %v2183_v4 }
 0x56f   : > { %9439 = vrcp.f32 %v2192_v51 }
 0x570   : > { %v9434_v26 = vpop.eup %9433 }
 0x571   : > { %v2189_v38 = vpop.xlane.xlu0 %2188  ;;  %v2271_v12 = vmul.f32 %v9434_v26, %v11326_v24  ;;  %v3071_v23 = vpop.xlane.xlu1 %3070 }
 0x572   : > { %9441 = vrcp.f32 %v2189_v38 }
 0x573   : > { %8624 = vmatprep.mubr.msk.f32.mxu1 %vm1934_vm5, %v2271_v12  ;;  %9443 = vrcp.f32 %v2198_v59 }
 0x574   : > { %8625 = vmatmul.mubr.msk.f32.gmra.mrb[54].mxu1 %vm1934_vm5, %v2272_v6  ;;  %v9436_v39 = vpop.eup %9435 }
 0x575   : > { %v2195_v52 = vpop.xlane.xlu0 %2194  ;;  %v2274_v24 = vmul.f32 %v9436_v39, %v11337_v62  ;;  %v3077_v4 = vpop.xlane.xlu1 %3076 }
 0x576   : > { %9445 = vrcp.f32 %v2195_v52 }
 0x577   : > { %9447 = vrcp.f32 %v2204_v57 }
 0x578   : > { %v9438_v45 = vpop.eup %9437 }
 0x579   : > { %v2201_v22 = vpop.xlane.xlu0 %2200  ;;  %v2273_v51 = vmul.f32 %v9438_v45, %v11348_v1  ;;  %v9440_v19 = vpop.eup %9439 }
 0x57a   : > { %9449 = vrcp.f32 %v2201_v22  ;;  %v2276_v50 = vmul.f32 %v9440_v19, %v11255_v9  ;;  %v3083_v52 = vpop.xlane.xlu1 %3082 }
 0x57b   : > { %8627 = vmatprep.mubr.msk.f32.mxu1 %vm1934_vm5, %v2273_v51  ;;  %9451 = vrcp.f32 %v2210_v15 }
 0x57c   : > { %v9442_v34 = vpop.eup %9441  ;;  %8628 = vmatmul.mubr.msk.f32.gmra.mrb[56].mxu1 %vm1934_vm5, %v2274_v24 }
 0x57d   : > { %v2207_v43 = vpop.xlane.xlu0 %2206  ;;  %v2275_v59 = vmul.f32 %v9442_v34, %v11359_v21  ;;  %v9444_v57 = vpop.eup %9443 }
 0x57e   : > { %9453 = vrcp.f32 %v2207_v43  ;;  %v2278_v53 = vmul.f32 %v9444_v57, %v11268_v31  ;;  %v3089_v22 = vpop.xlane.xlu1 %3088 }
 0x57f   : > { %8630 = vmatprep.mubr.msk.f32.mxu1 %vm1934_vm5, %v2275_v59  ;;  %9455 = vrcp.f32 %v2216_v60 }
 0x580   : > { %v9446_v1 = vpop.eup %9445  ;;  %8631 = vmatmul.mubr.msk.f32.gmra.mrb[58].mxu1 %vm1934_vm5, %v2276_v50 }
 0x581   : > { %v2213_v62 = vpop.xlane.xlu0 %2212  ;;  %v2277_v41 = vmul.f32 %v9446_v1, %v11372_v10  ;;  %v9448_v15 = vpop.eup %9447 }
 0x582   : > { %9457 = vrcp.f32 %v2213_v62  ;;  %v2280_v60 = vmul.f32 %v9448_v15, %v11279_v37  ;;  %v3095_v59 = vpop.xlane.xlu1 %3094 }
 0x583   : > { %8633 = vmatprep.mubr.msk.f32.mxu1 %vm1934_vm5, %v2277_v41  ;;  %9459 = vrcp.f32 %v2222_v16 }
 0x584   : > { %v9450_v21 = vpop.eup %9449  ;;  %8634 = vmatmul.mubr.msk.f32.gmra.mrb[60].mxu1 %vm1934_vm5, %v2278_v53 }
 0x585   : > { %v2219_v9 = vpop.xlane.xlu0 %2218  ;;  %v2279_v56 = vmul.f32 %v9450_v21, %v11381_v13  ;;  %v9452_v26 = vpop.eup %9451 }
 0x586   : > { %9461 = vrcp.f32 %v2219_v9  ;;  %v2282_v6 = vmul.f32 %v9452_v26, %v11292_v27  ;;  %v3101_v62 = vpop.xlane.xlu1 %3100 }
 0x587   : > { %8636 = vmatprep.mubr.msk.f32.mxu1 %vm1934_vm5, %v2279_v56  ;;  %9463 = vrcp.f32 %v3065_v54 }
 0x588   : > { %v9454_v10 = vpop.eup %9453  ;;  %8637 = vmatmul.mubr.msk.f32.gmra.mrb[62].mxu1 %vm1934_vm5, %v2280_v60 }
 0x589   : > { %v3062_v31 = vpop.xlane.xlu0 %3061  ;;  %v2281_v38 = vmul.f32 %v9454_v10, %v11393_v5  ;;  %v9456_v12 = vpop.eup %9455 }
 0x58a   : > { %9465 = vrcp.f32 %v3062_v31  ;;  %v2284_v39 = vmul.f32 %v9456_v12, %v11305_v30  ;;  %v3107_v15 = vpop.xlane.xlu1 %3106 }
 0x58b   : > { %8639 = vmatprep.mubr.msk.f32.mxu1 %vm1934_vm5, %v2281_v38  ;;  %9467 = vrcp.f32 %v3071_v23 }
 0x58c   : > { %v9458_v16 = vpop.eup %9457  ;;  %8640 = vmatmul.mubr.msk.f32.gmra.mrb[64].mxu1 %vm1934_vm5, %v2282_v6 }
 0x58d   : > { %v3068_v37 = vpop.xlane.xlu0 %3067  ;;  %v2283_v13 = vmul.f32 %v9458_v16, %v11402_v48  ;;  %v9460_v45 = vpop.eup %9459 }
 0x58e   : > { %9469 = vrcp.f32 %v3068_v37  ;;  %v2286_v24 = vmul.f32 %v9460_v45, %v11316_v63  ;;  %v3113_v60 = vpop.xlane.xlu1 %3112  ;;  %v13997_v37 = vld [vmem:[#allocation55_spill] sm:$0xff] }
 0x58f   : > { %8642 = vmatprep.mubr.msk.f32.mxu1 %vm1934_vm5, %v2283_v13  ;;  %9471 = vrcp.f32 %v3077_v4 }
 0x590   : > { %v9462_v5 = vpop.eup %9461  ;;  %8643 = vmatmul.mubr.msk.f32.gmra.mrb[66].mxu1 %vm1934_vm5, %v2284_v39 }
 0x591   : > { %v3074_v27 = vpop.xlane.xlu0 %3073  ;;  %v2285_v54 = vmul.f32 %v9462_v5, %v11408_v14  ;;  %v9464_v51 = vpop.eup %9463 }
 0x592   : > { %9473 = vrcp.f32 %v3074_v27  ;;  %v3189_v34 = vmul.f32 %v9464_v51, %v11329_v46 }
 0x593   : > { %8645 = vmatprep.mubr.msk.f32.mxu1 %vm1934_vm5, %v2285_v54  ;;  %9475 = vrcp.f32 %v3083_v52 }
 0x594   : > { %v9466_v48 = vpop.eup %9465  ;;  %8646 = vmatmul.mubr.msk.f32.gmra.mrb[68].mxu1 %vm1934_vm5, %v2286_v24 }
 0x595   : > { %v3080_v19 = vpop.xlane.xlu0 %3079  ;;  %v3188_v30 = vmul.f32 %v9466_v48, %v11417_v8  ;;  %v9468_v43 = vpop.eup %9467 }
 0x596   : > { %9477 = vrcp.f32 %v3080_v19  ;;  %v3191_v23 = vmul.f32 %v9468_v43, %v11340_v2  ;;  %v3119_v31 = vpop.xlane.xlu1 %3118  ;;  %v13999_v19 = vld [vmem:[#allocation39_spill] sm:$0xff] }
 0x597   : > { %8700 = vmatprep.mubr.msk.f32.mxu1 %vm1934_vm5, %v3188_v30  ;;  %9479 = vrcp.f32 %v3089_v22  ;;  %v13998_v22 = vld [vmem:[#allocation38_spill] sm:$0xff] }
 0x598   : > { %v9470_v14 = vpop.eup %9469  ;;  %8701 = vmatmul.mubr.msk.f32.vlgmr.msra.gmra.mrb[70].mxu1 %vm1934_vm5, %v3189_v34 }
 0x599   : > { %v3086_v63 = vpop.xlane.xlu0 %3085  ;;  %v3190_v50 = vmul.f32 %v9470_v14, %v11423_v17  ;;  %v9472_v57 = vpop.eup %9471 }
 0x59a   : > { %9481 = vrcp.f32 %v3086_v63  ;;  %v3193_v41 = vmul.f32 %v9472_v57, %v11351_v35 }
 0x59b   : > { %8703 = vmatprep.mubr.msk.f32.mxu1 %vm1934_vm5, %v3190_v50  ;;  %9483 = vrcp.f32 %v3095_v59  ;;  %v14000_v50 = vld [vmem:[#allocation40_spill] sm:$0xff] }
 0x59c   : > { %v9474_v8 = vpop.eup %9473  ;;  %8704 = vmatmul.mubr.msk.f32.gmra.mrb[72].mxu1 %vm1934_vm5, %v3191_v23 }
 0x59d   : > { %v3092_v46 = vpop.xlane.xlu0 %3091  ;;  %v3192_v1 = vmul.f32 %v9474_v8, %v11433_v3  ;;  %v9476_v53 = vpop.eup %9475 }
 0x59e   : > { %9485 = vrcp.f32 %v3092_v46  ;;  %v3195_v3 = vmul.f32 %v9476_v53, %v11362_v42  ;;  %v3125_v52 = vpop.xlane.xlu1 %3124 }
 0x59f   : > { %8706 = vmatprep.mubr.msk.f32.mxu1 %vm1934_vm5, %v3192_v1  ;;  %9487 = vrcp.f32 %v3101_v62  ;;  %v14001_v1 = vld [vmem:[#allocation41_spill] sm:$0xff] }
 0x5a0   : > { %v9478_v17 = vpop.eup %9477  ;;  %8707 = vmatmul.mubr.msk.f32.gmra.mrb[74].mxu1 %vm1934_vm5, %v3193_v41 }
 0x5a1   : > { %v3098_v2 = vpop.xlane.xlu0 %3097  ;;  %v3194_v21 = vmul.f32 %v9478_v17, %v11440_v32  ;;  %v9480_v9 = vpop.eup %9479 }
 0x5a2   : > { %9489 = vrcp.f32 %v3098_v2  ;;  %v3197_v26 = vmul.f32 %v9480_v9, %v11374_v0 }
 0x5a3   : > { %8709 = vmatprep.mubr.msk.f32.mxu1 %vm1934_vm5, %v3194_v21  ;;  %9491 = vrcp.f32 %v3107_v15 }
 0x5a4   : > { %v9482_v4 = vpop.eup %9481  ;;  %8710 = vmatmul.mubr.msk.f32.gmra.mrb[76].mxu1 %vm1934_vm5, %v3195_v3 }
 0x5a5   : > { %v3104_v56 = vpop.xlane.xlu0 %3103  ;;  %v3196_v35 = vmul.f32 %v9482_v4, %v11449_v47  ;;  %v9484_v10 = vpop.eup %9483 }
 0x5a6   : > { %9493 = vrcp.f32 %v3104_v56  ;;  %v3199_v47 = vmul.f32 %v9484_v10, %v11384_v61  ;;  %v3131_v45 = vpop.xlane.xlu1 %3130 }
 0x5a7   : > { %8712 = vmatprep.mubr.msk.f32.mxu1 %vm1934_vm5, %v3196_v35  ;;  %9495 = vrcp.f32 %v3113_v60  ;;  %v14002_v60 = vld [vmem:[#allocation45_spill] sm:$0xff] }
 0x5a8   : > { %v9486_v32 = vpop.eup %9485  ;;  %8713 = vmatmul.mubr.msk.f32.gmra.mrb[78].mxu1 %vm1934_vm5, %v3197_v26 }
 0x5a9   : > { %v3110_v42 = vpop.xlane.xlu0 %3109  ;;  %v3198_v38 = vmul.f32 %v9486_v32, %v11455_v11  ;;  %v9488_v12 = vpop.eup %9487 }
 0x5aa   : > { %9497 = vrcp.f32 %v3110_v42  ;;  %v3201_v13 = vmul.f32 %v9488_v12, %v13997_v37 }
 0x5ab   : > { %8715 = vmatprep.mubr.msk.f32.mxu1 %vm1934_vm5, %v3198_v38  ;;  %9499 = vrcp.f32 %v3119_v31  ;;  %v14003_v31 = vld [vmem:[#allocation42_spill] sm:$0xff] }
 0x5ac   : > { %v9490_v6 = vpop.eup %9489  ;;  %8716 = vmatmul.mubr.msk.f32.gmra.mrb[80].mxu1 %vm1934_vm5, %v3199_v47 }
 0x5ad   : > { %v3116_v16 = vpop.xlane.xlu0 %3115  ;;  %v3200_v0 = vmul.f32 %v9490_v6, %v11464_v7  ;;  %v9492_v39 = vpop.eup %9491 }
 0x5ae   : > { %9501 = vrcp.f32 %v3116_v16  ;;  %v3203_v7 = vmul.f32 %v9492_v39, %v13998_v22  ;;  %v3137_v48 = vpop.xlane.xlu1 %3136  ;;  %v416_v39 = vld [vmem:[%s13794_s3 + $0xe8] sm:$0xff] }
 0x5af   : > { %8718 = vmatprep.mubr.msk.f32.mxu1 %vm1934_vm5, %v3200_v0  ;;  %9503 = vrcp.f32 %v3125_v52 }
 0x5b0   : > { %v9494_v11 = vpop.eup %9493  ;;  %8719 = vmatmul.mubr.msk.f32.gmra.mrb[82].mxu1 %vm1934_vm5, %v3201_v13  ;;  %v415_v13 = vld [vmem:[%s13794_s3 + $0xe0] sm:$0xff] }
 0x5b1   : > { %v3122_v61 = vpop.xlane.xlu0 %3121  ;;  %v3202_v5 = vmul.f32 %v9494_v11, %v11470_v25  ;;  %v9496_v27 = vpop.eup %9495  ;;  %v9222_v11 = vpack.c.bf16 %v416_v39, %v415_v13  ;;  %v14005_v39 = vld [vmem:[#allocation7_spill] sm:$0xff] }
 0x5b2   : > { %9505 = vrcp.f32 %v3122_v61  ;;  %v3205_v30 = vmul.f32 %v9496_v27, %v13999_v19 }
 0x5b3   : > { %8721 = vmatprep.mubr.msk.f32.mxu1 %vm1934_vm5, %v3202_v5  ;;  %9507 = vrcp.f32 %v3131_v45  ;;  %9223 = vmatprep.subr.bf16.mxu1 %v9222_v11 }
 0x5b4   : > { %v9498_v54 = vpop.eup %9497  ;;  %8722 = vmatmul.mubr.msk.f32.gmra.mrb[84].mxu1 %vm1934_vm5, %v3203_v7 }
 0x5b5   : > { %v3128_v51 = vpop.xlane.xlu0 %3127  ;;  %v3204_v24 = vmul.f32 %v9498_v54, %v11479_v49  ;;  %v9500_v34 = vpop.eup %9499  ;;  %9225 = vmatpush3.bf16.msra.mxu1 %v9222_v11 }
 0x5b6   : > { %9509 = vrcp.f32 %v3128_v51  ;;  %v3143_v59 = vpop.xlane.xlu1 %3142  ;;  %v3207_v49 = vmul.f32 %v9500_v34, %v14000_v50 }
 0x5b7   : > { %8724 = vmatprep.mubr.msk.f32.mxu1 %vm1934_vm5, %v3204_v24  ;;  %9511 = vrcp.f32 %v3137_v48 }
 0x5b8   : > { %v9502_v25 = vpop.eup %9501  ;;  %8725 = vmatmul.mubr.msk.f32.gmra.mrb[86].mxu1 %vm1934_vm5, %v3205_v30 }
 0x5b9   : > { %v3134_v43 = vpop.xlane.xlu0 %3133  ;;  %v3206_v14 = vmul.f32 %v9502_v25, %v11484_v58  ;;  %v9504_v63 = vpop.eup %9503 }
 0x5ba   : > { %9513 = vrcp.f32 %v3134_v43  ;;  %v3209_v62 = vmul.f32 %v9504_v63, %v14001_v1  ;;  %v418_v63 = vld [vmem:[%s13794_s3 + $0xf8] sm:$0xff] }
 0x5bb   : > { %8727 = vmatprep.mubr.msk.f32.mxu1 %vm1934_vm5, %v3206_v14  ;;  %9515 = vrcp.f32 %v3143_v59  ;;  %v417_v14 = vld [vmem:[%s13794_s3 + $0xf0] sm:$0xff] }
 0x5bc   : > { %v9506_v57 = vpop.eup %9505  ;;  %8728 = vmatmul.mubr.msk.f32.gmra.mrb[88].mxu1 %vm1934_vm5, %v3207_v49  ;;  %v9226_v50 = vpack.c.bf16 %v418_v63, %v417_v14 }
 0x5bd   : > { %v3140_v23 = vpop.xlane.xlu0 %3139  ;;  %v3208_v8 = vmul.f32 %v9506_v57, %v11493_v44  ;;  %v3149_v46 = vpop.xlane.xlu1 %3148 }
 0x5be   : > { %9517 = vrcp.f32 %v3140_v23  ;;  %v9508_v41 = vpop.eup %9507  ;;  %9227 = vmatprep.subr.bf16.mxu1 %v9226_v50 }
 0x5bf   : > { %8730 = vmatprep.mubr.msk.f32.mxu1 %vm1934_vm5, %v3208_v8  ;;  %9519 = vrcp.f32 %v3149_v46  ;;  %v3211_v15 = vmul.f32 %v9508_v41, %v11472_v20  ;;  %9229 = vmatpush3.bf16.msra.mxu1 %v9226_v50 }
 0x5c0   : > { %v9510_v58 = vpop.eup %9509  ;;  %8731 = vmatmul.mubr.msk.f32.gmra.mrb[90].mxu1 %vm1934_vm5, %v3209_v62 }
 0x5c1   : > { %v3146_v53 = vpop.xlane.xlu0 %3145  ;;  %v3210_v17 = vmul.f32 %v9510_v58, %v11498_v55  ;;  %v9512_v2 = vpop.eup %9511 }
 0x5c2   : > { %9521 = vrcp.f32 %v3146_v53  ;;  %v3213_v3 = vmul.f32 %v9512_v2, %v11487_v33 }
 0x5c3   : > { %8733 = vmatprep.mubr.msk.f32.mxu1 %vm1934_vm5, %v3210_v17 }
 0x5c4   : > { %v9514_v44 = vpop.eup %9513  ;;  %8734 = vmatmul.mubr.msk.f32.gmra.mrb[92].mxu1 %vm1934_vm5, %v3211_v15 }
 0x5c5   : > { %v3152_v21 = vpop.xlane.xlu0 %3151  ;;  %v3212_v9 = vmul.f32 %v9514_v44, %v11507_v28  ;;  %v9516_v4 = vpop.eup %9515 }
 0x5c6   : > { %9523 = vrcp.f32 %v3152_v21  ;;  %v3215_v26 = vmul.f32 %v9516_v4, %v14002_v60 }
 0x5c7   : > { %8736 = vmatprep.mubr.msk.f32.mxu1 %vm1934_vm5, %v3212_v9 }
 0x5c8   : > { %v9518_v56 = vpop.eup %9517  ;;  %8737 = vmatmul.mubr.msk.f32.gmra.mrb[94].mxu1 %vm1934_vm5, %v3213_v3 }
 0x5c9   : > { %v3155_v55 = vpop.xlane.xlu1 %3154  ;;  %v3214_v20 = vmul.f32 %v9518_v56, %v11512_v29  ;;  %v9520_v35 = vpop.eup %9519 }
 0x5ca   : > { %9525 = vrcp.f32 %v3155_v55  ;;  %v3217_v33 = vmul.f32 %v9520_v35, %v11515_v40 }
 0x5cb   : > { %8739 = vmatprep.mubr.msk.f32.mxu1 %vm1934_vm5, %v3214_v20 }
 0x5cc   : > { %v9522_v10 = vpop.eup %9521  ;;  %8740 = vmatmul.mubr.msk.f32.gmra.mrb[96].mxu1 %vm1934_vm5, %v3215_v26 }
 0x5cd   : > { %v3216_v28 = vmul.f32 %v9522_v10, %v11522_v36 }
 0x5cf   : > { %8742 = vmatprep.mubr.msk.f32.mxu1 %vm1934_vm5, %v3216_v28 }
 0x5d0   : > { %v9524_v32 = vpop.eup %9523  ;;  %8743 = vmatmul.mubr.msk.f32.gmra.mrb[98].mxu1 %vm1934_vm5, %v3217_v33 }
 0x5d1   : > { %v3218_v42 = vmul.f32 %v9524_v32, %v11530_v18 }
 0x5d3   : > { %8745 = vmatprep.mubr.msk.f32.mxu1 %vm1934_vm5, %v3218_v42 }
 0x5d4   : > { %v9526_v29 = vpop.eup %9525 }
 0x5d5   : > { %v3219_v38 = vmul.f32 %v9526_v29, %v14003_v31 }
 0x5d7   : > { %8746 = vmatmul.mubr.msk.f32.gmra.mrb[100].mxu1 %vm1934_vm5, %v3219_v38 }
 0x607   : > { %v8602_v12 = vpop.f32.mrb[38].mxu1 }
 0x608   : > { %v2449_v47 = vpop.f32.mrb[39].mxu1 }
 0x609   : > { %8756 = vmatprep.mubr.msk.f32.mxu0 %vm435_vm2, %v2449_v47 }
 0x60a   : > { %8757 = vmatmul.mubr.msk.f32.vlgmr.msra.gmra.mrb[100].mxu0 %vm435_vm2, %v8602_v12 }
 0x60f   : > { %v8605_v36 = vpop.f32.mrb[40].mxu1 }
 0x610   : > { %v2459_v40 = vpop.f32.mrb[41].mxu1 }
 0x611   : > { %8759 = vmatprep.mubr.msk.f32.mxu0 %vm435_vm2, %v2459_v40 }
 0x612   : > { %8760 = vmatmul.mubr.msk.f32.gmra.mrb[102].mxu0 %vm435_vm2, %v8605_v36 }
 0x617   : > { %v8608_v18 = vpop.f32.mrb[42].mxu1 }
 0x618   : > { %v2469_v6 = vpop.f32.mrb[43].mxu1 }
 0x619   : > { %8762 = vmatprep.mubr.msk.f32.mxu0 %vm435_vm2, %v2469_v6 }
 0x61a   : > { %8763 = vmatmul.mubr.msk.f32.gmra.mrb[104].mxu0 %vm435_vm2, %v8608_v18 }
 0x61f   : > { %v8611_v16 = vpop.f32.mrb[44].mxu1 }
 0x620   : > { %v2479_v0 = vpop.f32.mrb[45].mxu1 }
 0x621   : > { %8765 = vmatprep.mubr.msk.f32.mxu0 %vm435_vm2, %v2479_v0  ;;  %v11753_v0 = vld [vmem:[%s13794_s3 + $0x16c] ss:$0 sm:$0xff] }
 0x622   : > { %8766 = vmatmul.mubr.msk.f32.gmra.mrb[106].mxu0 %vm435_vm2, %v8611_v16 }
 0x627   : > { %v8614_v52 = vpop.f32.mrb[46].mxu1 }
 0x628   : > { %v2489_v37 = vpop.f32.mrb[47].mxu1 }
 0x629   : > { %8768 = vmatprep.mubr.msk.f32.mxu0 %vm435_vm2, %v2489_v37 }
 0x62a   : > { %8769 = vmatmul.mubr.msk.f32.gmra.mrb[108].mxu0 %vm435_vm2, %v8614_v52  ;;  %v14004_v52 = vld [vmem:[#allocation6_spill] sm:$0xff] }
 0x62f   : > { %v8617_v61 = vpop.f32.mrb[48].mxu1 }
 0x630   : > { %v2499_v45 = vpop.f32.mrb[49].mxu1 }
 0x631   : > { %8771 = vmatprep.mubr.msk.f32.mxu0 %vm435_vm2, %v2499_v45 }
 0x632   : > { %8772 = vmatmul.mubr.msk.f32.gmra.mrb[110].mxu0 %vm435_vm2, %v8617_v61 }
 0x637   : > { %v8620_v5 = vpop.f32.mrb[50].mxu1 }
 0x638   : > { %v2509_v27 = vpop.f32.mrb[51].mxu1 }
 0x639   : > { %8774 = vmatprep.mubr.msk.f32.mxu0 %vm435_vm2, %v2509_v27  ;;  %v14006_v27 = vld [vmem:[#allocation8_spill] sm:$0xff] }
 0x63a   : > { %8775 = vmatmul.mubr.msk.f32.gmra.mrb[112].mxu0 %vm435_vm2, %v8620_v5 }
 0x63f   : > { %v8623_v22 = vpop.f32.mrb[52].mxu1 }
 0x640   : > { %v2519_v7 = vpop.f32.mrb[53].mxu1 }
 0x641   : > { %8777 = vmatprep.mubr.msk.f32.mxu0 %vm435_vm2, %v2519_v7 }
 0x642   : > { %8778 = vmatmul.mubr.msk.f32.gmra.mrb[114].mxu0 %vm435_vm2, %v8623_v22 }
 0x647   : > { %v8626_v54 = vpop.f32.mrb[54].mxu1 }
 0x648   : > { %v2529_v51 = vpop.f32.mrb[55].mxu1 }
 0x649   : > { %8780 = vmatprep.mubr.msk.f32.mxu0 %vm435_vm2, %v2529_v51 }
 0x64a   : > { %8781 = vmatmul.mubr.msk.f32.gmra.mrb[116].mxu0 %vm435_vm2, %v8626_v54  ;;  %v14007_v54 = vld [vmem:[#allocation9_spill] sm:$0xff] }
 0x64f   : > { %v8629_v24 = vpop.f32.mrb[56].mxu1 }
 0x650   : > { %v2539_v48 = vpop.f32.mrb[57].mxu1 }
 0x651   : > { %8783 = vmatprep.mubr.msk.f32.mxu0 %vm435_vm2, %v2539_v48 }
 0x652   : > { %8784 = vmatmul.mubr.msk.f32.gmra.mrb[118].mxu0 %vm435_vm2, %v8629_v24 }
 0x653   : > { %v8632_v19 = vpop.f32.mrb[58].mxu1 }
 0x654   : > { %v2549_v30 = vpop.f32.mrb[59].mxu1 }
 0x655   : > { %8786 = vmatprep.mubr.msk.f32.mxu0 %vm435_vm2, %v2549_v30  ;;  %v14008_v30 = vld [vmem:[#allocation10_spill] sm:$0xff] }
 0x656   : > { %8787 = vmatmul.mubr.msk.f32.gmra.mrb[120].mxu0 %vm435_vm2, %v8632_v19 }
 0x657   : > { %v8635_v34 = vpop.f32.mrb[60].mxu1 }
 0x658   : > { %v2559_v25 = vpop.f32.mrb[61].mxu1 }
 0x659   : > { %8789 = vmatprep.mubr.msk.f32.mxu0 %vm435_vm2, %v2559_v25 }
 0x65a   : > { %8790 = vmatmul.mubr.msk.f32.gmra.mrb[122].mxu0 %vm435_vm2, %v8635_v34 }
 0x65b   : > { %v8638_v43 = vpop.f32.mrb[62].mxu1 }
 0x65c   : > { %v2569_v59 = vpop.f32.mrb[63].mxu1 }
 0x65d   : > { %8792 = vmatprep.mubr.msk.f32.mxu0 %vm435_vm2, %v2569_v59 }
 0x65e   : > { %8793 = vmatmul.mubr.msk.f32.gmra.mrb[124].mxu0 %vm435_vm2, %v8638_v43  ;;  %v14009_v43 = vld [vmem:[#allocation11_spill] sm:$0xff] }
 0x65f   : > { %v8641_v49 = vpop.f32.mrb[64].mxu1 }
 0x660   : > { %v2579_v57 = vpop.f32.mrb[65].mxu1 }
 0x661   : > { %8795 = vmatprep.mubr.msk.f32.mxu0 %vm435_vm2, %v2579_v57 }
 0x662   : > { %8796 = vmatmul.mubr.msk.f32.gmra.mrb[126].mxu0 %vm435_vm2, %v8641_v49  ;;  %v14010_v49 = vld [vmem:[#allocation12_spill] sm:$0xff] }
 0x663   : > { %v8644_v23 = vpop.f32.mrb[66].mxu1 }
 0x664   : > { %v2589_v8 = vpop.f32.mrb[67].mxu1 }
 0x665   : > { %8798 = vmatprep.mubr.msk.f32.mxu0 %vm435_vm2, %v2589_v8  ;;  %v14011_v8 = vld [vmem:[#allocation13_spill] sm:$0xff] }
 0x666   : > { %8799 = vmatmul.mubr.msk.f32.gmra.mrb[128].mxu0 %vm435_vm2, %v8644_v23 }
 0x667   : > { %v8647_v46 = vpop.f32.mrb[68].mxu1 }
 0x668   : > { %v2599_v1 = vpop.f32.mrb[69].mxu1 }
 0x669   : > { %8801 = vmatprep.mubr.msk.f32.mxu0 %vm435_vm2, %v2599_v1 }
 0x66a   : > { %8802 = vmatmul.mubr.msk.f32.gmra.mrb[130].mxu0 %vm435_vm2, %v8647_v46 }
 0x66b   : > { %v8702_v62 = vpop.f32.mrb[70].mxu1 }
 0x66c   : > { %v3382_v41 = vpop.f32.mrb[71].mxu1 }
 0x66d   : > { %8804 = vmatprep.mubr.msk.f32.mxu0 %vm435_vm2, %v3382_v41 }
 0x66e   : > { %8805 = vmatmul.mubr.msk.f32.gmra.mrb[132].mxu0 %vm435_vm2, %v8702_v62 }
 0x66f   : > { %v8705_v58 = vpop.f32.mrb[72].mxu1 }
 0x670   : > { %v3392_v53 = vpop.f32.mrb[73].mxu1 }
 0x671   : > { %8807 = vmatprep.mubr.msk.f32.mxu0 %vm435_vm2, %v3392_v53 }
 0x672   : > { %8808 = vmatmul.mubr.msk.f32.gmra.mrb[134].mxu0 %vm435_vm2, %v8705_v58  ;;  %v14012_v58 = vld [vmem:[#allocation14_spill] sm:$0xff] }
 0x673   : > { %v8708_v17 = vpop.f32.mrb[74].mxu1 }
 0x674   : > { %v3402_v2 = vpop.f32.mrb[75].mxu1 }
 0x675   : > { %8810 = vmatprep.mubr.msk.f32.mxu0 %vm435_vm2, %v3402_v2  ;;  %v420_v2 = vld [vmem:[%s13794_s3 + $0x100] sm:$0xff] }
 0x676   : > { %8811 = vmatmul.mubr.msk.f32.gmra.mrb[136].mxu0 %vm435_vm2, %v8708_v17 }
 0x677   : > { %v8711_v15 = vpop.f32.mrb[76].mxu1 }
 0x678   : > { %v3412_v44 = vpop.f32.mrb[77].mxu1 }
 0x679   : > { %8813 = vmatprep.mubr.msk.f32.mxu0 %vm435_vm2, %v3412_v44  ;;  %v14013_v44 = vld [vmem:[#allocation15_spill] sm:$0xff] }
 0x67a   : > { %8814 = vmatmul.mubr.msk.f32.gmra.mrb[138].mxu0 %vm435_vm2, %v8711_v15  ;;  %v421_v15 = vld [vmem:[%s13794_s3 + $0x108] sm:$0xff] }
 0x67b   : > { %v8714_v21 = vpop.f32.mrb[78].mxu1 }
 0x67c   : > { %v3422_v9 = vpop.f32.mrb[79].mxu1 }
 0x67d   : > { %8816 = vmatprep.mubr.msk.f32.mxu0 %vm435_vm2, %v3422_v9  ;;  %v9230_v9 = vpack.c.bf16 %v421_v15, %v420_v2  ;;  %v14023_v2 = vld [vmem:[#allocation25_spill] sm:$0xff] }
 0x67e   : > { %8817 = vmatmul.mubr.msk.f32.gmra.mrb[140].mxu0 %vm435_vm2, %v8714_v21 }
 0x67f   : > { %v8717_v3 = vpop.f32.mrb[80].mxu1  ;;  %9231 = vmatprep.subr.bf16.mxu0 %v9230_v9 }
 0x680   : > { %v3432_v4 = vpop.f32.mrb[81].mxu1  ;;  %9233 = vmatpush3.bf16.msra.mxu0 %v9230_v9 }
 0x681   : > { %8819 = vmatprep.mubr.msk.f32.mxu0 %vm435_vm2, %v3432_v4 }
 0x682   : > { %8820 = vmatmul.mubr.msk.f32.gmra.mrb[142].mxu0 %vm435_vm2, %v8717_v3 }
 0x683   : > { %v8720_v56 = vpop.f32.mrb[82].mxu1 }
 0x684   : > { %v3442_v55 = vpop.f32.mrb[83].mxu1 }
 0x685   : > { %8822 = vmatprep.mubr.msk.f32.mxu0 %vm435_vm2, %v3442_v55  ;;  %v14014_v55 = vld [vmem:[#allocation16_spill] sm:$0xff] }
 0x686   : > { %8823 = vmatmul.mubr.msk.f32.gmra.mrb[144].mxu0 %vm435_vm2, %v8720_v56 }
 0x687   : > { %v8723_v20 = vpop.f32.mrb[84].mxu1 }
 0x688   : > { %v3452_v35 = vpop.f32.mrb[85].mxu1 }
 0x689   : > { %8825 = vmatprep.mubr.msk.f32.mxu0 %vm435_vm2, %v3452_v35 }
 0x68a   : > { %8826 = vmatmul.mubr.msk.f32.gmra.mrb[146].mxu0 %vm435_vm2, %v8723_v20 }
 0x68b   : > { %v8726_v60 = vpop.f32.mrb[86].mxu1 }
 0x68c   : > { %v3462_v26 = vpop.f32.mrb[87].mxu1 }
 0x68d   : > { %8828 = vmatprep.mubr.msk.f32.mxu0 %vm435_vm2, %v3462_v26  ;;  %v423_v26 = vld [vmem:[%s13794_s3 + $0x118] sm:$0xff] }
 0x68e   : > { %8829 = vmatmul.mubr.msk.f32.gmra.mrb[148].mxu0 %vm435_vm2, %v8726_v60  ;;  %v422_v60 = vld [vmem:[%s13794_s3 + $0x110] sm:$0xff] }
 0x68f   : > { %v8729_v10 = vpop.f32.mrb[88].mxu1 }
 0x690   : > { %v3472_v28 = vpop.f32.mrb[89].mxu1 }
 0x691   : > { %8831 = vmatprep.mubr.msk.f32.mxu0 %vm435_vm2, %v3472_v28 }
 0x692   : > { %8832 = vmatmul.mubr.msk.f32.gmra.mrb[150].mxu0 %vm435_vm2, %v8729_v10  ;;  %v14015_v10 = vld [vmem:[#allocation17_spill] sm:$0xff] }
 0x693   : > { %v8732_v33 = vpop.f32.mrb[90].mxu1 }
 0x694   : > { %v3482_v32 = vpop.f32.mrb[91].mxu1 }
 0x695   : > { %8834 = vmatprep.mubr.msk.f32.mxu0 %vm435_vm2, %v3482_v32 }
 0x696   : > { %8835 = vmatmul.mubr.msk.f32.gmra.mrb[152].mxu0 %vm435_vm2, %v8732_v33  ;;  %v9234_v33 = vpack.c.bf16 %v423_v26, %v422_v60  ;;  %v14025_v26 = vld [vmem:[#allocation27_spill] sm:$0xff] }
 0x697   : > { %v8735_v42 = vpop.f32.mrb[92].mxu1 }
 0x698   : > { %v3492_v29 = vpop.f32.mrb[93].mxu1  ;;  %9235 = vmatprep.subr.bf16.mxu0 %v9234_v33 }
 0x699   : > { %8837 = vmatprep.mubr.msk.f32.mxu0 %vm435_vm2, %v3492_v29  ;;  %9237 = vmatpush3.bf16.msra.mxu0 %v9234_v33 }
 0x69a   : > { %8838 = vmatmul.mubr.msk.f32.gmra.mrb[154].mxu0 %vm435_vm2, %v8735_v42 }
 0x69b   : > { %v8738_v31 = vpop.f32.mrb[94].mxu1 }
 0x69c   : > { %v3502_v38 = vpop.f32.mrb[95].mxu1 }
 0x69d   : > { %8840 = vmatprep.mubr.msk.f32.mxu0 %vm435_vm2, %v3502_v38 }
 0x69e   : > { %8841 = vmatmul.mubr.msk.f32.gmra.mrb[156].mxu0 %vm435_vm2, %v8738_v31  ;;  %v14016_v31 = vld [vmem:[#allocation18_spill] sm:$0xff] }
 0x69f   : > { %v8741_v12 = vpop.f32.mrb[96].mxu1 }
 0x6a0   : > { %v3512_v47 = vpop.f32.mrb[97].mxu1 }
 0x6a1   : > { %8843 = vmatprep.mubr.msk.f32.mxu0 %vm435_vm2, %v3512_v47  ;;  %v14017_v47 = vld [vmem:[#allocation19_spill] sm:$0xff] }
 0x6a2   : > { %8844 = vmatmul.mubr.msk.f32.gmra.mrb[158].mxu0 %vm435_vm2, %v8741_v12 }
 0x6a3   : > { %v8744_v36 = vpop.f32.mrb[98].mxu1 }
 0x6a4   : > { %v3522_v40 = vpop.f32.mrb[99].mxu1 }
 0x6a5   : > { %8846 = vmatprep.mubr.msk.f32.mxu0 %vm435_vm2, %v3522_v40 }
 0x6a6   : > { %8847 = vmatmul.mubr.msk.f32.gmra.mrb[160].mxu0 %vm435_vm2, %v8744_v36 }
 0x6aa   : > { %v8747_v18 = vpop.f32.mrb[100].mxu1 }
 0x6ab   : > { %v3532_v6 = vpop.f32.mrb[101].mxu1 }
 0x6ac   : > { %8849 = vmatprep.mubr.msk.f32.mxu0 %vm435_vm2, %v3532_v6 }
 0x6ad   : > { %8850 = vmatmul.mubr.msk.f32.gmra.mrb[162].mxu0 %vm435_vm2, %v8747_v18 }
 0x6dd   : > { %v8758_v16 = vpop.f32.mrb[100].mxu0 }
 0x6de   : > { %v4119_v37 = vadd.f32 %v8758_v16, %v14004_v52  ;;  %v3799_v13 = vpop.f32.mrb[101].mxu0  ;;  %v14018_v16 = vld [vmem:[#allocation20_spill] sm:$0xff] }
 0x6df   : > { %v4118_v11 = vadd.f32 %v3799_v13, %v14005_v39 }
 0x6e0   : > { %v11761_v45 = vadd.f32 %v11753_v0, %v4119_v37 }
 0x6e1   : > { %v11758_v61 = vadd.f32 %v11753_v0, %v4118_v11  ;;  %v14019_v11 = vld [vmem:[#allocation21_spill] sm:$0xff] }
 0x6e3   : > { %8860 = vmatprep.mubr.msk.f32.mxu1 %vm435_vm2, %v11758_v61 }
 0x6e4   : > { %8861 = vmatmul.mubr.msk.f32.vlgmr.msra.gmra.mrb[102].mxu1 %vm435_vm2, %v11761_v45 }
 0x6e5   : > { %v8761_v5 = vpop.f32.mrb[102].mxu0 }
 0x6e6   : > { %v4121_v22 = vadd.f32 %v8761_v5, %v14006_v27  ;;  %v3809_v7 = vpop.f32.mrb[103].mxu0 }
 0x6e7   : > { %v4120_v51 = vadd.f32 %v3809_v7, %v14007_v54 }
 0x6e8   : > { %v11773_v48 = vadd.f32 %v11753_v0, %v4121_v22 }
 0x6e9   : > { %v11770_v24 = vadd.f32 %v11753_v0, %v4120_v51 }
 0x6eb   : > { %8863 = vmatprep.mubr.msk.f32.mxu1 %vm435_vm2, %v11770_v24 }
 0x6ec   : > { %8864 = vmatmul.mubr.msk.f32.gmra.mrb[104].mxu1 %vm435_vm2, %v11773_v48 }
 0x6ed   : > { %v8764_v19 = vpop.f32.mrb[104].mxu0 }
 0x6ee   : > { %v4123_v34 = vadd.f32 %v8764_v19, %v14008_v30  ;;  %v3819_v25 = vpop.f32.mrb[105].mxu0  ;;  %v14020_v19 = vld [vmem:[#allocation22_spill] sm:$0xff] }
 0x6ef   : > { %v4122_v59 = vadd.f32 %v3819_v25, %v14009_v43 }
 0x6f0   : > { %v11785_v63 = vadd.f32 %v11753_v0, %v4123_v34 }
 0x6f1   : > { %v11782_v14 = vadd.f32 %v11753_v0, %v4122_v59  ;;  %v14021_v59 = vld [vmem:[#allocation23_spill] sm:$0xff] }
 0x6f3   : > { %8866 = vmatprep.mubr.msk.f32.mxu1 %vm435_vm2, %v11782_v14 }
 0x6f4   : > { %8867 = vmatmul.mubr.msk.f32.gmra.mrb[106].mxu1 %vm435_vm2, %v11785_v63 }
 0x6f5   : > { %v8767_v50 = vpop.f32.mrb[106].mxu0 }
 0x6f6   : > { %v4125_v57 = vadd.f32 %v8767_v50, %v14010_v49  ;;  %v3829_v23 = vpop.f32.mrb[107].mxu0 }
 0x6f7   : > { %v4124_v46 = vadd.f32 %v3829_v23, %v14011_v8 }
 0x6f8   : > { %v11797_v62 = vadd.f32 %v11753_v0, %v4125_v57 }
 0x6f9   : > { %v11794_v1 = vadd.f32 %v11753_v0, %v4124_v46 }
 0x6fb   : > { %8869 = vmatprep.mubr.msk.f32.mxu1 %vm435_vm2, %v11794_v1 }
 0x6fc   : > { %8870 = vmatmul.mubr.msk.f32.gmra.mrb[108].mxu1 %vm435_vm2, %v11797_v62 }
 0x6fd   : > { %v8770_v41 = vpop.f32.mrb[108].mxu0 }
 0x6fe   : > { %v4127_v53 = vadd.f32 %v8770_v41, %v14012_v58  ;;  %v3839_v17 = vpop.f32.mrb[109].mxu0  ;;  %v14022_v41 = vld [vmem:[#allocation24_spill] sm:$0xff] }
 0x6ff   : > { %v4126_v21 = vadd.f32 %v3839_v17, %v14013_v44 }
 0x700   : > { %v11815_v4 = vadd.f32 %v11753_v0, %v4127_v53 }
 0x701   : > { %v11812_v3 = vadd.f32 %v11753_v0, %v4126_v21 }
 0x703   : > { %8872 = vmatprep.mubr.msk.f32.mxu1 %vm435_vm2, %v11812_v3 }
 0x704   : > { %8873 = vmatmul.mubr.msk.f32.gmra.mrb[110].mxu1 %vm435_vm2, %v11815_v4 }
 0x705   : > { %v8773_v56 = vpop.f32.mrb[110].mxu0 }
 0x706   : > { %v4129_v20 = vadd.f32 %v8773_v56, %v14014_v55  ;;  %v3849_v35 = vpop.f32.mrb[111].mxu0 }
 0x707   : > { %v4128_v28 = vadd.f32 %v3849_v35, %v14015_v10 }
 0x708   : > { %v11833_v42 = vadd.f32 %v11753_v0, %v4129_v20  ;;  %v14024_v20 = vld [vmem:[#allocation26_spill] sm:$0xff] }
 0x709   : > { %v11830_v32 = vadd.f32 %v11753_v0, %v4128_v28 }
 0x70b   : > { %8875 = vmatprep.mubr.msk.f32.mxu1 %vm435_vm2, %v11830_v32 }
 0x70c   : > { %8876 = vmatmul.mubr.msk.f32.gmra.mrb[112].mxu1 %vm435_vm2, %v11833_v42 }
 0x70d   : > { %v8776_v29 = vpop.f32.mrb[112].mxu0 }
 0x70e   : > { %v4131_v38 = vadd.f32 %v8776_v29, %v14016_v31  ;;  %v3859_v12 = vpop.f32.mrb[113].mxu0 }
 0x70f   : > { %v4130_v36 = vadd.f32 %v3859_v12, %v14017_v47  ;;  %v14028_v12 = vld [vmem:[#allocation28_spill] sm:$0xff] }
 0x710   : > { %v11845_v18 = vadd.f32 %v11753_v0, %v4131_v38 }
 0x711   : > { %v11842_v40 = vadd.f32 %v11753_v0, %v4130_v36 }
 0x713   : > { %8878 = vmatprep.mubr.msk.f32.mxu1 %vm435_vm2, %v11842_v40 }
 0x714   : > { %8879 = vmatmul.mubr.msk.f32.gmra.mrb[114].mxu1 %vm435_vm2, %v11845_v18 }
 0x715   : > { %v8779_v6 = vpop.f32.mrb[114].mxu0 }
 0x716   : > { %v4133_v37 = vadd.f32 %v8779_v6, %v14018_v16  ;;  %v3869_v13 = vpop.f32.mrb[115].mxu0 }
 0x717   : > { %v4132_v5 = vadd.f32 %v3869_v13, %v14019_v11 }
 0x718   : > { %v11857_v7 = vadd.f32 %v11753_v0, %v4133_v37  ;;  %v14029_v37 = vld [vmem:[#allocation29_spill] sm:$0xff] }
 0x719   : > { %v11854_v22 = vadd.f32 %v11753_v0, %v4132_v5 }
 0x71b   : > { %8881 = vmatprep.mubr.msk.f32.mxu1 %vm435_vm2, %v11854_v22 }
 0x71c   : > { %8882 = vmatmul.mubr.msk.f32.gmra.mrb[116].mxu1 %vm435_vm2, %v11857_v7 }
 0x71d   : > { %v8782_v51 = vpop.f32.mrb[116].mxu0 }
 0x71e   : > { %v4135_v34 = vadd.f32 %v8782_v51, %v14020_v19  ;;  %v3879_v25 = vpop.f32.mrb[117].mxu0 }
 0x71f   : > { %v4134_v50 = vadd.f32 %v3879_v25, %v14021_v59  ;;  %v14032_v25 = vld [vmem:[#allocation30_spill] sm:$0xff] }
 0x720   : > { %v11869_v23 = vadd.f32 %v11753_v0, %v4135_v34 }
 0x721   : > { %v11866_v57 = vadd.f32 %v11753_v0, %v4134_v50 }
 0x723   : > { %8884 = vmatprep.mubr.msk.f32.mxu1 %vm435_vm2, %v11866_v57 }
 0x724   : > { %8885 = vmatmul.mubr.msk.f32.gmra.mrb[118].mxu1 %vm435_vm2, %v11869_v23 }
 0x725   : > { %v8785_v46 = vpop.f32.mrb[118].mxu0 }
 0x726   : > { %v4137_v53 = vadd.f32 %v8785_v46, %v14022_v41  ;;  %v3889_v17 = vpop.f32.mrb[119].mxu0 }
 0x727   : > { %v4136_v15 = vadd.f32 %v3889_v17, %v14023_v2 }
 0x728   : > { %v11881_v56 = vadd.f32 %v11753_v0, %v4137_v53  ;;  %v14033_v53 = vld [vmem:[#allocation31_spill] sm:$0xff] }
 0x729   : > { %v11878_v21 = vadd.f32 %v11753_v0, %v4136_v15  ;;  %v8788_v9 = vpop.f32.mrb[120].mxu0 }
 0x72a   : > { %v4139_v35 = vadd.f32 %v8788_v9, %v14024_v20  ;;  %v3899_v60 = vpop.f32.mrb[121].mxu0 }
 0x72b   : > { %v4138_v28 = vadd.f32 %v3899_v60, %v14025_v26  ;;  %8887 = vmatprep.mubr.msk.f32.mxu1 %vm435_vm2, %v11878_v21  ;;  %v14036_v60 = vld [vmem:[#allocation32_spill] sm:$0xff] }
 0x72c   : > { %8888 = vmatmul.mubr.msk.f32.gmra.mrb[120].mxu1 %vm435_vm2, %v11881_v56  ;;  %v11893_v38 = vadd.f32 %v11753_v0, %v4139_v35 }
 0x72d   : > { %v11890_v33 = vadd.f32 %v11753_v0, %v4138_v28  ;;  %v8791_v29 = vpop.f32.mrb[122].mxu0 }
 0x72e   : > { %14027 = vst [vmem:[#allocation47_spill] sm:$0xff] %v11893_v38  ;;  %v4141_v36 = vadd.f32 %v8791_v29, %v14028_v12  ;;  %v3909_v6 = vpop.f32.mrb[123].mxu0 }
 0x72f   : > { %14026 = vst [vmem:[#allocation43_spill] sm:$0xff] %v11890_v33  ;;  %v4140_v13 = vadd.f32 %v3909_v6, %v14029_v37  ;;  %8890 = vmatprep.mubr.msk.f32.mxu1 %vm435_vm2, %v11890_v33 }
 0x730   : > { %8891 = vmatmul.mubr.msk.f32.gmra.mrb[122].mxu1 %vm435_vm2, %v11893_v38  ;;  %v11905_v34 = vadd.f32 %v11753_v0, %v4141_v36  ;;  %v14037_v36 = vld [vmem:[#allocation33_spill] sm:$0xff] }
 0x731   : > { %v11902_v5 = vadd.f32 %v11753_v0, %v4140_v13  ;;  %v8794_v51 = vpop.f32.mrb[124].mxu0 }
 0x732   : > { %14031 = vst [vmem:[#allocation46_spill] sm:$0xff] %v11905_v34  ;;  %v4143_v50 = vadd.f32 %v8794_v51, %v14032_v25  ;;  %v3919_v46 = vpop.f32.mrb[125].mxu0 }
 0x733   : > { %14030 = vst [vmem:[#allocation44_spill] sm:$0xff] %v11902_v5  ;;  %v4142_v17 = vadd.f32 %v3919_v46, %v14033_v53  ;;  %8893 = vmatprep.mubr.msk.f32.mxu1 %vm435_vm2, %v11902_v5 }
 0x734   : > { %8894 = vmatmul.mubr.msk.f32.gmra.mrb[124].mxu1 %vm435_vm2, %v11905_v34  ;;  %v11917_v35 = vadd.f32 %v11753_v0, %v4143_v50  ;;  %v14040_v50 = vld [vmem:[#allocation34_spill] sm:$0xff] }
 0x735   : > { %v11914_v15 = vadd.f32 %v11753_v0, %v4142_v17  ;;  %v8797_v9 = vpop.f32.mrb[126].mxu0 }
 0x736   : > { %14035 = vst [vmem:[#allocation49_spill] sm:$0xff] %v11917_v35  ;;  %v4145_v28 = vadd.f32 %v8797_v9, %v14036_v60  ;;  %v3929_v29 = vpop.f32.mrb[127].mxu0  ;;  %v14041_v9 = vld [vmem:[#allocation35_spill] sm:$0xff] }
 0x737   : > { %14034 = vst [vmem:[#allocation48_spill] sm:$0xff] %v11914_v15  ;;  %v4144_v6 = vadd.f32 %v3929_v29, %v14037_v36  ;;  %8896 = vmatprep.mubr.msk.f32.mxu1 %vm435_vm2, %v11914_v15 }
 0x738   : > { %8897 = vmatmul.mubr.msk.f32.gmra.mrb[126].mxu1 %vm435_vm2, %v11917_v35  ;;  %v11929_v46 = vadd.f32 %v11753_v0, %v4145_v28  ;;  %v14044_v28 = vld [vmem:[#allocation36_spill] sm:$0xff] }
 0x739   : > { %v11926_v13 = vadd.f32 %v11753_v0, %v4144_v6  ;;  %v8800_v51 = vpop.f32.mrb[128].mxu0 }
 0x73a   : > { %14039 = vst [vmem:[#allocation52_spill] sm:$0xff] %v11929_v46  ;;  %v4147_v17 = vadd.f32 %v8800_v51, %v14040_v50  ;;  %v3939_v5 = vpop.f32.mrb[129].mxu0  ;;  %v14045_v51 = vld [vmem:[#allocation37_spill] sm:$0xff] }
 0x73b   : > { %14038 = vst [vmem:[#allocation50_spill] sm:$0xff] %v11926_v13  ;;  %v4146_v34 = vadd.f32 %v3939_v5, %v14041_v9  ;;  %8899 = vmatprep.mubr.msk.f32.mxu1 %vm435_vm2, %v11926_v13 }
 0x73c   : > { %8900 = vmatmul.mubr.msk.f32.gmra.mrb[128].mxu1 %vm435_vm2, %v11929_v46  ;;  %v11941_v15 = vadd.f32 %v11753_v0, %v4147_v17 }
 0x73d   : > { %v11938_v29 = vadd.f32 %v11753_v0, %v4146_v34  ;;  %v8803_v6 = vpop.f32.mrb[130].mxu0 }
 0x73e   : > { %14043 = vst [vmem:[#allocation54_spill] sm:$0xff] %v11941_v15  ;;  %v4149_v35 = vadd.f32 %v8803_v6, %v14044_v28  ;;  %v3949_v33 = vpop.f32.mrb[131].mxu0 }
 0x73f   : > { %14042 = vst [vmem:[#allocation51_spill] sm:$0xff] %v11938_v29  ;;  %v4148_v38 = vadd.f32 %v3949_v33, %v14045_v51  ;;  %8902 = vmatprep.mubr.msk.f32.mxu1 %vm435_vm2, %v11938_v29 }
 0x740   : > { %8903 = vmatmul.mubr.msk.f32.gmra.mrb[130].mxu1 %vm435_vm2, %v11941_v15  ;;  %v11953_v13 = vadd.f32 %v11753_v0, %v4149_v35 }
 0x741   : > { %v11950_v5 = vadd.f32 %v11753_v0, %v4148_v38  ;;  %v8806_v34 = vpop.f32.mrb[132].mxu0 }
 0x742   : > { %v4151_v17 = vadd.f32 %v8806_v34, %v14004_v52  ;;  %v3959_v46 = vpop.f32.mrb[133].mxu0 }
 0x743   : > { %v4150_v6 = vadd.f32 %v3959_v46, %v14005_v39  ;;  %8905 = vmatprep.mubr.msk.f32.mxu1 %vm435_vm2, %v11950_v5 }
 0x744   : > { %8906 = vmatmul.mubr.msk.f32.gmra.mrb[132].mxu1 %vm435_vm2, %v11953_v13  ;;  %v11965_v29 = vadd.f32 %v11753_v0, %v4151_v17 }
 0x745   : > { %v11962_v33 = vadd.f32 %v11753_v0, %v4150_v6  ;;  %v8809_v38 = vpop.f32.mrb[134].mxu0 }
 0x746   : > { %v4153_v35 = vadd.f32 %v8809_v38, %v14006_v27  ;;  %v3969_v15 = vpop.f32.mrb[135].mxu0  ;;  %v424_v38 = vld [vmem:[%s13794_s3 + $0x120] sm:$0xff] }
 0x747   : > { %v4152_v52 = vadd.f32 %v3969_v15, %v14007_v54  ;;  %8908 = vmatprep.mubr.msk.f32.mxu1 %vm435_vm2, %v11962_v33 }
 0x748   : > { %8909 = vmatmul.mubr.msk.f32.gmra.mrb[134].mxu1 %vm435_vm2, %v11965_v29  ;;  %v11977_v34 = vadd.f32 %v11753_v0, %v4153_v35 }
 0x749   : > { %v11974_v39 = vadd.f32 %v11753_v0, %v4152_v52  ;;  %v8812_v46 = vpop.f32.mrb[136].mxu0 }
 0x74a   : > { %v4155_v17 = vadd.f32 %v8812_v46, %v14008_v30  ;;  %v3979_v6 = vpop.f32.mrb[137].mxu0  ;;  %v425_v30 = vld [vmem:[%s13794_s3 + $0x128] sm:$0xff] }
 0x74b   : > { %14046 = vst [vmem:[#allocation53_spill] sm:$0xff] %v11974_v39  ;;  %v4154_v27 = vadd.f32 %v3979_v6, %v14009_v43  ;;  %8911 = vmatprep.mubr.msk.f32.mxu1 %vm435_vm2, %v11974_v39  ;;  %v9238_v46 = vpack.c.bf16 %v425_v30, %v424_v38 }
 0x74c   : > { %8912 = vmatmul.mubr.msk.f32.gmra.mrb[136].mxu1 %vm435_vm2, %v11977_v34  ;;  %v11995_v43 = vadd.f32 %v11753_v0, %v4155_v17 }
 0x74d   : > { %v11986_v54 = vadd.f32 %v11753_v0, %v4154_v27  ;;  %v8815_v15 = vpop.f32.mrb[138].mxu0  ;;  %9239 = vmatprep.subr.bf16.mxu0 %v9238_v46 }
 0x74e   : > { %v4157_v35 = vadd.f32 %v8815_v15, %v14010_v49  ;;  %v3989_v52 = vpop.f32.mrb[139].mxu0  ;;  %9241 = vmatpush3.bf16.msra.mxu0 %v9238_v46  ;;  %v426_v49 = vld [vmem:[%s13794_s3 + $0x130] sm:$0xff] }
 0x74f   : > { %v4156_v6 = vadd.f32 %v3989_v52, %v14011_v8  ;;  %8914 = vmatprep.mubr.msk.f32.mxu1 %vm435_vm2, %v11986_v54  ;;  %v427_v8 = vld [vmem:[%s13794_s3 + $0x138] sm:$0xff] }
 0x750   : > { %8915 = vmatmul.mubr.msk.f32.gmra.mrb[138].mxu1 %vm435_vm2, %v11995_v43  ;;  %v12013_v17 = vadd.f32 %v11753_v0, %v4157_v35  ;;  %v9242_v30 = vpack.c.bf16 %v427_v8, %v426_v49 }
 0x751   : > { %v12004_v27 = vadd.f32 %v11753_v0, %v4156_v6  ;;  %v8818_v39 = vpop.f32.mrb[140].mxu0 }
 0x752   : > { %v4159_v15 = vadd.f32 %v8818_v39, %v14012_v58  ;;  %v3999_v38 = vpop.f32.mrb[141].mxu0  ;;  %9243 = vmatprep.subr.bf16.mxu0 %v9242_v30 }
 0x753   : > { %14047 = vst [vmem:[#allocation55_spill] sm:$0xff] %v12004_v27  ;;  %v4158_v52 = vadd.f32 %v3999_v38, %v14013_v44  ;;  %8917 = vmatprep.mubr.msk.f32.mxu1 %vm435_vm2, %v12004_v27  ;;  %9245 = vmatpush3.bf16.msra.mxu0 %v9242_v30 }
 0x754   : > { %8918 = vmatmul.mubr.msk.f32.gmra.mrb[140].mxu1 %vm435_vm2, %v12013_v17  ;;  %v12025_v35 = vadd.f32 %v11753_v0, %v4159_v15 }
 0x755   : > { %v12022_v46 = vadd.f32 %v11753_v0, %v4158_v52  ;;  %v8821_v6 = vpop.f32.mrb[142].mxu0 }
 0x756   : > { %14049 = vst [vmem:[#allocation39_spill] sm:$0xff] %v12025_v35  ;;  %v4161_v58 = vadd.f32 %v8821_v6, %v14014_v55  ;;  %v4009_v39 = vpop.f32.mrb[143].mxu0 }
 0x757   : > { %14048 = vst [vmem:[#allocation38_spill] sm:$0xff] %v12022_v46  ;;  %v4160_v44 = vadd.f32 %v4009_v39, %v14015_v10  ;;  %8920 = vmatprep.mubr.msk.f32.mxu1 %vm435_vm2, %v12022_v46 }
 0x758   : > { %8921 = vmatmul.mubr.msk.f32.gmra.mrb[142].mxu1 %vm435_vm2, %v12025_v35  ;;  %v12037_v38 = vadd.f32 %v11753_v0, %v4161_v58 }
 0x759   : > { %v12034_v49 = vadd.f32 %v11753_v0, %v4160_v44  ;;  %v8824_v8 = vpop.f32.mrb[144].mxu0 }
 0x75a   : > { %14051 = vst [vmem:[#allocation41_spill] sm:$0xff] %v12037_v38  ;;  %v4163_v15 = vadd.f32 %v8824_v8, %v14016_v31  ;;  %v4019_v30 = vpop.f32.mrb[145].mxu0 }
 0x75b   : > { %14050 = vst [vmem:[#allocation40_spill] sm:$0xff] %v12034_v49  ;;  %v4162_v55 = vadd.f32 %v4019_v30, %v14017_v47  ;;  %8923 = vmatprep.mubr.msk.f32.mxu1 %vm435_vm2, %v12034_v49 }
 0x75c   : > { %8924 = vmatmul.mubr.msk.f32.gmra.mrb[144].mxu1 %vm435_vm2, %v12037_v38  ;;  %v12049_v6 = vadd.f32 %v11753_v0, %v4163_v15 }
 0x75d   : > { %v12046_v10 = vadd.f32 %v11753_v0, %v4162_v55  ;;  %v8827_v52 = vpop.f32.mrb[146].mxu0 }
 0x75e   : > { %14053 = vst [vmem:[#allocation42_spill] sm:$0xff] %v12049_v6  ;;  %v4165_v58 = vadd.f32 %v8827_v52, %v14018_v16  ;;  %v4029_v39 = vpop.f32.mrb[147].mxu0 }
 0x75f   : > { %14052 = vst [vmem:[#allocation45_spill] sm:$0xff] %v12046_v10  ;;  %v4164_v31 = vadd.f32 %v4029_v39, %v14019_v11  ;;  %8926 = vmatprep.mubr.msk.f32.mxu1 %vm435_vm2, %v12046_v10 }
 0x760   : > { %8927 = vmatmul.mubr.msk.f32.gmra.mrb[146].mxu1 %vm435_vm2, %v12049_v6  ;;  %v12061_v8 = vadd.f32 %v11753_v0, %v4165_v58 }
 0x761   : > { %v12058_v47 = vadd.f32 %v11753_v0, %v4164_v31  ;;  %v8830_v44 = vpop.f32.mrb[148].mxu0 }
 0x762   : > { %14055 = vst [vmem:[#allocation7_spill] sm:$0xff] %v12061_v8  ;;  %v4167_v15 = vadd.f32 %v8830_v44, %v14020_v19  ;;  %v4039_v30 = vpop.f32.mrb[149].mxu0 }
 0x763   : > { %14054 = vst [vmem:[#allocation6_spill] sm:$0xff] %v12058_v47  ;;  %v4166_v16 = vadd.f32 %v4039_v30, %v14021_v59  ;;  %8929 = vmatprep.mubr.msk.f32.mxu1 %vm435_vm2, %v12058_v47 }
 0x764   : > { %8930 = vmatmul.mubr.msk.f32.gmra.mrb[148].mxu1 %vm435_vm2, %v12061_v8  ;;  %v12073_v52 = vadd.f32 %v11753_v0, %v4167_v15 }
 0x765   : > { %v12070_v11 = vadd.f32 %v11753_v0, %v4166_v16  ;;  %v8833_v55 = vpop.f32.mrb[150].mxu0 }
 0x766   : > { %14057 = vst [vmem:[#allocation9_spill] sm:$0xff] %v12073_v52  ;;  %v4169_v58 = vadd.f32 %v8833_v55, %v14022_v41  ;;  %v4049_v39 = vpop.f32.mrb[151].mxu0 }
 0x767   : > { %14056 = vst [vmem:[#allocation8_spill] sm:$0xff] %v12070_v11  ;;  %v4168_v19 = vadd.f32 %v4049_v39, %v14023_v2  ;;  %8932 = vmatprep.mubr.msk.f32.mxu1 %vm435_vm2, %v12070_v11 }
 0x768   : > { %8933 = vmatmul.mubr.msk.f32.gmra.mrb[150].mxu1 %vm435_vm2, %v12073_v52  ;;  %v12085_v44 = vadd.f32 %v11753_v0, %v4169_v58 }
 0x769   : > { %v12082_v59 = vadd.f32 %v11753_v0, %v4168_v19  ;;  %v8836_v31 = vpop.f32.mrb[152].mxu0 }
 0x76a   : > { %14059 = vst [vmem:[#allocation11_spill] sm:$0xff] %v12085_v44  ;;  %v4171_v15 = vadd.f32 %v8836_v31, %v14024_v20  ;;  %v4059_v30 = vpop.f32.mrb[153].mxu0 }
 0x76b   : > { %14058 = vst [vmem:[#allocation10_spill] sm:$0xff] %v12082_v59  ;;  %v4170_v41 = vadd.f32 %v4059_v30, %v14025_v26  ;;  %8935 = vmatprep.mubr.msk.f32.mxu1 %vm435_vm2, %v12082_v59 }
 0x76c   : > { %8936 = vmatmul.mubr.msk.f32.gmra.mrb[152].mxu1 %vm435_vm2, %v12085_v44  ;;  %v12097_v55 = vadd.f32 %v11753_v0, %v4171_v15 }
 0x76d   : > { %v12094_v2 = vadd.f32 %v11753_v0, %v4170_v41  ;;  %v8839_v16 = vpop.f32.mrb[154].mxu0 }
 0x76e   : > { %14061 = vst [vmem:[#allocation13_spill] sm:$0xff] %v12097_v55  ;;  %v4173_v58 = vadd.f32 %v8839_v16, %v14028_v12  ;;  %v4069_v39 = vpop.f32.mrb[155].mxu0 }
 0x76f   : > { %14060 = vst [vmem:[#allocation12_spill] sm:$0xff] %v12094_v2  ;;  %v4172_v20 = vadd.f32 %v4069_v39, %v14029_v37  ;;  %8938 = vmatprep.mubr.msk.f32.mxu1 %vm435_vm2, %v12094_v2 }
 0x770   : > { %8939 = vmatmul.mubr.msk.f32.gmra.mrb[154].mxu1 %vm435_vm2, %v12097_v55  ;;  %v12109_v31 = vadd.f32 %v11753_v0, %v4173_v58 }
 0x771   : > { %v12106_v26 = vadd.f32 %v11753_v0, %v4172_v20  ;;  %v8842_v19 = vpop.f32.mrb[156].mxu0 }
 0x772   : > { %14063 = vst [vmem:[#allocation15_spill] sm:$0xff] %v12109_v31  ;;  %v4175_v15 = vadd.f32 %v8842_v19, %v14032_v25  ;;  %v4079_v30 = vpop.f32.mrb[157].mxu0 }
 0x773   : > { %14062 = vst [vmem:[#allocation14_spill] sm:$0xff] %v12106_v26  ;;  %v4174_v12 = vadd.f32 %v4079_v30, %v14033_v53  ;;  %8941 = vmatprep.mubr.msk.f32.mxu1 %vm435_vm2, %v12106_v26 }
 0x774   : > { %8942 = vmatmul.mubr.msk.f32.gmra.mrb[156].mxu1 %vm435_vm2, %v12109_v31  ;;  %v12121_v16 = vadd.f32 %v11753_v0, %v4175_v15 }
 0x775   : > { %v12118_v37 = vadd.f32 %v11753_v0, %v4174_v12  ;;  %v8845_v41 = vpop.f32.mrb[158].mxu0 }
 0x776   : > { %14065 = vst [vmem:[#allocation17_spill] sm:$0xff] %v12121_v16  ;;  %v4177_v58 = vadd.f32 %v8845_v41, %v14036_v60  ;;  %v4089_v39 = vpop.f32.mrb[159].mxu0 }
 0x777   : > { %14064 = vst [vmem:[#allocation16_spill] sm:$0xff] %v12118_v37  ;;  %v4176_v25 = vadd.f32 %v4089_v39, %v14037_v36  ;;  %8944 = vmatprep.mubr.msk.f32.mxu1 %vm435_vm2, %v12118_v37 }
 0x778   : > { %8945 = vmatmul.mubr.msk.f32.gmra.mrb[158].mxu1 %vm435_vm2, %v12121_v16  ;;  %v12133_v19 = vadd.f32 %v11753_v0, %v4177_v58 }
 0x779   : > { %v12130_v53 = vadd.f32 %v11753_v0, %v4176_v25  ;;  %v8848_v20 = vpop.f32.mrb[160].mxu0 }
 0x77a   : > { %14067 = vst [vmem:[#allocation19_spill] sm:$0xff] %v12133_v19  ;;  %v4179_v15 = vadd.f32 %v8848_v20, %v14040_v50  ;;  %v4099_v30 = vpop.f32.mrb[161].mxu0 }
 0x77b   : > { %14066 = vst [vmem:[#allocation18_spill] sm:$0xff] %v12130_v53  ;;  %v4178_v60 = vadd.f32 %v4099_v30, %v14041_v9  ;;  %8947 = vmatprep.mubr.msk.f32.mxu1 %vm435_vm2, %v12130_v53 }
 0x77c   : > { %8948 = vmatmul.mubr.msk.f32.gmra.mrb[160].mxu1 %vm435_vm2, %v12133_v19  ;;  %v12145_v12 = vadd.f32 %v11753_v0, %v4179_v15 }
 0x77d   : > { %v12142_v36 = vadd.f32 %v11753_v0, %v4178_v60 }
 0x77e   : > { %14069 = vst [vmem:[#allocation21_spill] sm:$0xff] %v12145_v12 }
 0x77f   : > { %14068 = vst [vmem:[#allocation20_spill] sm:$0xff] %v12142_v36  ;;  %8950 = vmatprep.mubr.msk.f32.mxu1 %vm435_vm2, %v12142_v36 }
 0x780   : > { %v8851_v41 = vpop.f32.mrb[162].mxu0  ;;  %8951 = vmatmul.mubr.msk.f32.gmra.mrb[162].mxu1 %vm435_vm2, %v12145_v12 }
 0x781   : > { %v4181_v50 = vadd.f32 %v8851_v41, %v14044_v28  ;;  %v4109_v9 = vpop.f32.mrb[163].mxu0  ;;  %v12166_v28 = vld [vmem:[%s13794_s3 + $0x16d] ss:$0 sm:$0xff] }
 0x782   : > { %v4180_v58 = vadd.f32 %v4109_v9, %v14045_v51 }
 0x783   : > { %v12157_v25 = vadd.f32 %v11753_v0, %v4181_v50 }
 0x784   : > { %v12154_v39 = vadd.f32 %v11753_v0, %v4180_v58 }
 0x785   : > { %14071 = vst [vmem:[#allocation23_spill] sm:$0xff] %v12157_v25 }
 0x786   : > { %14070 = vst [vmem:[#allocation22_spill] sm:$0xff] %v12154_v39  ;;  %8953 = vmatprep.mubr.msk.f32.mxu1 %vm435_vm2, %v12154_v39 }
 0x787   : > { %8954 = vmatmul.mubr.msk.f32.gmra.mrb[164].mxu1 %vm435_vm2, %v12157_v25 }
 0x7b7   : > { %v8862_v20 = vpop.f32.mrb[102].mxu1 }
 0x7b8   : > { %v4518_v51 = vadd.f32 %v8862_v20, %v12166_v28  ;;  %v4512_v15 = vpop.f32.mrb[103].mxu1 }
 0x7b9   : > { %v4513_v30 = vadd.f32 %v12166_v28, %v4512_v15 }
 0x7ba   : > { %v7688_v60 = vmul.f32 -1.442695, %v4518_v51 }
 0x7bb   : > { %v7687_v0 = vmul.f32 -1.442695, %v4513_v30 }
 0x7bc   : > { %9527 = vpow2.f32 %v7688_v60 }
 0x7bd   : > { %9529 = vpow2.f32 %v7687_v0 }
 0x7bf   : > { %v8865_v41 = vpop.f32.mrb[104].mxu1 }
 0x7c0   : > { %v4528_v50 = vadd.f32 %v8865_v41, %v12166_v28  ;;  %v4522_v9 = vpop.f32.mrb[105].mxu1 }
 0x7c1   : > { %v4523_v58 = vadd.f32 %v12166_v28, %v4522_v9 }
 0x7c2   : > { %v7690_v39 = vmul.f32 -1.442695, %v4528_v50 }
 0x7c3   : > { %v7689_v25 = vmul.f32 -1.442695, %v4523_v58 }
 0x7c4   : > { %9531 = vpow2.f32 %v7690_v39 }
 0x7c5   : > { %9533 = vpow2.f32 %v7689_v25 }
 0x7c6   : > { %v9528_v36 = vpop.eup %9527 }
 0x7c7   : > { %v9530_v12 = vpop.eup %9529  ;;  %v5024_v20 = vadd.f32 1.0, %v9528_v36  ;;  %v8868_v53 = vpop.f32.mrb[106].mxu1 }
 0x7c8   : > { %v5023_v19 = vadd.f32 1.0, %v9530_v12  ;;  %v12173_v15 = vadd.f32 %v8868_v53, %v12166_v28  ;;  %v4532_v60 = vpop.f32.mrb[107].mxu1 }
 0x7c9   : > { %9535 = vrcp.f32 %v5024_v20  ;;  %v4533_v0 = vadd.f32 %v12166_v28, %v4532_v60 }
 0x7ca   : > { %9537 = vrcp.f32 %v5023_v19  ;;  %v7692_v41 = vmul.f32 -1.442695, %v12173_v15 }
 0x7cb   : > { %v7691_v9 = vmul.f32 -1.442695, %v4533_v0 }
 0x7cc   : > { %9539 = vpow2.f32 %v7692_v41 }
 0x7cd   : > { %9541 = vpow2.f32 %v7691_v9 }
 0x7ce   : > { %v9532_v39 = vpop.eup %9531 }
 0x7cf   : > { %v9534_v25 = vpop.eup %9533  ;;  %v5026_v37 = vadd.f32 1.0, %v9532_v39  ;;  %v8871_v16 = vpop.f32.mrb[108].mxu1 }
 0x7d0   : > { %v5025_v36 = vadd.f32 1.0, %v9534_v25  ;;  %v12178_v12 = vadd.f32 %v8871_v16, %v12166_v28  ;;  %v4542_v53 = vpop.f32.mrb[109].mxu1 }
 0x7d1   : > { %9543 = vrcp.f32 %v5026_v37  ;;  %v12181_v20 = vadd.f32 %v12166_v28, %v4542_v53 }
 0x7d2   : > { %9545 = vrcp.f32 %v5025_v36  ;;  %v7694_v19 = vmul.f32 -1.442695, %v12178_v12 }
 0x7d3   : > { %v9536_v60 = vpop.eup %9535  ;;  %v7693_v41 = vmul.f32 -1.442695, %v12181_v20 }
 0x7d4   : > { %v9538_v9 = vpop.eup %9537  ;;  %9547 = vpow2.f32 %v7694_v19  ;;  %v5216_v26 = vmul.f32 %v9536_v60, %v4518_v51 }
 0x7d5   : > { %v5215_v39 = vmul.f32 %v9538_v9, %v4513_v30  ;;  %9549 = vpow2.f32 %v7693_v41 }
 0x7d6   : > { %v9540_v25 = vpop.eup %9539 }
 0x7d7   : > { %v9542_v16 = vpop.eup %9541  ;;  %v5028_v31 = vadd.f32 1.0, %v9540_v25  ;;  %v8874_v2 = vpop.f32.mrb[110].mxu1  ;;  %8972 = vmatprep.mubr.msk.f32.mxu0 %vm5279_vm6, %v5215_v39 }
 0x7d8   : > { %v5027_v37 = vadd.f32 1.0, %v9542_v16  ;;  %v12187_v36 = vadd.f32 %v8874_v2, %v12166_v28  ;;  %v4552_v53 = vpop.f32.mrb[111].mxu1  ;;  %8973 = vmatmul.mubr.msk.f32.vlgmr.msra.gmra.mrb[164].mxu0 %vm5279_vm6, %v5216_v26 }
 0x7d9   : > { %9551 = vrcp.f32 %v5028_v31  ;;  %v12191_v19 = vadd.f32 %v12166_v28, %v4552_v53 }
 0x7da   : > { %9553 = vrcp.f32 %v5027_v37  ;;  %v7696_v30 = vmul.f32 -1.442695, %v12187_v36 }
 0x7db   : > { %v9544_v51 = vpop.eup %9543  ;;  %v7695_v60 = vmul.f32 -1.442695, %v12191_v19 }
 0x7dc   : > { %v9546_v41 = vpop.eup %9545  ;;  %9555 = vpow2.f32 %v7696_v30  ;;  %v5218_v2 = vmul.f32 %v9544_v51, %v4528_v50 }
 0x7dd   : > { %v5217_v9 = vmul.f32 %v9546_v41, %v4523_v58  ;;  %9557 = vpow2.f32 %v7695_v60 }
 0x7de   : > { %v9548_v39 = vpop.eup %9547 }
 0x7df   : > { %v9550_v25 = vpop.eup %9549  ;;  %v5030_v16 = vadd.f32 1.0, %v9548_v39  ;;  %8975 = vmatprep.mubr.msk.f32.mxu0 %vm5279_vm6, %v5217_v9  ;;  %v8877_v31 = vpop.f32.mrb[112].mxu1 }
 0x7e0   : > { %v5029_v26 = vadd.f32 1.0, %v9550_v25  ;;  %8976 = vmatmul.mubr.msk.f32.gmra.mrb[166].mxu0 %vm5279_vm6, %v5218_v2  ;;  %v12198_v37 = vadd.f32 %v8877_v31, %v12166_v28  ;;  %v4562_v53 = vpop.f32.mrb[113].mxu1 }
 0x7e1   : > { %9559 = vrcp.f32 %v5030_v16  ;;  %v12201_v30 = vadd.f32 %v12166_v28, %v4562_v53 }
 0x7e2   : > { %9561 = vrcp.f32 %v5029_v26  ;;  %v7698_v50 = vmul.f32 -1.442695, %v12198_v37 }
 0x7e3   : > { %v9552_v58 = vpop.eup %9551  ;;  %v7697_v60 = vmul.f32 -1.442695, %v12201_v30 }
 0x7e4   : > { %v9554_v51 = vpop.eup %9553  ;;  %9563 = vpow2.f32 %v7698_v50  ;;  %v5220_v39 = vmul.f32 %v9552_v58, %v12173_v15 }
 0x7e5   : > { %v5219_v41 = vmul.f32 %v9554_v51, %v4533_v0  ;;  %9565 = vpow2.f32 %v7697_v60 }
 0x7e6   : > { %v9556_v9 = vpop.eup %9555 }
 0x7e7   : > { %v9558_v2 = vpop.eup %9557  ;;  %v5032_v25 = vadd.f32 1.0, %v9556_v9  ;;  %8978 = vmatprep.mubr.msk.f32.mxu0 %vm5279_vm6, %v5219_v41  ;;  %v8880_v26 = vpop.f32.mrb[114].mxu1 }
 0x7e8   : > { %v5031_v16 = vadd.f32 1.0, %v9558_v2  ;;  %8979 = vmatmul.mubr.msk.f32.gmra.mrb[168].mxu0 %vm5279_vm6, %v5220_v39  ;;  %v12209_v31 = vadd.f32 %v8880_v26, %v12166_v28  ;;  %v4572_v53 = vpop.f32.mrb[115].mxu1 }
 0x7e9   : > { %9567 = vrcp.f32 %v5032_v25  ;;  %v12212_v0 = vadd.f32 %v12166_v28, %v4572_v53 }
 0x7ea   : > { %9569 = vrcp.f32 %v5031_v16  ;;  %v7700_v15 = vmul.f32 -1.442695, %v12209_v31 }
 0x7eb   : > { %v9560_v50 = vpop.eup %9559  ;;  %v7699_v51 = vmul.f32 -1.442695, %v12212_v0 }
 0x7ec   : > { %v9562_v58 = vpop.eup %9561  ;;  %9571 = vpow2.f32 %v7700_v15  ;;  %v5222_v41 = vmul.f32 %v9560_v50, %v12178_v12  ;;  %v429_v50 = vld [vmem:[%s13794_s3 + $0x140] sm:$0xff] }
 0x7ed   : > { %v5221_v60 = vmul.f32 %v9562_v58, %v12181_v20  ;;  %9573 = vpow2.f32 %v7699_v51  ;;  %v430_v58 = vld [vmem:[%s13794_s3 + $0x148] sm:$0xff] }
 0x7ee   : > { %v9564_v9 = vpop.eup %9563 }
 0x7ef   : > { %8981 = vmatprep.mubr.msk.f32.mxu0 %vm5279_vm6, %v5221_v60  ;;  %v9566_v39 = vpop.eup %9565  ;;  %v5034_v2 = vadd.f32 1.0, %v9564_v9  ;;  %v8883_v25 = vpop.f32.mrb[116].mxu1 }
 0x7f0   : > { %8982 = vmatmul.mubr.msk.f32.gmra.mrb[170].mxu0 %vm5279_vm6, %v5222_v41  ;;  %v5033_v16 = vadd.f32 1.0, %v9566_v39  ;;  %v12221_v26 = vadd.f32 %v8883_v25, %v12166_v28  ;;  %v4582_v53 = vpop.f32.mrb[117].mxu1  ;;  %v9246_v41 = vpack.c.bf16 %v430_v58, %v429_v50 }
 0x7f1   : > { %9575 = vrcp.f32 %v5034_v2  ;;  %v12224_v20 = vadd.f32 %v12166_v28, %v4582_v53 }
 0x7f2   : > { %9577 = vrcp.f32 %v5033_v16  ;;  %v7702_v12 = vmul.f32 -1.442695, %v12221_v26  ;;  %9247 = vmatprep.subr.bf16.mxu1 %v9246_v41 }
 0x7f3   : > { %v9568_v15 = vpop.eup %9567  ;;  %v7701_v60 = vmul.f32 -1.442695, %v12224_v20  ;;  %9249 = vmatpush3.bf16.msra.mxu1 %v9246_v41  ;;  %v432_v41 = vld [vmem:[%s13794_s3 + $0x158] sm:$0xff] }
 0x7f4   : > { %v9570_v51 = vpop.eup %9569  ;;  %9579 = vpow2.f32 %v7702_v12  ;;  %v5224_v39 = vmul.f32 %v9568_v15, %v12187_v36 }
 0x7f5   : > { %v5223_v9 = vmul.f32 %v9570_v51, %v12191_v19  ;;  %9581 = vpow2.f32 %v7701_v60  ;;  %v431_v60 = vld [vmem:[%s13794_s3 + $0x150] sm:$0xff] }
 0x7f6   : > { %v9572_v2 = vpop.eup %9571 }
 0x7f7   : > { %8984 = vmatprep.mubr.msk.f32.mxu0 %vm5279_vm6, %v5223_v9  ;;  %v9574_v25 = vpop.eup %9573  ;;  %v5036_v16 = vadd.f32 1.0, %v9572_v2  ;;  %v8886_v53 = vpop.f32.mrb[118].mxu1 }
 0x7f8   : > { %8985 = vmatmul.mubr.msk.f32.gmra.mrb[172].mxu0 %vm5279_vm6, %v5224_v39  ;;  %v5035_v55 = vadd.f32 1.0, %v9574_v25  ;;  %v12239_v59 = vadd.f32 %v8886_v53, %v12166_v28  ;;  %v4592_v50 = vpop.f32.mrb[119].mxu1  ;;  %v9250_v39 = vpack.c.bf16 %v432_v41, %v431_v60 }
 0x7f9   : > { %9583 = vrcp.f32 %v5036_v16  ;;  %v12242_v19 = vadd.f32 %v12166_v28, %v4592_v50 }
 0x7fa   : > { %9585 = vrcp.f32 %v5035_v55  ;;  %v7704_v36 = vmul.f32 -1.442695, %v12239_v59  ;;  %9251 = vmatprep.subr.bf16.mxu1 %v9250_v39 }
 0x7fb   : > { %v9576_v15 = vpop.eup %9575  ;;  %v7703_v12 = vmul.f32 -1.442695, %v12242_v19  ;;  %9253 = vmatpush3.bf16.msra.mxu1 %v9250_v39 }
 0x7fc   : > { %v9578_v58 = vpop.eup %9577  ;;  %9587 = vpow2.f32 %v7704_v36  ;;  %v5226_v55 = vmul.f32 %v9576_v15, %v12198_v37 }
 0x7fd   : > { %v5225_v51 = vmul.f32 %v9578_v58, %v12201_v30  ;;  %9589 = vpow2.f32 %v7703_v12 }
 0x7fe   : > { %v9580_v9 = vpop.eup %9579 }
 0x7ff   : > { %v9582_v2 = vpop.eup %9581  ;;  %v5038_v25 = vadd.f32 1.0, %v9580_v9  ;;  %v8889_v16 = vpop.f32.mrb[120].mxu1  ;;  %8987 = vmatprep.mubr.msk.f32.mxu0 %vm5279_vm6, %v5225_v51 }
 0x800   : > { %v5037_v53 = vadd.f32 1.0, %v9582_v2  ;;  %v12256_v30 = vadd.f32 %v8889_v16, %v12166_v28  ;;  %v4602_v50 = vpop.f32.mrb[121].mxu1  ;;  %8988 = vmatmul.mubr.msk.f32.gmra.mrb[174].mxu0 %vm5279_vm6, %v5226_v55 }
 0x801   : > { %9591 = vrcp.f32 %v5038_v25  ;;  %v12260_v36 = vadd.f32 %v12166_v28, %v4602_v50 }
 0x802   : > { %9593 = vrcp.f32 %v5037_v53  ;;  %v7706_v37 = vmul.f32 -1.442695, %v12256_v30 }
 0x803   : > { %v9584_v15 = vpop.eup %9583  ;;  %v7705_v12 = vmul.f32 -1.442695, %v12260_v36  ;;  %v8892_v58 = vpop.f32.mrb[122].mxu1 }
 0x804   : > { %v9586_v51 = vpop.eup %9585  ;;  %9595 = vpow2.f32 %v7706_v37  ;;  %v12265_v60 = vadd.f32 %v8892_v58, %v12166_v28  ;;  %v4612_v41 = vpop.f32.mrb[123].mxu1  ;;  %v5228_v2 = vmul.f32 %v9584_v15, %v12209_v31 }
 0x805   : > { %v5227_v9 = vmul.f32 %v9586_v51, %v12212_v0  ;;  %9597 = vpow2.f32 %v7705_v12  ;;  %v12269_v55 = vadd.f32 %v12166_v28, %v4612_v41 }
 0x806   : > { %v9588_v39 = vpop.eup %9587  ;;  %v7708_v25 = vmul.f32 -1.442695, %v12265_v60 }
 0x807   : > { %v9590_v16 = vpop.eup %9589  ;;  %v5040_v53 = vadd.f32 1.0, %v9588_v39  ;;  %v7707_v50 = vmul.f32 -1.442695, %v12269_v55  ;;  %v8895_v37 = vpop.f32.mrb[124].mxu1  ;;  %8990 = vmatprep.mubr.msk.f32.mxu0 %vm5279_vm6, %v5227_v9 }
 0x808   : > { %v5039_v58 = vadd.f32 1.0, %v9590_v16  ;;  %9599 = vpow2.f32 %v7708_v25  ;;  %v12276_v0 = vadd.f32 %v8895_v37, %v12166_v28  ;;  %v4622_v12 = vpop.f32.mrb[125].mxu1  ;;  %8991 = vmatmul.mubr.msk.f32.gmra.mrb[176].mxu0 %vm5279_vm6, %v5228_v2 }
 0x809   : > { %9601 = vrcp.f32 %v5040_v53  ;;  %v12280_v31 = vadd.f32 %v12166_v28, %v4622_v12 }
 0x80a   : > { %9603 = vrcp.f32 %v5039_v58  ;;  %v7710_v15 = vmul.f32 -1.442695, %v12276_v0 }
 0x80b   : > { %v9592_v51 = vpop.eup %9591  ;;  %9605 = vpow2.f32 %v7707_v50  ;;  %v7709_v41 = vmul.f32 -1.442695, %v12280_v31  ;;  %v8898_v9 = vpop.f32.mrb[126].mxu1 }
 0x80c   : > { %v9594_v39 = vpop.eup %9593  ;;  %9607 = vpow2.f32 %v7710_v15  ;;  %v12285_v25 = vadd.f32 %v8898_v9, %v12166_v28  ;;  %v4632_v16 = vpop.f32.mrb[127].mxu1  ;;  %v5230_v58 = vmul.f32 %v9592_v51, %v12221_v26 }
 0x80d   : > { %v5229_v2 = vmul.f32 %v9594_v39, %v12224_v20  ;;  %9609 = vpow2.f32 %v7709_v41  ;;  %v12289_v53 = vadd.f32 %v12166_v28, %v4632_v16 }
 0x80e   : > { %v9596_v37 = vpop.eup %9595  ;;  %v7712_v50 = vmul.f32 -1.442695, %v12285_v25 }
 0x80f   : > { %v9598_v12 = vpop.eup %9597  ;;  %v5042_v44 = vadd.f32 1.0, %v9596_v37  ;;  %v7711_v11 = vmul.f32 -1.442695, %v12289_v53  ;;  %v8901_v15 = vpop.f32.mrb[128].mxu1  ;;  %8993 = vmatprep.mubr.msk.f32.mxu0 %vm5279_vm6, %v5229_v2 }
 0x810   : > { %v5041_v9 = vadd.f32 1.0, %v9598_v12  ;;  %9611 = vpow2.f32 %v7712_v50  ;;  %v12296_v20 = vadd.f32 %v8901_v15, %v12166_v28  ;;  %v4642_v41 = vpop.f32.mrb[129].mxu1  ;;  %8994 = vmatmul.mubr.msk.f32.gmra.mrb[178].mxu0 %vm5279_vm6, %v5230_v58 }
 0x811   : > { %9613 = vrcp.f32 %v5042_v44  ;;  %v12300_v26 = vadd.f32 %v12166_v28, %v4642_v41 }
 0x812   : > { %v9600_v51 = vpop.eup %9599  ;;  %9615 = vrcp.f32 %v5041_v9  ;;  %v7714_v39 = vmul.f32 -1.442695, %v12296_v20 }
 0x813   : > { %v9602_v16 = vpop.eup %9601  ;;  %v5044_v37 = vadd.f32 1.0, %v9600_v51  ;;  %9617 = vpow2.f32 %v7711_v11  ;;  %v7713_v2 = vmul.f32 -1.442695, %v12300_v26  ;;  %v8904_v50 = vpop.f32.mrb[130].mxu1 }
 0x814   : > { %v9604_v12 = vpop.eup %9603  ;;  %9619 = vpow2.f32 %v7714_v39  ;;  %v12305_v15 = vadd.f32 %v8904_v50, %v12166_v28  ;;  %v4652_v58 = vpop.f32.mrb[131].mxu1  ;;  %v5232_v47 = vmul.f32 %v9602_v16, %v12239_v59 }
 0x815   : > { %v9606_v44 = vpop.eup %9605  ;;  %v5231_v41 = vmul.f32 %v9604_v12, %v12242_v19  ;;  %v12309_v52 = vadd.f32 %v12166_v28, %v4652_v58  ;;  %9621 = vpow2.f32 %v7713_v2 }
 0x816   : > { %v9608_v9 = vpop.eup %9607  ;;  %v5043_v51 = vadd.f32 1.0, %v9606_v44  ;;  %9623 = vrcp.f32 %v5044_v37  ;;  %v7716_v39 = vmul.f32 -1.442695, %v12305_v15 }
 0x817   : > { %v9610_v11 = vpop.eup %9609  ;;  %v5046_v8 = vadd.f32 1.0, %v9608_v9  ;;  %v8907_v10 = vpop.f32.mrb[132].mxu1  ;;  %8996 = vmatprep.mubr.msk.f32.mxu0 %vm5279_vm6, %v5231_v41  ;;  %v7715_v19 = vmul.f32 -1.442695, %v12309_v52 }
 0x818   : > { %9625 = vrcp.f32 %v5043_v51  ;;  %v5045_v50 = vadd.f32 1.0, %v9610_v11  ;;  %v12316_v12 = vadd.f32 %v8907_v10, %v12166_v28  ;;  %v4662_v58 = vpop.f32.mrb[133].mxu1  ;;  %8997 = vmatmul.mubr.msk.f32.gmra.mrb[180].mxu0 %vm5279_vm6, %v5232_v47 }
 0x819   : > { %9627 = vrcp.f32 %v5046_v8  ;;  %v12320_v59 = vadd.f32 %v12166_v28, %v4662_v58 }
 0x81a   : > { %v9612_v16 = vpop.eup %9611  ;;  %9629 = vrcp.f32 %v5045_v50  ;;  %v7718_v37 = vmul.f32 -1.442695, %v12316_v12 }
 0x81b   : > { %v9614_v2 = vpop.eup %9613  ;;  %v5048_v44 = vadd.f32 1.0, %v9612_v16  ;;  %9631 = vpow2.f32 %v7716_v39  ;;  %v7717_v41 = vmul.f32 -1.442695, %v12320_v59  ;;  %v8910_v9 = vpop.f32.mrb[134].mxu1 }
 0x81c   : > { %v9616_v51 = vpop.eup %9615  ;;  %9633 = vpow2.f32 %v7715_v19  ;;  %v12325_v10 = vadd.f32 %v8910_v9, %v12166_v28  ;;  %v4672_v47 = vpop.f32.mrb[135].mxu1  ;;  %v5234_v16 = vmul.f32 %v9614_v2, %v12256_v30 }
 0x81d   : > { %v9618_v8 = vpop.eup %9617  ;;  %v5233_v11 = vmul.f32 %v9616_v51, %v12260_v36  ;;  %9635 = vrcp.f32 %v5048_v44  ;;  %v12329_v50 = vadd.f32 %v12166_v28, %v4672_v47 }
 0x81e   : > { %v9620_v58 = vpop.eup %9619  ;;  %v5047_v39 = vadd.f32 1.0, %v9618_v8  ;;  %9637 = vpow2.f32 %v7718_v37  ;;  %v7720_v6 = vmul.f32 -1.442695, %v12325_v10 }
 0x81f   : > { %v5050_v49 = vadd.f32 1.0, %v9620_v58  ;;  %9639 = vpow2.f32 %v7717_v41  ;;  %v8913_v19 = vpop.f32.mrb[136].mxu1  ;;  %8999 = vmatprep.mubr.msk.f32.mxu0 %vm5279_vm6, %v5233_v11  ;;  %v9622_v9 = vpop.eup %9621  ;;  %v7719_v36 = vmul.f32 -1.442695, %v12329_v50 }
 0x820   : > { %9641 = vrcp.f32 %v5047_v39  ;;  %v12336_v44 = vadd.f32 %v8913_v19, %v12166_v28  ;;  %v4682_v51 = vpop.f32.mrb[137].mxu1  ;;  %9000 = vmatmul.mubr.msk.f32.gmra.mrb[182].mxu0 %vm5279_vm6, %v5234_v16  ;;  %v9624_v30 = vpop.eup %9623  ;;  %v5049_v37 = vadd.f32 1.0, %v9622_v9 }
 0x821   : > { %9643 = vrcp.f32 %v5050_v49  ;;  %v12340_v2 = vadd.f32 %v12166_v28, %v4682_v51  ;;  %v5236_v16 = vmul.f32 %v9624_v30, %v12265_v60 }
 0x822   : > { %v9626_v41 = vpop.eup %9625  ;;  %9645 = vpow2.f32 %v7720_v6  ;;  %v7722_v47 = vmul.f32 -1.442695, %v12336_v44 }
 0x823   : > { %v9628_v8 = vpop.eup %9627  ;;  %v5235_v11 = vmul.f32 %v9626_v41, %v12269_v55  ;;  %9647 = vrcp.f32 %v5049_v37  ;;  %v7721_v58 = vmul.f32 -1.442695, %v12340_v2  ;;  %v8916_v39 = vpop.f32.mrb[138].mxu1 }
 0x824   : > { %v9630_v19 = vpop.eup %9629  ;;  %9649 = vpow2.f32 %v7719_v36  ;;  %v12347_v49 = vadd.f32 %v8916_v39, %v12166_v28  ;;  %v4692_v9 = vpop.f32.mrb[139].mxu1 }
 0x825   : > { %v9632_v51 = vpop.eup %9631  ;;  %v5237_v6 = vmul.f32 %v9630_v19, %v12280_v31  ;;  %9651 = vpow2.f32 %v7722_v47  ;;  %9002 = vmatprep.mubr.msk.f32.mxu0 %vm5279_vm6, %v5235_v11  ;;  %v12352_v55 = vadd.f32 %v12166_v28, %v4692_v9  ;;  %v5238_v31 = vmul.f32 %v9628_v8, %v12276_v0 }
 0x826   : > { %v9634_v37 = vpop.eup %9633  ;;  %v5052_v41 = vadd.f32 1.0, %v9632_v51  ;;  %9653 = vpow2.f32 %v7721_v58  ;;  %v7724_v38 = vmul.f32 -1.442695, %v12347_v49  ;;  %9003 = vmatmul.mubr.msk.f32.gmra.mrb[184].mxu0 %vm5279_vm6, %v5236_v16 }
 0x827   : > { %v9636_v60 = vpop.eup %9635  ;;  %v5051_v36 = vadd.f32 1.0, %v9634_v37  ;;  %v8919_v30 = vpop.f32.mrb[140].mxu1  ;;  %9005 = vmatprep.mubr.msk.f32.mxu0 %vm5279_vm6, %v5237_v6  ;;  %v7723_v9 = vmul.f32 -1.442695, %v12352_v55 }
 0x828   : > { %v9638_v39 = vpop.eup %9637  ;;  %9655 = vrcp.f32 %v5052_v41  ;;  %v12359_v47 = vadd.f32 %v8919_v30, %v12166_v28  ;;  %v4702_v11 = vpop.f32.mrb[141].mxu1 }
 0x829   : > { %v9640_v19 = vpop.eup %9639  ;;  %9657 = vrcp.f32 %v5051_v36  ;;  %v5054_v58 = vadd.f32 1.0, %v9638_v39  ;;  %v12363_v16 = vadd.f32 %v12166_v28, %v4702_v11  ;;  %v5240_v36 = vmul.f32 %v9636_v60, %v12285_v25 }
 0x82a   : > { %v9642_v51 = vpop.eup %9641  ;;  %v5053_v37 = vadd.f32 1.0, %v9640_v19  ;;  %9659 = vpow2.f32 %v7724_v38  ;;  %v7726_v6 = vmul.f32 -1.442695, %v12359_v47  ;;  %9006 = vmatmul.mubr.msk.f32.gmra.mrb[186].mxu0 %vm5279_vm6, %v5238_v31 }
 0x82b   : > { %v9644_v0 = vpop.eup %9643  ;;  %v5239_v8 = vmul.f32 %v9642_v51, %v12289_v53  ;;  %9661 = vrcp.f32 %v5054_v58  ;;  %v8922_v41 = vpop.f32.mrb[142].mxu1  ;;  %v7725_v39 = vmul.f32 -1.442695, %v12363_v16 }
 0x82c   : > { %v9646_v30 = vpop.eup %9645  ;;  %9663 = vrcp.f32 %v5053_v37  ;;  %v12371_v11 = vadd.f32 %v8922_v41, %v12166_v28  ;;  %v4712_v19 = vpop.f32.mrb[143].mxu1  ;;  %v5242_v60 = vmul.f32 %v9644_v0, %v12296_v20 }
 0x82d   : > { %v9648_v38 = vpop.eup %9647  ;;  %v5056_v46 = vadd.f32 1.0, %v9646_v30  ;;  %9665 = vpow2.f32 %v7723_v9  ;;  %9008 = vmatprep.mubr.msk.f32.mxu0 %vm5279_vm6, %v5239_v8  ;;  %v12375_v31 = vadd.f32 %v12166_v28, %v4712_v19 }
 0x82e   : > { %v9650_v53 = vpop.eup %9649  ;;  %v5241_v58 = vmul.f32 %v9648_v38, %v12300_v26  ;;  %9667 = vpow2.f32 %v7726_v6  ;;  %9009 = vmatmul.mubr.msk.f32.gmra.mrb[188].mxu0 %vm5279_vm6, %v5240_v36  ;;  %v7728_v9 = vmul.f32 -1.442695, %v12371_v11 }
 0x82f   : > { %v9652_v25 = vpop.eup %9651  ;;  %9669 = vrcp.f32 %v5056_v46  ;;  %v5055_v51 = vadd.f32 1.0, %v9650_v53  ;;  %v8925_v37 = vpop.f32.mrb[144].mxu1  ;;  %v7727_v36 = vmul.f32 -1.442695, %v12375_v31 }
 0x830   : > { %v9654_v41 = vpop.eup %9653  ;;  %v5058_v30 = vadd.f32 1.0, %v9652_v25  ;;  %9671 = vpow2.f32 %v7725_v39  ;;  %v12382_v8 = vadd.f32 %v8925_v37, %v12166_v28  ;;  %9011 = vmatprep.mubr.msk.f32.mxu0 %vm5279_vm6, %v5241_v58  ;;  %v4722_v26 = vpop.f32.mrb[145].mxu1 }
 0x831   : > { %9673 = vrcp.f32 %v5055_v51  ;;  %v5057_v6 = vadd.f32 1.0, %v9654_v41  ;;  %v12387_v20 = vadd.f32 %v12166_v28, %v4722_v26 }
 0x832   : > { %v9656_v46 = vpop.eup %9655  ;;  %9675 = vrcp.f32 %v5058_v30  ;;  %v7730_v0 = vmul.f32 -1.442695, %v12382_v8  ;;  %9012 = vmatmul.mubr.msk.f32.gmra.mrb[190].mxu0 %vm5279_vm6, %v5242_v60 }
 0x833   : > { %v9658_v39 = vpop.eup %9657  ;;  %9677 = vrcp.f32 %v5057_v6  ;;  %v8928_v19 = vpop.f32.mrb[146].mxu1  ;;  %v7729_v58 = vmul.f32 -1.442695, %v12387_v20  ;;  %v5244_v41 = vmul.f32 %v9656_v46, %v12305_v15 }
 0x834   : > { %v9660_v38 = vpop.eup %9659  ;;  %v5243_v53 = vmul.f32 %v9658_v39, %v12309_v52  ;;  %9679 = vpow2.f32 %v7728_v9  ;;  %v12394_v25 = vadd.f32 %v8928_v19, %v12166_v28  ;;  %v4732_v51 = vpop.f32.mrb[147].mxu1 }
 0x835   : > { %v9662_v37 = vpop.eup %9661  ;;  %v5060_v30 = vadd.f32 1.0, %v9660_v38  ;;  %9681 = vpow2.f32 %v7727_v36  ;;  %v12398_v60 = vadd.f32 %v12166_v28, %v4732_v51 }
 0x836   : > { %v9664_v26 = vpop.eup %9663  ;;  %9683 = vpow2.f32 %v7730_v0  ;;  %v7732_v6 = vmul.f32 -1.442695, %v12394_v25  ;;  %9014 = vmatprep.mubr.msk.f32.mxu0 %vm5279_vm6, %v5243_v53  ;;  %v5246_v51 = vmul.f32 %v9662_v37, %v12316_v12 }
 0x837   : > { %v9666_v52 = vpop.eup %9665  ;;  %v5245_v9 = vmul.f32 %v9664_v26, %v12320_v59  ;;  %9685 = vrcp.f32 %v5060_v30  ;;  %9015 = vmatmul.mubr.msk.f32.gmra.mrb[192].mxu0 %vm5279_vm6, %v5244_v41  ;;  %v8931_v39 = vpop.f32.mrb[148].mxu1  ;;  %v7731_v36 = vmul.f32 -1.442695, %v12398_v60 }
 0x838   : > { %v9668_v19 = vpop.eup %9667  ;;  %v5059_v15 = vadd.f32 1.0, %v9666_v52  ;;  %9687 = vpow2.f32 %v7729_v58  ;;  %v12406_v46 = vadd.f32 %v8931_v39, %v12166_v28  ;;  %v4742_v0 = vpop.f32.mrb[149].mxu1 }
 0x839   : > { %v9670_v38 = vpop.eup %9669  ;;  %v5062_v53 = vadd.f32 1.0, %v9668_v19  ;;  %9689 = vpow2.f32 %v7732_v6  ;;  %9017 = vmatprep.mubr.msk.f32.mxu0 %vm5279_vm6, %v5245_v9  ;;  %v12411_v59 = vadd.f32 %v12166_v28, %v4742_v0 }
 0x83a   : > { %v9672_v41 = vpop.eup %9671  ;;  %9691 = vrcp.f32 %v5059_v15  ;;  %v7734_v58 = vmul.f32 -1.442695, %v12406_v46  ;;  %v5248_v15 = vmul.f32 %v9670_v38, %v12325_v10 }
 0x83b   : > { %v9674_v30 = vpop.eup %9673  ;;  %9693 = vrcp.f32 %v5062_v53  ;;  %v5061_v26 = vadd.f32 1.0, %v9672_v41  ;;  %v7733_v52 = vmul.f32 -1.442695, %v12411_v59  ;;  %9018 = vmatmul.mubr.msk.f32.gmra.mrb[194].mxu0 %vm5279_vm6, %v5246_v51  ;;  %v8934_v39 = vpop.f32.mrb[150].mxu1 }
 0x83c   : > { %v9676_v12 = vpop.eup %9675  ;;  %v5247_v37 = vmul.f32 %v9674_v30, %v12329_v50  ;;  %9695 = vpow2.f32 %v7731_v36  ;;  %v12418_v6 = vadd.f32 %v8934_v39, %v12166_v28  ;;  %v4752_v9 = vpop.f32.mrb[151].mxu1 }
 0x83d   : > { %v9678_v19 = vpop.eup %9677  ;;  %9697 = vrcp.f32 %v5061_v26  ;;  %v12422_v0 = vadd.f32 %v12166_v28, %v4752_v9 }
 0x83e   : > { %v9680_v53 = vpop.eup %9679  ;;  %v5249_v41 = vmul.f32 %v9678_v19, %v12340_v2  ;;  %9699 = vpow2.f32 %v7734_v58  ;;  %v7736_v51 = vmul.f32 -1.442695, %v12418_v6  ;;  %9020 = vmatprep.mubr.msk.f32.mxu0 %vm5279_vm6, %v5247_v37  ;;  %v5250_v37 = vmul.f32 %v9676_v12, %v12336_v44 }
 0x83f   : > { %v9682_v50 = vpop.eup %9681  ;;  %v5064_v36 = vadd.f32 1.0, %v9680_v53  ;;  %9701 = vpow2.f32 %v7733_v52  ;;  %9021 = vmatmul.mubr.msk.f32.gmra.mrb[196].mxu0 %vm5279_vm6, %v5248_v15  ;;  %v8937_v30 = vpop.f32.mrb[152].mxu1  ;;  %v7735_v38 = vmul.f32 -1.442695, %v12422_v0 }
 0x840   : > { %v9684_v39 = vpop.eup %9683  ;;  %v5063_v10 = vadd.f32 1.0, %v9682_v50  ;;  %9703 = vpow2.f32 %v7736_v51  ;;  %v12430_v26 = vadd.f32 %v8937_v30, %v12166_v28  ;;  %9023 = vmatprep.mubr.msk.f32.mxu0 %vm5279_vm6, %v5249_v41  ;;  %v4762_v2 = vpop.f32.mrb[153].mxu1 }
 0x841   : > { %v9686_v58 = vpop.eup %9685  ;;  %9705 = vrcp.f32 %v5064_v36  ;;  %v5066_v9 = vadd.f32 1.0, %v9684_v39  ;;  %v12435_v52 = vadd.f32 %v12166_v28, %v4762_v2 }
 0x842   : > { %v9688_v19 = vpop.eup %9687  ;;  %9707 = vrcp.f32 %v5063_v10  ;;  %v7738_v51 = vmul.f32 -1.442695, %v12430_v26 }
 0x843   : > { %v9690_v15 = vpop.eup %9689  ;;  %9709 = vrcp.f32 %v5066_v9  ;;  %v5065_v53 = vadd.f32 1.0, %v9688_v19  ;;  %9024 = vmatmul.mubr.msk.f32.gmra.mrb[198].mxu0 %vm5279_vm6, %v5250_v37  ;;  %v8940_v50 = vpop.f32.mrb[154].mxu1  ;;  %v7737_v44 = vmul.f32 -1.442695, %v12435_v52  ;;  %v5252_v9 = vmul.f32 %v9686_v58, %v12347_v49 }
 0x844   : > { %v9692_v41 = vpop.eup %9691  ;;  %v5068_v30 = vadd.f32 1.0, %v9690_v15  ;;  %9711 = vpow2.f32 %v7735_v38  ;;  %v12441_v12 = vadd.f32 %v8940_v50, %v12166_v28  ;;  %v4772_v36 = vpop.f32.mrb[155].mxu1 }
 0x845   : > { %v9694_v39 = vpop.eup %9693  ;;  %v5251_v10 = vmul.f32 %v9692_v41, %v12352_v55  ;;  %9713 = vrcp.f32 %v5065_v53  ;;  %v12447_v19 = vadd.f32 %v12166_v28, %v4772_v36 }
 0x846   : > { %v9696_v2 = vpop.eup %9695  ;;  %9715 = vrcp.f32 %v5068_v30  ;;  %v7740_v37 = vmul.f32 -1.442695, %v12441_v12  ;;  %v5254_v30 = vmul.f32 %v9694_v39, %v12359_v47 }
 0x847   : > { %v9698_v38 = vpop.eup %9697  ;;  %v5067_v15 = vadd.f32 1.0, %v9696_v2  ;;  %9717 = vpow2.f32 %v7738_v51  ;;  %9026 = vmatprep.mubr.msk.f32.mxu0 %vm5279_vm6, %v5251_v10  ;;  %v8943_v50 = vpop.f32.mrb[156].mxu1 }
 0x848   : > { %v9700_v35 = vpop.eup %9699  ;;  %v5253_v27 = vmul.f32 %v9698_v38, %v12363_v16  ;;  %9719 = vpow2.f32 %v7737_v44  ;;  %9027 = vmatmul.mubr.msk.f32.gmra.mrb[200].mxu0 %vm5279_vm6, %v5252_v9  ;;  %v12453_v49 = vadd.f32 %v8943_v50, %v12166_v28  ;;  %v4782_v55 = vpop.f32.mrb[157].mxu1  ;;  %v7739_v16 = vmul.f32 -1.442695, %v12447_v19 }
 0x849   : > { %v9702_v58 = vpop.eup %9701  ;;  %9721 = vrcp.f32 %v5067_v15  ;;  %v5070_v53 = vadd.f32 1.0, %v9700_v35  ;;  %v12456_v41 = vadd.f32 %v12166_v28, %v4782_v55 }
 0x84a   : > { %v9704_v51 = vpop.eup %9703  ;;  %v5069_v36 = vadd.f32 1.0, %v9702_v58  ;;  %9723 = vpow2.f32 %v7740_v37  ;;  %9029 = vmatprep.mubr.msk.f32.mxu0 %vm5279_vm6, %v5253_v27  ;;  %v7742_v2 = vmul.f32 -1.442695, %v12453_v49 }
 0x84b   : > { %v9706_v44 = vpop.eup %9705  ;;  %9725 = vrcp.f32 %v5070_v53  ;;  %v5072_v10 = vadd.f32 1.0, %v9704_v51  ;;  %v8946_v9 = vpop.f32.mrb[158].mxu1  ;;  %v7741_v35 = vmul.f32 -1.442695, %v12456_v41 }
 0x84c   : > { %v9708_v38 = vpop.eup %9707  ;;  %9727 = vrcp.f32 %v5069_v36  ;;  %9030 = vmatmul.mubr.msk.f32.gmra.mrb[202].mxu0 %vm5279_vm6, %v5254_v30  ;;  %v12465_v47 = vadd.f32 %v8946_v9, %v12166_v28  ;;  %v4792_v39 = vpop.f32.mrb[159].mxu1  ;;  %v5256_v55 = vmul.f32 %v9706_v44, %v12371_v11 }
 0x84d   : > { %v9710_v37 = vpop.eup %9709  ;;  %v5255_v15 = vmul.f32 %v9708_v38, %v12375_v31  ;;  %9729 = vrcp.f32 %v5072_v10  ;;  %v12469_v27 = vadd.f32 %v12166_v28, %v4792_v39  ;;  %v9783_v28 = vld [vmem:[%s13794_s3 + $0x16d] ss:$0 sm:$0xff] }
 0x84e   : > { %v9712_v50 = vpop.eup %9711  ;;  %9731 = vpow2.f32 %v7739_v16  ;;  %v7744_v58 = vmul.f32 -1.442695, %v12465_v47  ;;  %v5258_v38 = vmul.f32 %v9710_v37, %v12382_v8 }
 0x84f   : > { %v9714_v53 = vpop.eup %9713  ;;  %v5071_v51 = vadd.f32 1.0, %v9712_v50  ;;  %9733 = vpow2.f32 %v7742_v2  ;;  %9032 = vmatprep.mubr.msk.f32.mxu0 %vm5279_vm6, %v5255_v15  ;;  %v7743_v30 = vmul.f32 -1.442695, %v12469_v27  ;;  %v8949_v36 = vpop.f32.mrb[160].mxu1 }
 0x850   : > { %v9716_v9 = vpop.eup %9715  ;;  %v5257_v31 = vmul.f32 %v9714_v53, %v12387_v20  ;;  %9735 = vpow2.f32 %v7741_v35  ;;  %9033 = vmatmul.mubr.msk.f32.gmra.mrb[204].mxu0 %vm5279_vm6, %v5256_v55  ;;  %v12480_v11 = vadd.f32 %v9783_v28, %v8949_v36  ;;  %v4802_v16 = vpop.f32.mrb[161].mxu1 }
 0x851   : > { %v9718_v44 = vpop.eup %9717  ;;  %9737 = vrcp.f32 %v5071_v51  ;;  %v12482_v10 = vadd.f32 %v9783_v28, %v4802_v16 }
 0x852   : > { %v9720_v2 = vpop.eup %9719  ;;  %v5074_v39 = vadd.f32 1.0, %v9718_v44  ;;  %9739 = vpow2.f32 %v7744_v58  ;;  %v7746_v20 = vmul.f32 -1.442695, %v12480_v11  ;;  %9035 = vmatprep.mubr.msk.f32.mxu0 %vm5279_vm6, %v5257_v31 }
 0x853   : > { %v9722_v35 = vpop.eup %9721  ;;  %v5073_v15 = vadd.f32 1.0, %v9720_v2  ;;  %9741 = vpow2.f32 %v7743_v30  ;;  %v8952_v50 = vpop.f32.mrb[162].mxu1  ;;  %v7745_v51 = vmul.f32 -1.442695, %v12482_v10  ;;  %v5260_v30 = vmul.f32 %v9716_v9, %v12394_v25 }
 0x854   : > { %v9724_v55 = vpop.eup %9723  ;;  %v5259_v53 = vmul.f32 %v9722_v35, %v12398_v60  ;;  %9743 = vrcp.f32 %v5074_v39  ;;  %9036 = vmatmul.mubr.msk.f32.gmra.mrb[206].mxu0 %vm5279_vm6, %v5258_v38  ;;  %v12490_v36 = vadd.f32 %v9783_v28, %v8952_v50  ;;  %v4812_v8 = vpop.f32.mrb[163].mxu1 }
 0x855   : > { %v9726_v37 = vpop.eup %9725  ;;  %9745 = vrcp.f32 %v5073_v15  ;;  %v5076_v58 = vadd.f32 1.0, %v9724_v55  ;;  %v12492_v16 = vadd.f32 %v9783_v28, %v4812_v8 }
 0x856   : > { %v9728_v31 = vpop.eup %9727  ;;  %9747 = vpow2.f32 %v7746_v20  ;;  %v7748_v44 = vmul.f32 -1.442695, %v12490_v36  ;;  %9038 = vmatprep.mubr.msk.f32.mxu0 %vm5279_vm6, %v5259_v53  ;;  %v5262_v20 = vmul.f32 %v9726_v37, %v12406_v46 }
 0x857   : > { %v9730_v60 = vpop.eup %9729  ;;  %v5261_v2 = vmul.f32 %v9728_v31, %v12411_v59  ;;  %9749 = vrcp.f32 %v5076_v58  ;;  %v7747_v38 = vmul.f32 -1.442695, %v12492_v16 }
 0x858   : > { %v9732_v39 = vpop.eup %9731  ;;  %9751 = vpow2.f32 %v7745_v51  ;;  %9039 = vmatmul.mubr.msk.f32.gmra.mrb[208].mxu0 %vm5279_vm6, %v5260_v30 }
 0x859   : > { %v9734_v35 = vpop.eup %9733  ;;  %v5075_v15 = vadd.f32 1.0, %v9732_v39  ;;  %9753 = vpow2.f32 %v7748_v44  ;;  %9041 = vmatprep.mubr.msk.f32.mxu0 %vm5279_vm6, %v5261_v2  ;;  %v5264_v2 = vmul.f32 %v9730_v60, %v12418_v6 }
 0x85a   : > { %v8955_v25 = vpop.f32.mrb[164].mxu1  ;;  %v9736_v9 = vpop.eup %9735  ;;  %v5078_v50 = vadd.f32 1.0, %v9734_v35  ;;  %9755 = vpow2.f32 %v7747_v38 }
 0x85b   : > { %v12502_v55 = vadd.f32 %v9783_v28, %v8955_v25  ;;  %v4822_v59 = vpop.f32.mrb[165].mxu1  ;;  %v9738_v53 = vpop.eup %9737  ;;  %9757 = vrcp.f32 %v5075_v15  ;;  %v5077_v8 = vadd.f32 1.0, %v9736_v9 }
 0x85c   : > { %v12504_v51 = vadd.f32 %v9783_v28, %v4822_v59  ;;  %v9740_v58 = vpop.eup %9739  ;;  %v5263_v31 = vmul.f32 %v9738_v53, %v12422_v0  ;;  %9759 = vrcp.f32 %v5078_v50  ;;  %9042 = vmatmul.mubr.msk.f32.gmra.mrb[210].mxu0 %vm5279_vm6, %v5262_v20 }
 0x85d   : > { %v7750_v30 = vmul.f32 -1.442695, %v12502_v55  ;;  %v9742_v44 = vpop.eup %9741  ;;  %9761 = vrcp.f32 %v5077_v8  ;;  %v5080_v38 = vadd.f32 1.0, %v9740_v58 }
 0x85e   : > { %v7749_v46 = vmul.f32 -1.442695, %v12504_v51  ;;  %v9744_v37 = vpop.eup %9743  ;;  %v5079_v39 = vadd.f32 1.0, %v9742_v44  ;;  %9044 = vmatprep.mubr.msk.f32.mxu0 %vm5279_vm6, %v5263_v31 }
 0x85f   : > { %9763 = vpow2.f32 %v7750_v30  ;;  %v9746_v28 = vpop.eup %9745  ;;  %v5266_v9 = vmul.f32 %v9744_v37, %v12430_v26 }
 0x860   : > { %v9748_v35 = vpop.eup %9747  ;;  %v5265_v0 = vmul.f32 %v9746_v28, %v12435_v52  ;;  %9765 = vrcp.f32 %v5079_v39  ;;  %9045 = vmatmul.mubr.msk.f32.gmra.mrb[212].mxu0 %vm5279_vm6, %v5264_v2 }
 0x861   : > { %v9750_v15 = vpop.eup %9749  ;;  %9767 = vpow2.f32 %v7749_v46  ;;  %v5082_v20 = vadd.f32 1.0, %v9748_v35 }
 0x862   : > { %v9752_v25 = vpop.eup %9751  ;;  %9769 = vrcp.f32 %v5080_v38  ;;  %9047 = vmatprep.mubr.msk.f32.mxu0 %vm5279_vm6, %v5265_v0  ;;  %v5268_v26 = vmul.f32 %v9750_v15, %v12441_v12 }
 0x863   : > { %v9754_v6 = vpop.eup %9753  ;;  %v5081_v60 = vadd.f32 1.0, %v9752_v25 }
 0x864   : > { %v9756_v50 = vpop.eup %9755  ;;  %9048 = vmatmul.mubr.msk.f32.gmra.mrb[214].mxu0 %vm5279_vm6, %v5266_v9  ;;  %v5084_v58 = vadd.f32 1.0, %v9754_v6 }
 0x865   : > { %v9758_v59 = vpop.eup %9757  ;;  %9771 = vrcp.f32 %v5081_v60  ;;  %v5083_v52 = vadd.f32 1.0, %v9756_v50 }
 0x866   : > { %v9760_v53 = vpop.eup %9759  ;;  %v5267_v8 = vmul.f32 %v9758_v59, %v12447_v19  ;;  %9773 = vrcp.f32 %v5082_v20 }
 0x867   : > { %v9762_v31 = vpop.eup %9761  ;;  %9775 = vrcp.f32 %v5083_v52  ;;  %v5270_v19 = vmul.f32 %v9760_v53, %v12453_v49 }
 0x868   : > { %v5269_v44 = vmul.f32 %v9762_v31, %v12456_v41  ;;  %9050 = vmatprep.mubr.msk.f32.mxu0 %vm5279_vm6, %v5267_v8  ;;  %9777 = vrcp.f32 %v5084_v58 }
 0x869   : > { %v9764_v30 = vpop.eup %9763  ;;  %9051 = vmatmul.mubr.msk.f32.gmra.mrb[216].mxu0 %vm5279_vm6, %v5268_v26 }
 0x86a   : > { %v5086_v46 = vadd.f32 1.0, %v9764_v30  ;;  %v9766_v37 = vpop.eup %9765  ;;  %9053 = vmatprep.mubr.msk.f32.mxu0 %vm5279_vm6, %v5269_v44 }
 0x86b   : > { %v9768_v2 = vpop.eup %9767  ;;  %v5271_v38 = vmul.f32 %v9766_v37, %v12469_v27 }
 0x86c   : > { %v9770_v39 = vpop.eup %9769  ;;  %v5085_v12 = vadd.f32 1.0, %v9768_v2  ;;  %9779 = vrcp.f32 %v5086_v46 }
 0x86d   : > { %9054 = vmatmul.mubr.msk.f32.gmra.mrb[218].mxu0 %vm5279_vm6, %v5270_v19  ;;  %v5272_v28 = vmul.f32 %v9770_v39, %v12465_v47 }
 0x86e   : > { %9781 = vrcp.f32 %v5085_v12  ;;  %9056 = vmatprep.mubr.msk.f32.mxu0 %vm5279_vm6, %v5271_v38 }
 0x86f   : > { %v9772_v41 = vpop.eup %9771 }
 0x870   : > { %v9774_v35 = vpop.eup %9773  ;;  %v5273_v0 = vmul.f32 %v9772_v41, %v12482_v10 }
 0x871   : > { %v9776_v15 = vpop.eup %9775  ;;  %9057 = vmatmul.mubr.msk.f32.gmra.mrb[220].mxu0 %vm5279_vm6, %v5272_v28  ;;  %v5274_v27 = vmul.f32 %v9774_v35, %v12480_v11 }
 0x872   : > { %v5275_v49 = vmul.f32 %v9776_v15, %v12492_v16  ;;  %9059 = vmatprep.mubr.msk.f32.mxu0 %vm5279_vm6, %v5273_v0  ;;  %v9778_v25 = vpop.eup %9777  ;;  %v12544_v16 = vld [vmem:[%s13794_s3 + $0x16e] ss:$0 sm:$0xff] }
 0x873   : > { %v5276_v47 = vmul.f32 %v9778_v25, %v12490_v36 }
 0x875   : > { %9060 = vmatmul.mubr.msk.f32.gmra.mrb[222].mxu0 %vm5279_vm6, %v5274_v27 }
 0x876   : > { %9062 = vmatprep.mubr.msk.f32.mxu0 %vm5279_vm6, %v5275_v49  ;;  %v9780_v9 = vpop.eup %9779 }
 0x877   : > { %v5278_v6 = vmul.f32 %v9780_v9, %v12502_v55 }
 0x878   : > { %v9782_v20 = vpop.eup %9781 }
 0x879   : > { %v5277_v10 = vmul.f32 %v9782_v20, %v12504_v51  ;;  %9063 = vmatmul.mubr.msk.f32.gmra.mrb[224].mxu0 %vm5279_vm6, %v5276_v47 }
 0x87b   : > { %9065 = vmatprep.mubr.msk.f32.mxu0 %vm5279_vm6, %v5277_v10 }
 0x87d   : > { %9066 = vmatmul.mubr.msk.f32.gmra.mrb[226].mxu0 %vm5279_vm6, %v5278_v6 }
 0x8ab   : > { %v8974_v11 = vpop.f32.mrb[164].mxu0 }
 0x8ac   : > { %v5858_v60 = vadd.f32 %v8974_v11, %v11761_v45  ;;  %v5538_v36 = vpop.f32.mrb[165].mxu0 }
 0x8ad   : > { %v5857_v50 = vadd.f32 %v5538_v36, %v11758_v61 }
 0x8ae   : > { %v5926_v59 = vadd.f32 %v12544_v16, %v5858_v60 }
 0x8af   : > { %v5925_v51 = vadd.f32 %v12544_v16, %v5857_v50 }
 0x8b1   : > { %9076 = vmatprep.mubr.msk.f32.mxu1 %vm435_vm2, %v5925_v51 }
 0x8b2   : > { %9077 = vmatmul.mubr.msk.f32.vlgmr.msra.gmra.mrb[166].mxu1 %vm435_vm2, %v5926_v59 }
 0x8b3   : > { %v8977_v55 = vpop.f32.mrb[166].mxu0 }
 0x8b4   : > { %v5860_v52 = vadd.f32 %v8977_v55, %v11773_v48  ;;  %v5548_v53 = vpop.f32.mrb[167].mxu0 }
 0x8b5   : > { %v5859_v8 = vadd.f32 %v5548_v53, %v11770_v24 }
 0x8b6   : > { %v5928_v45 = vadd.f32 %v12544_v16, %v5860_v52 }
 0x8b7   : > { %v5927_v58 = vadd.f32 %v12544_v16, %v5859_v8 }
 0x8b9   : > { %9079 = vmatprep.mubr.msk.f32.mxu1 %vm435_vm2, %v5927_v58 }
 0x8ba   : > { %9080 = vmatmul.mubr.msk.f32.gmra.mrb[168].mxu1 %vm435_vm2, %v5928_v45  ;;  %v14073_v45 = vld [vmem:[#allocation43_spill] sm:$0xff] }
 0x8bb   : > { %v8980_v61 = vpop.f32.mrb[168].mxu0 }
 0x8bc   : > { %v5862_v31 = vadd.f32 %v8980_v61, %v11785_v63  ;;  %v5558_v26 = vpop.f32.mrb[169].mxu0 }
 0x8bd   : > { %v5861_v30 = vadd.f32 %v5558_v26, %v11782_v14 }
 0x8be   : > { %v5930_v48 = vadd.f32 %v12544_v16, %v5862_v31 }
 0x8bf   : > { %v5929_v44 = vadd.f32 %v12544_v16, %v5861_v30 }
 0x8c1   : > { %9082 = vmatprep.mubr.msk.f32.mxu1 %vm435_vm2, %v5929_v44 }
 0x8c2   : > { %9083 = vmatmul.mubr.msk.f32.gmra.mrb[170].mxu1 %vm435_vm2, %v5930_v48  ;;  %v14075_v48 = vld [vmem:[#allocation44_spill] sm:$0xff] }
 0x8c3   : > { %v8983_v24 = vpop.f32.mrb[170].mxu0 }
 0x8c4   : > { %v5864_v46 = vadd.f32 %v8983_v24, %v11797_v62  ;;  %v5568_v37 = vpop.f32.mrb[171].mxu0 }
 0x8c5   : > { %v5863_v2 = vadd.f32 %v5568_v37, %v11794_v1 }
 0x8c6   : > { %v5932_v63 = vadd.f32 %v12544_v16, %v5864_v46 }
 0x8c7   : > { %v5931_v19 = vadd.f32 %v12544_v16, %v5863_v2 }
 0x8c9   : > { %9085 = vmatprep.mubr.msk.f32.mxu1 %vm435_vm2, %v5931_v19  ;;  %v14076_v19 = vld [vmem:[#allocation49_spill] sm:$0xff] }
 0x8ca   : > { %9086 = vmatmul.mubr.msk.f32.gmra.mrb[172].mxu1 %vm435_vm2, %v5932_v63 }
 0x8cb   : > { %v8986_v14 = vpop.f32.mrb[172].mxu0 }
 0x8cc   : > { %v5866_v38 = vadd.f32 %v8986_v14, %v11815_v4  ;;  %v5578_v39 = vpop.f32.mrb[173].mxu0 }
 0x8cd   : > { %v5865_v12 = vadd.f32 %v5578_v39, %v11812_v3 }
 0x8ce   : > { %v5934_v62 = vadd.f32 %v12544_v16, %v5866_v38  ;;  %v14077_v38 = vld [vmem:[#allocation48_spill] sm:$0xff] }
 0x8cf   : > { %v5933_v41 = vadd.f32 %v12544_v16, %v5865_v12 }
 0x8d1   : > { %9088 = vmatprep.mubr.msk.f32.mxu1 %vm435_vm2, %v5933_v41 }
 0x8d2   : > { %9089 = vmatmul.mubr.msk.f32.gmra.mrb[174].mxu1 %vm435_vm2, %v5934_v62 }
 0x8d3   : > { %v8989_v1 = vpop.f32.mrb[174].mxu0 }
 0x8d4   : > { %v5868_v28 = vadd.f32 %v8989_v1, %v11833_v42  ;;  %v5588_v35 = vpop.f32.mrb[175].mxu0  ;;  %v14078_v1 = vld [vmem:[#allocation52_spill] sm:$0xff] }
 0x8d5   : > { %v5867_v0 = vadd.f32 %v5588_v35, %v11830_v32 }
 0x8d6   : > { %v5936_v4 = vadd.f32 %v12544_v16, %v5868_v28 }
 0x8d7   : > { %v5935_v15 = vadd.f32 %v12544_v16, %v5867_v0  ;;  %v14079_v0 = vld [vmem:[#allocation50_spill] sm:$0xff] }
 0x8d9   : > { %9091 = vmatprep.mubr.msk.f32.mxu1 %vm435_vm2, %v5935_v15 }
 0x8da   : > { %9092 = vmatmul.mubr.msk.f32.gmra.mrb[176].mxu1 %vm435_vm2, %v5936_v4 }
 0x8db   : > { %v8992_v3 = vpop.f32.mrb[176].mxu0 }
 0x8dc   : > { %v5870_v49 = vadd.f32 %v8992_v3, %v11845_v18  ;;  %v5598_v27 = vpop.f32.mrb[177].mxu0 }
 0x8dd   : > { %v5869_v25 = vadd.f32 %v5598_v27, %v11842_v40  ;;  %v14080_v27 = vld [vmem:[#allocation54_spill] sm:$0xff] }
 0x8de   : > { %v5938_v42 = vadd.f32 %v12544_v16, %v5870_v49 }
 0x8df   : > { %v5937_v9 = vadd.f32 %v12544_v16, %v5869_v25 }
 0x8e1   : > { %9094 = vmatprep.mubr.msk.f32.mxu1 %vm435_vm2, %v5937_v9 }
 0x8e2   : > { %9095 = vmatmul.mubr.msk.f32.gmra.mrb[178].mxu1 %vm435_vm2, %v5938_v42  ;;  %v14081_v42 = vld [vmem:[#allocation51_spill] sm:$0xff] }
 0x8e3   : > { %v8995_v32 = vpop.f32.mrb[178].mxu0 }
 0x8e4   : > { %v5872_v47 = vadd.f32 %v8995_v32, %v11857_v7  ;;  %v5608_v20 = vpop.f32.mrb[179].mxu0 }
 0x8e5   : > { %v5871_v10 = vadd.f32 %v5608_v20, %v11854_v22 }
 0x8e6   : > { %v5940_v18 = vadd.f32 %v12544_v16, %v5872_v47 }
 0x8e7   : > { %v5939_v6 = vadd.f32 %v12544_v16, %v5871_v10 }
 0x8e9   : > { %9097 = vmatprep.mubr.msk.f32.mxu1 %vm435_vm2, %v5939_v6 }
 0x8ea   : > { %9098 = vmatmul.mubr.msk.f32.gmra.mrb[180].mxu1 %vm435_vm2, %v5940_v18 }
 0x8eb   : > { %v8998_v40 = vpop.f32.mrb[180].mxu0 }
 0x8ec   : > { %v5874_v11 = vadd.f32 %v8998_v40, %v11869_v23  ;;  %v5618_v60 = vpop.f32.mrb[181].mxu0 }
 0x8ed   : > { %v5873_v36 = vadd.f32 %v5618_v60, %v11866_v57  ;;  %v14072_v57 = vld [vmem:[#allocation47_spill] sm:$0xff] }
 0x8ee   : > { %v5942_v7 = vadd.f32 %v12544_v16, %v5874_v11 }
 0x8ef   : > { %v5941_v50 = vadd.f32 %v12544_v16, %v5873_v36 }
 0x8f1   : > { %9100 = vmatprep.mubr.msk.f32.mxu1 %vm435_vm2, %v5941_v50 }
 0x8f2   : > { %9101 = vmatmul.mubr.msk.f32.gmra.mrb[182].mxu1 %vm435_vm2, %v5942_v7 }
 0x8f3   : > { %v9001_v22 = vpop.f32.mrb[182].mxu0 }
 0x8f4   : > { %v5876_v51 = vadd.f32 %v9001_v22, %v11881_v56  ;;  %v5628_v59 = vpop.f32.mrb[183].mxu0 }
 0x8f5   : > { %v5875_v55 = vadd.f32 %v5628_v59, %v11878_v21  ;;  %v14074_v21 = vld [vmem:[#allocation46_spill] sm:$0xff] }
 0x8f6   : > { %v5944_v23 = vadd.f32 %v12544_v16, %v5876_v51 }
 0x8f7   : > { %v5943_v52 = vadd.f32 %v12544_v16, %v5875_v55 }
 0x8f9   : > { %v9004_v53 = vpop.f32.mrb[184].mxu0  ;;  %9103 = vmatprep.mubr.msk.f32.mxu1 %vm435_vm2, %v5943_v52  ;;  %v14082_v52 = vld [vmem:[#allocation53_spill] sm:$0xff] }
 0x8fa   : > { %v5878_v8 = vadd.f32 %v9004_v53, %v14072_v57  ;;  %v5638_v58 = vpop.f32.mrb[185].mxu0  ;;  %9104 = vmatmul.mubr.msk.f32.gmra.mrb[184].mxu1 %vm435_vm2, %v5944_v23 }
 0x8fb   : > { %v5877_v61 = vadd.f32 %v5638_v58, %v14073_v45 }
 0x8fc   : > { %v5946_v26 = vadd.f32 %v12544_v16, %v5878_v8 }
 0x8fd   : > { %v5945_v31 = vadd.f32 %v12544_v16, %v5877_v61  ;;  %v9007_v56 = vpop.f32.mrb[186].mxu0 }
 0x8fe   : > { %v5880_v30 = vadd.f32 %v9007_v56, %v14074_v21  ;;  %v5648_v44 = vpop.f32.mrb[187].mxu0 }
 0x8ff   : > { %v5879_v24 = vadd.f32 %v5648_v44, %v14075_v48  ;;  %9106 = vmatprep.mubr.msk.f32.mxu1 %vm435_vm2, %v5945_v31  ;;  %v14084_v44 = vld [vmem:[#allocation39_spill] sm:$0xff] }
 0x900   : > { %9107 = vmatmul.mubr.msk.f32.gmra.mrb[186].mxu1 %vm435_vm2, %v5946_v26  ;;  %v5948_v2 = vadd.f32 %v12544_v16, %v5880_v30  ;;  %v14083_v26 = vld [vmem:[#allocation55_spill] sm:$0xff] }
 0x901   : > { %v5947_v46 = vadd.f32 %v12544_v16, %v5879_v24  ;;  %v9010_v37 = vpop.f32.mrb[188].mxu0 }
 0x902   : > { %v5882_v63 = vadd.f32 %v9010_v37, %v14076_v19  ;;  %v5658_v14 = vpop.f32.mrb[189].mxu0 }
 0x903   : > { %v5881_v39 = vadd.f32 %v5658_v14, %v14077_v38  ;;  %9109 = vmatprep.mubr.msk.f32.mxu1 %vm435_vm2, %v5947_v46  ;;  %v14085_v46 = vld [vmem:[#allocation38_spill] sm:$0xff] }
 0x904   : > { %9110 = vmatmul.mubr.msk.f32.gmra.mrb[188].mxu1 %vm435_vm2, %v5948_v2  ;;  %v5950_v62 = vadd.f32 %v12544_v16, %v5882_v63  ;;  %v14086_v63 = vld [vmem:[#allocation41_spill] sm:$0xff] }
 0x905   : > { %v5949_v12 = vadd.f32 %v12544_v16, %v5881_v39  ;;  %v9013_v41 = vpop.f32.mrb[190].mxu0  ;;  %v14087_v39 = vld [vmem:[#allocation40_spill] sm:$0xff] }
 0x906   : > { %v5884_v28 = vadd.f32 %v9013_v41, %v14078_v1  ;;  %v5668_v35 = vpop.f32.mrb[191].mxu0 }
 0x907   : > { %v5883_v15 = vadd.f32 %v5668_v35, %v14079_v0  ;;  %9112 = vmatprep.mubr.msk.f32.mxu1 %vm435_vm2, %v5949_v12 }
 0x908   : > { %9113 = vmatmul.mubr.msk.f32.gmra.mrb[190].mxu1 %vm435_vm2, %v5950_v62  ;;  %v5952_v3 = vadd.f32 %v12544_v16, %v5884_v28  ;;  %v14088_v28 = vld [vmem:[#allocation42_spill] sm:$0xff] }
 0x909   : > { %v5951_v4 = vadd.f32 %v12544_v16, %v5883_v15  ;;  %v14089_v15 = vld [vmem:[#allocation45_spill] sm:$0xff] }
 0x90a   : > { %v9016_v49 = vpop.f32.mrb[192].mxu0 }
 0x90b   : > { %v5886_v25 = vadd.f32 %v9016_v49, %v14080_v27  ;;  %v5678_v9 = vpop.f32.mrb[193].mxu0  ;;  %9115 = vmatprep.mubr.msk.f32.mxu1 %vm435_vm2, %v5951_v4 }
 0x90c   : > { %v5885_v32 = vadd.f32 %v5678_v9, %v14081_v42  ;;  %9116 = vmatmul.mubr.msk.f32.gmra.mrb[192].mxu1 %vm435_vm2, %v5952_v3 }
 0x90d   : > { %v5954_v10 = vadd.f32 %v12544_v16, %v5886_v25  ;;  %v14090_v25 = vld [vmem:[#allocation7_spill] sm:$0xff] }
 0x90e   : > { %v5953_v47 = vadd.f32 %v12544_v16, %v5885_v32  ;;  %v9019_v20 = vpop.f32.mrb[194].mxu0  ;;  %v14091_v32 = vld [vmem:[#allocation6_spill] sm:$0xff] }
 0x90f   : > { %v5888_v6 = vadd.f32 %v9019_v20, %v11953_v13  ;;  %v5688_v18 = vpop.f32.mrb[195].mxu0 }
 0x910   : > { %v5887_v40 = vadd.f32 %v5688_v18, %v11950_v5  ;;  %9118 = vmatprep.mubr.msk.f32.mxu1 %vm435_vm2, %v5953_v47  ;;  %v14092_v18 = vld [vmem:[#allocation9_spill] sm:$0xff] }
 0x911   : > { %9119 = vmatmul.mubr.msk.f32.gmra.mrb[194].mxu1 %vm435_vm2, %v5954_v10  ;;  %v5956_v36 = vadd.f32 %v12544_v16, %v5888_v6 }
 0x912   : > { %v5955_v11 = vadd.f32 %v12544_v16, %v5887_v40  ;;  %v9022_v60 = vpop.f32.mrb[196].mxu0 }
 0x913   : > { %v5890_v50 = vadd.f32 %v9022_v60, %v11965_v29  ;;  %v5698_v7 = vpop.f32.mrb[197].mxu0  ;;  %v14093_v60 = vld [vmem:[#allocation8_spill] sm:$0xff] }
 0x914   : > { %v5889_v22 = vadd.f32 %v5698_v7, %v11962_v33  ;;  %9121 = vmatprep.mubr.msk.f32.mxu1 %vm435_vm2, %v5955_v11 }
 0x915   : > { %9122 = vmatmul.mubr.msk.f32.gmra.mrb[196].mxu1 %vm435_vm2, %v5956_v36  ;;  %v5958_v51 = vadd.f32 %v12544_v16, %v5890_v50 }
 0x916   : > { %v5957_v13 = vadd.f32 %v12544_v16, %v5889_v22  ;;  %v9025_v5 = vpop.f32.mrb[198].mxu0 }
 0x917   : > { %v5892_v59 = vadd.f32 %v9025_v5, %v11977_v34  ;;  %v5708_v55 = vpop.f32.mrb[199].mxu0 }
 0x918   : > { %v5891_v23 = vadd.f32 %v5708_v55, %v14082_v52  ;;  %9124 = vmatprep.mubr.msk.f32.mxu1 %vm435_vm2, %v5957_v13  ;;  %v14094_v13 = vld [vmem:[#allocation11_spill] sm:$0xff] }
 0x919   : > { %9125 = vmatmul.mubr.msk.f32.gmra.mrb[198].mxu1 %vm435_vm2, %v5958_v51  ;;  %v5960_v33 = vadd.f32 %v12544_v16, %v5892_v59  ;;  %v14095_v59 = vld [vmem:[#allocation10_spill] sm:$0xff] }
 0x91a   : > { %v5959_v29 = vadd.f32 %v12544_v16, %v5891_v23 }
 0x91b   : > { %v9028_v53 = vpop.f32.mrb[200].mxu0 }
 0x91c   : > { %v5894_v57 = vadd.f32 %v9028_v53, %v11995_v43  ;;  %v5718_v8 = vpop.f32.mrb[201].mxu0  ;;  %9127 = vmatprep.mubr.msk.f32.mxu1 %vm435_vm2, %v5959_v29 }
 0x91d   : > { %v5893_v58 = vadd.f32 %v5718_v8, %v11986_v54  ;;  %9128 = vmatmul.mubr.msk.f32.gmra.mrb[200].mxu1 %vm435_vm2, %v5960_v33  ;;  %v14096_v33 = vld [vmem:[#allocation13_spill] sm:$0xff]  ;;  %v14097_v8 = vld [vmem:[#allocation12_spill] sm:$0xff] }
 0x91e   : > { %v5962_v61 = vadd.f32 %v12544_v16, %v5894_v57 }
 0x91f   : > { %v5961_v34 = vadd.f32 %v12544_v16, %v5893_v58  ;;  %v9031_v45 = vpop.f32.mrb[202].mxu0 }
 0x920   : > { %v5896_v31 = vadd.f32 %v9031_v45, %v12013_v17  ;;  %v5728_v56 = vpop.f32.mrb[203].mxu0 }
 0x921   : > { %v5895_v21 = vadd.f32 %v5728_v56, %v14083_v26  ;;  %9130 = vmatprep.mubr.msk.f32.mxu1 %vm435_vm2, %v5961_v34 }
 0x922   : > { %9131 = vmatmul.mubr.msk.f32.gmra.mrb[202].mxu1 %vm435_vm2, %v5962_v61  ;;  %v5964_v54 = vadd.f32 %v12544_v16, %v5896_v31  ;;  %v14098_v31 = vld [vmem:[#allocation15_spill] sm:$0xff] }
 0x923   : > { %v5963_v43 = vadd.f32 %v12544_v16, %v5895_v21  ;;  %v9034_v30 = vpop.f32.mrb[204].mxu0  ;;  %v14099_v21 = vld [vmem:[#allocation14_spill] sm:$0xff] }
 0x924   : > { %v5898_v48 = vadd.f32 %v9034_v30, %v14084_v44  ;;  %v5738_v24 = vpop.f32.mrb[205].mxu0 }
 0x925   : > { %v5897_v37 = vadd.f32 %v5738_v24, %v14085_v46  ;;  %9133 = vmatprep.mubr.msk.f32.mxu1 %vm435_vm2, %v5963_v43 }
 0x926   : > { %9134 = vmatmul.mubr.msk.f32.gmra.mrb[204].mxu1 %vm435_vm2, %v5964_v54  ;;  %v5966_v19 = vadd.f32 %v12544_v16, %v5898_v48  ;;  %v14100_v48 = vld [vmem:[#allocation17_spill] sm:$0xff] }
 0x927   : > { %v5965_v17 = vadd.f32 %v12544_v16, %v5897_v37  ;;  %v9037_v2 = vpop.f32.mrb[206].mxu0  ;;  %v14101_v37 = vld [vmem:[#allocation16_spill] sm:$0xff] }
 0x928   : > { %v5900_v14 = vadd.f32 %v9037_v2, %v14086_v63  ;;  %v5748_v38 = vpop.f32.mrb[207].mxu0 }
 0x929   : > { %v5899_v12 = vadd.f32 %v5748_v38, %v14087_v39  ;;  %9136 = vmatprep.mubr.msk.f32.mxu1 %vm435_vm2, %v5965_v17 }
 0x92a   : > { %9137 = vmatmul.mubr.msk.f32.gmra.mrb[206].mxu1 %vm435_vm2, %v5966_v19  ;;  %v5968_v1 = vadd.f32 %v12544_v16, %v5900_v14  ;;  %v14102_v14 = vld [vmem:[#allocation19_spill] sm:$0xff] }
 0x92b   : > { %v5967_v41 = vadd.f32 %v12544_v16, %v5899_v12  ;;  %v9040_v62 = vpop.f32.mrb[208].mxu0  ;;  %v14103_v12 = vld [vmem:[#allocation18_spill] sm:$0xff] }
 0x92c   : > { %v5902_v35 = vadd.f32 %v9040_v62, %v14088_v28  ;;  %v5758_v0 = vpop.f32.mrb[209].mxu0 }
 0x92d   : > { %v5901_v4 = vadd.f32 %v5758_v0, %v14089_v15  ;;  %9139 = vmatprep.mubr.msk.f32.mxu1 %vm435_vm2, %v5967_v41 }
 0x92e   : > { %9140 = vmatmul.mubr.msk.f32.gmra.mrb[208].mxu1 %vm435_vm2, %v5968_v1  ;;  %v5970_v27 = vadd.f32 %v12544_v16, %v5902_v35  ;;  %v14104_v35 = vld [vmem:[#allocation21_spill] sm:$0xff] }
 0x92f   : > { %v5969_v3 = vadd.f32 %v12544_v16, %v5901_v4  ;;  %v9043_v49 = vpop.f32.mrb[210].mxu0  ;;  %v14105_v4 = vld [vmem:[#allocation20_spill] sm:$0xff] }
 0x930   : > { %v5904_v9 = vadd.f32 %v9043_v49, %v14090_v25  ;;  %v5768_v42 = vpop.f32.mrb[211].mxu0 }
 0x931   : > { %v5903_v47 = vadd.f32 %v5768_v42, %v14091_v32  ;;  %9142 = vmatprep.mubr.msk.f32.mxu1 %vm435_vm2, %v5969_v3 }
 0x932   : > { %9143 = vmatmul.mubr.msk.f32.gmra.mrb[210].mxu1 %vm435_vm2, %v5970_v27  ;;  %v5972_v6 = vadd.f32 %v12544_v16, %v5904_v9  ;;  %v14106_v9 = vld [vmem:[#allocation23_spill] sm:$0xff] }
 0x933   : > { %v5971_v20 = vadd.f32 %v12544_v16, %v5903_v47  ;;  %v9046_v10 = vpop.f32.mrb[212].mxu0  ;;  %v14107_v47 = vld [vmem:[#allocation22_spill] sm:$0xff] }
 0x934   : > { %v5906_v40 = vadd.f32 %v9046_v10, %v14092_v18  ;;  %v5778_v11 = vpop.f32.mrb[213].mxu0  ;;  %v6734_v18 = vld [vmem:[#allocation2 + $0x108] sm:$0xff] }
 0x935   : > { %v5905_v36 = vadd.f32 %v5778_v11, %v14093_v60  ;;  %9145 = vmatprep.mubr.msk.f32.mxu1 %vm435_vm2, %v5971_v20  ;;  %v6733_v11 = vld [vmem:[#allocation2 + $0x100] sm:$0xff] }
 0x936   : > { %9146 = vmatmul.mubr.msk.f32.gmra.mrb[212].mxu1 %vm435_vm2, %v5972_v6  ;;  %v5974_v22 = vadd.f32 %v12544_v16, %v5906_v40  ;;  %v6798_v40 = vld [vmem:[#allocation2 + $0x8] sm:$0xff]  ;;  %v6797_v60 = vld [vmem:[#allocation2] sm:$0xff] }
 0x937   : > { %v5973_v50 = vadd.f32 %v12544_v16, %v5905_v36  ;;  %v9049_v7 = vpop.f32.mrb[214].mxu0  ;;  %6830 = vst.msk [vmem:[#allocation2 + $0x108] sm:$0xff] %vm739_vm4, %v6798_v40  ;;  %v6668_v36 = vld [vmem:[#allocation2 + $0x208] sm:$0xff]  ;;  %6829 = vst.msk [vmem:[#allocation2 + $0x100] sm:$0xff] %vm739_vm4, %v6797_v60  ;;  %v6815_v40 = vld [vmem:[#allocation2 + $0x90] sm:$0xff] }
 0x938   : > { %v5908_v5 = vadd.f32 %v9049_v7, %v14094_v13  ;;  %v5788_v51 = vpop.f32.mrb[215].mxu0  ;;  %6701 = vst.msk [vmem:[#allocation2 + $0x308] sm:$0xff] %vm739_vm4, %v6668_v36  ;;  %6766 = vst.msk [vmem:[#allocation2 + $0x208] sm:$0xff] %vm739_vm4, %v6734_v18  ;;  %v6800_v7 = vld [vmem:[#allocation2 + $0x18] sm:$0xff]  ;;  %v6799_v13 = vld [vmem:[#allocation2 + $0x10] sm:$0xff] }
 0x939   : > { %v5907_v55 = vadd.f32 %v5788_v51, %v14095_v59  ;;  %9148 = vmatprep.mubr.msk.f32.mxu1 %vm435_vm2, %v5973_v50  ;;  %v6667_v50 = vld [vmem:[#allocation2 + $0x200] sm:$0xff]  ;;  %v6669_v51 = vld [vmem:[#allocation2 + $0x210] sm:$0xff]  ;;  %v6738_v59 = vld [vmem:[#allocation2 + $0x128] sm:$0xff] }
 0x93a   : > { %9149 = vmatmul.mubr.msk.f32.gmra.mrb[214].mxu1 %vm435_vm2, %v5974_v22  ;;  %v5976_v23 = vadd.f32 %v12544_v16, %v5908_v5  ;;  %6700 = vst.msk [vmem:[#allocation2 + $0x300] sm:$0xff] %vm739_vm4, %v6667_v50  ;;  %6765 = vst.msk [vmem:[#allocation2 + $0x200] sm:$0xff] %vm739_vm4, %v6733_v11  ;;  %v6735_v22 = vld [vmem:[#allocation2 + $0x110] sm:$0xff]  ;;  %v6670_v5 = vld [vmem:[#allocation2 + $0x218] sm:$0xff] }
 0x93b   : > { %v5975_v52 = vadd.f32 %v12544_v16, %v5907_v55  ;;  %6831 = vst.msk [vmem:[#allocation2 + $0x110] sm:$0xff] %vm739_vm4, %v6799_v13  ;;  %6703 = vst.msk [vmem:[#allocation2 + $0x318] sm:$0xff] %vm739_vm4, %v6670_v5  ;;  %v6802_v55 = vld [vmem:[#allocation2 + $0x28] sm:$0xff]  ;;  %v6751_v18 = vld [vmem:[#allocation2 + $0x190] sm:$0xff] }
 0x93c   : > { %v9052_v29 = vpop.f32.mrb[216].mxu0  ;;  %6702 = vst.msk [vmem:[#allocation2 + $0x310] sm:$0xff] %vm739_vm4, %v6669_v51  ;;  %6767 = vst.msk [vmem:[#allocation2 + $0x210] sm:$0xff] %vm739_vm4, %v6735_v22  ;;  %v6688_v11 = vld [vmem:[#allocation2 + $0x2a8] sm:$0xff]  ;;  %v6753_v22 = vld [vmem:[#allocation2 + $0x1a0] sm:$0xff] }
 0x93d   : > { %v5910_v53 = vadd.f32 %v9052_v29, %v14096_v33  ;;  %v5798_v57 = vpop.f32.mrb[217].mxu0  ;;  %9151 = vmatprep.mubr.msk.f32.mxu1 %vm435_vm2, %v5975_v52  ;;  %6834 = vst.msk [vmem:[#allocation2 + $0x128] sm:$0xff] %vm739_vm4, %v6802_v55  ;;  %v6737_v52 = vld [vmem:[#allocation2 + $0x120] sm:$0xff]  ;;  %v6672_v29 = vld [vmem:[#allocation2 + $0x228] sm:$0xff]  ;;  %6847 = vst.msk [vmem:[#allocation2 + $0x190] sm:$0xff] %vm739_vm4, %v6815_v40  ;;  %v12878_v40 = vstv %s6929_s13 }
 0x93e   : > { %v5909_v58 = vadd.f32 %v5798_v57, %v14097_v8  ;;  %9152 = vmatmul.mubr.msk.f32.gmra.mrb[216].mxu1 %vm435_vm2, %v5976_v23  ;;  %v6801_v23 = vld [vmem:[#allocation2 + $0x20] sm:$0xff]  ;;  %6705 = vst.msk [vmem:[#allocation2 + $0x328] sm:$0xff] %vm739_vm4, %v6672_v29  ;;  %6770 = vst.msk [vmem:[#allocation2 + $0x228] sm:$0xff] %vm739_vm4, %v6738_v59  ;;  %v6804_v57 = vld [vmem:[#allocation2 + $0x38] sm:$0xff] }
 0x93f   : > { %v5978_v61 = vadd.f32 %v12544_v16, %v5910_v53  ;;  %6833 = vst.msk [vmem:[#allocation2 + $0x120] sm:$0xff] %vm739_vm4, %v6801_v23  ;;  %v6671_v33 = vld [vmem:[#allocation2 + $0x220] sm:$0xff]  ;;  %v6740_v53 = vld [vmem:[#allocation2 + $0x138] sm:$0xff]  ;;  %6721 = vst.msk [vmem:[#allocation2 + $0x3a8] sm:$0xff] %vm739_vm4, %v6688_v11  ;;  %v12880_v11 = vstv %s7028_s14 }
 0x940   : > { %v5977_v34 = vadd.f32 %v12544_v16, %v5909_v58  ;;  %v9055_v45 = vpop.f32.mrb[218].mxu0  ;;  %6704 = vst.msk [vmem:[#allocation2 + $0x320] sm:$0xff] %vm739_vm4, %v6671_v33  ;;  %6769 = vst.msk [vmem:[#allocation2 + $0x220] sm:$0xff] %vm739_vm4, %v6737_v52  ;;  %v6674_v8 = vld [vmem:[#allocation2 + $0x238] sm:$0xff]  ;;  %v6739_v58 = vld [vmem:[#allocation2 + $0x130] sm:$0xff] }
 0x941   : > { %v5912_v56 = vadd.f32 %v9055_v45, %v14098_v31  ;;  %v5808_v26 = vpop.f32.mrb[219].mxu0  ;;  %6836 = vst.msk [vmem:[#allocation2 + $0x138] sm:$0xff] %vm739_vm4, %v6804_v57  ;;  %6707 = vst.msk [vmem:[#allocation2 + $0x338] sm:$0xff] %vm739_vm4, %v6674_v8  ;;  %v6803_v45 = vld [vmem:[#allocation2 + $0x30] sm:$0xff]  ;;  %v6676_v31 = vld [vmem:[#allocation2 + $0x248] sm:$0xff] }
 0x942   : > { %v5911_v43 = vadd.f32 %v5808_v26, %v14099_v21  ;;  %9154 = vmatprep.mubr.msk.f32.mxu1 %vm435_vm2, %v5977_v34  ;;  %6772 = vst.msk [vmem:[#allocation2 + $0x238] sm:$0xff] %vm739_vm4, %v6740_v53  ;;  %v6673_v34 = vld [vmem:[#allocation2 + $0x230] sm:$0xff]  ;;  %6835 = vst.msk [vmem:[#allocation2 + $0x130] sm:$0xff] %vm739_vm4, %v6803_v45  ;;  %v6675_v26 = vld [vmem:[#allocation2 + $0x240] sm:$0xff] }
 0x943   : > { %9155 = vmatmul.mubr.msk.f32.gmra.mrb[218].mxu1 %vm435_vm2, %v5978_v61  ;;  %v5980_v44 = vadd.f32 %v12544_v16, %v5912_v56  ;;  %6706 = vst.msk [vmem:[#allocation2 + $0x330] sm:$0xff] %vm739_vm4, %v6673_v34  ;;  %6771 = vst.msk [vmem:[#allocation2 + $0x230] sm:$0xff] %vm739_vm4, %v6739_v58  ;;  %v6742_v61 = vld [vmem:[#allocation2 + $0x148] sm:$0xff]  ;;  %v6741_v21 = vld [vmem:[#allocation2 + $0x140] sm:$0xff] }
 0x944   : > { %v5979_v30 = vadd.f32 %v12544_v16, %v5911_v43  ;;  %v9058_v54 = vpop.f32.mrb[220].mxu0  ;;  %6709 = vst.msk [vmem:[#allocation2 + $0x348] sm:$0xff] %vm739_vm4, %v6676_v31  ;;  %6774 = vst.msk [vmem:[#allocation2 + $0x248] sm:$0xff] %vm739_vm4, %v6742_v61  ;;  %v6806_v56 = vld [vmem:[#allocation2 + $0x48] sm:$0xff]  ;;  %v6805_v43 = vld [vmem:[#allocation2 + $0x40] sm:$0xff] }
 0x945   : > { %v5914_v24 = vadd.f32 %v9058_v54, %v14100_v48  ;;  %v5818_v46 = vpop.f32.mrb[221].mxu0  ;;  %6838 = vst.msk [vmem:[#allocation2 + $0x148] sm:$0xff] %vm739_vm4, %v6806_v56  ;;  %6708 = vst.msk [vmem:[#allocation2 + $0x340] sm:$0xff] %vm739_vm4, %v6675_v26  ;;  %v6678_v54 = vld [vmem:[#allocation2 + $0x258] sm:$0xff]  ;;  %v6754_v36 = vld [vmem:[#allocation2 + $0x1a8] sm:$0xff] }
 0x946   : > { %v5913_v17 = vadd.f32 %v5818_v46, %v14101_v37  ;;  %9157 = vmatprep.mubr.msk.f32.mxu1 %vm435_vm2, %v5979_v30  ;;  %6773 = vst.msk [vmem:[#allocation2 + $0x240] sm:$0xff] %vm739_vm4, %v6741_v21  ;;  %6837 = vst.msk [vmem:[#allocation2 + $0x140] sm:$0xff] %vm739_vm4, %v6805_v43  ;;  %v6744_v48 = vld [vmem:[#allocation2 + $0x158] sm:$0xff]  ;;  %v6677_v46 = vld [vmem:[#allocation2 + $0x250] sm:$0xff] }
 0x947   : > { %9158 = vmatmul.mubr.msk.f32.gmra.mrb[220].mxu1 %vm435_vm2, %v5980_v44  ;;  %v5982_v63 = vadd.f32 %v12544_v16, %v5914_v24  ;;  %6711 = vst.msk [vmem:[#allocation2 + $0x358] sm:$0xff] %vm739_vm4, %v6678_v54  ;;  %6776 = vst.msk [vmem:[#allocation2 + $0x258] sm:$0xff] %vm739_vm4, %v6744_v48  ;;  %v6808_v24 = vld [vmem:[#allocation2 + $0x58] sm:$0xff]  ;;  %v6743_v37 = vld [vmem:[#allocation2 + $0x150] sm:$0xff] }
 0x948   : > { %v5981_v2 = vadd.f32 %v12544_v16, %v5913_v17  ;;  %v9061_v19 = vpop.f32.mrb[222].mxu0  ;;  %6840 = vst.msk [vmem:[#allocation2 + $0x158] sm:$0xff] %vm739_vm4, %v6808_v24  ;;  %6710 = vst.msk [vmem:[#allocation2 + $0x350] sm:$0xff] %vm739_vm4, %v6677_v46  ;;  %v6807_v17 = vld [vmem:[#allocation2 + $0x50] sm:$0xff]  ;;  %v6817_v13 = vld [vmem:[#allocation2 + $0xa0] sm:$0xff] }
 0x949   : > { %v5916_v38 = vadd.f32 %v9061_v19, %v14102_v14  ;;  %v5828_v39 = vpop.f32.mrb[223].mxu0  ;;  %6775 = vst.msk [vmem:[#allocation2 + $0x250] sm:$0xff] %vm739_vm4, %v6743_v37  ;;  %6839 = vst.msk [vmem:[#allocation2 + $0x150] sm:$0xff] %vm739_vm4, %v6807_v17  ;;  %v6680_v19 = vld [vmem:[#allocation2 + $0x268] sm:$0xff]  ;;  %v6690_v5 = vld [vmem:[#allocation2 + $0x2b8] sm:$0xff] }
 0x94a   : > { %v5915_v41 = vadd.f32 %v5828_v39, %v14103_v12  ;;  %9160 = vmatprep.mubr.msk.f32.mxu1 %vm435_vm2, %v5981_v2  ;;  %v6746_v2 = vld [vmem:[#allocation2 + $0x168] sm:$0xff]  ;;  %6713 = vst.msk [vmem:[#allocation2 + $0x368] sm:$0xff] %vm739_vm4, %v6680_v19  ;;  %v6745_v39 = vld [vmem:[#allocation2 + $0x160] sm:$0xff]  ;;  %6786 = vst.msk [vmem:[#allocation2 + $0x2a8] sm:$0xff] %vm739_vm4, %v6754_v36 }
 0x94b   : > { %9161 = vmatmul.mubr.msk.f32.gmra.mrb[222].mxu1 %vm435_vm2, %v5982_v63  ;;  %v5984_v28 = vadd.f32 %v12544_v16, %v5916_v38  ;;  %6778 = vst.msk [vmem:[#allocation2 + $0x268] sm:$0xff] %vm739_vm4, %v6746_v2  ;;  %v6810_v63 = vld [vmem:[#allocation2 + $0x68] sm:$0xff]  ;;  %v6679_v38 = vld [vmem:[#allocation2 + $0x260] sm:$0xff]  ;;  %6849 = vst.msk [vmem:[#allocation2 + $0x1a0] sm:$0xff] %vm739_vm4, %v6817_v13 }
 0x94c   : > { %v5983_v62 = vadd.f32 %v12544_v16, %v5915_v41  ;;  %v9064_v1 = vpop.f32.mrb[224].mxu0  ;;  %6842 = vst.msk [vmem:[#allocation2 + $0x168] sm:$0xff] %vm739_vm4, %v6810_v63  ;;  %v6809_v12 = vld [vmem:[#allocation2 + $0x60] sm:$0xff]  ;;  %6712 = vst.msk [vmem:[#allocation2 + $0x360] sm:$0xff] %vm739_vm4, %v6679_v38  ;;  %v6756_v51 = vld [vmem:[#allocation2 + $0x1b8] sm:$0xff] }
 0x94d   : > { %v5918_v0 = vadd.f32 %v9064_v1, %v14104_v35  ;;  %v5838_v15 = vpop.f32.mrb[225].mxu0  ;;  %6777 = vst.msk [vmem:[#allocation2 + $0x260] sm:$0xff] %vm739_vm4, %v6745_v39  ;;  %6841 = vst.msk [vmem:[#allocation2 + $0x160] sm:$0xff] %vm739_vm4, %v6809_v12  ;;  %v6748_v1 = vld [vmem:[#allocation2 + $0x178] sm:$0xff]  ;;  %v6681_v35 = vld [vmem:[#allocation2 + $0x270] sm:$0xff] }
 0x94e   : > { %v5917_v3 = vadd.f32 %v5838_v15, %v14105_v4  ;;  %9163 = vmatprep.mubr.msk.f32.mxu1 %vm435_vm2, %v5983_v62  ;;  %v6682_v62 = vld [vmem:[#allocation2 + $0x278] sm:$0xff]  ;;  %6714 = vst.msk [vmem:[#allocation2 + $0x370] sm:$0xff] %vm739_vm4, %v6681_v35  ;;  %v6811_v15 = vld [vmem:[#allocation2 + $0x70] sm:$0xff]  ;;  %v6684_v4 = vld [vmem:[#allocation2 + $0x288] sm:$0xff] }
 0x94f   : > { %9164 = vmatmul.mubr.msk.f32.gmra.mrb[224].mxu1 %vm435_vm2, %v5984_v28  ;;  %v5986_v25 = vadd.f32 %v12544_v16, %v5918_v0  ;;  %6715 = vst.msk [vmem:[#allocation2 + $0x378] sm:$0xff] %vm739_vm4, %v6682_v62  ;;  %6780 = vst.msk [vmem:[#allocation2 + $0x278] sm:$0xff] %vm739_vm4, %v6748_v1  ;;  %v6812_v28 = vld [vmem:[#allocation2 + $0x78] sm:$0xff]  ;;  %v6747_v0 = vld [vmem:[#allocation2 + $0x170] sm:$0xff] }
 0x950   : > { %v5985_v49 = vadd.f32 %v12544_v16, %v5917_v3  ;;  %v9067_v27 = vpop.f32.mrb[226].mxu0  ;;  %6844 = vst.msk [vmem:[#allocation2 + $0x178] sm:$0xff] %vm739_vm4, %v6812_v28  ;;  %6779 = vst.msk [vmem:[#allocation2 + $0x270] sm:$0xff] %vm739_vm4, %v6747_v0  ;;  %v6750_v3 = vld [vmem:[#allocation2 + $0x188] sm:$0xff]  ;;  %v6820_v59 = vld [vmem:[#allocation2 + $0xb8] sm:$0xff] }
 0x951   : > { %v5920_v42 = vadd.f32 %v9067_v27, %v14106_v9  ;;  %v5848_v32 = vpop.f32.mrb[227].mxu0  ;;  %6843 = vst.msk [vmem:[#allocation2 + $0x170] sm:$0xff] %vm739_vm4, %v6811_v15  ;;  %6717 = vst.msk [vmem:[#allocation2 + $0x388] sm:$0xff] %vm739_vm4, %v6684_v4  ;;  %v6683_v9 = vld [vmem:[#allocation2 + $0x280] sm:$0xff]  ;;  %v6689_v55 = vld [vmem:[#allocation2 + $0x2b0] sm:$0xff] }
 0x952   : > { %9166 = vmatprep.mubr.msk.f32.mxu1 %vm435_vm2, %v5985_v49  ;;  %v5919_v20 = vadd.f32 %v5848_v32, %v14107_v47  ;;  %6782 = vst.msk [vmem:[#allocation2 + $0x288] sm:$0xff] %vm739_vm4, %v6750_v3  ;;  %6716 = vst.msk [vmem:[#allocation2 + $0x380] sm:$0xff] %vm739_vm4, %v6683_v9  ;;  %v6813_v32 = vld [vmem:[#allocation2 + $0x80] sm:$0xff]  ;;  %v6686_v47 = vld [vmem:[#allocation2 + $0x298] sm:$0xff] }
 0x953   : > { %9167 = vmatmul.mubr.msk.f32.gmra.mrb[226].mxu1 %vm435_vm2, %v5986_v25  ;;  %v5988_v6 = vadd.f32 %v12544_v16, %v5920_v42  ;;  %v6814_v25 = vld [vmem:[#allocation2 + $0x88] sm:$0xff]  ;;  %v6749_v42 = vld [vmem:[#allocation2 + $0x180] sm:$0xff]  ;;  %6719 = vst.msk [vmem:[#allocation2 + $0x398] sm:$0xff] %vm739_vm4, %v6686_v47  ;;  %6723 = vst.msk [vmem:[#allocation2 + $0x3b8] sm:$0xff] %vm739_vm4, %v6690_v5  ;;  %v12884_v5 = vstv %s7127_s0 }
 0x954   : > { %v5987_v10 = vadd.f32 %v12544_v16, %v5919_v20  ;;  %v6736_v16 = vld [vmem:[#allocation2 + $0x118] sm:$0xff]  ;;  %6846 = vst.msk [vmem:[#allocation2 + $0x188] sm:$0xff] %vm739_vm4, %v6814_v25  ;;  %6781 = vst.msk [vmem:[#allocation2 + $0x280] sm:$0xff] %vm739_vm4, %v6749_v42  ;;  %v6755_v52 = vld [vmem:[#allocation2 + $0x1b0] sm:$0xff] }
 0x955   : > { %6832 = vst.msk [vmem:[#allocation2 + $0x118] sm:$0xff] %vm739_vm4, %v6800_v7  ;;  %6768 = vst.msk [vmem:[#allocation2 + $0x218] sm:$0xff] %vm739_vm4, %v6736_v16  ;;  %v6752_v20 = vld [vmem:[#allocation2 + $0x198] sm:$0xff]  ;;  %v6818_v16 = vld [vmem:[#allocation2 + $0xa8] sm:$0xff] }
 0x956   : > { %9169 = vmatprep.mubr.msk.f32.mxu1 %vm435_vm2, %v5987_v10  ;;  %6845 = vst.msk [vmem:[#allocation2 + $0x180] sm:$0xff] %vm739_vm4, %v6813_v32  ;;  %6784 = vst.msk [vmem:[#allocation2 + $0x298] sm:$0xff] %vm739_vm4, %v6752_v20  ;;  %v6816_v10 = vld [vmem:[#allocation2 + $0x98] sm:$0xff]  ;;  %v6687_v7 = vld [vmem:[#allocation2 + $0x2a0] sm:$0xff] }
 0x957   : > { %9170 = vmatmul.mubr.msk.f32.gmra.mrb[228].mxu1 %vm435_vm2, %v5988_v6  ;;  %6848 = vst.msk [vmem:[#allocation2 + $0x198] sm:$0xff] %vm739_vm4, %v6816_v10  ;;  %v6685_v6 = vld [vmem:[#allocation2 + $0x290] sm:$0xff]  ;;  %6850 = vst.msk [vmem:[#allocation2 + $0x1a8] sm:$0xff] %vm739_vm4, %v6818_v16  ;;  %v6692_v53 = vld [vmem:[#allocation2 + $0x2c8] sm:$0xff] }
 0x958   : > { %6718 = vst.msk [vmem:[#allocation2 + $0x390] sm:$0xff] %vm739_vm4, %v6685_v6  ;;  %6783 = vst.msk [vmem:[#allocation2 + $0x290] sm:$0xff] %vm739_vm4, %v6751_v18  ;;  %v6819_v29 = vld [vmem:[#allocation2 + $0xb0] sm:$0xff]  ;;  %v6758_v57 = vld [vmem:[#allocation2 + $0x1c8] sm:$0xff] }
 0x959   : > { %6720 = vst.msk [vmem:[#allocation2 + $0x3a0] sm:$0xff] %vm739_vm4, %v6687_v7  ;;  %6785 = vst.msk [vmem:[#allocation2 + $0x2a0] sm:$0xff] %vm739_vm4, %v6753_v22  ;;  %v6822_v8 = vld [vmem:[#allocation2 + $0xc8] sm:$0xff]  ;;  %v6691_v58 = vld [vmem:[#allocation2 + $0x2c0] sm:$0xff] }
 0x95a   : > { %6788 = vst.msk [vmem:[#allocation2 + $0x2b8] sm:$0xff] %vm739_vm4, %v6756_v51  ;;  %6852 = vst.msk [vmem:[#allocation2 + $0x1b8] sm:$0xff] %vm739_vm4, %v6820_v59  ;;  %v6757_v34 = vld [vmem:[#allocation2 + $0x1c0] sm:$0xff]  ;;  %v6694_v61 = vld [vmem:[#allocation2 + $0x2d8] sm:$0xff] }
 0x95b   : > { %6722 = vst.msk [vmem:[#allocation2 + $0x3b0] sm:$0xff] %vm739_vm4, %v6689_v55  ;;  %6787 = vst.msk [vmem:[#allocation2 + $0x2b0] sm:$0xff] %vm739_vm4, %v6755_v52  ;;  %v6821_v45 = vld [vmem:[#allocation2 + $0xc0] sm:$0xff]  ;;  %v6760_v31 = vld [vmem:[#allocation2 + $0x1d8] sm:$0xff] }
 0x95c   : > { %6851 = vst.msk [vmem:[#allocation2 + $0x1b0] sm:$0xff] %vm739_vm4, %v6819_v29  ;;  %6725 = vst.msk [vmem:[#allocation2 + $0x3c8] sm:$0xff] %vm739_vm4, %v6692_v53  ;;  %v6824_v56 = vld [vmem:[#allocation2 + $0xd8] sm:$0xff]  ;;  %v6693_v26 = vld [vmem:[#allocation2 + $0x2d0] sm:$0xff] }
 0x95d   : > { %6790 = vst.msk [vmem:[#allocation2 + $0x2c8] sm:$0xff] %vm739_vm4, %v6758_v57  ;;  %6854 = vst.msk [vmem:[#allocation2 + $0x1c8] sm:$0xff] %vm739_vm4, %v6822_v8  ;;  %v6759_v43 = vld [vmem:[#allocation2 + $0x1d0] sm:$0xff]  ;;  %v6696_v24 = vld [vmem:[#allocation2 + $0x2e8] sm:$0xff] }
 0x95e   : > { %6724 = vst.msk [vmem:[#allocation2 + $0x3c0] sm:$0xff] %vm739_vm4, %v6691_v58  ;;  %6789 = vst.msk [vmem:[#allocation2 + $0x2c0] sm:$0xff] %vm739_vm4, %v6757_v34  ;;  %v6823_v54 = vld [vmem:[#allocation2 + $0xd0] sm:$0xff]  ;;  %v6762_v46 = vld [vmem:[#allocation2 + $0x1e8] sm:$0xff]  ;;  %v12893_v34 = vstv %s6894_s15 }
 0x95f   : > { %6853 = vst.msk [vmem:[#allocation2 + $0x1c0] sm:$0xff] %vm739_vm4, %v6821_v45  ;;  %6727 = vst.msk [vmem:[#allocation2 + $0x3d8] sm:$0xff] %vm739_vm4, %v6694_v61  ;;  %v6826_v37 = vld [vmem:[#allocation2 + $0xe8] sm:$0xff]  ;;  %v6695_v17 = vld [vmem:[#allocation2 + $0x2e0] sm:$0xff] }
 0x960   : > { %6792 = vst.msk [vmem:[#allocation2 + $0x2d8] sm:$0xff] %vm739_vm4, %v6760_v31  ;;  %6856 = vst.msk [vmem:[#allocation2 + $0x1d8] sm:$0xff] %vm739_vm4, %v6824_v56  ;;  %v6761_v2 = vld [vmem:[#allocation2 + $0x1e0] sm:$0xff]  ;;  %v6764_v63 = vld [vmem:[#allocation2 + $0x1f8] sm:$0xff] }
 0x961   : > { %6726 = vst.msk [vmem:[#allocation2 + $0x3d0] sm:$0xff] %vm739_vm4, %v6693_v26  ;;  %6791 = vst.msk [vmem:[#allocation2 + $0x2d0] sm:$0xff] %vm739_vm4, %v6759_v43  ;;  %v6825_v19 = vld [vmem:[#allocation2 + $0xe0] sm:$0xff]  ;;  %v6698_v38 = vld [vmem:[#allocation2 + $0x2f8] sm:$0xff] }
 0x962   : > { %6855 = vst.msk [vmem:[#allocation2 + $0x1d0] sm:$0xff] %vm739_vm4, %v6823_v54  ;;  %6729 = vst.msk [vmem:[#allocation2 + $0x3e8] sm:$0xff] %vm739_vm4, %v6696_v24  ;;  %v6828_v12 = vld [vmem:[#allocation2 + $0xf8] sm:$0xff]  ;;  %v6697_v1 = vld [vmem:[#allocation2 + $0x2f0] sm:$0xff] }
 0x963   : > { %6794 = vst.msk [vmem:[#allocation2 + $0x2e8] sm:$0xff] %vm739_vm4, %v6762_v46  ;;  %6858 = vst.msk [vmem:[#allocation2 + $0x1e8] sm:$0xff] %vm739_vm4, %v6826_v37  ;;  %v6763_v28 = vld [vmem:[#allocation2 + $0x1f0] sm:$0xff]  ;;  %v6931_v42 = vld [vmem:[#allocation2 + $0x108] sm:$0xff] }
 0x964   : > { %6728 = vst.msk [vmem:[#allocation2 + $0x3e0] sm:$0xff] %vm739_vm4, %v6695_v17  ;;  %6793 = vst.msk [vmem:[#allocation2 + $0x2e0] sm:$0xff] %vm739_vm4, %v6761_v2  ;;  %v6827_v35 = vld [vmem:[#allocation2 + $0xf0] sm:$0xff]  ;;  %v7030_v32 = vld [vmem:[#allocation2 + $0x208] sm:$0xff]  ;;  %v12896_v45 = vmul.f32 %v12878_v40, %v6931_v42 }
 0x965   : > { %6857 = vst.msk [vmem:[#allocation2 + $0x1e0] sm:$0xff] %vm739_vm4, %v6825_v19  ;;  %6731 = vst.msk [vmem:[#allocation2 + $0x3f8] sm:$0xff] %vm739_vm4, %v6698_v38  ;;  %v6930_v47 = vld [vmem:[#allocation2 + $0x100] sm:$0xff]  ;;  %v7129_v20 = vld [vmem:[#allocation2 + $0x308] sm:$0xff]  ;;  %v12899_v61 = vmul.f32 %v12880_v11, %v7030_v32 }
 0x966   : > { %6796 = vst.msk [vmem:[#allocation2 + $0x2f8] sm:$0xff] %vm739_vm4, %v6764_v63  ;;  %6860 = vst.msk [vmem:[#allocation2 + $0x1f8] sm:$0xff] %vm739_vm4, %v6828_v12  ;;  %v7029_v10 = vld [vmem:[#allocation2 + $0x200] sm:$0xff]  ;;  %v6933_v18 = vld [vmem:[#allocation2 + $0x118] sm:$0xff]  ;;  %v12902_v31 = vmul.f32 %v12878_v40, %v6930_v47  ;;  %v12905_v54 = vmul.f32 %v12884_v5, %v7129_v20 }
 0x967   : > { %6730 = vst.msk [vmem:[#allocation2 + $0x3f0] sm:$0xff] %vm739_vm4, %v6697_v1  ;;  %6795 = vst.msk [vmem:[#allocation2 + $0x2f0] sm:$0xff] %vm739_vm4, %v6763_v28  ;;  %v7128_v6 = vld [vmem:[#allocation2 + $0x300] sm:$0xff]  ;;  %v7032_v36 = vld [vmem:[#allocation2 + $0x218] sm:$0xff]  ;;  %v12908_v24 = vmul.f32 %v12880_v11, %v7029_v10  ;;  %v12914_v37 = vmul.f32 %v12878_v40, %v6933_v18 }
 0x968   : > { %6859 = vst.msk [vmem:[#allocation2 + $0x1f0] sm:$0xff] %vm739_vm4, %v6827_v35  ;;  %v7131_v16 = vld [vmem:[#allocation2 + $0x318] sm:$0xff]  ;;  %v6932_v7 = vld [vmem:[#allocation2 + $0x110] sm:$0xff]  ;;  %14108 = vst [vmem:[#allocation24_spill] sm:$0xff] %v12884_v5  ;;  %v12911_v46 = vmul.f32 %v12884_v5, %v7128_v6  ;;  %v12919_v12 = vmul.f32 %v12880_v11, %v7032_v36 }
 0x969   : > { %v7031_v22 = vld [vmem:[#allocation2 + $0x210] sm:$0xff]  ;;  %v6935_v59 = vld [vmem:[#allocation2 + $0x128] sm:$0xff]  ;;  %v6934_v52 = vld [vmem:[#allocation2 + $0x120] sm:$0xff]  ;;  %v12922_v1 = vmul.f32 %v12884_v5, %v7131_v16  ;;  %v12925_v28 = vmul.f32 %v12878_v40, %v6932_v7 }
 0x96a   : > { %v7130_v51 = vld [vmem:[#allocation2 + $0x310] sm:$0xff]  ;;  %v7034_v55 = vld [vmem:[#allocation2 + $0x228] sm:$0xff]  ;;  %v7033_v57 = vld [vmem:[#allocation2 + $0x220] sm:$0xff]  ;;  %v12928_v35 = vmul.f32 %v12880_v11, %v7031_v22  ;;  %v12936_v6 = vmul.f32 %v12878_v40, %v6935_v59  ;;  %v12942_v36 = vmul.f32 %v12878_v40, %v6934_v52 }
 0x96b   : > { %v7133_v53 = vld [vmem:[#allocation2 + $0x328] sm:$0xff]  ;;  %v6937_v8 = vld [vmem:[#allocation2 + $0x138] sm:$0xff]  ;;  %v7132_v56 = vld [vmem:[#allocation2 + $0x320] sm:$0xff]  ;;  %14109 = vst [vmem:[#allocation25_spill] sm:$0xff] %v12922_v1  ;;  %v12933_v10 = vmul.f32 %v12884_v5, %v7130_v51  ;;  %v12939_v18 = vmul.f32 %v12880_v11, %v7034_v55 }
 0x96c   : > { %v12891_v58 = vld [vmem:[%s13794_s3 + $0x16f] ss:$0 sm:$0xff]  ;;  %v7036_v26 = vld [vmem:[#allocation2 + $0x238] sm:$0xff]  ;;  %v6936_v43 = vld [vmem:[#allocation2 + $0x130] sm:$0xff]  ;;  %14110 = vst [vmem:[#allocation26_spill] sm:$0xff] %v12928_v35  ;;  %v12945_v1 = vmul.f32 %v12884_v5, %v7133_v53  ;;  %v12948_v35 = vmul.f32 %v12880_v11, %v7033_v57  ;;  %v12951_v51 = vmul.f32 %v12884_v5, %v7132_v56  ;;  %v12954_v59 = vmul.f32 %v12878_v40, %v6937_v8 }
 0x96d   : > { %v7135_v17 = vld [vmem:[#allocation2 + $0x338] sm:$0xff]  ;;  %v7035_v2 = vld [vmem:[#allocation2 + $0x230] sm:$0xff]  ;;  %v7038_v63 = vld [vmem:[#allocation2 + $0x248] sm:$0xff]  ;;  %14111 = vst [vmem:[#allocation27_spill] sm:$0xff] %v12933_v10  ;;  %v12965_v57 = vmul.f32 %v12880_v11, %v7036_v26  ;;  %v12968_v56 = vmul.f32 %v12878_v40, %v6936_v43 }
 0x96e   : > { %v7134_v19 = vld [vmem:[#allocation2 + $0x330] sm:$0xff]  ;;  %v6939_v42 = vld [vmem:[#allocation2 + $0x148] sm:$0xff]  ;;  %v7037_v47 = vld [vmem:[#allocation2 + $0x240] sm:$0xff]  ;;  %14112 = vst [vmem:[#allocation28_spill] sm:$0xff] %v12936_v6  ;;  %v12982_v26 = vmul.f32 %v12880_v11, %v7038_v63 }
 0x96f   : > { %v7137_v32 = vld [vmem:[#allocation2 + $0x348] sm:$0xff]  ;;  %14113 = vst [vmem:[#allocation29_spill] sm:$0xff] %v12939_v18  ;;  %14114 = vst [vmem:[#allocation30_spill] sm:$0xff] %v12942_v36  ;;  %v6938_v16 = vld [vmem:[#allocation2 + $0x140] sm:$0xff]  ;;  %v12987_v10 = vmul.f32 %v12878_v40, %v6939_v42 }
 0x970   : > { %v7136_v7 = vld [vmem:[#allocation2 + $0x340] sm:$0xff]  ;;  %v7040_v22 = vld [vmem:[#allocation2 + $0x258] sm:$0xff]  ;;  %14115 = vst [vmem:[#allocation31_spill] sm:$0xff] %v12945_v1  ;;  %14116 = vst [vmem:[#allocation32_spill] sm:$0xff] %v12948_v35  ;;  %v12973_v35 = vmul.f32 %v12884_v5, %v7135_v17  ;;  %v12990_v17 = vmul.f32 %v12884_v5, %v7137_v32 }
 0x971   : > { %14117 = vst [vmem:[#allocation33_spill] sm:$0xff] %v12951_v51  ;;  %14118 = vst [vmem:[#allocation34_spill] sm:$0xff] %v12954_v59  ;;  %v6941_v55 = vld [vmem:[#allocation2 + $0x158] sm:$0xff]  ;;  %v7039_v6 = vld [vmem:[#allocation2 + $0x250] sm:$0xff]  ;;  %v13007_v32 = vmul.f32 %v12884_v5, %v7136_v7 }
 0x972   : > { %v7139_v18 = vld [vmem:[#allocation2 + $0x358] sm:$0xff]  ;;  %14119 = vst [vmem:[#allocation35_spill] sm:$0xff] %v12965_v57  ;;  %14120 = vst [vmem:[#allocation36_spill] sm:$0xff] %v12968_v56  ;;  %v6940_v51 = vld [vmem:[#allocation2 + $0x150] sm:$0xff] }
 0x973   : > { %v7138_v8 = vld [vmem:[#allocation2 + $0x350] sm:$0xff]  ;;  %v7042_v59 = vld [vmem:[#allocation2 + $0x268] sm:$0xff]  ;;  %14121 = vst [vmem:[#allocation37_spill] sm:$0xff] %v12973_v35  ;;  %14124 = vst [vmem:[#allocation46_spill] sm:$0xff] %v12982_v26 }
 0x974   : > { %v6943_v57 = vld [vmem:[#allocation2 + $0x168] sm:$0xff]  ;;  %v6942_v56 = vld [vmem:[#allocation2 + $0x160] sm:$0xff]  ;;  %14125 = vst [vmem:[#allocation44_spill] sm:$0xff] %v12987_v10  ;;  %14126 = vst [vmem:[#allocation49_spill] sm:$0xff] %v12990_v17  ;;  %v13016_v10 = vmul.f32 %v12884_v5, %v7139_v18  ;;  %v13033_v18 = vmul.f32 %v12880_v11, %v7042_v59 }
 0x975   : > { %v7141_v43 = vld [vmem:[#allocation2 + $0x368] sm:$0xff]  ;;  %v7140_v63 = vld [vmem:[#allocation2 + $0x360] sm:$0xff]  ;;  %v7044_v26 = vld [vmem:[#allocation2 + $0x278] sm:$0xff]  ;;  %14129 = vst [vmem:[#allocation50_spill] sm:$0xff] %v13007_v32 }
 0x976   : > { %v6945_v17 = vld [vmem:[#allocation2 + $0x178] sm:$0xff]  ;;  %14132 = vst [vmem:[#allocation53_spill] sm:$0xff] %v13016_v10  ;;  %v6944_v7 = vld [vmem:[#allocation2 + $0x170] sm:$0xff]  ;;  %14137 = vst [vmem:[#allocation40_spill] sm:$0xff] %v13033_v18  ;;  %v13051_v59 = vmul.f32 %v12884_v5, %v7140_v63 }
 0x977   : > { %v7043_v32 = vld [vmem:[#allocation2 + $0x270] sm:$0xff]  ;;  %v6947_v10 = vld [vmem:[#allocation2 + $0x188] sm:$0xff]  ;;  %v7048_v18 = vld [vmem:[#allocation2 + $0x298] sm:$0xff] }
 0x978   : > { %14141 = vst [vmem:[#allocation6_spill] sm:$0xff] %v13051_v59  ;;  %v6948_v63 = vld [vmem:[#allocation2 + $0x190] sm:$0xff]  ;;  %v13067_v59 = vmul.f32 %v12878_v40, %v6944_v7 }
 0x97a   : > { %14145 = vst [vmem:[#allocation10_spill] sm:$0xff] %v13067_v59 }
 0x985   : > { %v12767_v30 = vpop.f32.mrb[166].mxu1 }
 0x986   : > { %v12770_v44 = vpop.f32.mrb[167].mxu1  ;;  %v12958_v52 = vadd.f32 %v12767_v30, %v12891_v58  ;;  %v12976_v30 = vmul.f32 %v12880_v11, %v7035_v2  ;;  %v12993_v2 = vmul.f32 %v12878_v40, %v6938_v16  ;;  %v13010_v16 = vmul.f32 %v12880_v11, %v7040_v22 }
 0x987   : > { %v12962_v53 = vadd.f32 %v12891_v58, %v12770_v44  ;;  %v12979_v44 = vmul.f32 %v12884_v5, %v7134_v19  ;;  %v12996_v19 = vmul.f32 %v12880_v11, %v7037_v47  ;;  %v7143_v47 = vld [vmem:[#allocation2 + $0x378] sm:$0xff] }
 0x988   : > { %14122 = vst [vmem:[#allocation47_spill] sm:$0xff] %v12976_v30  ;;  %14127 = vst [vmem:[#allocation48_spill] sm:$0xff] %v12993_v2  ;;  %v13013_v2 = vmul.f32 %v12878_v40, %v6941_v55  ;;  %v7046_v30 = vld [vmem:[#allocation2 + $0x288] sm:$0xff]  ;;  %v13030_v55 = vmul.f32 %v12878_v40, %v6943_v57 }
 0x989   : > { %14123 = vst [vmem:[#allocation43_spill] sm:$0xff] %v12979_v44  ;;  %14128 = vst [vmem:[#allocation52_spill] sm:$0xff] %v12996_v19  ;;  %v7041_v44 = vld [vmem:[#allocation2 + $0x260] sm:$0xff]  ;;  %v7142_v19 = vld [vmem:[#allocation2 + $0x370] sm:$0xff] }
 0x98a   : > { %14130 = vst [vmem:[#allocation54_spill] sm:$0xff] %v13010_v16  ;;  %14131 = vst [vmem:[#allocation51_spill] sm:$0xff] %v13013_v2  ;;  %v13027_v16 = vmul.f32 %v12878_v40, %v6940_v51  ;;  %v13045_v51 = vmul.f32 %v12878_v40, %v6942_v56  ;;  %v13048_v57 = vmul.f32 %v12880_v11, %v7041_v44  ;;  %v6949_v44 = vld [vmem:[#allocation2 + $0x198] sm:$0xff] }
 0x98b   : > { %14136 = vst [vmem:[#allocation41_spill] sm:$0xff] %v13030_v55  ;;  %v13064_v56 = vmul.f32 %v12884_v5, %v7143_v47 }
 0x98c   : > { %14135 = vst [vmem:[#allocation38_spill] sm:$0xff] %v13027_v16  ;;  %14139 = vst [vmem:[#allocation45_spill] sm:$0xff] %v13045_v51  ;;  %v13061_v16 = vmul.f32 %v12880_v11, %v7044_v26  ;;  %v13070_v51 = vmul.f32 %v12880_v11, %v7043_v32  ;;  %v7047_v26 = vld [vmem:[#allocation2 + $0x290] sm:$0xff]  ;;  %v13087_v32 = vmul.f32 %v12878_v40, %v6947_v10 }
 0x98d   : > { %v12781_v14 = vpop.f32.mrb[168].mxu1  ;;  %14140 = vst [vmem:[#allocation7_spill] sm:$0xff] %v13048_v57  ;;  %14144 = vst [vmem:[#allocation11_spill] sm:$0xff] %v13064_v56  ;;  %v7147_v57 = vld [vmem:[#allocation2 + $0x398] sm:$0xff]  ;;  %v13104_v10 = vmul.f32 %v12880_v11, %v7048_v18 }
 0x98e   : > { %v12783_v41 = vpop.f32.mrb[169].mxu1  ;;  %v13000_v35 = vadd.f32 %v12781_v14, %v12891_v58  ;;  %v13019_v14 = vmul.f32 %v12880_v11, %v7039_v6  ;;  %v13036_v6 = vmul.f32 %v12884_v5, %v7141_v43  ;;  %v6946_v43 = vld [vmem:[#allocation2 + $0x180] sm:$0xff]  ;;  %14143 = vst [vmem:[#allocation8_spill] sm:$0xff] %v13061_v16  ;;  %14146 = vst [vmem:[#allocation13_spill] sm:$0xff] %v13070_v51  ;;  %v7146_v16 = vld [vmem:[#allocation2 + $0x390] sm:$0xff] }
 0x98f   : > { %v13004_v42 = vadd.f32 %v12891_v58, %v12783_v41  ;;  %v13022_v41 = vmul.f32 %v12884_v5, %v7138_v8  ;;  %v7145_v8 = vld [vmem:[#allocation2 + $0x388] sm:$0xff]  ;;  %14150 = vst [vmem:[#allocation17_spill] sm:$0xff] %v13087_v32  ;;  %v13095_v51 = vmul.f32 %v12878_v40, %v6946_v43  ;;  %14155 = vst [vmem:[#allocation20_spill] sm:$0xff] %v13104_v10  ;;  %v6950_v32 = vld [vmem:[#allocation2 + $0x1a0] sm:$0xff] }
 0x990   : > { %14133 = vst [vmem:[#allocation55_spill] sm:$0xff] %v13019_v14  ;;  %14138 = vst [vmem:[#allocation42_spill] sm:$0xff] %v13036_v6  ;;  %v7144_v6 = vld [vmem:[#allocation2 + $0x380] sm:$0xff]  ;;  %v13112_v43 = vmul.f32 %v12884_v5, %v7147_v57  ;;  %v7151_v18 = vld [vmem:[#allocation2 + $0x3b8] sm:$0xff]  ;;  %v13129_v57 = vmul.f32 %v12884_v5, %v7146_v16 }
 0x991   : > { %14134 = vst [vmem:[#allocation39_spill] sm:$0xff] %v13022_v41  ;;  %v7045_v41 = vld [vmem:[#allocation2 + $0x280] sm:$0xff]  ;;  %14152 = vst [vmem:[#allocation19_spill] sm:$0xff] %v13095_v51  ;;  %v7051_v10 = vld [vmem:[#allocation2 + $0x2b0] sm:$0xff] }
 0x992   : > { %14157 = vst [vmem:[#allocation22_spill] sm:$0xff] %v13112_v43  ;;  %14160 = vst [vmem:[#allocation58_spill] sm:$0xff] %v13129_v57  ;;  %v6952_v43 = vld [vmem:[#allocation2 + $0x1b0] sm:$0xff]  ;;  %v6955_v16 = vld [vmem:[#allocation2 + $0x1c8] sm:$0xff] }
 0x993   : > { %v7153_v57 = vld [vmem:[#allocation2 + $0x3c8] sm:$0xff]  ;;  %v7152_v51 = vld [vmem:[#allocation2 + $0x3c0] sm:$0xff] }
 0x995   : > { %v12795_v49 = vpop.f32.mrb[170].mxu1 }
 0x996   : > { %v12798_v27 = vpop.f32.mrb[171].mxu1  ;;  %v13040_v14 = vadd.f32 %v12795_v49, %v12891_v58  ;;  %v13058_v49 = vmul.f32 %v12878_v40, %v6945_v17  ;;  %v13076_v17 = vmul.f32 %v12880_v11, %v7046_v30  ;;  %v7149_v30 = vld [vmem:[#allocation2 + $0x3a8] sm:$0xff] }
 0x997   : > { %v13055_v55 = vadd.f32 %v12891_v58, %v12798_v27  ;;  %v13073_v27 = vmul.f32 %v12884_v5, %v7142_v19  ;;  %v13090_v19 = vmul.f32 %v12884_v5, %v7145_v8  ;;  %v7049_v8 = vld [vmem:[#allocation2 + $0x2a0] sm:$0xff] }
 0x998   : > { %14142 = vst [vmem:[#allocation9_spill] sm:$0xff] %v13058_v49  ;;  %14148 = vst [vmem:[#allocation15_spill] sm:$0xff] %v13076_v17  ;;  %v7050_v49 = vld [vmem:[#allocation2 + $0x2a8] sm:$0xff]  ;;  %v7148_v17 = vld [vmem:[#allocation2 + $0x3a0] sm:$0xff] }
 0x999   : > { %14147 = vst [vmem:[#allocation12_spill] sm:$0xff] %v13073_v27  ;;  %14151 = vst [vmem:[#allocation16_spill] sm:$0xff] %v13090_v19  ;;  %v6951_v27 = vld [vmem:[#allocation2 + $0x1a8] sm:$0xff]  ;;  %v7052_v19 = vld [vmem:[#allocation2 + $0x2b8] sm:$0xff] }
 0x99d   : > { %v12810_v60 = vpop.f32.mrb[172].mxu1 }
 0x99e   : > { %v12813_v50 = vpop.f32.mrb[173].mxu1  ;;  %v13080_v47 = vadd.f32 %v12810_v60, %v12891_v58  ;;  %v13098_v60 = vmul.f32 %v12880_v11, %v7045_v41  ;;  %v13115_v41 = vmul.f32 %v12878_v40, %v6948_v63  ;;  %v13132_v63 = vmul.f32 %v12880_v11, %v7050_v49 }
 0x99f   : > { %v13084_v7 = vadd.f32 %v12891_v58, %v12813_v50  ;;  %v13101_v50 = vmul.f32 %v12884_v5, %v7144_v6  ;;  %v13118_v6 = vmul.f32 %v12880_v11, %v7047_v26  ;;  %v7150_v26 = vld [vmem:[#allocation2 + $0x3b0] sm:$0xff] }
 0x9a0   : > { %14153 = vst [vmem:[#allocation18_spill] sm:$0xff] %v13098_v60  ;;  %14158 = vst [vmem:[#allocation56_spill] sm:$0xff] %v13115_v41  ;;  %v13135_v41 = vmul.f32 %v12878_v40, %v6951_v27 }
 0x9a1   : > { %14149 = vst [vmem:[#allocation14_spill] sm:$0xff] %v13084_v7  ;;  %14154 = vst [vmem:[#allocation21_spill] sm:$0xff] %v13101_v50  ;;  %v13109_v7 = vmul.f32 %v12878_v40, %v6949_v44  ;;  %v6953_v50 = vld [vmem:[#allocation2 + $0x1b8] sm:$0xff] }
 0x9a2   : > { %14159 = vst [vmem:[#allocation57_spill] sm:$0xff] %v13118_v6  ;;  %14161 = vst [vmem:[#allocation59_spill] sm:$0xff] %v13132_v63  ;;  %v7054_v6 = vld [vmem:[#allocation2 + $0x2c8] sm:$0xff]  ;;  %v13149_v63 = vmul.f32 %v12878_v40, %v6950_v32  ;;  %v13152_v27 = vmul.f32 %v12878_v40, %v6953_v50  ;;  %v13167_v32 = vmul.f32 %v12878_v40, %v6952_v43 }
 0x9a3   : > { %14156 = vst [vmem:[#allocation23_spill] sm:$0xff] %v13109_v7  ;;  %14162 = vst [vmem:[#allocation60_spill] sm:$0xff] %v13135_v41  ;;  %v13138_v7 = vmul.f32 %v12884_v5, %v7149_v30  ;;  %v13155_v30 = vmul.f32 %v12880_v11, %v7052_v19  ;;  %v13170_v50 = vmul.f32 %v12880_v11, %v7051_v10  ;;  %v6956_v10 = vld [vmem:[#allocation2 + $0x1d0] sm:$0xff] }
 0x9a4   : > { %14166 = vst [vmem:[#allocation64_spill] sm:$0xff] %v13149_v63  ;;  %14167 = vst [vmem:[#allocation65_spill] sm:$0xff] %v13152_v27  ;;  %v13173_v19 = vmul.f32 %v12884_v5, %v7150_v26  ;;  %v13183_v63 = vmul.f32 %v12880_v11, %v7054_v6  ;;  %v13186_v43 = vmul.f32 %v12884_v5, %v7153_v57  ;;  %v7058_v6 = vld [vmem:[#allocation2 + $0x2e8] sm:$0xff] }
 0x9a5   : > { %v12822_v23 = vpop.f32.mrb[174].mxu1  ;;  %14163 = vst [vmem:[#allocation61_spill] sm:$0xff] %v13138_v7  ;;  %14168 = vst [vmem:[#allocation66_spill] sm:$0xff] %v13155_v30  ;;  %v6954_v7 = vld [vmem:[#allocation2 + $0x1c0] sm:$0xff]  ;;  %v7154_v30 = vld [vmem:[#allocation2 + $0x3d0] sm:$0xff] }
 0x9a6   : > { %v12827_v33 = vpop.f32.mrb[175].mxu1  ;;  %v13122_v60 = vadd.f32 %v12822_v23, %v12891_v58  ;;  %v13141_v23 = vmul.f32 %v12880_v11, %v7049_v8  ;;  %v13158_v8 = vmul.f32 %v12884_v5, %v7151_v18  ;;  %14170 = vst [vmem:[#allocation68_spill] sm:$0xff] %v13170_v50  ;;  %14171 = vst [vmem:[#allocation69_spill] sm:$0xff] %v13173_v19  ;;  %v6957_v18 = vld [vmem:[#allocation2 + $0x1d8] sm:$0xff]  ;;  %v7055_v50 = vld [vmem:[#allocation2 + $0x2d0] sm:$0xff] }
 0x9a7   : > { %v13126_v44 = vadd.f32 %v12891_v58, %v12827_v33  ;;  %v13144_v33 = vmul.f32 %v12884_v5, %v7148_v17  ;;  %v7053_v17 = vld [vmem:[#allocation2 + $0x2c0] sm:$0xff]  ;;  %14173 = vst [vmem:[#allocation71_spill] sm:$0xff] %v13183_v63  ;;  %14174 = vst [vmem:[#allocation72_spill] sm:$0xff] %v13186_v43  ;;  %v13189_v26 = vmul.f32 %v12878_v40, %v6954_v7  ;;  %v7157_v63 = vld [vmem:[#allocation2 + $0x3e8] sm:$0xff] }
 0x9a8   : > { %14164 = vst [vmem:[#allocation62_spill] sm:$0xff] %v13141_v23  ;;  %14169 = vst [vmem:[#allocation67_spill] sm:$0xff] %v13158_v8  ;;  %v7155_v8 = vld [vmem:[#allocation2 + $0x3d8] sm:$0xff]  ;;  %v13192_v19 = vmul.f32 %v12880_v11, %v7053_v17  ;;  %v13205_v7 = vmul.f32 %v12878_v40, %v6957_v18  ;;  %v13222_v18 = vmul.f32 %v12880_v11, %v7055_v50 }
 0x9a9   : > { %14165 = vst [vmem:[#allocation63_spill] sm:$0xff] %v13144_v33  ;;  %v7056_v33 = vld [vmem:[#allocation2 + $0x2d8] sm:$0xff]  ;;  %14175 = vst [vmem:[#allocation73_spill] sm:$0xff] %v13189_v26  ;;  %v13208_v17 = vmul.f32 %v12884_v5, %v7155_v8  ;;  %v13219_v26 = vmul.f32 %v12878_v40, %v6956_v10 }
 0x9aa   : > { %14176 = vst [vmem:[#allocation74_spill] sm:$0xff] %v13192_v19 }
 0x9ad   : > { %v12838_v21 = vpop.f32.mrb[176].mxu1 }
 0x9ae   : > { %v12842_v48 = vpop.f32.mrb[177].mxu1  ;;  %v13162_v23 = vadd.f32 %v12838_v21, %v12891_v58  ;;  %v13180_v21 = vmul.f32 %v12878_v40, %v6955_v16  ;;  %v13198_v16 = vmul.f32 %v12880_v11, %v7056_v33  ;;  %v7156_v33 = vld [vmem:[#allocation2 + $0x3e0] sm:$0xff] }
 0x9af   : > { %v13177_v27 = vadd.f32 %v12891_v58, %v12842_v48  ;;  %v13195_v48 = vmul.f32 %v12884_v5, %v7152_v51  ;;  %v13211_v51 = vmul.f32 %v12884_v5, %v7154_v30 }
 0x9b0   : > { %14172 = vst [vmem:[#allocation70_spill] sm:$0xff] %v13180_v21  ;;  %14178 = vst [vmem:[#allocation76_spill] sm:$0xff] %v13198_v16  ;;  %v6959_v21 = vld [vmem:[#allocation2 + $0x1e8] sm:$0xff] }
 0x9b1   : > { %14177 = vst [vmem:[#allocation75_spill] sm:$0xff] %v13195_v48  ;;  %14179 = vst [vmem:[#allocation77_spill] sm:$0xff] %v13211_v51  ;;  %v6958_v48 = vld [vmem:[#allocation2 + $0x1e0] sm:$0xff]  ;;  %v13226_v30 = vmul.f32 %v12878_v40, %v6959_v21  ;;  %v13229_v51 = vmul.f32 %v12880_v11, %v7058_v6 }
 0x9b2   : > { %v13240_v50 = vmul.f32 %v12878_v40, %v6958_v48 }
 0x9b3   : > { %14180 = vst [vmem:[#allocation78_spill] sm:$0xff] %v13229_v51 }
 0x9b4   : > { %14182 = vst [vmem:[#allocation80_spill] sm:$0xff] %v13240_v50 }
 0x9b5   : > { %v12852_v39 = vpop.f32.mrb[178].mxu1 }
 0x9b6   : > { %v12856_v62 = vpop.f32.mrb[179].mxu1  ;;  %v13202_v57 = vadd.f32 %v12852_v39, %v12891_v58 }
 0x9b7   : > { %v13215_v16 = vadd.f32 %v12891_v58, %v12856_v62  ;;  %v13232_v62 = vmul.f32 %v12884_v5, %v7157_v63 }
 0x9b9   : > { %14181 = vst [vmem:[#allocation79_spill] sm:$0xff] %v13232_v62 }
 0x9bd   : > { %v12862_v0 = vpop.f32.mrb[180].mxu1 }
 0x9be   : > { %v12864_v15 = vpop.f32.mrb[181].mxu1 }
 0x9bf   : > { %v13247_v21 = vadd.f32 %v12891_v58, %v12864_v15 }
 0x9c5   : > { %v12866_v4 = vpop.f32.mrb[182].mxu1 }
 0x9c6   : > { %v12868_v3 = vpop.f32.mrb[183].mxu1  ;;  %v13251_v63 = vadd.f32 %v12866_v4, %v12891_v58 }
 0x9cd   : > { %v12874_v25 = vpop.f32.mrb[184].mxu1 }
 0x9ce   : > { %v12876_v9 = vpop.f32.mrb[185].mxu1  ;;  %v13260_v48 = vadd.f32 %v12874_v25, %v12891_v58 }
 0x9d3   : > { %v12882_v13 = vpop.f32.mrb[186].mxu1 }
 0x9d4   : > { %v12886_v29 = vpop.f32.mrb[187].mxu1 }
 0x9d7   : > { %v12916_v38 = vpop.f32.mrb[188].mxu1 }
 0x9d8   : > { %v12930_v20 = vpop.f32.mrb[189].mxu1  ;;  %v13278_v62 = vadd.f32 %v12916_v38, %v12891_v58 }
 0x9db   : > { %v12970_v1 = vpop.f32.mrb[190].mxu1 }
 0x9dc   : > { %v12984_v36 = vpop.f32.mrb[191].mxu1 }
 0x9df   : > { %v13024_v22 = vpop.f32.mrb[192].mxu1 }
 0x9e0   : > { %v13042_v2 = vpop.f32.mrb[193].mxu1 }
 0x9e4   : > { %v13092_v56 = vpop.f32.mrb[194].mxu1 }
 0x9e5   : > { %v13106_v59 = vpop.f32.mrb[195].mxu1 }
 0x9e8   : > { %v13146_v49 = vpop.f32.mrb[196].mxu1 }
 0x9e9   : > { %v13164_v41 = vpop.f32.mrb[197].mxu1 }
 0x9ec   : > { %v9126_v43 = vpop.f32.mrb[198].mxu1 }
 0x9ed   : > { %v6417_v19 = vadd.f32 %v9126_v43, %v12891_v58  ;;  %v6411_v39 = vpop.f32.mrb[199].mxu1  ;;  %v13236_v43 = vadd.f32 %v12862_v0, %v12891_v58  ;;  %v13255_v0 = vadd.f32 %v12891_v58, %v12868_v3  ;;  %v13273_v3 = vadd.f32 %v12891_v58, %v12886_v29 }
 0x9ee   : > { %v6412_v8 = vadd.f32 %v12891_v58, %v6411_v39  ;;  %v13243_v39 = vmul.f32 %v12884_v5, %v7156_v33  ;;  %v13264_v33 = vadd.f32 %v12891_v58, %v12876_v9  ;;  %v13269_v5 = vadd.f32 %v12882_v13, %v12891_v58 }
 0x9ef   : > { %v6571_v10 = vsub.f32 %v6417_v19, %v12958_v52  ;;  %v13282_v9 = vadd.f32 %v12891_v58, %v12930_v20  ;;  %v13292_v29 = vadd.f32 %v12891_v58, %v12984_v36  ;;  %v13298_v20 = vadd.f32 %v13024_v22, %v12891_v58 }
 0x9f0   : > { %14183 = vst [vmem:[#allocation81_spill] sm:$0xff] %v13243_v39  ;;  %v6570_v19 = vsub.f32 %v6412_v8, %v12962_v53  ;;  %v9129_v6 = vpop.f32.mrb[200].mxu1  ;;  %v13308_v36 = vadd.f32 %v13092_v56, %v12891_v58  ;;  %v13322_v56 = vadd.f32 %v13146_v49, %v12891_v58 }
 0x9f1   : > { %v6603_v15 = vmul.f32 7.5, %v6571_v10  ;;  %v6427_v39 = vadd.f32 %v9129_v6, %v12891_v58  ;;  %v6421_v4 = vpop.f32.mrb[201].mxu1  ;;  %v13288_v6 = vadd.f32 %v12970_v1, %v12891_v58 }
 0x9f2   : > { %v6602_v8 = vmul.f32 7.5, %v6570_v19  ;;  %v6422_v25 = vadd.f32 %v12891_v58, %v6421_v4 }
 0x9f3   : > { %v6635_v10 = vadd.f32 %v6603_v15, %v12958_v52  ;;  %v6573_v13 = vsub.f32 %v6427_v39, %v13000_v35  ;;  %v13302_v52 = vadd.f32 %v12891_v58, %v13042_v2  ;;  %v13315_v2 = vadd.f32 %v12891_v58, %v13106_v59 }
 0x9f4   : > { %v6634_v19 = vadd.f32 %v6602_v8, %v12962_v53  ;;  %v6572_v38 = vsub.f32 %v6422_v25, %v13004_v42  ;;  %v13329_v59 = vadd.f32 %v12891_v58, %v13164_v41 }
 0x9f5   : > { %6862 = vst.msk [vmem:[#allocation2 + $0x8] sm:$0xff] %vm739_vm4, %v6635_v10  ;;  %v6897_v1 = vmul.f32 %v12893_v34, %v6635_v10  ;;  %v6605_v39 = vmul.f32 7.5, %v6573_v13  ;;  %v9132_v15 = vpop.f32.mrb[202].mxu1 }
 0x9f6   : > { %6861 = vst.msk [vmem:[#allocation2] sm:$0xff] %vm739_vm4, %v6634_v19  ;;  %v6896_v53 = vmul.f32 %v12893_v34, %v6634_v19  ;;  %v6604_v22 = vmul.f32 7.5, %v6572_v38  ;;  %v6437_v4 = vadd.f32 %v9132_v15, %v12891_v58  ;;  %v6431_v8 = vpop.f32.mrb[203].mxu1 }
 0x9f7   : > { %v6996_v25 = vadd.f32 %v12896_v45, %v6897_v1  ;;  %v6637_v10 = vadd.f32 %v6605_v39, %v13000_v35  ;;  %v6432_v13 = vadd.f32 %v12891_v58, %v6431_v8 }
 0x9f8   : > { %v6995_v19 = vadd.f32 %v12902_v31, %v6896_v53  ;;  %v6636_v38 = vadd.f32 %v6604_v22, %v13004_v42  ;;  %v6575_v15 = vsub.f32 %v6437_v4, %v13040_v14  ;;  %v7226_v31 = vld [vmem:[%s13796_s5 + $0x8] sm:$0xff]  ;;  %v7225_v4 = vld [vmem:[%s13796_s5] sm:$0xff] }
 0x9f9   : > { %v7095_v45 = vadd.f32 %v12899_v61, %v6996_v25  ;;  %6864 = vst.msk [vmem:[#allocation2 + $0x18] sm:$0xff] %vm739_vm4, %v6637_v10  ;;  %v6899_v35 = vmul.f32 %v12893_v34, %v6637_v10  ;;  %v6574_v1 = vsub.f32 %v6432_v13, %v13055_v55  ;;  %v9135_v49 = vpop.f32.mrb[204].mxu1 }
 0x9fa   : > { %v7094_v42 = vadd.f32 %v12908_v24, %v6995_v19  ;;  %6863 = vst.msk [vmem:[#allocation2 + $0x10] sm:$0xff] %vm739_vm4, %v6636_v38  ;;  %v6898_v41 = vmul.f32 %v12893_v34, %v6636_v38  ;;  %v6607_v39 = vmul.f32 7.5, %v6575_v15  ;;  %v6447_v61 = vadd.f32 %v9135_v49, %v12891_v58  ;;  %v6441_v53 = vpop.f32.mrb[205].mxu1  ;;  %v14184_v49 = vld [vmem:[#allocation14_spill] sm:$0xff] }
 0x9fb   : > { %v7194_v22 = vadd.f32 %v12905_v54, %v7095_v45  ;;  %v6998_v8 = vadd.f32 %v12914_v37, %v6899_v35  ;;  %v6606_v25 = vmul.f32 7.5, %v6574_v1  ;;  %v6442_v10 = vadd.f32 %v12891_v58, %v6441_v53  ;;  %v7228_v35 = vld [vmem:[%s13796_s5 + $0x18] sm:$0xff]  ;;  %v14187_v53 = vld [vmem:[#allocation27_spill] sm:$0xff] }
 0x9fc   : > { %v7193_v24 = vadd.f32 %v12911_v46, %v7094_v42  ;;  %v6997_v13 = vadd.f32 %v12925_v28, %v6898_v41  ;;  %v6639_v19 = vadd.f32 %v6607_v39, %v13040_v14  ;;  %v6577_v38 = vsub.f32 %v6447_v61, %v13080_v47  ;;  %v14185_v46 = vld [vmem:[#allocation26_spill] sm:$0xff]  ;;  %v7227_v42 = vld [vmem:[%s13796_s5 + $0x10] sm:$0xff] }
 0x9fd   : > { %v7258_v15 = vadd.f32 %v7226_v31, %v7194_v22  ;;  %v7097_v54 = vadd.f32 %v12919_v12, %v6998_v8  ;;  %v6638_v45 = vadd.f32 %v6606_v25, %v13055_v55  ;;  %v6576_v51 = vsub.f32 %v6442_v10, %v14184_v49  ;;  %v9138_v50 = vpop.f32.mrb[206].mxu1  ;;  %v14186_v12 = vld [vmem:[#allocation25_spill] sm:$0xff] }
 0x9fe   : > { %v7257_v37 = vadd.f32 %v7225_v4, %v7193_v24  ;;  %v7096_v1 = vadd.f32 %v14185_v46, %v6997_v13  ;;  %6866 = vst.msk [vmem:[#allocation2 + $0x28] sm:$0xff] %vm739_vm4, %v6639_v19  ;;  %v6901_v28 = vmul.f32 %v12893_v34, %v6639_v19  ;;  %v6609_v14 = vmul.f32 7.5, %v6577_v38  ;;  %v6451_v31 = vpop.f32.mrb[207].mxu1  ;;  %v14188_v4 = vld [vmem:[#allocation28_spill] sm:$0xff]  ;;  %v14189_v13 = vld [vmem:[#allocation30_spill] sm:$0xff] }
 0x9ff   : > { %7290 = vst.msk [vmem:[%s13796_s5 + $0x8] sm:$0xff] %vm739_vm4, %v7258_v15  ;;  %v7196_v55 = vadd.f32 %v14186_v12, %v7097_v54  ;;  %6865 = vst.msk [vmem:[#allocation2 + $0x20] sm:$0xff] %vm739_vm4, %v6638_v45  ;;  %v6900_v41 = vmul.f32 %v12893_v34, %v6638_v45  ;;  %v6608_v39 = vmul.f32 7.5, %v6576_v51  ;;  %v6457_v61 = vadd.f32 %v9138_v50, %v12891_v58  ;;  %v14190_v54 = vld [vmem:[#allocation29_spill] sm:$0xff]  ;;  %v14192_v12 = vld [vmem:[#allocation31_spill] sm:$0xff] }
 0xa00   : > { %7289 = vst.msk [vmem:[%s13796_s5] sm:$0xff] %vm739_vm4, %v7257_v37  ;;  %v7195_v22 = vadd.f32 %v14187_v53, %v7096_v1  ;;  %v7000_v8 = vadd.f32 %v14188_v4, %v6901_v28  ;;  %v6641_v25 = vadd.f32 %v6609_v14, %v13080_v47  ;;  %v6452_v10 = vadd.f32 %v12891_v58, %v6451_v31 }
 0xa01   : > { %v7260_v24 = vadd.f32 %v7228_v35, %v7196_v55  ;;  %v6999_v19 = vadd.f32 %v14189_v13, %v6900_v41  ;;  %v6640_v51 = vadd.f32 %v6608_v39, %v14184_v49  ;;  %v6579_v50 = vsub.f32 %v6457_v61, %v13122_v60  ;;  %v9141_v38 = vpop.f32.mrb[208].mxu1  ;;  %v7230_v49 = vld [vmem:[%s13796_s5 + $0x28] sm:$0xff]  ;;  %v14191_v35 = vld [vmem:[#allocation32_spill] sm:$0xff]  ;;  %v14193_v41 = vld [vmem:[#allocation34_spill] sm:$0xff] }
 0xa02   : > { %v7259_v15 = vadd.f32 %v7227_v42, %v7195_v22  ;;  %v7099_v45 = vadd.f32 %v14190_v54, %v7000_v8  ;;  %6868 = vst.msk [vmem:[#allocation2 + $0x38] sm:$0xff] %vm739_vm4, %v6641_v25  ;;  %v6903_v37 = vmul.f32 %v12893_v34, %v6641_v25  ;;  %v6578_v46 = vsub.f32 %v6452_v10, %v13126_v44  ;;  %v6461_v47 = vpop.f32.mrb[209].mxu1  ;;  %v7229_v42 = vld [vmem:[%s13796_s5 + $0x20] sm:$0xff]  ;;  %v14194_v22 = vld [vmem:[#allocation33_spill] sm:$0xff]  ;;  %v14195_v8 = vld [vmem:[#allocation36_spill] sm:$0xff] }
 0xa03   : > { %7292 = vst.msk [vmem:[%s13796_s5 + $0x18] sm:$0xff] %vm739_vm4, %v7260_v24  ;;  %v7098_v1 = vadd.f32 %v14191_v35, %v6999_v19  ;;  %6867 = vst.msk [vmem:[#allocation2 + $0x30] sm:$0xff] %vm739_vm4, %v6640_v51  ;;  %v6902_v28 = vmul.f32 %v12893_v34, %v6640_v51  ;;  %v6611_v14 = vmul.f32 7.5, %v6579_v50  ;;  %v6467_v31 = vadd.f32 %v9141_v38, %v12891_v58  ;;  %v14196_v51 = vld [vmem:[#allocation35_spill] sm:$0xff] }
 0xa04   : > { %7291 = vst.msk [vmem:[%s13796_s5 + $0x10] sm:$0xff] %vm739_vm4, %v7259_v15  ;;  %v7198_v55 = vadd.f32 %v14192_v12, %v7099_v45  ;;  %v7002_v39 = vadd.f32 %v14193_v41, %v6903_v37  ;;  %v6610_v61 = vmul.f32 7.5, %v6578_v46  ;;  %v6462_v53 = vadd.f32 %v12891_v58, %v6461_v47  ;;  %v7232_v37 = vld [vmem:[%s13796_s5 + $0x38] sm:$0xff]  ;;  %v14197_v46 = vld [vmem:[#allocation47_spill] sm:$0xff] }
 0xa05   : > { %v7197_v4 = vadd.f32 %v14194_v22, %v7098_v1  ;;  %v7001_v25 = vadd.f32 %v14195_v8, %v6902_v28  ;;  %v6643_v10 = vadd.f32 %v6611_v14, %v13122_v60  ;;  %v6581_v24 = vsub.f32 %v6467_v31, %v13162_v23  ;;  %v9144_v13 = vpop.f32.mrb[210].mxu1  ;;  %v7231_v1 = vld [vmem:[%s13796_s5 + $0x30] sm:$0xff]  ;;  %v14199_v12 = vld [vmem:[#allocation43_spill] sm:$0xff] }
 0xa06   : > { %v7262_v19 = vadd.f32 %v7230_v49, %v7198_v55  ;;  %v7101_v50 = vadd.f32 %v14196_v51, %v7002_v39  ;;  %v6642_v38 = vadd.f32 %v6610_v61, %v13126_v44  ;;  %v6580_v15 = vsub.f32 %v6462_v53, %v13177_v27  ;;  %v6471_v54 = vpop.f32.mrb[211].mxu1  ;;  %v14198_v44 = vld [vmem:[#allocation37_spill] sm:$0xff] }
 0xa07   : > { %v7261_v45 = vadd.f32 %v7229_v42, %v7197_v4  ;;  %v7100_v47 = vadd.f32 %v14197_v46, %v7001_v25  ;;  %6870 = vst.msk [vmem:[#allocation2 + $0x48] sm:$0xff] %vm739_vm4, %v6643_v10  ;;  %v6905_v60 = vmul.f32 %v12893_v34, %v6643_v10  ;;  %v6613_v35 = vmul.f32 7.5, %v6581_v24  ;;  %v14200_v42 = vld [vmem:[#allocation44_spill] sm:$0xff]  ;;  %v14204_v46 = vld [vmem:[#allocation49_spill] sm:$0xff] }
 0xa08   : > { %7294 = vst.msk [vmem:[%s13796_s5 + $0x28] sm:$0xff] %vm739_vm4, %v7262_v19  ;;  %v7200_v49 = vadd.f32 %v14198_v44, %v7101_v50  ;;  %6869 = vst.msk [vmem:[#allocation2 + $0x40] sm:$0xff] %vm739_vm4, %v6642_v38  ;;  %v6904_v28 = vmul.f32 %v12893_v34, %v6642_v38  ;;  %v6612_v14 = vmul.f32 7.5, %v6580_v15  ;;  %v6477_v31 = vadd.f32 %v9144_v13, %v12891_v58  ;;  %v14201_v4 = vld [vmem:[#allocation48_spill] sm:$0xff]  ;;  %v14202_v19 = vld [vmem:[#allocation46_spill] sm:$0xff] }
 0xa09   : > { %7293 = vst.msk [vmem:[%s13796_s5 + $0x20] sm:$0xff] %vm739_vm4, %v7261_v45  ;;  %v7199_v55 = vadd.f32 %v14199_v12, %v7100_v47  ;;  %v7004_v41 = vadd.f32 %v14200_v42, %v6905_v60  ;;  %v6645_v39 = vadd.f32 %v6613_v35, %v13162_v23  ;;  %v6472_v61 = vadd.f32 %v12891_v58, %v6471_v54  ;;  %v9147_v53 = vpop.f32.mrb[212].mxu1  ;;  %v14203_v38 = vld [vmem:[#allocation52_spill] sm:$0xff]  ;;  %v7233_v60 = vld [vmem:[%s13796_s5 + $0x40] sm:$0xff]  ;;  %v14205_v35 = vld [vmem:[#allocation51_spill] sm:$0xff] }
 0xa0a   : > { %v7264_v22 = vadd.f32 %v7232_v37, %v7200_v49  ;;  %v7003_v8 = vadd.f32 %v14201_v4, %v6904_v28  ;;  %v6644_v25 = vadd.f32 %v6612_v14, %v13177_v27  ;;  %v6583_v10 = vsub.f32 %v6477_v31, %v13202_v57  ;;  %v6481_v24 = vpop.f32.mrb[213].mxu1  ;;  %v7234_v27 = vld [vmem:[%s13796_s5 + $0x48] sm:$0xff]  ;;  %v14206_v14 = vld [vmem:[#allocation50_spill] sm:$0xff] }
 0xa0b   : > { %v7263_v13 = vadd.f32 %v7231_v1, %v7199_v55  ;;  %v7103_v51 = vadd.f32 %v14202_v19, %v7004_v41  ;;  %6872 = vst.msk [vmem:[#allocation2 + $0x58] sm:$0xff] %vm739_vm4, %v6645_v39  ;;  %v6907_v50 = vmul.f32 %v12893_v34, %v6645_v39  ;;  %v6582_v23 = vsub.f32 %v6472_v61, %v13215_v16  ;;  %v14207_v12 = vld [vmem:[#allocation38_spill] sm:$0xff] }
 0xa0c   : > { %7296 = vst.msk [vmem:[%s13796_s5 + $0x38] sm:$0xff] %vm739_vm4, %v7264_v22  ;;  %v7102_v15 = vadd.f32 %v14203_v38, %v7003_v8  ;;  %6871 = vst.msk [vmem:[#allocation2 + $0x50] sm:$0xff] %vm739_vm4, %v6644_v25  ;;  %v6906_v54 = vmul.f32 %v12893_v34, %v6644_v25  ;;  %v6615_v45 = vmul.f32 7.5, %v6583_v10  ;;  %v6487_v37 = vadd.f32 %v9147_v53, %v12891_v58  ;;  %v14208_v53 = vld [vmem:[#allocation54_spill] sm:$0xff]  ;;  %v7236_v10 = vld [vmem:[%s13796_s5 + $0x58] sm:$0xff] }
 0xa0d   : > { %7295 = vst.msk [vmem:[%s13796_s5 + $0x30] sm:$0xff] %vm739_vm4, %v7263_v13  ;;  %v7202_v47 = vadd.f32 %v14204_v46, %v7103_v51  ;;  %v7006_v44 = vadd.f32 %v14205_v35, %v6907_v50  ;;  %v6614_v49 = vmul.f32 7.5, %v6582_v23  ;;  %v6482_v1 = vadd.f32 %v12891_v58, %v6481_v24  ;;  %v9150_v28 = vpop.f32.mrb[214].mxu1  ;;  %v14209_v24 = vld [vmem:[#allocation55_spill] sm:$0xff]  ;;  %v7235_v50 = vld [vmem:[%s13796_s5 + $0x50] sm:$0xff] }
 0xa0e   : > { %v7201_v31 = vadd.f32 %v14206_v14, %v7102_v15  ;;  %v7005_v55 = vadd.f32 %v14207_v12, %v6906_v54  ;;  %v6647_v42 = vadd.f32 %v6615_v45, %v13202_v57  ;;  %v6585_v41 = vsub.f32 %v6487_v37, %v13236_v43  ;;  %v6491_v39 = vpop.f32.mrb[215].mxu1  ;;  %v14211_v54 = vld [vmem:[#allocation39_spill] sm:$0xff]  ;;  %v14212_v37 = vld [vmem:[#allocation41_spill] sm:$0xff]  ;;  %v14214_v12 = vld [vmem:[#allocation40_spill] sm:$0xff] }
 0xa0f   : > { %v7266_v61 = vadd.f32 %v7234_v27, %v7202_v47  ;;  %v7105_v22 = vadd.f32 %v14208_v53, %v7006_v44  ;;  %v6646_v4 = vadd.f32 %v6614_v49, %v13215_v16  ;;  %v6584_v8 = vsub.f32 %v6482_v1, %v13247_v21  ;;  %v14210_v16 = vld [vmem:[#allocation53_spill] sm:$0xff] }
 0xa10   : > { %v7265_v25 = vadd.f32 %v7233_v60, %v7201_v31  ;;  %v7104_v13 = vadd.f32 %v14209_v24, %v7005_v55  ;;  %6874 = vst.msk [vmem:[#allocation2 + $0x68] sm:$0xff] %vm739_vm4, %v6647_v42  ;;  %v6909_v57 = vmul.f32 %v12893_v34, %v6647_v42  ;;  %v6617_v19 = vmul.f32 7.5, %v6585_v41  ;;  %v14213_v49 = vld [vmem:[#allocation45_spill] sm:$0xff] }
 0xa11   : > { %7298 = vst.msk [vmem:[%s13796_s5 + $0x48] sm:$0xff] %vm739_vm4, %v7266_v61  ;;  %v7204_v51 = vadd.f32 %v14210_v16, %v7105_v22  ;;  %6873 = vst.msk [vmem:[#allocation2 + $0x60] sm:$0xff] %vm739_vm4, %v6646_v4  ;;  %v6908_v23 = vmul.f32 %v12893_v34, %v6646_v4  ;;  %v6616_v27 = vmul.f32 7.5, %v6584_v8  ;;  %v6497_v38 = vadd.f32 %v9150_v28, %v12891_v58  ;;  %v9153_v15 = vpop.f32.mrb[216].mxu1  ;;  %v14216_v4 = vld [vmem:[#allocation42_spill] sm:$0xff] }
 0xa12   : > { %7297 = vst.msk [vmem:[%s13796_s5 + $0x40] sm:$0xff] %vm739_vm4, %v7265_v25  ;;  %v7203_v45 = vadd.f32 %v14211_v54, %v7104_v13  ;;  %v7008_v46 = vadd.f32 %v14212_v37, %v6909_v57  ;;  %v6649_v47 = vadd.f32 %v6617_v19, %v13236_v43  ;;  %v6492_v60 = vadd.f32 %v12891_v58, %v6491_v39  ;;  %v6501_v35 = vpop.f32.mrb[217].mxu1  ;;  %v7238_v43 = vld [vmem:[%s13796_s5 + $0x68] sm:$0xff]  ;;  %v7237_v25 = vld [vmem:[%s13796_s5 + $0x60] sm:$0xff] }
 0xa13   : > { %v7268_v44 = vadd.f32 %v7236_v10, %v7204_v51  ;;  %v7007_v1 = vadd.f32 %v14213_v49, %v6908_v23  ;;  %v6648_v28 = vadd.f32 %v6616_v27, %v13247_v21  ;;  %v6587_v14 = vsub.f32 %v6497_v38, %v13251_v63  ;;  %v14215_v21 = vld [vmem:[#allocation7_spill] sm:$0xff]  ;;  %v14217_v10 = vld [vmem:[#allocation9_spill] sm:$0xff]  ;;  %v14218_v16 = vld [vmem:[#allocation6_spill] sm:$0xff] }
 0xa14   : > { %v7267_v31 = vadd.f32 %v7235_v50, %v7203_v45  ;;  %v7107_v55 = vadd.f32 %v14214_v12, %v7008_v46  ;;  %6876 = vst.msk [vmem:[#allocation2 + $0x78] sm:$0xff] %vm739_vm4, %v6649_v47  ;;  %v6911_v42 = vmul.f32 %v12893_v34, %v6649_v47  ;;  %v6586_v41 = vsub.f32 %v6492_v60, %v13255_v0  ;;  %v14219_v50 = vld [vmem:[#allocation10_spill] sm:$0xff]  ;;  %v14220_v45 = vld [vmem:[#allocation8_spill] sm:$0xff] }
 0xa15   : > { %7300 = vst.msk [vmem:[%s13796_s5 + $0x58] sm:$0xff] %vm739_vm4, %v7268_v44  ;;  %v7106_v39 = vadd.f32 %v14215_v21, %v7007_v1  ;;  %6875 = vst.msk [vmem:[#allocation2 + $0x70] sm:$0xff] %vm739_vm4, %v6648_v28  ;;  %v6910_v61 = vmul.f32 %v12893_v34, %v6648_v28  ;;  %v6619_v53 = vmul.f32 7.5, %v6587_v14  ;;  %v6507_v22 = vadd.f32 %v9153_v15, %v12891_v58  ;;  %v14221_v44 = vld [vmem:[#allocation13_spill] sm:$0xff]  ;;  %v7239_v14 = vld [vmem:[%s13796_s5 + $0x70] sm:$0xff] }
 0xa16   : > { %7299 = vst.msk [vmem:[%s13796_s5 + $0x50] sm:$0xff] %vm739_vm4, %v7267_v31  ;;  %v7206_v8 = vadd.f32 %v14216_v4, %v7107_v55  ;;  %v7010_v24 = vadd.f32 %v14217_v10, %v6911_v42  ;;  %v6618_v13 = vmul.f32 7.5, %v6586_v41  ;;  %v6502_v57 = vadd.f32 %v12891_v58, %v6501_v35  ;;  %v9156_v19 = vpop.f32.mrb[218].mxu1  ;;  %v7240_v35 = vld [vmem:[%s13796_s5 + $0x78] sm:$0xff]  ;;  %v14223_v41 = vld [vmem:[#allocation12_spill] sm:$0xff] }
 0xa17   : > { %v7205_v51 = vadd.f32 %v14218_v16, %v7106_v39  ;;  %v7009_v23 = vadd.f32 %v14219_v50, %v6910_v61  ;;  %v6651_v27 = vadd.f32 %v6619_v53, %v13251_v63  ;;  %v6589_v38 = vsub.f32 %v6507_v22, %v13260_v48  ;;  %v6511_v15 = vpop.f32.mrb[219].mxu1  ;;  %v14224_v21 = vld [vmem:[#allocation17_spill] sm:$0xff] }
 0xa18   : > { %v7270_v54 = vadd.f32 %v7238_v43, %v7206_v8  ;;  %v7109_v37 = vadd.f32 %v14220_v45, %v7010_v24  ;;  %v6650_v46 = vadd.f32 %v6618_v13, %v13255_v0  ;;  %v6588_v47 = vsub.f32 %v6502_v57, %v13264_v33  ;;  %v14222_v0 = vld [vmem:[#allocation11_spill] sm:$0xff] }
 0xa19   : > { %v7269_v60 = vadd.f32 %v7237_v25, %v7205_v51  ;;  %v7108_v49 = vadd.f32 %v14221_v44, %v7009_v23  ;;  %6878 = vst.msk [vmem:[#allocation2 + $0x88] sm:$0xff] %vm739_vm4, %v6651_v27  ;;  %v6913_v63 = vmul.f32 %v12893_v34, %v6651_v27  ;;  %v6621_v1 = vmul.f32 7.5, %v6589_v38  ;;  %v14225_v8 = vld [vmem:[#allocation19_spill] sm:$0xff] }
 0xa1a   : > { %7302 = vst.msk [vmem:[%s13796_s5 + $0x68] sm:$0xff] %vm739_vm4, %v7270_v54  ;;  %v7208_v28 = vadd.f32 %v14222_v0, %v7109_v37  ;;  %6877 = vst.msk [vmem:[#allocation2 + $0x80] sm:$0xff] %vm739_vm4, %v6650_v46  ;;  %v6912_v31 = vmul.f32 %v12893_v34, %v6650_v46  ;;  %v6620_v12 = vmul.f32 7.5, %v6588_v47  ;;  %v6517_v55 = vadd.f32 %v9156_v19, %v12891_v58  ;;  %v9159_v42 = vpop.f32.mrb[220].mxu1  ;;  %v14226_v57 = vld [vmem:[#allocation15_spill] sm:$0xff]  ;;  %v14228_v54 = vld [vmem:[#allocation16_spill] sm:$0xff] }
 0xa1b   : > { %7301 = vst.msk [vmem:[%s13796_s5 + $0x60] sm:$0xff] %vm739_vm4, %v7269_v60  ;;  %v7207_v43 = vadd.f32 %v14223_v41, %v7108_v49  ;;  %v7012_v39 = vadd.f32 %v14224_v21, %v6913_v63  ;;  %v6653_v61 = vadd.f32 %v6621_v1, %v13260_v48  ;;  %v6512_v53 = vadd.f32 %v12891_v58, %v6511_v15  ;;  %v6521_v22 = vpop.f32.mrb[221].mxu1  ;;  %v7242_v48 = vld [vmem:[%s13796_s5 + $0x88] sm:$0xff]  ;;  %v7241_v37 = vld [vmem:[%s13796_s5 + $0x80] sm:$0xff]  ;;  %v14230_v49 = vld [vmem:[#allocation21_spill] sm:$0xff] }
 0xa1c   : > { %v7272_v4 = vadd.f32 %v7240_v35, %v7208_v28  ;;  %v7011_v25 = vadd.f32 %v14225_v8, %v6912_v31  ;;  %v6652_v10 = vadd.f32 %v6620_v12, %v13264_v33  ;;  %v6591_v24 = vsub.f32 %v6517_v55, %v13269_v5  ;;  %v14227_v33 = vld [vmem:[#allocation18_spill] sm:$0xff]  ;;  %v14229_v46 = vld [vmem:[#allocation23_spill] sm:$0xff]  ;;  %v14231_v1 = vld [vmem:[#allocation56_spill] sm:$0xff] }
 0xa1d   : > { %v7271_v13 = vadd.f32 %v7239_v14, %v7207_v43  ;;  %v7111_v19 = vadd.f32 %v14226_v57, %v7012_v39  ;;  %6880 = vst.msk [vmem:[#allocation2 + $0x98] sm:$0xff] %vm739_vm4, %v6653_v61  ;;  %v6915_v16 = vmul.f32 %v12893_v34, %v6653_v61  ;;  %v6590_v51 = vsub.f32 %v6512_v53, %v13273_v3  ;;  %v14232_v12 = vld [vmem:[#allocation20_spill] sm:$0xff]  ;;  %v7244_v21 = vld [vmem:[%s13796_s5 + $0x98] sm:$0xff]  ;;  %v14235_v57 = vld [vmem:[#allocation58_spill] sm:$0xff] }
 0xa1e   : > { %7304 = vst.msk [vmem:[%s13796_s5 + $0x78] sm:$0xff] %vm739_vm4, %v7272_v4  ;;  %v7110_v50 = vadd.f32 %v14227_v33, %v7011_v25  ;;  %6879 = vst.msk [vmem:[#allocation2 + $0x90] sm:$0xff] %vm739_vm4, %v6652_v10  ;;  %v6914_v23 = vmul.f32 %v12893_v34, %v6652_v10  ;;  %v6623_v27 = vmul.f32 7.5, %v6591_v24  ;;  %v6527_v38 = vadd.f32 %v9159_v42, %v12891_v58  ;;  %v9162_v15 = vpop.f32.mrb[222].mxu1  ;;  %v14233_v39 = vld [vmem:[#allocation57_spill] sm:$0xff]  ;;  %v7243_v8 = vld [vmem:[%s13796_s5 + $0x90] sm:$0xff] }
 0xa1f   : > { %7303 = vst.msk [vmem:[%s13796_s5 + $0x70] sm:$0xff] %vm739_vm4, %v7271_v13  ;;  %v7210_v45 = vadd.f32 %v14228_v54, %v7111_v19  ;;  %v7014_v47 = vadd.f32 %v14229_v46, %v6915_v16  ;;  %v6622_v60 = vmul.f32 7.5, %v6590_v51  ;;  %v6522_v35 = vadd.f32 %v12891_v58, %v6521_v22  ;;  %v6531_v44 = vpop.f32.mrb[223].mxu1  ;;  %v14236_v16 = vld [vmem:[#allocation60_spill] sm:$0xff] }
 0xa20   : > { %v7209_v63 = vadd.f32 %v14230_v49, %v7110_v50  ;;  %v7013_v0 = vadd.f32 %v14231_v1, %v6914_v23  ;;  %v6655_v28 = vadd.f32 %v6623_v27, %v13269_v5  ;;  %v6593_v14 = vsub.f32 %v6527_v38, %v13278_v62  ;;  %v14237_v23 = vld [vmem:[#allocation64_spill] sm:$0xff] }
 0xa21   : > { %v7274_v31 = vadd.f32 %v7242_v48, %v7210_v45  ;;  %v7113_v55 = vadd.f32 %v14232_v12, %v7014_v47  ;;  %v6654_v42 = vadd.f32 %v6622_v60, %v13273_v3  ;;  %v6592_v41 = vsub.f32 %v6522_v35, %v13282_v9  ;;  %v14234_v3 = vld [vmem:[#allocation22_spill] sm:$0xff]  ;;  %v14238_v45 = vld [vmem:[#allocation59_spill] sm:$0xff] }
 0xa22   : > { %v7273_v43 = vadd.f32 %v7241_v37, %v7209_v63  ;;  %v7112_v61 = vadd.f32 %v14233_v39, %v7013_v0  ;;  %6882 = vst.msk [vmem:[#allocation2 + $0xa8] sm:$0xff] %vm739_vm4, %v6655_v28  ;;  %v6917_v5 = vmul.f32 %v12893_v34, %v6655_v28  ;;  %v6625_v53 = vmul.f32 7.5, %v6593_v14  ;;  %v9165_v22 = vpop.f32.mrb[224].mxu1  ;;  %v14240_v0 = vld [vmem:[#allocation61_spill] sm:$0xff]  ;;  %v7245_v14 = vld [vmem:[%s13796_s5 + $0xa0] sm:$0xff] }
 0xa23   : > { %7306 = vst.msk [vmem:[%s13796_s5 + $0x88] sm:$0xff] %vm739_vm4, %v7274_v31  ;;  %v7212_v4 = vadd.f32 %v14234_v3, %v7113_v55  ;;  %6881 = vst.msk [vmem:[#allocation2 + $0xa0] sm:$0xff] %vm739_vm4, %v6654_v42  ;;  %v6916_v25 = vmul.f32 %v12893_v34, %v6654_v42  ;;  %v6624_v10 = vmul.f32 7.5, %v6592_v41  ;;  %v6537_v24 = vadd.f32 %v9162_v15, %v12891_v58  ;;  %v6541_v13 = vpop.f32.mrb[225].mxu1  ;;  %v14241_v31 = vld [vmem:[#allocation65_spill] sm:$0xff]  ;;  %v14242_v41 = vld [vmem:[#allocation63_spill] sm:$0xff] }
 0xa24   : > { %7305 = vst.msk [vmem:[%s13796_s5 + $0x80] sm:$0xff] %vm739_vm4, %v7273_v43  ;;  %v7211_v19 = vadd.f32 %v14235_v57, %v7112_v61  ;;  %v7016_v51 = vadd.f32 %v14236_v16, %v6917_v5  ;;  %v6657_v48 = vadd.f32 %v6625_v53, %v13278_v62  ;;  %v6532_v33 = vadd.f32 %v12891_v58, %v6531_v44  ;;  %v7246_v62 = vld [vmem:[%s13796_s5 + $0xa8] sm:$0xff]  ;;  %v14243_v53 = vld [vmem:[#allocation66_spill] sm:$0xff]  ;;  %v7247_v16 = vld [vmem:[%s13796_s5 + $0xb0] sm:$0xff] }
 0xa25   : > { %v7276_v50 = vadd.f32 %v7244_v21, %v7212_v4  ;;  %v7015_v27 = vadd.f32 %v14237_v23, %v6916_v25  ;;  %v6656_v38 = vadd.f32 %v6624_v10, %v13282_v9  ;;  %v6595_v15 = vsub.f32 %v6537_v24, %v13288_v6  ;;  %v14239_v9 = vld [vmem:[#allocation62_spill] sm:$0xff]  ;;  %v9784_v42 = vld [vmem:[%s13794_s3 + $0x16f] ss:$0 sm:$0xff]  ;;  %v7248_v10 = vld [vmem:[%s13796_s5 + $0xb8] sm:$0xff] }
 0xa26   : > { %v7275_v54 = vadd.f32 %v7243_v8, %v7211_v19  ;;  %v7115_v37 = vadd.f32 %v14238_v45, %v7016_v51  ;;  %6884 = vst.msk [vmem:[#allocation2 + $0xb8] sm:$0xff] %vm739_vm4, %v6657_v48  ;;  %v6919_v46 = vmul.f32 %v12893_v34, %v6657_v48  ;;  %v6594_v47 = vsub.f32 %v6532_v33, %v13292_v29  ;;  %v9168_v60 = vpop.f32.mrb[226].mxu1  ;;  %v14244_v24 = vld [vmem:[#allocation68_spill] sm:$0xff] }
 0xa27   : > { %7308 = vst.msk [vmem:[%s13796_s5 + $0x98] sm:$0xff] %vm739_vm4, %v7276_v50  ;;  %v7114_v35 = vadd.f32 %v14239_v9, %v7015_v27  ;;  %6883 = vst.msk [vmem:[#allocation2 + $0xb0] sm:$0xff] %vm739_vm4, %v6656_v38  ;;  %v6918_v44 = vmul.f32 %v12893_v34, %v6656_v38  ;;  %v6627_v49 = vmul.f32 7.5, %v6595_v15  ;;  %v6547_v63 = vadd.f32 %v9165_v22, %v12891_v58  ;;  %v6551_v1 = vpop.f32.mrb[227].mxu1  ;;  %v14246_v50 = vld [vmem:[#allocation69_spill] sm:$0xff]  ;;  %v14247_v27 = vld [vmem:[#allocation70_spill] sm:$0xff] }
 0xa28   : > { %7307 = vst.msk [vmem:[%s13796_s5 + $0x90] sm:$0xff] %vm739_vm4, %v7275_v54  ;;  %v7214_v28 = vadd.f32 %v14240_v0, %v7115_v37  ;;  %v7018_v12 = vadd.f32 %v14241_v31, %v6919_v46  ;;  %v6626_v55 = vmul.f32 7.5, %v6594_v47  ;;  %v6542_v58 = vadd.f32 %v9784_v42, %v6541_v13  ;;  %v14248_v37 = vld [vmem:[#allocation73_spill] sm:$0xff]  ;;  %v14249_v9 = vld [vmem:[#allocation71_spill] sm:$0xff] }
 0xa29   : > { %v7213_v43 = vadd.f32 %v14242_v41, %v7114_v35  ;;  %v7017_v21 = vadd.f32 %v13167_v32, %v6918_v44  ;;  %v6659_v39 = vadd.f32 %v6627_v49, %v13288_v6  ;;  %v6597_v61 = vsub.f32 %v6547_v63, %v13298_v20 }
 0xa2a   : > { %v7278_v5 = vadd.f32 %v7246_v62, %v7214_v28  ;;  %v7117_v22 = vadd.f32 %v14243_v53, %v7018_v12  ;;  %v6658_v3 = vadd.f32 %v6626_v55, %v13292_v29  ;;  %v6596_v4 = vsub.f32 %v6542_v58, %v13302_v52  ;;  %v9171_v8 = vpop.f32.mrb[228].mxu1  ;;  %v14245_v29 = vld [vmem:[#allocation67_spill] sm:$0xff]  ;;  %v7249_v12 = vld [vmem:[%s13796_s5 + $0xc0] sm:$0xff] }
 0xa2b   : > { %v7277_v25 = vadd.f32 %v7245_v14, %v7213_v43  ;;  %v7116_v13 = vadd.f32 %v14244_v24, %v7017_v21  ;;  %6886 = vst.msk [vmem:[#allocation2 + $0xc8] sm:$0xff] %vm739_vm4, %v6659_v39  ;;  %v6921_v32 = vmul.f32 %v12893_v34, %v6659_v39  ;;  %v6629_v6 = vmul.f32 7.5, %v6597_v61  ;;  %v6561_v57 = vpop.f32.mrb[229].mxu1  ;;  %v14251_v14 = vld [vmem:[#allocation72_spill] sm:$0xff]  ;;  %v14252_v43 = vld [vmem:[#allocation75_spill] sm:$0xff] }
 0xa2c   : > { %7310 = vst.msk [vmem:[%s13796_s5 + $0xa8] sm:$0xff] %vm739_vm4, %v7278_v5  ;;  %v7216_v19 = vadd.f32 %v14245_v29, %v7117_v22  ;;  %6885 = vst.msk [vmem:[#allocation2 + $0xc0] sm:$0xff] %vm739_vm4, %v6658_v3  ;;  %v6920_v51 = vmul.f32 %v12893_v34, %v6658_v3  ;;  %v6628_v48 = vmul.f32 7.5, %v6596_v4  ;;  %v6557_v33 = vadd.f32 %v9784_v42, %v9168_v60  ;;  %v7057_v5 = vld [vmem:[#allocation2 + $0x2e0] sm:$0xff]  ;;  %v14253_v3 = vld [vmem:[#allocation76_spill] sm:$0xff] }
 0xa2d   : > { %7309 = vst.msk [vmem:[%s13796_s5 + $0xa0] sm:$0xff] %vm739_vm4, %v7277_v25  ;;  %v7215_v23 = vadd.f32 %v14246_v50, %v7116_v13  ;;  %v7020_v38 = vadd.f32 %v14247_v27, %v6921_v32  ;;  %v6661_v15 = vadd.f32 %v6629_v6, %v13298_v20  ;;  %v6552_v54 = vadd.f32 %v9784_v42, %v6551_v1  ;;  %v7250_v20 = vld [vmem:[%s13796_s5 + $0xc8] sm:$0xff]  ;;  %v6961_v25 = vld [vmem:[#allocation2 + $0x1f8] sm:$0xff]  ;;  %v6960_v13 = vld [vmem:[#allocation2 + $0x1f0] sm:$0xff] }
 0xa2e   : > { %v7280_v45 = vadd.f32 %v7248_v10, %v7216_v19  ;;  %v7019_v46 = vadd.f32 %v14248_v37, %v6920_v51  ;;  %v6660_v47 = vadd.f32 %v6628_v48, %v13302_v52  ;;  %v6599_v62 = vsub.f32 %v6557_v33, %v13308_v36  ;;  %v14250_v52 = vld [vmem:[#allocation74_spill] sm:$0xff]  ;;  %v7251_v32 = vld [vmem:[%s13796_s5 + $0xd0] sm:$0xff]  ;;  %v14254_v19 = vld [vmem:[#allocation77_spill] sm:$0xff] }
 0xa2f   : > { %v7279_v60 = vadd.f32 %v7247_v16, %v7215_v23  ;;  %v7119_v35 = vadd.f32 %v14249_v9, %v7020_v38  ;;  %6888 = vst.msk [vmem:[#allocation2 + $0xd8] sm:$0xff] %vm739_vm4, %v6661_v15  ;;  %v6923_v44 = vmul.f32 %v12893_v34, %v6661_v15  ;;  %v6598_v49 = vsub.f32 %v6552_v54, %v13315_v2  ;;  %v7059_v33 = vld [vmem:[#allocation2 + $0x2f0] sm:$0xff]  ;;  %v7159_v38 = vld [vmem:[#allocation2 + $0x3f8] sm:$0xff]  ;;  %v14256_v37 = vld [vmem:[#allocation78_spill] sm:$0xff] }
 0xa30   : > { %7312 = vst.msk [vmem:[%s13796_s5 + $0xb8] sm:$0xff] %vm739_vm4, %v7280_v45  ;;  %v7118_v63 = vadd.f32 %v14250_v52, %v7019_v46  ;;  %6887 = vst.msk [vmem:[#allocation2 + $0xd0] sm:$0xff] %vm739_vm4, %v6660_v47  ;;  %v6922_v1 = vmul.f32 %v12893_v34, %v6660_v47  ;;  %v6631_v0 = vmul.f32 7.5, %v6599_v62  ;;  %v6567_v28 = vadd.f32 %v9784_v42, %v9171_v8  ;;  %v14255_v23 = vld [vmem:[#allocation80_spill] sm:$0xff]  ;;  %v14257_v9 = vld [vmem:[#allocation79_spill] sm:$0xff] }
 0xa31   : > { %7311 = vst.msk [vmem:[%s13796_s5 + $0xb0] sm:$0xff] %vm739_vm4, %v7279_v60  ;;  %v7218_v31 = vadd.f32 %v14251_v14, %v7119_v35  ;;  %v7022_v55 = vadd.f32 %v13205_v7, %v6923_v44  ;;  %v6630_v58 = vmul.f32 7.5, %v6598_v49  ;;  %v6562_v41 = vadd.f32 %v9784_v42, %v6561_v57  ;;  %v7252_v42 = vld [vmem:[%s13796_s5 + $0xd8] sm:$0xff]  ;;  %v7158_v47 = vld [vmem:[#allocation2 + $0x3f0] sm:$0xff]  ;;  %v7253_v44 = vld [vmem:[%s13796_s5 + $0xe0] sm:$0xff] }
 0xa32   : > { %v7217_v21 = vadd.f32 %v14252_v43, %v7118_v63  ;;  %v7021_v39 = vadd.f32 %v13219_v26, %v6922_v1  ;;  %v6663_v61 = vadd.f32 %v6631_v0, %v13308_v36  ;;  %v6601_v53 = vsub.f32 %v6567_v28, %v13322_v56  ;;  %v7060_v57 = vld [vmem:[#allocation2 + $0x2f8] sm:$0xff] }
 0xa33   : > { %v7282_v22 = vadd.f32 %v7250_v20, %v7218_v31  ;;  %v7121_v4 = vadd.f32 %v14253_v3, %v7022_v55  ;;  %v6662_v8 = vadd.f32 %v6630_v58, %v13315_v2  ;;  %v6600_v10 = vsub.f32 %v6562_v41, %v13329_v59  ;;  %v14258_v20 = vld [vmem:[#allocation24_spill] sm:$0xff]  ;;  %v14259_v63 = vld [vmem:[#allocation81_spill] sm:$0xff] }
 0xa34   : > { %v7281_v7 = vadd.f32 %v7249_v12, %v7217_v21  ;;  %v7120_v26 = vadd.f32 %v13222_v18, %v7021_v39  ;;  %6890 = vst.msk [vmem:[#allocation2 + $0xe8] sm:$0xff] %vm739_vm4, %v6663_v61  ;;  %v6925_v36 = vmul.f32 %v12893_v34, %v6663_v61  ;;  %v6633_v24 = vmul.f32 7.5, %v6601_v53  ;;  %v7256_v31 = vld [vmem:[%s13796_s5 + $0xf8] sm:$0xff]  ;;  %v7255_v58 = vld [vmem:[%s13796_s5 + $0xf0] sm:$0xff] }
 0xa35   : > { %7314 = vst.msk [vmem:[%s13796_s5 + $0xc8] sm:$0xff] %vm739_vm4, %v7282_v22  ;;  %v7220_v2 = vadd.f32 %v13208_v17, %v7121_v4  ;;  %6889 = vst.msk [vmem:[#allocation2 + $0xe0] sm:$0xff] %vm739_vm4, %v6662_v8  ;;  %v6924_v18 = vmul.f32 %v12893_v34, %v6662_v8  ;;  %v7090_v6 = vmul.f32 %v12880_v11, %v7057_v5  ;;  %v6632_v29 = vmul.f32 7.5, %v6600_v10 }
 0xa36   : > { %7313 = vst.msk [vmem:[%s13796_s5 + $0xc0] sm:$0xff] %vm739_vm4, %v7281_v7  ;;  %v7219_v16 = vadd.f32 %v14254_v19, %v7120_v26  ;;  %v7024_v17 = vadd.f32 %v13226_v30, %v6925_v36  ;;  %v6665_v51 = vadd.f32 %v6633_v24, %v13322_v56  ;;  %v6994_v48 = vmul.f32 %v12878_v40, %v6961_v25 }
 0xa37   : > { %v7284_v50 = vadd.f32 %v7252_v42, %v7220_v2  ;;  %v7023_v27 = vadd.f32 %v14255_v23, %v6924_v18  ;;  %v6664_v15 = vadd.f32 %v6632_v29, %v13329_v59  ;;  %v6993_v54 = vmul.f32 %v12878_v40, %v6960_v13  ;;  %v7254_v59 = vld [vmem:[%s13796_s5 + $0xe8] sm:$0xff] }
 0xa38   : > { %v7283_v45 = vadd.f32 %v7251_v32, %v7219_v16  ;;  %v7123_v46 = vadd.f32 %v14256_v37, %v7024_v17  ;;  %6892 = vst.msk [vmem:[#allocation2 + $0xf8] sm:$0xff] %vm739_vm4, %v6665_v51  ;;  %v6927_v30 = vmul.f32 %v12893_v34, %v6665_v51  ;;  %v7093_v56 = vmul.f32 %v12880_v11, %v7060_v57 }
 0xa39   : > { %7316 = vst.msk [vmem:[%s13796_s5 + $0xd8] sm:$0xff] %vm739_vm4, %v7284_v50  ;;  %v7122_v40 = vadd.f32 %v7090_v6, %v7023_v27  ;;  %6891 = vst.msk [vmem:[#allocation2 + $0xf0] sm:$0xff] %vm739_vm4, %v6664_v15  ;;  %v6926_v62 = vmul.f32 %v12893_v34, %v6664_v15  ;;  %v7092_v60 = vmul.f32 %v12880_v11, %v7059_v33 }
 0xa3a   : > { %7315 = vst.msk [vmem:[%s13796_s5 + $0xd0] sm:$0xff] %vm739_vm4, %v7283_v45  ;;  %v7222_v35 = vadd.f32 %v14257_v9, %v7123_v46  ;;  %v7026_v49 = vadd.f32 %v6994_v48, %v6927_v30  ;;  %v7192_v52 = vmul.f32 %v14258_v20, %v7159_v38  ;;  %v7191_v34 = vmul.f32 %v14258_v20, %v7158_v47 }
 0xa3b   : > { %v7221_v1 = vadd.f32 %v14259_v63, %v7122_v40  ;;  %v7025_v0 = vadd.f32 %v6993_v54, %v6926_v62 }
 0xa3c   : > { %v7286_v11 = vadd.f32 %v7254_v59, %v7222_v35  ;;  %v7125_v28 = vadd.f32 %v7093_v56, %v7026_v49 }
 0xa3d   : > { %v7285_v14 = vadd.f32 %v7253_v44, %v7221_v1  ;;  %v7124_v12 = vadd.f32 %v7092_v60, %v7025_v0 }
 0xa3e   : > { %7318 = vst.msk [vmem:[%s13796_s5 + $0xe8] sm:$0xff] %vm739_vm4, %v7286_v11  ;;  %v7224_v55 = vadd.f32 %v7192_v52, %v7125_v28 }
 0xa3f   : > { %7317 = vst.msk [vmem:[%s13796_s5 + $0xe0] sm:$0xff] %vm739_vm4, %v7285_v14  ;;  %v7223_v41 = vadd.f32 %v7191_v34, %v7124_v12 }
 0xa40   : > { %v7288_v43 = vadd.f32 %v7256_v31, %v7224_v55 }
 0xa41   : > { %v7287_v21 = vadd.f32 %v7255_v58, %v7223_v41 }
 0xa42   : > { %7320 = vst.msk [vmem:[%s13796_s5 + $0xf8] sm:$0xff] %vm739_vm4, %v7288_v43 }
 0xa43   : > { %7319 = vst.msk [vmem:[%s13796_s5 + $0xf0] sm:$0xff] %vm739_vm4, %v7287_v21 }
 0xa44 PF: > { %s21_s23 = sadd.s32 1, %s9805_s23  }
 0xa45   : > { %p18_p10 = scmp.ge.s32.totalorder %s21_s23, 7  }
 0xa47   :  { %20 = sbr.rel (!%p18_p10) target bundleno = 16 (0x10), region = 69 }

</bundles_post_ra>
